<compile_context>
chip_gen: v7x
topology: tpu7x:2x2x1
jax: 0.10.0
libtpu: 0.0.40
codegen_flags: <defaults>
</compile_context>

<pallas_src>
import functools

import jax
import jax.numpy as jnp
from jax.experimental import pallas as pl
from jax.experimental.pallas import tpu as pltpu


# ----------------------------------------------------------------------------
# Fused Pallas kernel: full IntNet pyramid for one tile of M = Bt*L rows.
# ----------------------------------------------------------------------------
def _make_fused_kernel(n_layers, M, L, A, D, H, total):
    KT, PAD = 5, 2                     # every conv pair runs in a 5-tap frame

    def kernel(ids_ref, emb_ref, *refs):
        o_ref, fb = refs[-2], refs[-1]     # (M, total) f32 out / bf16 scratch
        w = refs[:-2]

        # Position of every flat row inside its word (for 'same'-pad masking).
        pos = jax.lax.broadcasted_iota(jnp.int32, (M, 1), 0) % L
        valid_lo = {1: pos >= 1, 2: pos >= 2}          # masks for off < 0
        valid_hi = {1: pos < L - 1, 2: pos < L - 2}    # masks for off > 0

        def pair_conv(xf, w_ref, b_ref):
            """Fused k3+k5 'same' Conv1d pair + bias + ReLU as ONE im2col dot.

            xf: (M, C) bf16; w_ref: (5*C, 2*Cout) bf16; b_ref: (1, 2*Cout) f32.
            Returns (M, 2*Cout) f32 == concat([relu(conv3), relu(conv5)], -1).
            """
            C = xf.shape[-1]
            zp = jnp.zeros((PAD, C), xf.dtype)
            xp = jnp.concatenate([zp, xf, zp], axis=0)          # (M + 4, C)
            cols = []
            for t in range(KT):
                off = t - PAD                                    # -2 .. 2
                c = xp[t:t + M, :]                               # row -> row+off
                if off < 0:      # rows that would read the previous word
                    c = jnp.where(valid_lo[-off], c, jnp.zeros_like(c))
                elif off > 0:    # rows that would read the next word
                    c = jnp.where(valid_hi[off], c, jnp.zeros_like(c))
                cols.append(c)
            cols = jnp.concatenate(cols, axis=-1)                # (M, 5*C) bf16
            acc = jnp.dot(cols, w_ref[...],
                          preferred_element_type=jnp.float32)
            return jnp.maximum(acc + b_ref[...], 0.0)

        # ---- embedding lookup as a one-hot matmul (gather-free) ------------
        ids = ids_ref[...]                                       # (M, 1) int32
        onehot = (jax.lax.broadcasted_iota(jnp.int32, (M, A), 1) == ids
                  ).astype(jnp.bfloat16)
        x = jnp.dot(onehot, emb_ref[...],
                    preferred_element_type=jnp.float32).astype(jnp.bfloat16)

        # ---- init k3/k5 pair -> right-most (reference-order) channel slot --
        pair0 = pair_conv(x, w[0], w[1])                         # (M, 2D) f32
        fb[:, 2 * H * n_layers:] = pair0.astype(jnp.bfloat16)

        # ---- dense feature pyramid ------------------------------------------
        for j in range(n_layers):
            cw, cb, pw, pb = w[2 + 4 * j: 6 + 4 * j]
            start = 2 * H * (n_layers - j)
            # Suffix of fb == [pair_j, ..., pair_1, pair_0]: exactly the
            # reference input channel order of cnn_list[j] (no weight permute).
            f = jnp.dot(fb[:, start:], cw[...],
                        preferred_element_type=jnp.float32)
            f = jnp.maximum(f + cb[...], 0.0).astype(jnp.bfloat16)   # (M, H)
            pair = pair_conv(f, pw, pb)                          # (M, 2H) f32
            fb[:, start - 2 * H:start] = pair.astype(jnp.bfloat16)

        # One lane-dense store of the full concatenated feature slab.
        # (Feature values round through bf16; covered by the tolerance below.)
        o_ref[...] = fb[...].astype(jnp.float32)

    return kernel


def _const_index_map(ndim):
    return lambda i: (0,) * ndim


def _pick_block_b(B, L, target_m=2048):
    """Rows-per-tile Bt.  Pick the largest divisor of B whose tile (Bt*L rows)
    stays within ~target_m rows: big tiles amortize the ~0.35us per-grid-step
    overhead and keep the output store lane-dense.  We do NOT force >= 2
    blocks: on single-TC v5e/v6e extra blocks are pure overhead, and on v7x a
    megacore split only pays once each block already has ~1k+ rows (which
    large B gives for free via the target_m cap)."""
    cands = [bt for bt in range(1, B + 1)
             if B % bt == 0 and (bt == B or (bt * L) % 8 == 0)]
    fit = [bt for bt in cands if bt * L <= target_m]
    return max(fit) if fit else min(cands)


# ----------------------------------------------------------------------------
# Parameter construction (PyTorch-layout, mirrors IntNet.__init__).
# ----------------------------------------------------------------------------
def init_intnet_params(key, alphabet_size, embedding_dim, cnn_layer,
                       kernel_type, hidden_size):
    keys = jax.random.split(key, 64)
    ki = iter(range(64))

    def nxt():
        return keys[next(ki)]

    scale_emb = jnp.sqrt(3.0 / embedding_dim)
    emb = jax.random.uniform(
        nxt(), (alphabet_size, embedding_dim),
        minval=-scale_emb, maxval=scale_emb, dtype=jnp.float32)

    def conv_params(cout, cin, k):
        # PyTorch Conv1d default init: U(-bound, bound), bound = 1/sqrt(cin*k)
        bound = 1.0 / jnp.sqrt(cin * k)
        w = jax.random.uniform(nxt(), (cout, cin, k),
                               minval=-bound, maxval=bound, dtype=jnp.float32)
        b = jax.random.uniform(nxt(), (cout,),
                               minval=-bound, maxval=bound, dtype=jnp.float32)
        return w, b

    init3_w, init3_b = conv_params(embedding_dim, embedding_dim, 3)
    init5_w, init5_b = conv_params(embedding_dim, embedding_dim, 5)

    layers = []
    last_dim = embedding_dim * kernel_type
    for _ in range(int((cnn_layer - 1) / 2)):
        cnn_w, cnn_b = conv_params(hidden_size, last_dim, 1)
        w3, b3 = conv_params(hidden_size, hidden_size, 3)
        w5, b5 = conv_params(hidden_size, hidden_size, 5)
        layers.append(dict(cnn_w=cnn_w, cnn_b=cnn_b, w3=w3, b3=b3, w5=w5, b5=b5))
        last_dim += hidden_size * kernel_type

    return dict(emb=emb, init3_w=init3_w, init3_b=init3_b,
                init5_w=init5_w, init5_b=init5_b, layers=layers)


def prepare_intnet_params(params):
    """One-time conversion to the fused-kernel layout (hoisted out of forward):
      * k3 weights zero-padded to 5 taps and fused with the k5 weights along
        Cout -> one (5*Cin, 2*Cout) bf16 im2col weight per conv pair,
      * 1x1 conv weights as (Cin, Cout) bf16 (no channel permutation needed:
        the kernel keeps the feature buffer in reference channel order),
      * biases as (1, Cout) f32, embedding table as bf16."""
    emb = params["emb"]
    A, D = emb.shape
    layers = params["layers"]
    n = len(layers)
    H = layers[0]["w3"].shape[0] if n else 0

    def im2col_w(w_oik):
        cout, cin, k = w_oik.shape
        return jnp.transpose(w_oik, (2, 1, 0)).reshape(k * cin, cout)

    def fuse_pair(w3, b3, w5, b5):
        w3p = jnp.pad(w3, ((0, 0), (0, 0), (1, 1)))   # 3 taps -> 5-tap frame
        w = jnp.concatenate([im2col_w(w3p), im2col_w(w5)], axis=1)
        b = jnp.concatenate([b3, b5]).reshape(1, -1)
        return w.astype(jnp.bfloat16), b.astype(jnp.float32)

    i_w, i_b = fuse_pair(params["init3_w"], params["init3_b"],
                         params["init5_w"], params["init5_b"])
    prep_layers = []
    for lyr in layers:
        cw = jnp.transpose(lyr["cnn_w"][:, :, 0], (1, 0)).astype(jnp.bfloat16)
        cb = lyr["cnn_b"].reshape(1, -1).astype(jnp.float32)
        pw, pb = fuse_pair(lyr["w3"], lyr["b3"], lyr["w5"], lyr["b5"])
        prep_layers.append(dict(cw=cw, cb=cb, pw=pw, pb=pb))

    return dict(emb_bf=emb.astype(jnp.bfloat16), i_w=i_w, i_b=i_b,
                layers=prep_layers, A=A, D=D, H=H, n_layers=n)


# ----------------------------------------------------------------------------
# Forward pass: everything (embedding included) in one fused kernel.
# ----------------------------------------------------------------------------
def intnet_forward(prepared, char_ids, *, block_b=None):
    """== IntNet.get_all_hiddens: (B, L) char ids -> (B, L, total) features."""
    B, L = char_ids.shape
    A, D, H, n = prepared["A"], prepared["D"], prepared["H"], prepared["n_layers"]
    total = 2 * D + 2 * H * n

    Bt = block_b if block_b is not None else _pick_block_b(B, L)
    assert B % Bt == 0
    M = Bt * L

    kernel = _make_fused_kernel(n, M, L, A, D, H, total)

    ids_flat = char_ids.reshape(B * L, 1).astype(jnp.int32)

    weight_args = [prepared["emb_bf"], prepared["i_w"], prepared["i_b"]]
    for lyr in prepared["layers"]:
        weight_args += [lyr["cw"], lyr["cb"], lyr["pw"], lyr["pb"]]

    # Weights use constant index maps -> Pallas skips their re-DMA on later
    # grid steps; at D=H=32 the extra double-buffer VMEM is negligible, so we
    # do not bother with pipeline_mode=pl.Buffered(1).
    in_specs = [pl.BlockSpec((M, 1), lambda i: (i, 0))]
    for wa in weight_args:
        in_specs.append(pl.BlockSpec(wa.shape, _const_index_map(wa.ndim)))

    out_flat = pl.pallas_call(
        kernel,
        out_shape=jax.ShapeDtypeStruct((B * L, total), jnp.float32),
        grid=(B // Bt,),
        in_specs=in_specs,
        out_specs=pl.BlockSpec((M, total), lambda i: (i, 0)),
        scratch_shapes=[pltpu.VMEM((M, total), jnp.bfloat16)],
        compiler_params=pltpu.CompilerParams(
            dimension_semantics=("parallel",)),
    )(ids_flat, *weight_args)

    return out_flat.reshape(B, L, total)


# ----------------------------------------------------------------------------
# Pure-JAX f32 reference (independent conv implementation) for validation.
# ----------------------------------------------------------------------------
def _conv1d_ref(x_blc, w_oik, b):
    k = w_oik.shape[-1]
    pad = (k - 1) // 2
    w = jnp.transpose(w_oik, (2, 1, 0))  # (K, Cin, Cout)
    y = jax.lax.conv_general_dilated(
        x_blc, w, window_strides=(1,), padding=[(pad, pad)],
        dimension_numbers=("NWC", "WIO", "NWC"))
    return jax.nn.relu(y + b)


def intnet_reference(params, char_ids):
    x = jnp.take(params["emb"], char_ids, axis=0)
    out3 = _conv1d_ref(x, params["init3_w"], params["init3_b"])
    out5 = _conv1d_ref(x, params["init5_w"], params["init5_b"])
    last = jnp.concatenate([out3, out5], axis=-1)
    for lyr in params["layers"]:
        f = _conv1d_ref(last, lyr["cnn_w"], lyr["cnn_b"])
        f3 = _conv1d_ref(f, lyr["w3"], lyr["b3"])
        f5 = _conv1d_ref(f, lyr["w5"], lyr["b5"])
        last = jnp.concatenate([f3, f5, last], axis=-1)
    return last


if __name__ == "__main__":
    # small, forward-consistent config
    alphabet_size = 32
    embedding_dim = 32
    cnn_layer = 5          # -> 2 pyramid layers
    kernel_type = 2
    hidden_size = 32
    B, L = 16, 16          # 256 positions -> a single (256, 192) tile

    key = jax.random.PRNGKey(0)
    pkey, ikey = jax.random.split(key)
    params = init_intnet_params(pkey, alphabet_size, embedding_dim,
                                cnn_layer, kernel_type, hidden_size)
    prepared = prepare_intnet_params(params)

    char_ids = jax.random.randint(ikey, (B, L), 0, alphabet_size, dtype=jnp.int32)
    seq_lengths = jnp.full((B, 1), L, dtype=jnp.int32)  # unused by forward; parity

    fwd = jax.jit(functools.partial(intnet_forward, prepared))
    out = fwd(char_ids)
    jax.block_until_ready(out)

    expected_dim = embedding_dim * kernel_type + \
        hidden_size * kernel_type * int((cnn_layer - 1) / 2)
    assert out.shape == (B, L, expected_dim), out.shape

    # bf16 matmul operands + bf16 feature buffer vs full-f32 reference:
    # documented tolerance of ~6% of the global max plus a small absolute term.
    ref = intnet_reference(params, char_ids)
    err = float(jnp.max(jnp.abs(out - ref)))
    scale = float(jnp.max(jnp.abs(ref))) + 1e-6
    assert err <= 6e-2 * scale + 5e-3, (err, scale)

    print("KERNEL_OK")
</pallas_src>

<mosaic_0001>
module attributes {stable_mosaic.version = 11 : i64} {
  func.func @kernel(%arg0: i32, %arg1: memref<256x1xi32, #tpu.memory_space<vmem>>, %arg2: memref<32x32xbf16, #tpu.memory_space<vmem>>, %arg3: memref<160x64xbf16, #tpu.memory_space<vmem>>, %arg4: memref<1x64xf32, #tpu.memory_space<vmem>>, %arg5: memref<64x32xbf16, #tpu.memory_space<vmem>>, %arg6: memref<1x32xf32, #tpu.memory_space<vmem>>, %arg7: memref<160x64xbf16, #tpu.memory_space<vmem>>, %arg8: memref<1x64xf32, #tpu.memory_space<vmem>>, %arg9: memref<128x32xbf16, #tpu.memory_space<vmem>>, %arg10: memref<1x32xf32, #tpu.memory_space<vmem>>, %arg11: memref<160x64xbf16, #tpu.memory_space<vmem>>, %arg12: memref<1x64xf32, #tpu.memory_space<vmem>>, %arg13: memref<256x192xf32, #tpu.memory_space<vmem>>, %arg14: memref<256x192xbf16, #tpu.memory_space<vmem>>) attributes {dimension_semantics = [#tpu.dimension_semantics<parallel>], iteration_bounds = array<i64: 1>, scalar_prefetch = 0 : i64, scratch_operands = 1 : i64, tpu.core_type = #tpu.core_type<tc>, window_params = [{transform_indices = @transform_0, window_bounds = array<i64: 256, 1>}, {pipeline_mode = #tpu.pipeline_mode<synchronous>, transform_indices = @transform_1, window_bounds = array<i64: 32, 32>}, {pipeline_mode = #tpu.pipeline_mode<synchronous>, transform_indices = @transform_2, window_bounds = array<i64: 160, 64>}, {pipeline_mode = #tpu.pipeline_mode<synchronous>, transform_indices = @transform_3, window_bounds = array<i64: 1, 64>}, {pipeline_mode = #tpu.pipeline_mode<synchronous>, transform_indices = @transform_4, window_bounds = array<i64: 64, 32>}, {pipeline_mode = #tpu.pipeline_mode<synchronous>, transform_indices = @transform_5, window_bounds = array<i64: 1, 32>}, {pipeline_mode = #tpu.pipeline_mode<synchronous>, transform_indices = @transform_6, window_bounds = array<i64: 160, 64>}, {pipeline_mode = #tpu.pipeline_mode<synchronous>, transform_indices = @transform_7, window_bounds = array<i64: 1, 64>}, {pipeline_mode = #tpu.pipeline_mode<synchronous>, transform_indices = @transform_8, window_bounds = array<i64: 128, 32>}, {pipeline_mode = #tpu.pipeline_mode<synchronous>, transform_indices = @transform_9, window_bounds = array<i64: 1, 32>}, {pipeline_mode = #tpu.pipeline_mode<synchronous>, transform_indices = @transform_10, window_bounds = array<i64: 160, 64>}, {pipeline_mode = #tpu.pipeline_mode<synchronous>, transform_indices = @transform_11, window_bounds = array<i64: 1, 64>}, {transform_indices = @transform_12, window_bounds = array<i64: 256, 192>}]} {
    %0 = tpu.iota {dimensions = array<i32: 0>} : vector<256x1xi32>
    %c16_i32 = arith.constant 16 : i32
    %c0_i32 = arith.constant 0 : i32
    %1 = arith.cmpi eq, %c16_i32, %c0_i32 : i32
    %c1_i32 = arith.constant 1 : i32
    %2 = arith.select %1, %c1_i32, %c16_i32 : i32
    %3 = vector.broadcast %2 : i32 to vector<256x1xi32>
    %4 = arith.remsi %0, %3 : vector<256x1xi32>
    %c0_i32_0 = arith.constant 0 : i32
    %5 = vector.broadcast %c0_i32_0 : i32 to vector<256x1xi32>
    %6 = arith.cmpi ne, %4, %5 : vector<256x1xi32>
    %c0_i32_1 = arith.constant 0 : i32
    %7 = vector.broadcast %c0_i32_1 : i32 to vector<256x1xi32>
    %8 = arith.cmpi slt, %4, %7 : vector<256x1xi32>
    %c0_i32_2 = arith.constant 0 : i32
    %9 = arith.cmpi slt, %2, %c0_i32_2 : i32
    %10 = vector.broadcast %9 : i1 to vector<256x1xi1>
    %11 = vector.broadcast %10 : vector<256x1xi1> to vector<256x1xi1>
    %12 = arith.xori %8, %11 : vector<256x1xi1>
    %13 = arith.andi %12, %6 : vector<256x1xi1>
    %14 = vector.broadcast %2 : i32 to vector<256x1xi32>
    %15 = arith.addi %4, %14 : vector<256x1xi32>
    %16 = arith.select %13, %15, %4 : vector<256x1xi1>, vector<256x1xi32>
    %c1_i32_3 = arith.constant 1 : i32
    %17 = vector.broadcast %c1_i32_3 : i32 to vector<256x1xi32>
    %18 = arith.cmpi sge, %16, %17 : vector<256x1xi32>
    %c2_i32 = arith.constant 2 : i32
    %19 = vector.broadcast %c2_i32 : i32 to vector<256x1xi32>
    %20 = arith.cmpi sge, %16, %19 : vector<256x1xi32>
    %c15_i32 = arith.constant 15 : i32
    %21 = vector.broadcast %c15_i32 : i32 to vector<256x1xi32>
    %22 = arith.cmpi slt, %16, %21 : vector<256x1xi32>
    %c14_i32 = arith.constant 14 : i32
    %23 = vector.broadcast %c14_i32 : i32 to vector<256x1xi32>
    %24 = arith.cmpi slt, %16, %23 : vector<256x1xi32>
    %c0 = arith.constant 0 : index
    %c0_4 = arith.constant 0 : index
    %25 = vector.load %arg1[%c0, %c0_4] : memref<256x1xi32, #tpu.memory_space<vmem>>, vector<256x1xi32>
    %26 = tpu.iota {dimensions = array<i32: 1>} : vector<256x32xi32>
    %27 = vector.broadcast %25 : vector<256x1xi32> to vector<256x32xi32>
    %28 = arith.cmpi eq, %26, %27 : vector<256x32xi32>
    %29 = arith.extui %28 : vector<256x32xi1> to vector<256x32xi32>
    %30 = arith.sitofp %29 : vector<256x32xi32> to vector<256x32xf32>
    %31 = arith.truncf %30 : vector<256x32xf32> to vector<256x32xbf16>
    %c0_5 = arith.constant 0 : index
    %c0_6 = arith.constant 0 : index
    %32 = vector.load %arg2[%c0_5, %c0_6] : memref<32x32xbf16, #tpu.memory_space<vmem>>, vector<32x32xbf16>
    %cst = arith.constant dense<0.000000e+00> : vector<256x32xf32>
    %33 = tpu.matmul %31, %32, %cst {dimension_numbers = #tpu.dot_dimension_numbers<[1], [0], [0], [1], [0, 0, 1, 1], [], []>} : vector<256x32xbf16>, vector<32x32xbf16>, vector<256x32xf32> -> vector<256x32xf32>
    %34 = arith.truncf %33 : vector<256x32xf32> to vector<256x32xbf16>
    %cst_7 = arith.constant 0.000000e+00 : bf16
    %35 = vector.broadcast %cst_7 : bf16 to vector<2x32xbf16>
    %36 = tpu.concatenate %35, %34, %35 in 0 : vector<2x32xbf16>, vector<256x32xbf16>, vector<2x32xbf16> -> vector<260x32xbf16>
    %37 = vector.extract_strided_slice %36 {offsets = [0, 0], sizes = [256, 32], strides = [1, 1]} : vector<260x32xbf16> to vector<256x32xbf16>
    %cst_8 = arith.constant 0.000000e+00 : bf16
    %38 = vector.broadcast %cst_8 : bf16 to vector<256x32xbf16>
    %39 = vector.shape_cast %20 : vector<256x1xi1> to vector<256x1xi1>
    %40 = vector.broadcast %39 : vector<256x1xi1> to vector<256x32xi1>
    %41 = arith.select %40, %37, %38 : vector<256x32xi1>, vector<256x32xbf16>
    %42 = vector.extract_strided_slice %36 {offsets = [1, 0], sizes = [256, 32], strides = [1, 1]} : vector<260x32xbf16> to vector<256x32xbf16>
    %cst_9 = arith.constant 0.000000e+00 : bf16
    %43 = vector.broadcast %cst_9 : bf16 to vector<256x32xbf16>
    %44 = vector.shape_cast %18 : vector<256x1xi1> to vector<256x1xi1>
    %45 = vector.broadcast %44 : vector<256x1xi1> to vector<256x32xi1>
    %46 = arith.select %45, %42, %43 : vector<256x32xi1>, vector<256x32xbf16>
    %47 = vector.extract_strided_slice %36 {offsets = [2, 0], sizes = [256, 32], strides = [1, 1]} : vector<260x32xbf16> to vector<256x32xbf16>
    %48 = vector.extract_strided_slice %36 {offsets = [3, 0], sizes = [256, 32], strides = [1, 1]} : vector<260x32xbf16> to vector<256x32xbf16>
    %cst_10 = arith.constant 0.000000e+00 : bf16
    %49 = vector.broadcast %cst_10 : bf16 to vector<256x32xbf16>
    %50 = vector.shape_cast %22 : vector<256x1xi1> to vector<256x1xi1>
    %51 = vector.broadcast %50 : vector<256x1xi1> to vector<256x32xi1>
    %52 = arith.select %51, %48, %49 : vector<256x32xi1>, vector<256x32xbf16>
    %53 = vector.extract_strided_slice %36 {offsets = [4, 0], sizes = [256, 32], strides = [1, 1]} : vector<260x32xbf16> to vector<256x32xbf16>
    %cst_11 = arith.constant 0.000000e+00 : bf16
    %54 = vector.broadcast %cst_11 : bf16 to vector<256x32xbf16>
    %55 = vector.shape_cast %24 : vector<256x1xi1> to vector<256x1xi1>
    %56 = vector.broadcast %55 : vector<256x1xi1> to vector<256x32xi1>
    %57 = arith.select %56, %53, %54 : vector<256x32xi1>, vector<256x32xbf16>
    %58 = tpu.concatenate %41, %46, %47, %52, %57 in 1 : vector<256x32xbf16>, vector<256x32xbf16>, vector<256x32xbf16>, vector<256x32xbf16>, vector<256x32xbf16> -> vector<256x160xbf16>
    %c0_12 = arith.constant 0 : index
    %c0_13 = arith.constant 0 : index
    %59 = vector.load %arg3[%c0_12, %c0_13] : memref<160x64xbf16, #tpu.memory_space<vmem>>, vector<160x64xbf16>
    %cst_14 = arith.constant dense<0.000000e+00> : vector<256x64xf32>
    %60 = tpu.matmul %58, %59, %cst_14 {dimension_numbers = #tpu.dot_dimension_numbers<[1], [0], [0], [1], [0, 0, 1, 1], [], []>} : vector<256x160xbf16>, vector<160x64xbf16>, vector<256x64xf32> -> vector<256x64xf32>
    %c0_15 = arith.constant 0 : index
    %c0_16 = arith.constant 0 : index
    %61 = vector.load %arg4[%c0_15, %c0_16] : memref<1x64xf32, #tpu.memory_space<vmem>>, vector<1x64xf32>
    %62 = vector.broadcast %61 : vector<1x64xf32> to vector<256x64xf32>
    %63 = arith.addf %60, %62 : vector<256x64xf32>
    %cst_17 = arith.constant 0.000000e+00 : f32
    %64 = vector.broadcast %cst_17 : f32 to vector<256x64xf32>
    %65 = arith.maximumf %63, %64 : vector<256x64xf32>
    %66 = arith.truncf %65 : vector<256x64xf32> to vector<256x64xbf16>
    %c0_18 = arith.constant 0 : index
    %c128 = arith.constant 128 : index
    %67 = vector.load %arg14[%c0_18, %c128] : memref<256x192xbf16, #tpu.memory_space<vmem>>, vector<256x64xbf16>
    tpu.vector_store %arg14[%c0_18, %c128], %66 {strides = array<i32>} : memref<256x192xbf16, #tpu.memory_space<vmem>>, vector<256x64xbf16>,
    %c0_19 = arith.constant 0 : index
    %c128_20 = arith.constant 128 : index
    %68 = vector.load %arg14[%c0_19, %c128_20] : memref<256x192xbf16, #tpu.memory_space<vmem>>, vector<256x64xbf16>
    %c0_21 = arith.constant 0 : index
    %c0_22 = arith.constant 0 : index
    %69 = vector.load %arg5[%c0_21, %c0_22] : memref<64x32xbf16, #tpu.memory_space<vmem>>, vector<64x32xbf16>
    %cst_23 = arith.constant dense<0.000000e+00> : vector<256x32xf32>
    %70 = tpu.matmul %68, %69, %cst_23 {dimension_numbers = #tpu.dot_dimension_numbers<[1], [0], [0], [1], [0, 0, 1, 1], [], []>} : vector<256x64xbf16>, vector<64x32xbf16>, vector<256x32xf32> -> vector<256x32xf32>
    %c0_24 = arith.constant 0 : index
    %c0_25 = arith.constant 0 : index
    %71 = vector.load %arg6[%c0_24, %c0_25] : memref<1x32xf32, #tpu.memory_space<vmem>>, vector<1x32xf32>
    %72 = vector.broadcast %71 : vector<1x32xf32> to vector<256x32xf32>
    %73 = arith.addf %70, %72 : vector<256x32xf32>
    %cst_26 = arith.constant 0.000000e+00 : f32
    %74 = vector.broadcast %cst_26 : f32 to vector<256x32xf32>
    %75 = arith.maximumf %73, %74 : vector<256x32xf32>
    %76 = arith.truncf %75 : vector<256x32xf32> to vector<256x32xbf16>
    %cst_27 = arith.constant 0.000000e+00 : bf16
    %77 = vector.broadcast %cst_27 : bf16 to vector<2x32xbf16>
    %78 = tpu.concatenate %77, %76, %77 in 0 : vector<2x32xbf16>, vector<256x32xbf16>, vector<2x32xbf16> -> vector<260x32xbf16>
    %79 = vector.extract_strided_slice %78 {offsets = [0, 0], sizes = [256, 32], strides = [1, 1]} : vector<260x32xbf16> to vector<256x32xbf16>
    %cst_28 = arith.constant 0.000000e+00 : bf16
    %80 = vector.broadcast %cst_28 : bf16 to vector<256x32xbf16>
    %81 = vector.shape_cast %20 : vector<256x1xi1> to vector<256x1xi1>
    %82 = vector.broadcast %81 : vector<256x1xi1> to vector<256x32xi1>
    %83 = arith.select %82, %79, %80 : vector<256x32xi1>, vector<256x32xbf16>
    %84 = vector.extract_strided_slice %78 {offsets = [1, 0], sizes = [256, 32], strides = [1, 1]} : vector<260x32xbf16> to vector<256x32xbf16>
    %cst_29 = arith.constant 0.000000e+00 : bf16
    %85 = vector.broadcast %cst_29 : bf16 to vector<256x32xbf16>
    %86 = vector.shape_cast %18 : vector<256x1xi1> to vector<256x1xi1>
    %87 = vector.broadcast %86 : vector<256x1xi1> to vector<256x32xi1>
    %88 = arith.select %87, %84, %85 : vector<256x32xi1>, vector<256x32xbf16>
    %89 = vector.extract_strided_slice %78 {offsets = [2, 0], sizes = [256, 32], strides = [1, 1]} : vector<260x32xbf16> to vector<256x32xbf16>
    %90 = vector.extract_strided_slice %78 {offsets = [3, 0], sizes = [256, 32], strides = [1, 1]} : vector<260x32xbf16> to vector<256x32xbf16>
    %cst_30 = arith.constant 0.000000e+00 : bf16
    %91 = vector.broadcast %cst_30 : bf16 to vector<256x32xbf16>
    %92 = vector.shape_cast %22 : vector<256x1xi1> to vector<256x1xi1>
    %93 = vector.broadcast %92 : vector<256x1xi1> to vector<256x32xi1>
    %94 = arith.select %93, %90, %91 : vector<256x32xi1>, vector<256x32xbf16>
    %95 = vector.extract_strided_slice %78 {offsets = [4, 0], sizes = [256, 32], strides = [1, 1]} : vector<260x32xbf16> to vector<256x32xbf16>
    %cst_31 = arith.constant 0.000000e+00 : bf16
    %96 = vector.broadcast %cst_31 : bf16 to vector<256x32xbf16>
    %97 = vector.shape_cast %24 : vector<256x1xi1> to vector<256x1xi1>
    %98 = vector.broadcast %97 : vector<256x1xi1> to vector<256x32xi1>
    %99 = arith.select %98, %95, %96 : vector<256x32xi1>, vector<256x32xbf16>
    %100 = tpu.concatenate %83, %88, %89, %94, %99 in 1 : vector<256x32xbf16>, vector<256x32xbf16>, vector<256x32xbf16>, vector<256x32xbf16>, vector<256x32xbf16> -> vector<256x160xbf16>
    %c0_32 = arith.constant 0 : index
    %c0_33 = arith.constant 0 : index
    %101 = vector.load %arg7[%c0_32, %c0_33] : memref<160x64xbf16, #tpu.memory_space<vmem>>, vector<160x64xbf16>
    %cst_34 = arith.constant dense<0.000000e+00> : vector<256x64xf32>
    %102 = tpu.matmul %100, %101, %cst_34 {dimension_numbers = #tpu.dot_dimension_numbers<[1], [0], [0], [1], [0, 0, 1, 1], [], []>} : vector<256x160xbf16>, vector<160x64xbf16>, vector<256x64xf32> -> vector<256x64xf32>
    %c0_35 = arith.constant 0 : index
    %c0_36 = arith.constant 0 : index
    %103 = vector.load %arg8[%c0_35, %c0_36] : memref<1x64xf32, #tpu.memory_space<vmem>>, vector<1x64xf32>
    %104 = vector.broadcast %103 : vector<1x64xf32> to vector<256x64xf32>
    %105 = arith.addf %102, %104 : vector<256x64xf32>
    %cst_37 = arith.constant 0.000000e+00 : f32
    %106 = vector.broadcast %cst_37 : f32 to vector<256x64xf32>
    %107 = arith.maximumf %105, %106 : vector<256x64xf32>
    %108 = arith.truncf %107 : vector<256x64xf32> to vector<256x64xbf16>
    %c0_38 = arith.constant 0 : index
    %c64 = arith.constant 64 : index
    %109 = vector.load %arg14[%c0_38, %c64] : memref<256x192xbf16, #tpu.memory_space<vmem>>, vector<256x64xbf16>
    tpu.vector_store %arg14[%c0_38, %c64], %108 {strides = array<i32>} : memref<256x192xbf16, #tpu.memory_space<vmem>>, vector<256x64xbf16>,
    %c0_39 = arith.constant 0 : index
    %c64_40 = arith.constant 64 : index
    %110 = vector.load %arg14[%c0_39, %c64_40] : memref<256x192xbf16, #tpu.memory_space<vmem>>, vector<256x128xbf16>
    %c0_41 = arith.constant 0 : index
    %c0_42 = arith.constant 0 : index
    %111 = vector.load %arg9[%c0_41, %c0_42] : memref<128x32xbf16, #tpu.memory_space<vmem>>, vector<128x32xbf16>
    %cst_43 = arith.constant dense<0.000000e+00> : vector<256x32xf32>
    %112 = tpu.matmul %110, %111, %cst_43 {dimension_numbers = #tpu.dot_dimension_numbers<[1], [0], [0], [1], [0, 0, 1, 1], [], []>} : vector<256x128xbf16>, vector<128x32xbf16>, vector<256x32xf32> -> vector<256x32xf32>
    %c0_44 = arith.constant 0 : index
    %c0_45 = arith.constant 0 : index
    %113 = vector.load %arg10[%c0_44, %c0_45] : memref<1x32xf32, #tpu.memory_space<vmem>>, vector<1x32xf32>
    %114 = vector.broadcast %113 : vector<1x32xf32> to vector<256x32xf32>
    %115 = arith.addf %112, %114 : vector<256x32xf32>
    %cst_46 = arith.constant 0.000000e+00 : f32
    %116 = vector.broadcast %cst_46 : f32 to vector<256x32xf32>
    %117 = arith.maximumf %115, %116 : vector<256x32xf32>
    %118 = arith.truncf %117 : vector<256x32xf32> to vector<256x32xbf16>
    %cst_47 = arith.constant 0.000000e+00 : bf16
    %119 = vector.broadcast %cst_47 : bf16 to vector<2x32xbf16>
    %120 = tpu.concatenate %119, %118, %119 in 0 : vector<2x32xbf16>, vector<256x32xbf16>, vector<2x32xbf16> -> vector<260x32xbf16>
    %121 = vector.extract_strided_slice %120 {offsets = [0, 0], sizes = [256, 32], strides = [1, 1]} : vector<260x32xbf16> to vector<256x32xbf16>
    %cst_48 = arith.constant 0.000000e+00 : bf16
    %122 = vector.broadcast %cst_48 : bf16 to vector<256x32xbf16>
    %123 = vector.shape_cast %20 : vector<256x1xi1> to vector<256x1xi1>
    %124 = vector.broadcast %123 : vector<256x1xi1> to vector<256x32xi1>
    %125 = arith.select %124, %121, %122 : vector<256x32xi1>, vector<256x32xbf16>
    %126 = vector.extract_strided_slice %120 {offsets = [1, 0], sizes = [256, 32], strides = [1, 1]} : vector<260x32xbf16> to vector<256x32xbf16>
    %cst_49 = arith.constant 0.000000e+00 : bf16
    %127 = vector.broadcast %cst_49 : bf16 to vector<256x32xbf16>
    %128 = vector.shape_cast %18 : vector<256x1xi1> to vector<256x1xi1>
    %129 = vector.broadcast %128 : vector<256x1xi1> to vector<256x32xi1>
    %130 = arith.select %129, %126, %127 : vector<256x32xi1>, vector<256x32xbf16>
    %131 = vector.extract_strided_slice %120 {offsets = [2, 0], sizes = [256, 32], strides = [1, 1]} : vector<260x32xbf16> to vector<256x32xbf16>
    %132 = vector.extract_strided_slice %120 {offsets = [3, 0], sizes = [256, 32], strides = [1, 1]} : vector<260x32xbf16> to vector<256x32xbf16>
    %cst_50 = arith.constant 0.000000e+00 : bf16
    %133 = vector.broadcast %cst_50 : bf16 to vector<256x32xbf16>
    %134 = vector.shape_cast %22 : vector<256x1xi1> to vector<256x1xi1>
    %135 = vector.broadcast %134 : vector<256x1xi1> to vector<256x32xi1>
    %136 = arith.select %135, %132, %133 : vector<256x32xi1>, vector<256x32xbf16>
    %137 = vector.extract_strided_slice %120 {offsets = [4, 0], sizes = [256, 32], strides = [1, 1]} : vector<260x32xbf16> to vector<256x32xbf16>
    %cst_51 = arith.constant 0.000000e+00 : bf16
    %138 = vector.broadcast %cst_51 : bf16 to vector<256x32xbf16>
    %139 = vector.shape_cast %24 : vector<256x1xi1> to vector<256x1xi1>
    %140 = vector.broadcast %139 : vector<256x1xi1> to vector<256x32xi1>
    %141 = arith.select %140, %137, %138 : vector<256x32xi1>, vector<256x32xbf16>
    %142 = tpu.concatenate %125, %130, %131, %136, %141 in 1 : vector<256x32xbf16>, vector<256x32xbf16>, vector<256x32xbf16>, vector<256x32xbf16>, vector<256x32xbf16> -> vector<256x160xbf16>
    %c0_52 = arith.constant 0 : index
    %c0_53 = arith.constant 0 : index
    %143 = vector.load %arg11[%c0_52, %c0_53] : memref<160x64xbf16, #tpu.memory_space<vmem>>, vector<160x64xbf16>
    %cst_54 = arith.constant dense<0.000000e+00> : vector<256x64xf32>
    %144 = tpu.matmul %142, %143, %cst_54 {dimension_numbers = #tpu.dot_dimension_numbers<[1], [0], [0], [1], [0, 0, 1, 1], [], []>} : vector<256x160xbf16>, vector<160x64xbf16>, vector<256x64xf32> -> vector<256x64xf32>
    %c0_55 = arith.constant 0 : index
    %c0_56 = arith.constant 0 : index
    %145 = vector.load %arg12[%c0_55, %c0_56] : memref<1x64xf32, #tpu.memory_space<vmem>>, vector<1x64xf32>
    %146 = vector.broadcast %145 : vector<1x64xf32> to vector<256x64xf32>
    %147 = arith.addf %144, %146 : vector<256x64xf32>
    %cst_57 = arith.constant 0.000000e+00 : f32
    %148 = vector.broadcast %cst_57 : f32 to vector<256x64xf32>
    %149 = arith.maximumf %147, %148 : vector<256x64xf32>
    %150 = arith.truncf %149 : vector<256x64xf32> to vector<256x64xbf16>
    %c0_58 = arith.constant 0 : index
    %c0_59 = arith.constant 0 : index
    %151 = vector.load %arg14[%c0_58, %c0_59] : memref<256x192xbf16, #tpu.memory_space<vmem>>, vector<256x64xbf16>
    tpu.vector_store %arg14[%c0_58, %c0_59], %150 {strides = array<i32>} : memref<256x192xbf16, #tpu.memory_space<vmem>>, vector<256x64xbf16>,
    %c0_60 = arith.constant 0 : index
    %c0_61 = arith.constant 0 : index
    %152 = vector.load %arg14[%c0_60, %c0_61] : memref<256x192xbf16, #tpu.memory_space<vmem>>, vector<256x192xbf16>
    %153 = arith.extf %152 : vector<256x192xbf16> to vector<256x192xf32>
    %c0_62 = arith.constant 0 : index
    %c0_63 = arith.constant 0 : index
    %154 = vector.load %arg13[%c0_62, %c0_63] : memref<256x192xf32, #tpu.memory_space<vmem>>, vector<256x192xf32>
    tpu.vector_store %arg13[%c0_62, %c0_63], %153 {strides = array<i32>} : memref<256x192xf32, #tpu.memory_space<vmem>>, vector<256x192xf32>,
    return
  }
  func.func @transform_0(%arg0: i32) -> (i32, i32) {
    %c0_i32 = arith.constant 0 : i32
    %c0_i32_0 = arith.constant 0 : i32
    return %arg0, %c0_i32 : i32, i32
  }
  func.func @transform_1(%arg0: i32) -> (i32, i32) {
    %c0_i32 = arith.constant 0 : i32
    %c0_i32_0 = arith.constant 0 : i32
    %c0_i32_1 = arith.constant 0 : i32
    return %c0_i32, %c0_i32_0 : i32, i32
  }
  func.func @transform_2(%arg0: i32) -> (i32, i32) {
    %c0_i32 = arith.constant 0 : i32
    %c0_i32_0 = arith.constant 0 : i32
    %c0_i32_1 = arith.constant 0 : i32
    return %c0_i32, %c0_i32_0 : i32, i32
  }
  func.func @transform_3(%arg0: i32) -> (i32, i32) {
    %c0_i32 = arith.constant 0 : i32
    %c0_i32_0 = arith.constant 0 : i32
    %c0_i32_1 = arith.constant 0 : i32
    return %c0_i32, %c0_i32_0 : i32, i32
  }
  func.func @transform_4(%arg0: i32) -> (i32, i32) {
    %c0_i32 = arith.constant 0 : i32
    %c0_i32_0 = arith.constant 0 : i32
    %c0_i32_1 = arith.constant 0 : i32
    return %c0_i32, %c0_i32_0 : i32, i32
  }
  func.func @transform_5(%arg0: i32) -> (i32, i32) {
    %c0_i32 = arith.constant 0 : i32
    %c0_i32_0 = arith.constant 0 : i32
    %c0_i32_1 = arith.constant 0 : i32
    return %c0_i32, %c0_i32_0 : i32, i32
  }
  func.func @transform_6(%arg0: i32) -> (i32, i32) {
    %c0_i32 = arith.constant 0 : i32
    %c0_i32_0 = arith.constant 0 : i32
    %c0_i32_1 = arith.constant 0 : i32
    return %c0_i32, %c0_i32_0 : i32, i32
  }
  func.func @transform_7(%arg0: i32) -> (i32, i32) {
    %c0_i32 = arith.constant 0 : i32
    %c0_i32_0 = arith.constant 0 : i32
    %c0_i32_1 = arith.constant 0 : i32
    return %c0_i32, %c0_i32_0 : i32, i32
  }
  func.func @transform_8(%arg0: i32) -> (i32, i32) {
    %c0_i32 = arith.constant 0 : i32
    %c0_i32_0 = arith.constant 0 : i32
    %c0_i32_1 = arith.constant 0 : i32
    return %c0_i32, %c0_i32_0 : i32, i32
  }
  func.func @transform_9(%arg0: i32) -> (i32, i32) {
    %c0_i32 = arith.constant 0 : i32
    %c0_i32_0 = arith.constant 0 : i32
    %c0_i32_1 = arith.constant 0 : i32
    return %c0_i32, %c0_i32_0 : i32, i32
  }
  func.func @transform_10(%arg0: i32) -> (i32, i32) {
    %c0_i32 = arith.constant 0 : i32
    %c0_i32_0 = arith.constant 0 : i32
    %c0_i32_1 = arith.constant 0 : i32
    return %c0_i32, %c0_i32_0 : i32, i32
  }
  func.func @transform_11(%arg0: i32) -> (i32, i32) {
    %c0_i32 = arith.constant 0 : i32
    %c0_i32_0 = arith.constant 0 : i32
    %c0_i32_1 = arith.constant 0 : i32
    return %c0_i32, %c0_i32_0 : i32, i32
  }
  func.func @transform_12(%arg0: i32) -> (i32, i32) {
    %c0_i32 = arith.constant 0 : i32
    %c0_i32_0 = arith.constant 0 : i32
    return %arg0, %c0_i32 : i32, i32
  }
}

</mosaic_0001>

<bundles_post_ra>
// kernel: intnet_forward.1
= control target key start
LH: loop header
LB: loop body
LE: loop exit
PB: predicated region body
PF: predicated region fallthrough
CT: control target
= control target key end

     0   :  { %17 = vsyncpa [#allocation4], 0  ;;  %s10882_s0 = inlined_call_operand.vmem [shape: s32[256,1], index: 0, kind: input, shape index: {}]   ;;  %s10883_s1 = inlined_call_operand.hbm [shape: bf16[32,32], index: 1, kind: input, shape index: {}]   ;;  %s10884_s2 = inlined_call_operand.vmem [shape: bf16[160,64], index: 2, kind: input, shape index: {}]   ;;  %s10885_s3 = inlined_call_operand.hbm [shape: f32[1,64], index: 3, kind: input, shape index: {}]   ;;  %s10886_s4 = inlined_call_operand.hbm [shape: bf16[64,32], index: 4, kind: input, shape index: {}]   ;;  %s10887_s5 = inlined_call_operand.hbm [shape: f32[1,32], index: 5, kind: input, shape index: {}]   ;;  %s10888_s6 = inlined_call_operand.vmem [shape: bf16[160,64], index: 6, kind: input, shape index: {}]   ;;  %s10889_s7 = inlined_call_operand.hbm [shape: f32[1,64], index: 7, kind: input, shape index: {}]   ;;  %s10890_s8 = inlined_call_operand.vmem [shape: bf16[128,32], index: 8, kind: input, shape index: {}]   ;;  %s10891_s9 = inlined_call_operand.vmem [shape: f32[1,32], index: 9, kind: input, shape index: {}]   ;;  %s10892_s10 = inlined_call_operand.vmem [shape: bf16[160,64], index: 10, kind: input, shape index: {}]   ;;  %s10893_s11 = inlined_call_operand.vmem [shape: f32[1,64], index: 11, kind: input, shape index: {}]   ;;  %s10894_s12 = inlined_call_operand.hbm [shape: f32[256,192], index: 12, kind: output, shape index: {}]  }
   0x1   :  { %18 = vsyncpa [#allocation7], 0 }
   0x2   :  { %19 = vsyncpa [#allocation10], 0 }
   0x3   :  { %20 = vsyncpa [#allocation5], 0  ;;  %s7113_s21 = smov [#allocation6]   ;;  %s7114_s23 = smov [#allocation9]  }
   0x4   :  { %s43_s22 = sshll.u32 %s7113_s21, 4  ;;  %s65_s24 = sshll.u32 %s7114_s23, 4  ;;  %s44_s22 = int_to_ptr.vmem [resolvable:$true] %s43_s22  ;;  %s66_s24 = int_to_ptr.vmem [resolvable:$true] %s65_s24 }
   0x5   :  { %s6973_s27 = scalar_lea.hbm %s10885_s3, 16 }
   0x6   :  { %p6974_p0 = scmp.ne.s32.totalorder %s10885_s3, %s6973_s27  ;;  %p6977_p1 = scmp.lt.u32.totalorder %s6973_s27, %s10885_s3 }
   0x8   :  { %p6979_p2 = pnand %p6977_p1, %p6974_p0 }
   0xa   :  { %6982 = shalt.err (!%p6979_p2)
}
   0xb   :  { %s6983_s14 = scalar_lea.vmem %s44_s22, 16  ;;  %s6987_s15 = scalar_lea.vmem %s44_s22, 32 }
   0xc   :  { %p6984_p3 = scmp.ne.s32.totalorder %s44_s22, %s6983_s14  ;;  %p6988_p4 = scmp.lt.s32.totalorder %s44_s22, %s44_s22 }
   0xd   :  { %p6989_p5 = scmp.lt.s32.totalorder %s6987_s15, %s6983_s14 }
   0xf   :  { %p6990_p6 = por %p6989_p5, %p6988_p4 }
  0x11   :  { %p6991_p7 = pnand %p6990_p6, %p6984_p3 }
  0x13   :  { %6994 = shalt.err (!%p6991_p7)
}
  0x14   :  { %46 = dma.hbm_to_vmem [thread:$0]  %s10885_s3, 16, %s44_s22, [#allocation7]  }
  0x15   :  { %s6995_s20 = scalar_lea.hbm %s10887_s5, 16 }
  0x16   :  { %p6996_p8 = scmp.ne.s32.totalorder %s10887_s5, %s6995_s20  ;;  %p6999_p9 = scmp.lt.u32.totalorder %s6995_s20, %s10887_s5 }
  0x18   :  { %p7001_p10 = pnand %p6999_p9, %p6996_p8 }
  0x1a   :  { %7004 = shalt.err (!%p7001_p10)
}
  0x1b   :  { %s7005_s27 = scalar_lea.vmem %s66_s24, 16  ;;  %s7009_s28 = scalar_lea.vmem %s66_s24, 32 }
  0x1c   :  { %p7006_p11 = scmp.ne.s32.totalorder %s66_s24, %s7005_s27  ;;  %p7010_p12 = scmp.lt.s32.totalorder %s66_s24, %s66_s24 }
  0x1d   :  { %p7011_p13 = scmp.lt.s32.totalorder %s7009_s28, %s7005_s27 }
  0x1f   :  { %p7012_p0 = por %p7011_p13, %p7010_p12 }
  0x21   :  { %p7013_p1 = pnand %p7012_p0, %p7006_p11 }
  0x23   :  { %7016 = shalt.err (!%p7013_p1)
}
  0x24   :  { %68 = dma.hbm_to_vmem [thread:$0]  %s10887_s5, 16, %s66_s24, [#allocation10]  }
  0x25   :  { %s7115_s29 = smov [#allocation3]   ;;  %s7017_s15 = scalar_lea.hbm %s10883_s1, 256 }
  0x26   :  { %s28_s30 = sshll.u32 %s7115_s29, 4  ;;  %p7018_p2 = scmp.ne.s32.totalorder %s10883_s1, %s7017_s15  ;;  %s29_s30 = int_to_ptr.vmem [resolvable:$true] %s28_s30 }
  0x27   :  { %p7021_p3 = scmp.lt.u32.totalorder %s7017_s15, %s10883_s1 }
  0x29   :  { %p7023_p4 = pnand %p7021_p3, %p7018_p2 }
  0x2b   :  { %7026 = shalt.err (!%p7023_p4)
}
  0x2c   :  { %s7027_s20 = scalar_lea.vmem %s29_s30, 256  ;;  %p7032_p6 = scmp.lt.s32.totalorder %s29_s30, %s29_s30 }
  0x2d   :  { %p7028_p5 = scmp.ne.s32.totalorder %s29_s30, %s7027_s20  ;;  %p7033_p7 = scmp.lt.s32.totalorder %s7027_s20, %s7027_s20 }
  0x2f   :  { %p7034_p8 = por %p7033_p7, %p7032_p6 }
  0x31   :  { %p7035_p9 = pnand %p7034_p8, %p7028_p5 }
  0x33   :  { %7038 = shalt.err (!%p7035_p9)
}
  0x34   :  { %s7116_s5 = smov 64   ;;  %s7117_s24 = smov 4  }
  0x35   :  { %34 = dma.hbm_to_vmem [thread:$0]  %s10883_s1, 256, %s29_s30, [#allocation4], %s7116_s5, %s7116_s5, %s7117_s24  }
  0x36   :  { %s7118_s25 = smov [#allocation8]   ;;  %s7119_s27 = smov [#allocation11]  }
  0x37   :  { %s52_s26 = sshll.u32 %s7118_s25, 4  ;;  %s77_s28 = sshll.u32 %s7119_s27, 4  ;;  %s53_s26 = int_to_ptr.vmem [resolvable:$true] %s52_s26  ;;  %s78_s28 = int_to_ptr.vmem [resolvable:$true] %s77_s28 }
  0x38   :  { %s7039_s29 = scalar_lea.hbm %s10886_s4, 512 }
  0x39   :  { %p7040_p10 = scmp.ne.s32.totalorder %s10886_s4, %s7039_s29  ;;  %p7043_p11 = scmp.lt.u32.totalorder %s7039_s29, %s10886_s4 }
  0x3b   :  { %p7045_p12 = pnand %p7043_p11, %p7040_p10 }
  0x3d   :  { %7048 = shalt.err (!%p7045_p12)
}
  0x3e   :  { %s7049_s1 = scalar_lea.vmem %s53_s26, 512  ;;  %p7054_p0 = scmp.lt.s32.totalorder %s53_s26, %s53_s26 }
  0x3f   :  { %p7050_p13 = scmp.ne.s32.totalorder %s53_s26, %s7049_s1  ;;  %p7055_p1 = scmp.lt.s32.totalorder %s7049_s1, %s7049_s1 }
  0x41   :  { %p7056_p2 = por %p7055_p1, %p7054_p0 }
  0x43   :  { %p7057_p3 = pnand %p7056_p2, %p7050_p13 }
  0x45   :  { %7060 = shalt.err (!%p7057_p3)
}
  0x46   :  { %58 = dma.hbm_to_vmem [thread:$0]  %s10886_s4, 512, %s53_s26, [#allocation7], %s7116_s5, %s7116_s5, %s7117_s24  }
  0x47   :  { %s7061_s20 = scalar_lea.hbm %s10889_s7, 16 }
  0x48   :  { %p7062_p4 = scmp.ne.s32.totalorder %s10889_s7, %s7061_s20  ;;  %p7065_p5 = scmp.lt.u32.totalorder %s7061_s20, %s10889_s7 }
  0x4a   :  { %p7067_p6 = pnand %p7065_p5, %p7062_p4 }
  0x4c   :  { %7070 = shalt.err (!%p7067_p6)
}
  0x4d   :  { %s7071_s3 = scalar_lea.vmem %s78_s28, 16  ;;  %s7075_s22 = scalar_lea.vmem %s78_s28, 32 }
  0x4e   :  { %p7072_p7 = scmp.ne.s32.totalorder %s78_s28, %s7071_s3  ;;  %p7076_p8 = scmp.lt.s32.totalorder %s78_s28, %s78_s28 }
  0x4f   :  { %p7077_p9 = scmp.lt.s32.totalorder %s7075_s22, %s7071_s3 }
  0x51   :  { %p7078_p10 = por %p7077_p9, %p7076_p8 }
  0x53   :  { %p7079_p11 = pnand %p7078_p10, %p7072_p7 }
  0x55   :  { %7082 = shalt.err (!%p7079_p11)
}
  0x56   :  { %80 = dma.hbm_to_vmem [thread:$0]  %s10889_s7, 16, %s78_s28, [#allocation10]  }
  0x57   :  { %7105 = dma.done.wait [#allocation4], 256  }
  0x58   :  { %7106 = vsyncadd [#allocation4], 4294967040 }
  0x59   :  { %7107 = dma.done.wait [#allocation7], 528  }
  0x5a   :  { %7108 = vsyncadd [#allocation7], 4294966768 }
  0x5b   :  { %7109 = dma.done.wait [#allocation10], 32  }
  0x5c   :  { %7110 = vsyncadd [#allocation10], 4294967264  ;;  %v10910_v0 = vmov 0   ;;  %v654_v1 = vld [vmem:[%s10882_s0 + $0x10] sm:$0xff]  ;;  %v652_v2 = vld [vmem:[%s10882_s0] sm:$0xff]  ;;  %v107_v35 = vlaneseq  ;;  %vm11080_vm4 = vcmask 261120  }
  0x5d   :  { %6928 = vset.pattern.permute.xlu1 %v10910_v0  ;;  %6927 = vset.pattern.permute.xlu0 %v10910_v0  ;;  %v655_v3 = vld [vmem:[%s10882_s0 + $0x18] sm:$0xff]  ;;  %v653_v4 = vld [vmem:[%s10882_s0 + $0x8] sm:$0xff]  ;;  %v656_v6 = vld [vmem:[%s10882_s0 + $0x20] sm:$0xff]  ;;  %v7121_v41 = vmov 0.0   ;;  %s7124_s27 = smov 96  }
  0x5e   :  { %6892 = vmatprep.subr.bf16.mxu1 %v10910_v0  ;;  %693 = vperm.xlu1 %6928, %v654_v1   ;;  %v657_v5 = vld [vmem:[%s10882_s0 + $0x28] sm:$0xff]  ;;  %v659_v7 = vld [vmem:[%s10882_s0 + $0x38] sm:$0xff]  ;;  %v658_v8 = vld [vmem:[%s10882_s0 + $0x30] sm:$0xff]  ;;  %v7358_v36 = vand.u32 127, %v107_v35 }
  0x5f   :  { %687 = vperm.xlu0 %6927, %v652_v2   ;;  %v6929_v9 = vld [vmem:[#allocation3] sm:$0xff]   ;;  %v661_v10 = vld [vmem:[%s10882_s0 + $0x48] sm:$0xff]  ;;  %v663_v13 = vld [vmem:[%s10882_s0 + $0x58] sm:$0xff] }
  0x60   :  { %v660_v11 = vld [vmem:[%s10882_s0 + $0x40] sm:$0xff]  ;;  %v6930_v12 = vld [vmem:[#allocation3 + $0x8] sm:$0xff]   ;;  %6768 = vmatprep.subr.bf16.mxu0 %v6929_v9  ;;  %v662_v14 = vld [vmem:[%s10882_s0 + $0x50] sm:$0xff] }
  0x61   :  { %6769 = vmatpush3.bf16.msra.mxu0 %v6929_v9  ;;  %v665_v15 = vld [vmem:[%s10882_s0 + $0x68] sm:$0xff]  ;;  %v664_v16 = vld [vmem:[%s10882_s0 + $0x60] sm:$0xff]  ;;  %v667_v17 = vld [vmem:[%s10882_s0 + $0x78] sm:$0xff] }
  0x62   :  { %696 = vperm.xlu1 %6928, %v655_v3   ;;  %6770 = vmatprep.subr.bf16.mxu0 %v6930_v12  ;;  %v666_v18 = vld [vmem:[%s10882_s0 + $0x70] sm:$0xff]  ;;  %v669_v19 = vld [vmem:[%s10882_s0 + $0x88] sm:$0xff]  ;;  %v668_v20 = vld [vmem:[%s10882_s0 + $0x80] sm:$0xff] }
  0x63   :  { %690 = vperm.xlu0 %6927, %v653_v4   ;;  %v671_v21 = vld [vmem:[%s10882_s0 + $0x98] sm:$0xff]  ;;  %v670_v22 = vld [vmem:[%s10882_s0 + $0x90] sm:$0xff]  ;;  %v673_v23 = vld [vmem:[%s10882_s0 + $0xa8] sm:$0xff] }
  0x64   :  { %v672_v24 = vld [vmem:[%s10882_s0 + $0xa0] sm:$0xff]  ;;  %v675_v25 = vld [vmem:[%s10882_s0 + $0xb8] sm:$0xff]  ;;  %v674_v26 = vld [vmem:[%s10882_s0 + $0xb0] sm:$0xff] }
  0x65   :  { %6771 = vmatpush3.bf16.msra.mxu0 %v6930_v12  ;;  %v677_v27 = vld [vmem:[%s10882_s0 + $0xc8] sm:$0xff]  ;;  %v676_v28 = vld [vmem:[%s10882_s0 + $0xc0] sm:$0xff]  ;;  %v679_v29 = vld [vmem:[%s10882_s0 + $0xd8] sm:$0xff] }
  0x66   :  { %702 = vperm.xlu1 %6928, %v657_v5   ;;  %3083 = vmatprep.subr.bf16.mxu0 %v10910_v0  ;;  %v678_v30 = vld [vmem:[%s10882_s0 + $0xd0] sm:$0xff]  ;;  %v681_v31 = vld [vmem:[%s10882_s0 + $0xe8] sm:$0xff]  ;;  %v680_v32 = vld [vmem:[%s10882_s0 + $0xe0] sm:$0xff] }
  0x67   :  { %699 = vperm.xlu0 %6927, %v656_v6   ;;  %v683_v33 = vld [vmem:[%s10882_s0 + $0xf8] sm:$0xff]  ;;  %v682_v34 = vld [vmem:[%s10882_s0 + $0xf0] sm:$0xff] }
  0x6a   :  { %708 = vperm.xlu1 %6928, %v659_v7  }
  0x6b   :  { %705 = vperm.xlu0 %6927, %v658_v8  }
  0x6e   :  { %714 = vperm.xlu1 %6928, %v661_v10  }
  0x6f   :  { %711 = vperm.xlu0 %6927, %v660_v11  }
  0x72   :  { %720 = vperm.xlu1 %6928, %v663_v13  }
  0x73   :  { %717 = vperm.xlu0 %6927, %v662_v14  }
  0x76   :  { %726 = vperm.xlu1 %6928, %v665_v15  }
  0x77   :  { %723 = vperm.xlu0 %6927, %v664_v16  }
  0x7a   :  { %732 = vperm.xlu1 %6928, %v667_v17  }
  0x7b   :  { %729 = vperm.xlu0 %6927, %v666_v18  }
  0x7e   :  { %738 = vperm.xlu1 %6928, %v669_v19  }
  0x7f   :  { %735 = vperm.xlu0 %6927, %v668_v20  }
  0x82   :  { %744 = vperm.xlu1 %6928, %v671_v21  }
  0x83   :  { %741 = vperm.xlu0 %6927, %v670_v22  }
  0x86   :  { %750 = vperm.xlu1 %6928, %v673_v23  }
  0x87   :  { %747 = vperm.xlu0 %6927, %v672_v24  }
  0x8a   :  { %756 = vperm.xlu1 %6928, %v675_v25  }
  0x8b   :  { %753 = vperm.xlu0 %6927, %v674_v26  }
  0x8e   :  { %762 = vperm.xlu1 %6928, %v677_v27  }
  0x8f   :  { %759 = vperm.xlu0 %6927, %v676_v28  }
  0x92   :  { %768 = vperm.xlu1 %6928, %v679_v29  }
  0x93   :  { %765 = vperm.xlu0 %6927, %v678_v30  }
  0x96   :  { %774 = vperm.xlu1 %6928, %v681_v31  }
  0x97   :  { %771 = vperm.xlu0 %6927, %v680_v32  }
  0x9a   :  { %780 = vperm.xlu1 %6928, %v683_v33  }
  0x9b   :  { %777 = vperm.xlu0 %6927, %v682_v34  }
  0xdd   :  { %v694_v37 = vpop.permute.xlu1 %693 }
  0xde   :  { %v688_v38 = vpop.permute.xlu0 %687  ;;  %vm784_vm0 = vcmp.eq.s32.totalorder %v7358_v36, %v694_v37 }
  0xdf   :  { %vm782_vm1 = vcmp.eq.s32.totalorder %v7358_v36, %v688_v38  ;;  %v6483_v42 = vsel %vm784_vm0, 1.0, %v7121_v41 }
  0xe0   :  { %v6481_v44 = vsel %vm782_vm1, 1.0, %v7121_v41 }
  0xe1   :  { %v697_v39 = vpop.permute.xlu1 %696 }
  0xe2   :  { %v691_v40 = vpop.permute.xlu0 %690  ;;  %vm785_vm2 = vcmp.eq.s32.totalorder %v7358_v36, %v697_v39 }
  0xe3   :  { %vm783_vm3 = vcmp.eq.s32.totalorder %v7358_v36, %v691_v40  ;;  %v6484_v43 = vsel %vm785_vm2, 1.0, %v7121_v41 }
  0xe4   :  { %v6482_v45 = vsel %vm783_vm3, 1.0, %v7121_v41  ;;  %v879_v46 = vpack.c.bf16 %v6484_v43, %v6483_v42 }
  0xe5   :  { %v878_v47 = vpack.c.bf16 %v6482_v45, %v6481_v44  ;;  %v703_v48 = vpop.permute.xlu1 %702 }
  0xe6   :  { %v700_v49 = vpop.permute.xlu0 %699  ;;  %vm787_vm5 = vcmp.eq.s32.totalorder %v7358_v36, %v703_v48 }
  0xe7   :  { %vm786_vm6 = vcmp.eq.s32.totalorder %v7358_v36, %v700_v49  ;;  %6772 = vmatprep.mubr.msk.bf16.mxu0 %vm11080_vm4, %v878_v47  ;;  %v6486_v50 = vsel %vm787_vm5, 1.0, %v7121_v41 }
  0xe8   :  { %v6485_v51 = vsel %vm786_vm6, 1.0, %v7121_v41  ;;  %6773 = vmatmul.mubr.msk.bf16.vlgmr.msra.gmra.mrb[0].mxu0 %vm11080_vm4, %v879_v46 }
  0xe9   :  { %v880_v52 = vpack.c.bf16 %v6486_v50, %v6485_v51  ;;  %v709_v53 = vpop.permute.xlu1 %708 }
  0xea   :  { %v706_v54 = vpop.permute.xlu0 %705  ;;  %vm789_vm7 = vcmp.eq.s32.totalorder %v7358_v36, %v709_v53 }
  0xeb   :  { %vm788_vm8 = vcmp.eq.s32.totalorder %v7358_v36, %v706_v54  ;;  %6776 = vmatprep.mubr.msk.bf16.mxu0 %vm11080_vm4, %v880_v52  ;;  %v6488_v55 = vsel %vm789_vm7, 1.0, %v7121_v41 }
  0xec   :  { %v6487_v56 = vsel %vm788_vm8, 1.0, %v7121_v41 }
  0xed   :  { %v881_v57 = vpack.c.bf16 %v6488_v55, %v6487_v56  ;;  %v715_v58 = vpop.permute.xlu1 %714 }
  0xee   :  { %v712_v59 = vpop.permute.xlu0 %711  ;;  %vm791_vm9 = vcmp.eq.s32.totalorder %v7358_v36, %v715_v58  ;;  %v7441_v58 = vshrl.u32 %v107_v35, 7 }
  0xef   :  { %vm790_vm10 = vcmp.eq.s32.totalorder %v7358_v36, %v712_v59  ;;  %v6490_v60 = vsel %vm791_vm9, 1.0, %v7121_v41 }
  0xf0   :  { %v6489_v61 = vsel %vm790_vm10, 1.0, %v7121_v41  ;;  %6777 = vmatmul.mubr.msk.bf16.gmra.mrb[4].mxu0 %vm11080_vm4, %v881_v57  ;;  %11146 = vst [vmem:[#allocation17_spill] sm:$0xff] %v7441_v58  ;;  %v109_v59 = vadd.s32 8, %v7441_v58 }
  0xf1   :  { %v882_v62 = vpack.c.bf16 %v6490_v60, %v6489_v61  ;;  %v721_v63 = vpop.permute.xlu1 %720  ;;  %v111_v61 = vadd.s32 24, %v7441_v58 }
  0xf2   :  { %v718_v1 = vpop.permute.xlu0 %717  ;;  %vm793_vm11 = vcmp.eq.s32.totalorder %v7358_v36, %v721_v63  ;;  %v151_v60 = vand.u32 15, %v109_v59 }
  0xf3   :  { %vm792_vm12 = vcmp.eq.s32.totalorder %v7358_v36, %v718_v1  ;;  %6780 = vmatprep.mubr.msk.bf16.mxu0 %vm11080_vm4, %v882_v62  ;;  %v6492_v2 = vsel %vm793_vm11, 1.0, %v7121_v41  ;;  %v7446_v62 = vadd.s32 16, %v7441_v58  ;;  %v7455_v1 = vadd.s32 32, %v7441_v58 }
  0xf4   :  { %v6491_v3 = vsel %vm792_vm12, 1.0, %v7121_v41 }
  0xf5   :  { %v883_v4 = vpack.c.bf16 %v6492_v2, %v6491_v3  ;;  %v727_v5 = vpop.permute.xlu1 %726  ;;  %11147 = vst [vmem:[#allocation18_spill] sm:$0xff] %v7446_v62  ;;  %v10902_v63 = vand.u32 15, %v7446_v62  ;;  %11150 = vst [vmem:[#allocation19_spill] sm:$0xff] %v7455_v1 }
  0xf6   :  { %v724_v6 = vpop.permute.xlu0 %723  ;;  %vm795_vm13 = vcmp.eq.s32.totalorder %v7358_v36, %v727_v5  ;;  %v7468_v5 = vadd.s32 40, %v7441_v58 }
  0xf7   :  { %vm794_vm14 = vcmp.eq.s32.totalorder %v7358_v36, %v724_v6  ;;  %v6494_v7 = vsel %vm795_vm13, 1.0, %v7121_v41  ;;  %v7592_v6 = vadd.s32 72, %v7441_v58 }
  0xf8   :  { %v6493_v8 = vsel %vm794_vm14, 1.0, %v7121_v41  ;;  %6781 = vmatmul.mubr.msk.bf16.gmra.mrb[8].mxu0 %vm11080_vm4, %v883_v4  ;;  %11153 = vst [vmem:[#allocation20_spill] sm:$0xff] %v7468_v5 }
  0xf9   :  { %v884_v9 = vpack.c.bf16 %v6494_v7, %v6493_v8  ;;  %v733_v10 = vpop.permute.xlu1 %732 }
  0xfa   :  { %v730_v11 = vpop.permute.xlu0 %729  ;;  %vm797_vm15 = vcmp.eq.s32.totalorder %v7358_v36, %v733_v10  ;;  %v10901_v10 = vand.u32 15, %v7455_v1 }
  0xfb   :  { %vm796_vm0 = vcmp.eq.s32.totalorder %v7358_v36, %v730_v11  ;;  %6784 = vmatprep.mubr.msk.bf16.mxu0 %vm11080_vm4, %v884_v9  ;;  %v6496_v12 = vsel %vm797_vm15, 1.0, %v7121_v41  ;;  %v7493_v11 = vadd.s32 48, %v7441_v58  ;;  %v121_v9 = vadd.s32 104, %v7441_v58 }
  0xfc   :  { %v6495_v13 = vsel %vm796_vm0, 1.0, %v7121_v41 }
  0xfd   :  { %v885_v14 = vpack.c.bf16 %v6496_v12, %v6495_v13  ;;  %v739_v15 = vpop.permute.xlu1 %738  ;;  %11160 = vst [vmem:[#allocation21_spill] sm:$0xff] %v7493_v11  ;;  %v10904_v12 = vand.u32 15, %v7468_v5  ;;  %v7500_v13 = vadd.s32 56, %v7441_v58 }
  0xfe   :  { %v736_v16 = vpop.permute.xlu0 %735  ;;  %vm799_vm1 = vcmp.eq.s32.totalorder %v7358_v36, %v739_v15 }
  0xff   :  { %vm798_vm2 = vcmp.eq.s32.totalorder %v7358_v36, %v736_v16  ;;  %v6498_v17 = vsel %vm799_vm1, 1.0, %v7121_v41 }
 0x100   :  { %v6497_v18 = vsel %vm798_vm2, 1.0, %v7121_v41  ;;  %6785 = vmatmul.mubr.msk.bf16.gmra.mrb[12].mxu0 %vm11080_vm4, %v885_v14  ;;  %vm589_vm2 = vcmp.lt.s32.totalorder %v151_v60, 15  ;;  %v7506_v14 = vadd.s32 64, %v7441_v58 }
 0x101   :  { %v886_v19 = vpack.c.bf16 %v6498_v17, %v6497_v18  ;;  %v745_v20 = vpop.permute.xlu1 %744 }
 0x102   :  { %v742_v21 = vpop.permute.xlu0 %741  ;;  %vm801_vm3 = vcmp.eq.s32.totalorder %v7358_v36, %v745_v20  ;;  %11161 = vst [vmem:[#allocation22_spill] sm:$0xff] %v7506_v14  ;;  %v10900_v20 = vand.u32 15, %v7493_v11 }
 0x103   :  { %vm800_vm5 = vcmp.eq.s32.totalorder %v7358_v36, %v742_v21  ;;  %6788 = vmatprep.mubr.msk.bf16.mxu0 %vm11080_vm4, %v886_v19  ;;  %v6500_v22 = vsel %vm801_vm3, 1.0, %v7121_v41  ;;  %vm7122_vm3 = vmmov 1  }
 0x104   :  { %v6499_v23 = vsel %vm800_vm5, 1.0, %v7121_v41  ;;  %vm1272_vm5 = vmpackc.low %vm7122_vm3, %vm7122_vm3 }
 0x105   :  { %v887_v24 = vpack.c.bf16 %v6500_v22, %v6499_v23  ;;  %v751_v25 = vpop.permute.xlu1 %750  ;;  %v7458_v2 = vsel %vm1272_vm5, 65537, %v10910_v0 }
 0x106   :  { %v748_v26 = vpop.permute.xlu0 %747  ;;  %vm803_vm6 = vcmp.eq.s32.totalorder %v7358_v36, %v751_v25 }
 0x107   :  { %vm802_vm7 = vcmp.eq.s32.totalorder %v7358_v36, %v748_v26  ;;  %v6502_v27 = vsel %vm803_vm6, 1.0, %v7121_v41  ;;  %vm1818_vm6 = vmpackc.low %vm589_vm2, %vm589_vm2  ;;  %vm7524_vm2 = vcmp.lt.s32.totalorder %v10904_v12, 15  ;;  %v10899_v26 = vand.u32 15, %v7506_v14 }
 0x108   :  { %v6501_v28 = vsel %vm802_vm7, 1.0, %v7121_v41  ;;  %6789 = vmatmul.mubr.msk.bf16.gmra.mrb[16].mxu0 %vm11080_vm4, %v887_v24  ;;  %v1850_v3 = vsel %vm1818_vm6, 65537, %v10910_v0  ;;  %v10907_v24 = vand.u32 15, %v7500_v13  ;;  %vm1822_vm5 = vmpackc.low %vm7524_vm2, %vm7524_vm2  ;;  %vm7543_vm6 = vcmp.ge.s32.totalorder %v10900_v20, 1 }
 0x109   :  { %v888_v29 = vpack.c.bf16 %v6502_v27, %v6501_v28  ;;  %v757_v30 = vpop.permute.xlu1 %756  ;;  %v6563_v8 = vcombine.low %v7458_v2, %v1850_v3  ;;  %v7849_v12 = vadd.s32 248, %v7441_v58 }
 0x10a   :  { %v754_v31 = vpop.permute.xlu0 %753  ;;  %vm805_vm8 = vcmp.eq.s32.totalorder %v7358_v36, %v757_v30 }
 0x10b   :  { %vm804_vm9 = vcmp.eq.s32.totalorder %v7358_v36, %v754_v31  ;;  %6792 = vmatprep.mubr.msk.bf16.mxu0 %vm11080_vm4, %v888_v29  ;;  %v6504_v32 = vsel %vm805_vm8, 1.0, %v7121_v41  ;;  %v1931_v17 = vshrl.u32 %v6563_v8, 16  ;;  %v1934_v21 = vshll.u32 %v6563_v8, 16 }
 0x10c   :  { %v6503_v33 = vsel %vm804_vm9, 1.0, %v7121_v41  ;;  %vm7472_vm9 = vcmp.ge.s32.totalorder %v10902_v63, 1 }
 0x10d   :  { %v889_v34 = vpack.c.bf16 %v6504_v32, %v6503_v33  ;;  %v763_v37 = vpop.permute.xlu1 %762  ;;  %v1933_v32 = vrot.slane %v1931_v17, 6  ;;  %v1936_v33 = vrot.slane %v1934_v21, 7 }
 0x10e   :  { %v760_v38 = vpop.permute.xlu0 %759  ;;  %vm807_vm10 = vcmp.eq.s32.totalorder %v7358_v36, %v763_v37 }
 0x10f   :  { %vm806_vm11 = vcmp.eq.s32.totalorder %v7358_v36, %v760_v38  ;;  %v6506_v39 = vsel %vm807_vm10, 1.0, %v7121_v41  ;;  %vm7476_vm10 = vcmp.lt.s32.totalorder %v151_v60, 14 }
 0x110   :  { %v6505_v40 = vsel %vm806_vm11, 1.0, %v7121_v41  ;;  %6793 = vmatmul.mubr.msk.bf16.gmra.mrb[20].mxu0 %vm11080_vm4, %v889_v34 }
 0x111   :  { %v890_v42 = vpack.c.bf16 %v6506_v39, %v6505_v40  ;;  %v769_v43 = vpop.permute.xlu1 %768 }
 0x112   :  { %v766_v44 = vpop.permute.xlu0 %765  ;;  %vm809_vm12 = vcmp.eq.s32.totalorder %v7358_v36, %v769_v43  ;;  %v1854_v43 = vsel %vm1822_vm5, 65537, %v10910_v0 }
 0x113   :  { %vm808_vm13 = vcmp.eq.s32.totalorder %v7358_v36, %v766_v44  ;;  %6796 = vmatprep.mubr.msk.bf16.mxu0 %vm11080_vm4, %v890_v42  ;;  %v6508_v45 = vsel %vm809_vm12, 1.0, %v7121_v41 }
 0x114   :  { %v6507_v46 = vsel %vm808_vm13, 1.0, %v7121_v41 }
 0x115   :  { %v891_v47 = vpack.c.bf16 %v6508_v45, %v6507_v46  ;;  %v775_v48 = vpop.permute.xlu1 %774  ;;  %v119_v46 = vadd.s32 88, %v7441_v58 }
 0x116   :  { %v772_v49 = vpop.permute.xlu0 %771  ;;  %vm811_vm14 = vcmp.eq.s32.totalorder %v7358_v36, %v775_v48 }
 0x117   :  { %vm810_vm15 = vcmp.eq.s32.totalorder %v7358_v36, %v772_v49  ;;  %v6510_v50 = vsel %vm811_vm14, 1.0, %v7121_v41  ;;  %vm1481_vm14 = vmpackc.low %vm7472_vm9, %vm7472_vm9 }
 0x118   :  { %v6509_v51 = vsel %vm810_vm15, 1.0, %v7121_v41  ;;  %6797 = vmatmul.mubr.msk.bf16.gmra.mrb[24].mxu0 %vm11080_vm4, %v891_v47  ;;  %vm2172_vm15 = vmpackc.low %vm7476_vm10, %vm7476_vm10  ;;  %v1513_v18 = vsel %vm1481_vm14, 65537, %v10910_v0  ;;  %v7569_v47 = vor.u32 %v1936_v33, %v1933_v32  ;;  %vm1929_vm14 = vsmask.f32 1280 }
 0x119   :  { %v892_v52 = vpack.c.bf16 %v6510_v50, %v6509_v51  ;;  %v781_v53 = vpop.permute.xlu1 %780  ;;  %v2204_v22 = vsel %vm2172_vm15, 65537, %v10910_v0  ;;  %v6548_v28 = vcombine.low %v1513_v18, %v7458_v2  ;;  %vm1485_vm9 = vmpackc.low %vm7543_vm6, %vm7543_vm6  ;;  %v7601_v18 = vadd.s32 80, %v7441_v58 }
 0x11a   :  { %v778_v54 = vpop.permute.xlu0 %777  ;;  %vm813_vm0 = vcmp.eq.s32.totalorder %v7358_v36, %v781_v53  ;;  %v6579_v29 = vcombine.low %v7458_v2, %v2204_v22  ;;  %11172 = vst [vmem:[#allocation23_spill] sm:$0xff] %v7569_v47  ;;  %v1517_v53 = vsel %vm1485_vm9, 65537, %v10910_v0  ;;  %v123_v22 = vadd.s32 120, %v7441_v58 }
 0x11b   :  { %vm812_vm1 = vcmp.eq.s32.totalorder %v7358_v36, %v778_v54  ;;  %6800 = vmatprep.mubr.msk.bf16.mxu0 %vm11080_vm4, %v892_v52  ;;  %v6512_v55 = vsel %vm813_vm0, 1.0, %v7121_v41  ;;  %v165_v36 = vand.u32 15, %v111_v61  ;;  %v1600_v42 = vshrl.u32 %v6548_v28, 16  ;;  %11177 = vst [vmem:[#allocation28_spill] sm:$0xff] %v7601_v18 }
 0x11c   :  { %v6511_v56 = vsel %vm812_vm1, 1.0, %v7121_v41  ;;  %v10903_v41 = vand.u32 15, %v7441_v58  ;;  %vm7516_vm1 = vcmp.ge.s32.totalorder %v10901_v10, 1  ;;  %v7571_v48 = vrot.slane %v6579_v29, 6 }
 0x11d   :  { %v893_v57 = vpack.c.bf16 %v6512_v55, %v6511_v56  ;;  %vm7450_vm7 = vcmp.lt.s32.totalorder %v165_v36, 15  ;;  %vm7484_vm12 = vcmp.lt.s32.totalorder %v165_v36, 14  ;;  %vm1483_vm3 = vmpackc.low %vm7516_vm1, %vm7516_vm1  ;;  %v6565_v52 = vcombine.low %v7458_v2, %v1854_v43 }
 0x11e   :  { %vm7463_vm8 = vcmp.ge.s32.totalorder %v10903_v41, 1  ;;  %vm1820_vm11 = vmpackc.low %vm7450_vm7, %vm7450_vm7  ;;  %vm7550_vm7 = vcmp.lt.s32.totalorder %v10907_v24, 15  ;;  %v1515_v38 = vsel %vm1483_vm3, 65537, %v10910_v0  ;;  %11173 = vst [vmem:[#allocation24_spill] sm:$0xff] %v7571_v48  ;;  %v7581_v55 = vrot.slane %v1600_v42, 7 }
 0x11f   :  { %vm1479_vm13 = vmpackc.low %vm7463_vm8, %vm7463_vm8  ;;  %v1852_v16 = vsel %vm1820_vm11, 65537, %v10910_v0  ;;  %vm7557_vm8 = vcmp.ge.s32.totalorder %v10899_v26, 1  ;;  %v6549_v50 = vcombine.low %v1515_v38, %v7458_v2  ;;  %v1603_v56 = vshll.u32 %v6548_v28, 16 }
 0x120   :  { %6801 = vmatmul.mubr.msk.bf16.gmra.mrb[28].mxu0 %vm11080_vm4, %v893_v57  ;;  %vm2174_vm0 = vmpackc.low %vm7484_vm12, %vm7484_vm12  ;;  %v1511_v15 = vsel %vm1479_vm13, 65537, %v10910_v0  ;;  %v6564_v30 = vcombine.low %v7458_v2, %v1852_v16  ;;  %vm2283_vm12 = vcmask 1041408   ;;  %v221_v36 = vand.u32 15, %v119_v46 }
 0x121   :  { %v2206_v25 = vsel %vm2174_vm0, 65537, %v10910_v0  ;;  %v6547_v27 = vcombine.low %v1511_v15, %v7458_v2  ;;  %vm1824_vm10 = vmpackc.low %vm7550_vm7, %vm7550_vm7  ;;  %vm1591_vm13 = vsmask.f32 256  ;;  %v1608_v3 = vshrl.u32 %v6549_v50, 16 }
 0x122   :  { %v6580_v34 = vcombine.low %v7458_v2, %v2206_v25  ;;  %v1939_v44 = vshrl.u32 %v6564_v30, 16  ;;  %v1942_v45 = vshll.u32 %v6564_v30, 16  ;;  %vm1487_vm11 = vmpackc.low %vm7557_vm8, %vm7557_vm8  ;;  %v1856_v57 = vsel %vm1824_vm10, 65537, %v10910_v0 }
 0x123   :  { %v1593_v40 = vshrl.u32 %v6547_v27, 16  ;;  %v1596_v51 = vshll.u32 %v6547_v27, 16  ;;  %v1519_v61 = vsel %vm1487_vm11, 65537, %v10910_v0  ;;  %v6550_v4 = vcombine.low %v1517_v53, %v7458_v2 }
 0x124   :  { %v7573_v49 = vrot.slane %v6580_v34, 6  ;;  %v1941_v59 = vrot.slane %v1939_v44, 6  ;;  %v1944_v60 = vrot.slane %v1942_v45, 7  ;;  %v1948_v7 = vshrl.u32 %v6565_v52, 16 }
 0x125   :  { %v1595_v54 = vrot.slane %v1593_v40, 7  ;;  %v6566_v8 = vcombine.low %v7458_v2, %v1856_v57  ;;  %v1605_v16 = vor.u32 %v1603_v56, %v7581_v55  ;;  %v6551_v17 = vcombine.low %v1519_v61, %v7458_v2 }
 0x126   :  { %11174 = vst [vmem:[#allocation25_spill] sm:$0xff] %v7573_v49  ;;  %v7588_v35 = vsel %vm2283_vm12, %v7571_v48, %v7573_v49  ;;  %v7603_v19 = vor.u32 %v1944_v60, %v1941_v59  ;;  %v1951_v21 = vshll.u32 %v6565_v52, 16  ;;  %vm7606_vm15 = vcmp.lt.s32.totalorder %v221_v36, 15 }
 0x127   :  { %11175 = vst [vmem:[#allocation26_spill] sm:$0xff] %v7588_v35  ;;  %v7596_v15 = vor.u32 %v1596_v51, %v1595_v54  ;;  %v7610_v25 = vrot.slane %v1608_v3, 7  ;;  %v1611_v27 = vshll.u32 %v6549_v50, 16  ;;  %v1616_v28 = vshrl.u32 %v6550_v4, 16  ;;  %vm1828_vm1 = vmpackc.low %vm7606_vm15, %vm7606_vm15 }
 0x128   :  { %v10906_v29 = vand.u32 15, %v7592_v6  ;;  %v1950_v30 = vrot.slane %v1948_v7, 6  ;;  %v1619_v31 = vshll.u32 %v6550_v4, 16  ;;  %v1957_v32 = vshrl.u32 %v6566_v8, 16 }
 0x129   :  { %11176 = vst [vmem:[#allocation27_spill] sm:$0xff] %v7596_v15  ;;  %v235_v33 = vand.u32 15, %v121_v9  ;;  %v1960_v34 = vshll.u32 %v6566_v8, 16  ;;  %v1624_v37 = vshrl.u32 %v6551_v17, 16  ;;  %vm7613_vm0 = vcmp.lt.s32.totalorder %v221_v36, 14 }
 0x12a   :  { %v10897_v39 = vand.u32 15, %v7601_v18  ;;  %v1953_v40 = vrot.slane %v1951_v21, 7  ;;  %v249_v42 = vand.u32 15, %v123_v22  ;;  %v7626_v44 = vadd.s32 96, %v7441_v58  ;;  %vm2182_vm6 = vmpackc.low %vm7613_vm0, %vm7613_vm0 }
 0x12b   :  { %vm7621_vm2 = vcmp.lt.s32.totalorder %v235_v33, 14  ;;  %v1613_v45 = vor.u32 %v1611_v27, %v7610_v25  ;;  %v1618_v46 = vrot.slane %v1616_v28, 7  ;;  %vm7631_vm3 = vcmp.lt.s32.totalorder %v10906_v29, 15 }
 0x12c   :  { %11184 = vst [vmem:[#allocation29_spill] sm:$0xff] %v7626_v44  ;;  %v7636_v51 = vadd.s32 112, %v7441_v58  ;;  %v1959_v52 = vrot.slane %v1957_v32, 6  ;;  %vm7638_vm5 = vcmp.lt.s32.totalorder %v249_v42, 14  ;;  %v1860_v56 = vsel %vm1828_vm1, 65537, %v10910_v0  ;;  %vm2184_vm7 = vmpackc.low %vm7621_vm2, %vm7621_vm2 }
 0x12d   :  { %v7647_v57 = vadd.s32 128, %v7441_v58  ;;  %v1962_v59 = vrot.slane %v1960_v34, 7  ;;  %v7649_v60 = vrot.slane %v1624_v37, 7  ;;  %v1627_v61 = vshll.u32 %v6551_v17, 16  ;;  %vm1826_vm9 = vmpackc.low %vm7631_vm3, %vm7631_vm3 }
 0x12e   :  { %11187 = vst [vmem:[#allocation30_spill] sm:$0xff] %v7636_v51  ;;  %vm7656_vm8 = vcmp.ge.s32.totalorder %v10897_v39, 1  ;;  %v7661_v3 = vsel %vm1591_vm13, %v1595_v54, %v1605_v16  ;;  %v7666_v4 = vsel %vm1929_vm14, %v7569_v47, %v7603_v19  ;;  %v1954_v7 = vor.u32 %v1953_v40, %v1950_v30  ;;  %vm2186_vm11 = vmpackc.low %vm7638_vm5, %vm7638_vm5 }
 0x12f   :  { %11190 = vst [vmem:[#allocation31_spill] sm:$0xff] %v7647_v57  ;;  %11193 = vst [vmem:[#allocation32_spill] sm:$0xff] %v7661_v3  ;;  %v10898_v8 = vand.u32 15, %v7626_v44  ;;  %vm7672_vm10 = vcmp.lt.s32.totalorder %v235_v33, 15  ;;  %v2214_v54 = vsel %vm2182_vm6, 65537, %v10910_v0  ;;  %v6568_v16 = vcombine.low %v7458_v2, %v1860_v56 }
 0x130   :  { %11194 = vst [vmem:[#allocation33_spill] sm:$0xff] %v7666_v4  ;;  %v10896_v17 = vand.u32 15, %v7636_v51  ;;  %v7684_v21 = vsel %vm1591_vm13, %v7581_v55, %v1613_v45  ;;  %vm7686_vm15 = vcmp.lt.s32.totalorder %v249_v42, 15  ;;  %v2216_v23 = vsel %vm2184_vm7, 65537, %v10910_v0  ;;  %vm1489_vm0 = vmpackc.low %vm7656_vm8, %vm7656_vm8 }
 0x131   :  { %11197 = vst [vmem:[#allocation34_spill] sm:$0xff] %v7684_v21  ;;  %v10895_v27 = vand.u32 15, %v7647_v57  ;;  %v1621_v28 = vor.u32 %v1619_v31, %v1618_v46  ;;  %v7695_v30 = vor.u32 %v1962_v59, %v1959_v52  ;;  %v1629_v32 = vor.u32 %v1627_v61, %v7649_v60  ;;  %vm1830_vm1 = vmpackc.low %vm7672_vm10, %vm7672_vm10 }
 0x132   :  { %v1858_v55 = vsel %vm1826_vm9, 65537, %v10910_v0  ;;  %v2218_v33 = vsel %vm2186_vm11, 65537, %v10910_v0  ;;  %v6584_v34 = vcombine.low %v7458_v2, %v2214_v54  ;;  %vm7706_vm2 = vcmp.ge.s32.totalorder %v10898_v8, 1  ;;  %vm1832_vm3 = vmpackc.low %vm7686_vm15, %vm7686_vm15 }
 0x133   :  { %v7711_v31 = vadd.s32 136, %v7441_v58  ;;  %v6585_v38 = vcombine.low %v7458_v2, %v2216_v23  ;;  %v1521_v40 = vsel %vm1489_vm0, 65537, %v10910_v0  ;;  %v1975_v42 = vshrl.u32 %v6568_v16, 16  ;;  %vm1491_vm7 = vmpackc.low %vm7706_vm2, %vm7706_vm2 }
 0x134   :  { %vm7720_vm5 = vcmp.ge.s32.totalorder %v10896_v17, 1  ;;  %v7726_v45 = vsel %vm1929_vm14, %v7603_v19, %v1954_v7  ;;  %v6567_v50 = vcombine.low %v7458_v2, %v1858_v55  ;;  %v1978_v52 = vshll.u32 %v6568_v16, 16 }
 0x135   :  { %11204 = vst [vmem:[#allocation35_spill] sm:$0xff] %v7726_v45  ;;  %vm7731_vm6 = vcmp.ge.s32.totalorder %v10895_v27, 1  ;;  %v7737_v56 = vsel %vm1591_vm13, %v7610_v25, %v1621_v28  ;;  %v7741_v59 = vsel %vm1929_vm14, %v1954_v7, %v7695_v30  ;;  %v1862_v19 = vsel %vm1830_vm1, 65537, %v10910_v0  ;;  %v6931_v25 = vld [vmem:[%s10884_s2] sm:$0xff]   ;;  %vm1493_vm8 = vmpackc.low %vm7720_vm5, %vm7720_vm5 }
 0x136   :  { %11207 = vst [vmem:[#allocation36_spill] sm:$0xff] %v7737_v56  ;;  %11208 = vst [vmem:[#allocation37_spill] sm:$0xff] %v7741_v59  ;;  %v6586_v61 = vcombine.low %v7458_v2, %v2218_v33  ;;  %v7757_v36 = vsel %vm1591_vm13, %v1618_v46, %v1629_v32  ;;  %v1864_v7 = vsel %vm1832_vm3, 65537, %v10910_v0  ;;  %v7766_v9 = vcombine.low %v1521_v40, %v7458_v2 }
 0x137   :  { %11209 = vst [vmem:[#allocation38_spill] sm:$0xff] %v7757_v36  ;;  %v10909_v54 = vand.u32 15, %v7711_v31  ;;  %v7772_v16 = vrot.slane %v6584_v34, 6  ;;  %v2295_v46 = vrot.slane %v6585_v38, 6  ;;  %v1977_v23 = vrot.slane %v1975_v42, 6  ;;  %vm1495_vm9 = vmpackc.low %vm7731_vm6, %vm7731_vm6  ;;  %3084 = vmatpush1.bf16.msra.mxu0 %v6931_v25  ;;  %6902 = vmatpush1.bf16.msra.mxu1 %v6931_v25 }
 0x138   :  { %v7778_v22 = vadd.s32 144, %v7441_v58  ;;  %v1966_v28 = vshrl.u32 %v6567_v50, 16  ;;  %v1969_v32 = vshll.u32 %v6567_v50, 16  ;;  %v1980_v55 = vrot.slane %v1978_v52, 7  ;;  %3085 = vmatprep.subr.bf16.mxu0 %v10910_v0  ;;  %6893 = vmatprep.subr.bf16.mxu1 %v10910_v0 }
 0x139   :  { %11210 = vst [vmem:[#allocation39_spill] sm:$0xff] %v7772_v16  ;;  %v1523_v33 = vsel %vm1491_vm7, 65537, %v10910_v0  ;;  %v7788_v34 = vrot.slane %v6586_v61, 6  ;;  %v6569_v38 = vcombine.low %v7458_v2, %v1862_v19  ;;  %v1525_v40 = vsel %vm1493_vm8, 65537, %v10910_v0 }
 0x13a   :  { %11211 = vst [vmem:[#allocation40_spill] sm:$0xff] %v7778_v22  ;;  %v7798_v42 = vadd.s32 152, %v7441_v58  ;;  %v1632_v37 = vshrl.u32 %v7766_v9, 16  ;;  %v1527_v50 = vsel %vm1495_vm9, 65537, %v10910_v0  ;;  %vm7804_vm10 = vcmp.lt.s32.totalorder %v10909_v54, 15 }
 0x13b   :  { %11212 = vst [vmem:[#allocation41_spill] sm:$0xff] %v7788_v34  ;;  %v7809_v53 = vadd.s32 160, %v7441_v58  ;;  %v7813_v43 = vsel %vm2283_vm12, %v7772_v16, %v2295_v46  ;;  %v6553_v19 = vcombine.low %v1523_v33, %v7458_v2  ;;  %v6570_v61 = vcombine.low %v7458_v2, %v1864_v7  ;;  %vm1834_vm11 = vmpackc.low %vm7804_vm10, %vm7804_vm10 }
 0x13c   :  { %11216 = vst [vmem:[#allocation43_spill] sm:$0xff] %v7813_v43  ;;  %v10905_v25 = vand.u32 15, %v7778_v22  ;;  %v1968_v27 = vrot.slane %v1966_v28, 6  ;;  %v1971_v17 = vrot.slane %v1969_v32, 7  ;;  %v7818_v39 = vor.u32 %v1980_v55, %v1977_v23  ;;  %v6932_v23 = vld [vmem:[%s10884_s2 + $0x8] sm:$0xff]  }
 0x13d   :  { %11215 = vst [vmem:[#allocation42_spill] sm:$0xff] %v7809_v53  ;;  %v7821_v8 = vcombine.low %v1525_v40, %v7458_v2  ;;  %v7825_v26 = vsel %vm2283_vm12, %v2295_v46, %v7788_v34  ;;  %v1984_v20 = vshrl.u32 %v6569_v38, 16  ;;  %v7828_v10 = vcombine.low %v1527_v50, %v7458_v2  ;;  %3086 = vmatpush1.bf16.msra.mxu0 %v6932_v23 }
 0x13e   :  { %11217 = vst [vmem:[#allocation44_spill] sm:$0xff] %v7825_v26  ;;  %v10908_v7 = vand.u32 15, %v7798_v42  ;;  %v7837_v28 = vrot.slane %v1632_v37, 7  ;;  %v1635_v32 = vshll.u32 %v7766_v9, 16  ;;  %v1987_v46 = vshll.u32 %v6569_v38, 16  ;;  %6903 = vmatpush1.bf16.msra.mxu1 %v6932_v23  ;;  %3087 = vmatprep.subr.bf16.mxu0 %v10910_v0 }
 0x13f   :  { %v10912_v55 = vand.u32 15, %v7809_v53  ;;  %v1640_v33 = vshrl.u32 %v6553_v19, 16  ;;  %v1993_v40 = vshrl.u32 %v6570_v61, 16  ;;  %v1996_v50 = vshll.u32 %v6570_v61, 16  ;;  %6894 = vmatprep.subr.bf16.mxu1 %v10910_v0 }
 0x140   :  { %vm7843_vm15 = vcmp.ge.s32.totalorder %v10905_v25, 1  ;;  %v1972_v41 = vor.u32 %v1971_v17, %v1968_v27  ;;  %v1648_v37 = vshrl.u32 %v7821_v8, 16  ;;  %v1866_v9 = vsel %vm1834_vm11, 65537, %v10910_v0 }
 0x141   :  { %v1986_v38 = vrot.slane %v1984_v20, 6  ;;  %v1656_v61 = vshrl.u32 %v7828_v10, 16  ;;  %vm7862_vm0 = vcmp.lt.s32.totalorder %v10908_v7, 15  ;;  %v7867_v27 = vadd.s32 168, %v7441_v58  ;;  %vm1497_vm1 = vmpackc.low %vm7843_vm15, %vm7843_vm15  ;;  %v6934_v20 = vld [vmem:[%s10884_s2 + $0x18] sm:$0xff]  }
 0x142   :  { %v1643_v23 = vshll.u32 %v6553_v19, 16  ;;  %v1989_v52 = vrot.slane %v1987_v46, 7  ;;  %vm7874_vm2 = vcmp.ge.s32.totalorder %v10912_v55, 1  ;;  %v7879_v25 = vadd.s32 176, %v7441_v58  ;;  %vm1836_vm3 = vmpackc.low %vm7862_vm0, %vm7862_vm0 }
 0x143   :  { %v1642_v29 = vrot.slane %v1640_v33, 7  ;;  %v1995_v24 = vrot.slane %v1993_v40, 6  ;;  %v1998_v7 = vrot.slane %v1996_v50, 7  ;;  %v6571_v54 = vcombine.low %v7458_v2, %v1866_v9  ;;  %vm1499_vm5 = vmpackc.low %vm7874_vm2, %vm7874_vm2 }
 0x144   :  { %11224 = vst [vmem:[#allocation45_spill] sm:$0xff] %v7879_v25  ;;  %v1637_v19 = vor.u32 %v1635_v32, %v7837_v28  ;;  %v1650_v46 = vrot.slane %v1648_v37, 7  ;;  %v1651_v63 = vshll.u32 %v7821_v8, 16  ;;  %v7888_v55 = vrot.slane %v1656_v61, 7  ;;  %v6933_v8 = vld [vmem:[%s10884_s2 + $0x10] sm:$0xff]  }
 0x145   :  { %v1659_v53 = vshll.u32 %v7828_v10, 16  ;;  %v11225_v33 = vmov 0   ;;  %v7901_v50 = vsel %vm1929_vm14, %v7695_v30, %v1972_v41  ;;  %v1990_v37 = vor.u32 %v1989_v52, %v1986_v38  ;;  %3088 = vmatpush1.bf16.msra.mxu0 %v6933_v8  ;;  %6904 = vmatpush1.bf16.msra.mxu1 %v6933_v8 }
 0x146   :  { %v1529_v40 = vsel %vm1497_vm1, 65537, %v11225_v33  ;;  %11226 = vst [vmem:[#allocation46_spill] sm:$0xff] %v7901_v50  ;;  %v10916_v9 = vand.u32 15, %v7879_v25  ;;  %v7905_v10 = vadd.s32 184, %v7441_v58  ;;  %v1645_v61 = vor.u32 %v1643_v23, %v1642_v29  ;;  %3089 = vmatprep.subr.bf16.mxu0 %v11225_v33  ;;  %6895 = vmatprep.subr.bf16.mxu1 %v11225_v33 }
 0x147   :  { %v7907_v17 = vor.u32 %v1998_v7, %v1995_v24  ;;  %v2002_v0 = vshrl.u32 %v6571_v54, 16  ;;  %v1868_v32 = vsel %vm1836_vm3, 65537, %v11225_v33  ;;  %v11227_v22 = vand.u32 15, %v7849_v12 }
 0x148   :  { %v2005_v30 = vshll.u32 %v6571_v54, 16  ;;  %v7917_v38 = vcombine.low %v1529_v40, %v7458_v2  ;;  %v1531_v24 = vsel %vm1499_vm5, 65537, %v11225_v33  ;;  %v1653_v7 = vor.u32 %v1651_v63, %v1650_v46 }
 0x149   :  { %vm7912_vm6 = vcmp.lt.s32.totalorder %v11227_v22, 15  ;;  %v7929_v22 = vsel %vm1929_vm14, %v1972_v41, %v7818_v39  ;;  %v1661_v54 = vor.u32 %v1659_v53, %v7888_v55  ;;  %v11231_v23 = vand.u32 15, %v7867_v27  ;;  %3090 = vmatpush1.bf16.msra.mxu0 %v6934_v20  ;;  %6905 = vmatpush1.bf16.msra.mxu1 %v6934_v20 }
 0x14a   :  { %11230 = vst [vmem:[#allocation47_spill] sm:$0xff] %v7929_v22  ;;  %v7943_v40 = vsel %vm1591_vm13, %v7649_v60, %v1637_v19  ;;  %v6572_v41 = vcombine.low %v7458_v2, %v1868_v32  ;;  %vm7948_vm8 = vcmp.ge.s32.totalorder %v10916_v9, 1  ;;  %v10917_v63 = vand.u32 15, %v7905_v10  ;;  %vm1848_vm9 = vmpackc.low %vm7912_vm6, %vm7912_vm6  ;;  %3091 = vmatprep.subr.bf16.mxu0 %v11225_v33  ;;  %6896 = vmatprep.subr.bf16.mxu1 %v11225_v33 }
 0x14b   :  { %vm7934_vm7 = vcmp.lt.s32.totalorder %v11231_v23, 15  ;;  %11234 = vst [vmem:[#allocation48_spill] sm:$0xff] %v7943_v40  ;;  %v7955_v8 = vsel %vm1591_vm13, %v7837_v28, %v1645_v61  ;;  %v7959_v23 = vsel %vm1929_vm14, %v7818_v39, %v1990_v37  ;;  %v7965_v60 = vcombine.low %v1531_v24, %v7458_v2  ;;  %vm1501_vm11 = vmpackc.low %vm7948_vm8, %vm7948_vm8 }
 0x14c   :  { %11237 = vst [vmem:[#allocation49_spill] sm:$0xff] %v7955_v8  ;;  %11238 = vst [vmem:[#allocation50_spill] sm:$0xff] %v7959_v23  ;;  %v7968_v19 = vadd.s32 192, %v7441_v58  ;;  %v7972_v28 = vsel %vm1929_vm14, %v1990_v37, %v7907_v17  ;;  %v2004_v32 = vrot.slane %v2002_v0, 6  ;;  %v2007_v61 = vrot.slane %v2005_v30, 7 }
 0x14d   :  { %11240 = vst [vmem:[#allocation52_spill] sm:$0xff] %v7972_v28  ;;  %v1664_v39 = vshrl.u32 %v7917_v38, 16  ;;  %vm1838_vm10 = vmpackc.low %vm7934_vm7, %vm7934_vm7  ;;  %v7981_v24 = vsel %vm1591_vm13, %v1642_v29, %v1653_v7  ;;  %v7984_v20 = vsel %vm1591_vm13, %v1650_v46, %v1661_v54  ;;  %v1667_v37 = vshll.u32 %v7917_v38, 16 }
 0x14e   :  { %11239 = vst [vmem:[#allocation51_spill] sm:$0xff] %v7968_v19  ;;  %11241 = vst [vmem:[#allocation53_spill] sm:$0xff] %v7981_v24  ;;  %v7991_v0 = vadd.s32 200, %v7441_v58  ;;  %v1880_v29 = vsel %vm1848_vm9, 65537, %v11225_v33  ;;  %v2011_v30 = vshrl.u32 %v6572_v41, 16  ;;  %v2014_v7 = vshll.u32 %v6572_v41, 16 }
 0x14f   :  { %11242 = vst [vmem:[#allocation54_spill] sm:$0xff] %v7984_v20  ;;  %vm8001_vm15 = vcmp.lt.s32.totalorder %v10917_v63, 15  ;;  %v1672_v38 = vshrl.u32 %v7965_v60, 16  ;;  %v1870_v54 = vsel %vm1838_vm10, 65537, %v11225_v33  ;;  %v8009_v53 = vadd.s32 208, %v7441_v58 }
 0x150   :  { %v8011_v57 = vor.u32 %v2007_v61, %v2004_v32  ;;  %v8013_v9 = vrot.slane %v1664_v39, 7  ;;  %v1533_v41 = vsel %vm1501_vm11, 65537, %v11225_v33  ;;  %v8017_v63 = vadd.s32 216, %v7441_v58  ;;  %vm1840_vm1 = vmpackc.low %vm8001_vm15, %vm8001_vm15  ;;  %v6935_v39 = vld [vmem:[%s10884_s2 + $0x20] sm:$0xff]  }
 0x151   :  { %11245 = vst [vmem:[#allocation55_spill] sm:$0xff] %v8009_v53  ;;  %v11246_v25 = vand.u32 15, %v7849_v12  ;;  %v6578_v52 = vcombine.low %v7458_v2, %v1880_v29  ;;  %v8031_v61 = vadd.s32 224, %v7441_v58  ;;  %v2013_v12 = vrot.slane %v2011_v30, 6  ;;  %3092 = vmatpush1.bf16.msra.mxu0 %v6935_v39  ;;  %6906 = vmatpush1.bf16.msra.mxu1 %v6935_v39  ;;  %v6936_v39 = vld [vmem:[%s10884_s2 + $0x28] sm:$0xff]  }
 0x152   :  { %v6573_v18 = vcombine.low %v7458_v2, %v1870_v54  ;;  %v8038_v44 = vadd.s32 232, %v7441_v58  ;;  %v8040_v29 = vrot.slane %v1672_v38, 7  ;;  %v8043_v46 = vcombine.low %v1533_v41, %v7458_v2  ;;  %3093 = vmatprep.subr.bf16.mxu0 %v11225_v33  ;;  %6897 = vmatprep.subr.bf16.mxu1 %v11225_v33 }
 0x153   :  { %vm8021_vm0 = vcmp.lt.s32.totalorder %v11246_v25, 14  ;;  %11249 = vst [vmem:[#allocation56_spill] sm:$0xff] %v8031_v61  ;;  %v2016_v25 = vrot.slane %v2014_v7, 7  ;;  %v11251_v32 = vand.u32 15, %v7968_v19  ;;  %v1675_v30 = vshll.u32 %v7965_v60, 16 }
 0x154   :  { %11250 = vst [vmem:[#allocation57_spill] sm:$0xff] %v8038_v44  ;;  %v1872_v7 = vsel %vm1840_vm1, 65537, %v11225_v33  ;;  %v8056_v54 = vadd.s32 240, %v7441_v58  ;;  %v2065_v41 = vshrl.u32 %v6578_v52, 16  ;;  %v11255_v19 = vand.u32 15, %v7991_v0  ;;  %vm2202_vm9 = vmpackc.low %vm8021_vm0, %vm8021_vm0 }
 0x155   :  { %vm8047_vm2 = vcmp.ge.s32.totalorder %v11251_v32, 1  ;;  %v2068_v32 = vshll.u32 %v6578_v52, 16  ;;  %v8073_v38 = vsel %vm1929_vm14, %v7907_v17, %v8011_v57  ;;  %v2020_v1 = vshrl.u32 %v6573_v18, 16  ;;  %3094 = vmatpush1.bf16.msra.mxu0 %v6936_v39  ;;  %6907 = vmatpush1.bf16.msra.mxu1 %v6936_v39 }
 0x156   :  { %11254 = vst [vmem:[#allocation58_spill] sm:$0xff] %v8056_v54  ;;  %vm8062_vm3 = vcmp.lt.s32.totalorder %v11255_v19, 15  ;;  %11258 = vst [vmem:[#allocation59_spill] sm:$0xff] %v8073_v38  ;;  %v2023_v49 = vshll.u32 %v6573_v18, 16  ;;  %v10930_v19 = vand.u32 15, %v8038_v44  ;;  %v1669_v52 = vor.u32 %v1667_v37, %v8013_v9  ;;  %3095 = vmatprep.subr.bf16.mxu0 %v11225_v33  ;;  %6898 = vmatprep.subr.bf16.mxu1 %v11225_v33 }
 0x157   :  { %vm1503_vm5 = vmpackc.low %vm8047_vm2, %vm8047_vm2  ;;  %v1680_v60 = vshrl.u32 %v8043_v46, 16  ;;  %v6574_v62 = vcombine.low %v7458_v2, %v1872_v7  ;;  %v11259_v58 = vand.u32 15, %v8009_v53  ;;  %v8088_v18 = vor.u32 %v2016_v25, %v2013_v12 }
 0x158   :  { %v1677_v17 = vor.u32 %v1675_v30, %v8040_v29  ;;  %vm1842_vm7 = vmpackc.low %vm8062_vm3, %vm8062_vm3  ;;  %v11262_v37 = vand.u32 15, %v8017_v63  ;;  %v2067_v12 = vrot.slane %v2065_v41, 6  ;;  %v2070_v25 = vrot.slane %v2068_v32, 7 }
 0x159   :  { %vm8084_vm6 = vcmp.ge.s32.totalorder %v11259_v58, 1  ;;  %v1535_v30 = vsel %vm1503_vm5, 65537, %v11225_v33  ;;  %v11265_v39 = vand.u32 15, %v8031_v61  ;;  %v2022_v58 = vrot.slane %v2020_v1, 6 }
 0x15a   :  { %vm8096_vm8 = vcmp.lt.s32.totalorder %v11262_v37, 15  ;;  %v2025_v41 = vrot.slane %v2023_v49, 7  ;;  %v1683_v32 = vshll.u32 %v8043_v46, 16  ;;  %vm1505_vm11 = vmpackc.low %vm8084_vm6, %vm8084_vm6  ;;  %vm8124_vm15 = vcmp.lt.s32.totalorder %v10930_v19, 15 }
 0x15b   :  { %vm8114_vm10 = vcmp.ge.s32.totalorder %v11265_v39, 1  ;;  %v8128_v51 = vrot.slane %v1680_v60, 7  ;;  %v2029_v39 = vshrl.u32 %v6574_v62, 16  ;;  %v1874_v1 = vsel %vm1842_vm7, 65537, %v11225_v33  ;;  %vm1844_vm0 = vmpackc.low %vm8096_vm8, %vm8096_vm8 }
 0x15c   :  { %v11270_v49 = vand.u32 15, %v7711_v31  ;;  %v8146_v60 = vsel %vm2202_vm9, 65537, %v11225_v33  ;;  %v2032_v19 = vshll.u32 %v6574_v62, 16  ;;  %v8149_v61 = vcombine.low %v1535_v30, %v7458_v2  ;;  %vm1507_vm2 = vmpackc.low %vm8114_vm10, %vm8114_vm10 }
 0x15d   :  { %11273 = vst [vmem:[#allocation60_spill] sm:$0xff] %v8146_v60  ;;  %v11274_v11 = vand.u32 15, %v8056_v54  ;;  %v8160_v31 = vor.u32 %v2070_v25, %v2067_v12  ;;  %v8169_v62 = vsel %vm1929_vm14, %v8011_v57, %v8088_v18  ;;  %v8173_v30 = vsel %vm1591_vm13, %v8013_v9, %v1677_v17  ;;  %vm1846_vm5 = vmpackc.low %vm8124_vm15, %vm8124_vm15  ;;  %v6937_v12 = vld [vmem:[%s10884_s2 + $0x30] sm:$0xff]  }
 0x15e   :  { %vm8141_vm1 = vcmp.lt.s32.totalorder %v11270_v49, 14  ;;  %v8164_v49 = vsel %vm1591_vm13, %v7888_v55, %v1669_v52  ;;  %11279 = vst [vmem:[#allocation63_spill] sm:$0xff] %v8169_v62  ;;  %11280 = vst [vmem:[#allocation64_spill] sm:$0xff] %v8173_v30  ;;  %v8181_v25 = vor.u32 %v2025_v41, %v2022_v58  ;;  %v8184_v55 = vcombine.low %v7458_v2, %v1874_v1 }
 0x15f   :  { %vm8156_vm3 = vcmp.ge.s32.totalorder %v11274_v11, 1  ;;  %11277 = vst [vmem:[#allocation61_spill] sm:$0xff] %v8160_v31  ;;  %11278 = vst [vmem:[#allocation62_spill] sm:$0xff] %v8164_v49  ;;  %v1537_v9 = vsel %vm1505_vm11, 65537, %v11225_v33  ;;  %v11281_v57 = vand.u32 15, %v7798_v42  ;;  %v8202_v17 = vor.u32 %v1683_v32, %v8128_v51  ;;  %3096 = vmatpush1.bf16.msra.mxu0 %v6937_v12  ;;  %v6938_v42 = vld [vmem:[%s10884_s2 + $0x38] sm:$0xff]   ;;  %6908 = vmatpush1.bf16.msra.mxu1 %v6937_v12 }
 0x160   :  { %vm2188_vm7 = vmpackc.low %vm8141_vm1, %vm8141_vm1  ;;  %v8204_v58 = vrot.slane %v2029_v39, 6  ;;  %v1876_v5 = vsel %vm1844_vm0, 65537, %v11225_v33  ;;  %v8219_v32 = vrot.slane %v2032_v19, 7  ;;  %v1688_v39 = vshrl.u32 %v8149_v61, 16  ;;  %3097 = vmatprep.subr.bf16.mxu0 %v11225_v33  ;;  %6899 = vmatprep.subr.bf16.mxu1 %v11225_v33 }
 0x161   :  { %vm8197_vm9 = vcmp.lt.s32.totalorder %v11281_v57, 14  ;;  %vm1509_vm6 = vmpackc.low %vm8156_vm3, %vm8156_vm3  ;;  %v2220_v41 = vsel %vm2188_vm7, 65537, %v11225_v33  ;;  %v1539_v19 = vsel %vm1507_vm2, 65537, %v11225_v33  ;;  %v1878_v46 = vsel %vm1846_vm5, 65537, %v11225_v33 }
 0x162   :  { %v6587_v1 = vcombine.low %v7458_v2, %v2220_v41  ;;  %vm2190_vm8 = vmpackc.low %vm8197_vm9, %vm8197_vm9  ;;  %v11284_v12 = vand.u32 15, %v7867_v27  ;;  %v1541_v37 = vsel %vm1509_vm6, 65537, %v11225_v33  ;;  %v11286_v14 = vand.u32 15, %v7905_v10 }
 0x163   :  { %v2222_v11 = vsel %vm2190_vm8, 65537, %v11225_v33  ;;  %v2038_v27 = vshrl.u32 %v8184_v55, 16  ;;  %v6576_v53 = vcombine.low %v7458_v2, %v1876_v5  ;;  %3098 = vmatpush1.bf16.msra.mxu0 %v6938_v42  ;;  %6909 = vmatpush1.bf16.msra.mxu1 %v6938_v42  ;;  %v8272_v10 = vcombine.low %v1539_v19, %v7458_v2 }
 0x164   :  { %vm641_vm11 = vcmp.lt.s32.totalorder %v11284_v12, 14  ;;  %v8250_v57 = vrot.slane %v6587_v1, 6  ;;  %v6588_v52 = vcombine.low %v7458_v2, %v2222_v11  ;;  %vm8255_vm15 = vcmp.lt.s32.totalorder %v11286_v14, 14  ;;  %v6939_v1 = vld [vmem:[%s10884_s2 + $0x40] sm:$0xff]   ;;  %3099 = vmatprep.subr.bf16.mxu0 %v11225_v33  ;;  %6900 = vmatprep.subr.bf16.mxu1 %v11225_v33 }
 0x165   :  { %vm2192_vm10 = vmpackc.low %vm641_vm11, %vm641_vm11  ;;  %v8261_v12 = vcombine.low %v1537_v9, %v7458_v2  ;;  %v6577_v9 = vcombine.low %v7458_v2, %v1878_v46  ;;  %v8278_v7 = vrot.slane %v1688_v39, 7  ;;  %v2041_v42 = vshll.u32 %v8184_v55, 16 }
 0x166   :  { %11285 = vst [vmem:[#allocation65_spill] sm:$0xff] %v8250_v57  ;;  %v2224_v11 = vsel %vm2192_vm10, 65537, %v11225_v33  ;;  %vm2194_vm0 = vmpackc.low %vm8255_vm15, %vm8255_vm15  ;;  %v2301_v5 = vrot.slane %v6588_v52, 6  ;;  %v8282_v41 = vcombine.low %v1541_v37, %v7458_v2  ;;  %v11289_v19 = vand.u32 15, %v7500_v13 }
 0x167   :  { %v6589_v14 = vcombine.low %v7458_v2, %v2224_v11  ;;  %v2226_v54 = vsel %vm2194_vm0, 65537, %v11225_v33  ;;  %v2040_v34 = vrot.slane %v2038_v27, 6  ;;  %v1696_v55 = vshrl.u32 %v8261_v12, 16  ;;  %3100 = vmatpush1.bf16.msra.mxu0 %v6939_v1  ;;  %6910 = vmatpush1.bf16.msra.mxu1 %v6939_v1 }
 0x168   :  { %vm8287_vm1 = vcmp.lt.s32.totalorder %v11289_v19, 14  ;;  %v8293_v52 = vsel %vm2283_vm12, %v8250_v57, %v2301_v5  ;;  %v6590_v39 = vcombine.low %v7458_v2, %v2226_v54  ;;  %v2047_v37 = vshrl.u32 %v6576_v53, 16  ;;  %3101 = vmatprep.subr.bf16.mxu0 %v11225_v33  ;;  %6901 = vmatprep.subr.bf16.mxu1 %v11225_v33 }
 0x169   :  { %11292 = vst [vmem:[#allocation66_spill] sm:$0xff] %v8293_v52  ;;  %v2303_v11 = vrot.slane %v6589_v14, 6  ;;  %v2050_v60 = vshll.u32 %v6576_v53, 16  ;;  %v1704_v13 = vshrl.u32 %v8272_v10, 16  ;;  %v2056_v19 = vshrl.u32 %v6577_v9, 16  ;;  %vm2178_vm2 = vmpackc.low %vm8287_vm1, %vm8287_vm1 }
 0x16a   :  { %v2305_v14 = vrot.slane %v6590_v39, 6  ;;  %v2059_v52 = vshll.u32 %v6577_v9, 16  ;;  %v11294_v54 = vand.u32 15, %v7592_v6  ;;  %v11297_v53 = vand.u32 15, %v7991_v0 }
 0x16b   :  { %v8301_v57 = vsel %vm2283_vm12, %v2301_v5, %v2303_v11  ;;  %v11298_v1 = vand.u32 15, %v8017_v63  ;;  %v2043_v9 = vrot.slane %v2041_v42, 7  ;;  %v1699_v39 = vshll.u32 %v8261_v12, 16  ;;  %v6940_v42 = vld [vmem:[%s10884_s2 + $0x48] sm:$0xff]   ;;  %s7123_s2 = smov 32  }
 0x16c   :  { %11293 = vst [vmem:[#allocation67_spill] sm:$0xff] %v8301_v57  ;;  %vm8308_vm3 = vcmp.lt.s32.totalorder %v11294_v54, 14  ;;  %vm645_vm5 = vcmp.lt.s32.totalorder %v11297_v53, 14  ;;  %v1712_v57 = vshrl.u32 %v8282_v41, 16  ;;  %v8323_v6 = vsel %vm2283_vm12, %v2303_v11, %v2305_v14  ;;  %3102 = vmatpush1.bf16.msra.mxu0 %v6940_v42  ;;  %6911 = vmatpush1.bf16.msra.mxu1 %v6940_v42 }
 0x16d   :  { %vm8316_vm7 = vcmp.lt.s32.totalorder %v11298_v1, 14  ;;  %11301 = vst [vmem:[#allocation68_spill] sm:$0xff] %v8323_v6  ;;  %vm2196_vm9 = vmpackc.low %vm645_vm5, %vm645_vm5  ;;  %vm11074_vm6 = vcmask 1040384   ;;  %v1698_v54 = vrot.slane %v1696_v55, 7  ;;  %v2049_v44 = vrot.slane %v2047_v37, 6 }
 0x16e   :  { %v2052_v0 = vrot.slane %v2050_v60, 7  ;;  %v2228_v53 = vsel %vm2196_vm9, 65537, %v11225_v33  ;;  %vm2198_vm8 = vmpackc.low %vm8316_vm7, %vm8316_vm7  ;;  %vm10945_vm11 = vcmp.ne.s16.totalorder %v7569_v47, 0  ;;  %vm11073_vm10 = vcmp.ne.s16.totalorder %v7571_v48, 0 }
 0x16f   :  { %v1706_v63 = vrot.slane %v1704_v13, 7  ;;  %v1707_v12 = vshll.u32 %v8272_v10, 16  ;;  %vm2180_vm15 = vmpackc.low %vm8308_vm3, %vm8308_vm3  ;;  %v6591_v60 = vcombine.low %v7458_v2, %v2228_v53  ;;  %v2230_v11 = vsel %vm2198_vm8, 65537, %v11225_v33 }
 0x170   :  { %vm10973_vm0 = vcmp.ne.s16.totalorder %v7588_v35, 0  ;;  %vm10960_vm5 = vcmp.ne.s16.totalorder %v7596_v15, 0  ;;  %vm10959_vm7 = vcmp.ne.s16.totalorder %v7661_v3, 0  ;;  %v2035_v10 = vor.u32 %v8219_v32, %v8204_v58 }
 0x171   :  { %v2058_v55 = vrot.slane %v2056_v19, 6  ;;  %v2061_v37 = vrot.slane %v2059_v52, 7  ;;  %v6592_v13 = vcombine.low %v7458_v2, %v2230_v11  ;;  %vm11072_vm9 = vcmask 1046528  }
 0x172   :  { %v8346_v5 = vrot.slane %v1712_v57, 7  ;;  %v1715_v53 = vshll.u32 %v8282_v41, 16  ;;  %v2210_v6 = vsel %vm2178_vm2, 65537, %v11225_v33  ;;  %v2307_v58 = vrot.slane %v6591_v60, 6 }
 0x173   :  { %vm10956_vm8 = vcmp.ne.s16.totalorder %v7666_v4, 0  ;;  %v11303_v52 = vshll.u32 %v8149_v61, 16  ;;  %v2044_v19 = vor.u32 %v2043_v9, %v2040_v34  ;;  %v2212_v41 = vsel %vm2180_vm15, 65537, %v11225_v33 }
 0x174   :  { %11302 = vst [vmem:[#allocation69_spill] sm:$0xff] %v8346_v5  ;;  %v8365_v46 = vrot.slane %v6592_v13, 6  ;;  %vm11071_vm1 = vcmask 1045504   ;;  %v1701_v42 = vor.u32 %v1699_v39, %v1698_v54  ;;  %v2053_v60 = vor.u32 %v2052_v0, %v2049_v44 }
 0x175   :  { %v1693_v57 = vor.u32 %v11303_v52, %v8278_v7  ;;  %v1709_v16 = vor.u32 %v1707_v12, %v1706_v63  ;;  %v8368_v30 = vsel %vm2283_vm12, %v2305_v14, %v2307_v58  ;;  %v2062_v34 = vor.u32 %v2061_v37, %v2058_v55 }
 0x176   :  { %11304 = vst [vmem:[#allocation70_spill] sm:$0xff] %v8368_v30  ;;  %v6582_v9 = vcombine.low %v7458_v2, %v2210_v6  ;;  %v8373_v27 = vsel %vm2283_vm12, %v2307_v58, %v8365_v46  ;;  %v8378_v13 = vsel %vm1929_vm14, %v8088_v18, %v8181_v25  ;;  %v1717_v44 = vor.u32 %v1715_v53, %v8346_v5 }
 0x177   :  { %11305 = vst [vmem:[#allocation71_spill] sm:$0xff] %v8373_v27  ;;  %11306 = vst [vmem:[#allocation72_spill] sm:$0xff] %v8378_v13  ;;  %v6583_v14 = vcombine.low %v7458_v2, %v2212_v41  ;;  %v8385_v0 = vsel %vm1591_vm13, %v8040_v29, %v8202_v17  ;;  %v8389_v6 = vsel %vm1929_vm14, %v8181_v25, %v2035_v10  ;;  %vm10970_vm2 = vcmp.ne.s16.totalorder %v7684_v21, 0 }
 0x178   :  { %11307 = vst [vmem:[#allocation73_spill] sm:$0xff] %v8385_v0  ;;  %11308 = vst [vmem:[#allocation74_spill] sm:$0xff] %v8389_v6  ;;  %v8393_v12 = vsel %vm1591_vm13, %v8128_v51, %v1693_v57  ;;  %v8397_v55 = vsel %vm1929_vm14, %v2035_v10, %v2044_v19  ;;  %v8401_v37 = vsel %vm1591_vm13, %v8278_v7, %v1701_v42  ;;  %vm11070_vm3 = vsmask.f32 7424 }
 0x179   :  { %11309 = vst [vmem:[#allocation75_spill] sm:$0xff] %v8393_v12  ;;  %11310 = vst [vmem:[#allocation76_spill] sm:$0xff] %v8397_v55  ;;  %v8404_v29 = vsel %vm1929_vm14, %v2044_v19, %v2053_v60  ;;  %vm10969_vm15 = vcmp.ne.s16.totalorder %v7726_v45, 0  ;;  %v8408_v25 = vsel %vm1591_vm13, %v1698_v54, %v1709_v16  ;;  %v8415_v51 = vsel %vm1929_vm14, %v2062_v34, %v8160_v31 }
 0x17a   :  { %11311 = vst [vmem:[#allocation77_spill] sm:$0xff] %v8401_v37  ;;  %11312 = vst [vmem:[#allocation78_spill] sm:$0xff] %v8404_v29  ;;  %v8417_v17 = vrot.slane %v6582_v9, 6  ;;  %v8426_v53 = vsel %vm1591_vm13, %v1706_v63, %v1717_v44  ;;  %v8428_v16 = vrot.slane %v6583_v14, 6  ;;  %vm11069_vm13 = vsmask.f32 6400 }
 0x17b   :  { %11313 = vst [vmem:[#allocation79_spill] sm:$0xff] %v8408_v25  ;;  %11315 = vst [vmem:[#allocation81_spill] sm:$0xff] %v8415_v51 }
 0x17c   :  { %11318 = vst [vmem:[#allocation84_spill] sm:$0xff] %v8426_v53 }
 0x1bb   :  { %v6774_v1 = vpop.f32.mrb[0].mxu0 }
 0x1bc   :  { %v993_v32 = vpop.f32.mrb[1].mxu0 }
 0x1bd   :  { %v6775_v11 = vpop.f32.mrb[2].mxu0 }
 0x1be   :  { %v1121_v61 = vpack.c.bf16 %v6775_v11, %v6774_v1  ;;  %v996_v52 = vpop.f32.mrb[3].mxu0 }
 0x1bf   :  { %v1120_v33 = vpack.c.bf16 %v996_v52, %v993_v32 }
 0x1c0   :  { %v1154_v39 = vrot.slane %v1121_v61, 7 }
 0x1c1   :  { %v1153_v18 = vrot.slane %v1120_v33, 7  ;;  %v8411_v33 = vsel %vm1929_vm14, %v2053_v60, %v2062_v34  ;;  %vm10971_vm14 = vcmp.ne.s16.totalorder %v7737_v56, 0 }
 0x1c2   :  { %11314 = vst [vmem:[#allocation80_spill] sm:$0xff] %v8411_v33 }
 0x1c3   :  { %v8420_v7 = vsel %vm11074_vm6, %v1153_v18, %v1154_v39  ;;  %v8423_v10 = vsel %vm11074_vm6, 0, %v1153_v18  ;;  %v6778_v1 = vpop.f32.mrb[4].mxu0 }
 0x1c4   :  { %11316 = vst [vmem:[#allocation82_spill] sm:$0xff] %v8420_v7  ;;  %11317 = vst [vmem:[#allocation83_spill] sm:$0xff] %v8423_v10  ;;  %v2090_v54 = vsel %vm10945_vm11, %v8423_v10, 0  ;;  %v1009_v58 = vpop.f32.mrb[5].mxu0  ;;  %v2517_v32 = vrot.slane %v8423_v10, 1  ;;  %v2518_v57 = vrot.slane %v8420_v7, 1 }
 0x1c5   :  { %v2332_v19 = vsel %vm11073_vm10, %v8423_v10, 0  ;;  %v6779_v41 = vpop.f32.mrb[6].mxu0  ;;  %v8442_v63 = vsel %vm10973_vm0, %v8420_v7, 0  ;;  %v1736_v42 = vsel %vm10960_vm5, %v8423_v10, 0  ;;  %v1737_v60 = vsel %vm10959_vm7, %v8420_v7, 0 }
 0x1c6   :  { %11319 = vst [vmem:[#allocation85_spill] sm:$0xff] %v8442_v63  ;;  %v2785_v11 = vrot.slane %v2332_v19, 2  ;;  %v1123_v61 = vpack.c.bf16 %v6779_v41, %v6778_v1  ;;  %v1012_v52 = vpop.f32.mrb[7].mxu0  ;;  %v2519_v34 = vsel %vm11072_vm9, %v2517_v32, %v2518_v57  ;;  %v10958_v9 = vrot.slane %v8442_v63, 2 }
 0x1c7   :  { %v2351_v44 = vshrl.u32 %v1736_v42, 16  ;;  %v1122_v14 = vpack.c.bf16 %v1012_v52, %v1009_v58  ;;  %2550 = vrot.lane.b32.xlu1 %v2519_v34, %s7116_s5  ;;  %v2353_v18 = vshll.u32 %v1736_v42, 16  ;;  %v2358_v19 = vshll.u32 %v1737_v60, 16 }
 0x1c8   :  { %v2091_v47 = vsel %vm10956_vm8, %v8420_v7, 0  ;;  %vm10972_vm11 = vcmp.ne.s16.totalorder %v7741_v59, 0  ;;  %v1158_v3 = vrot.slane %v1123_v61, 7  ;;  %v2787_v1 = vsel %vm11071_vm1, %v2785_v11, %v10958_v9 }
 0x1c9   :  { %v2584_v32 = vshrl.u32 %v2090_v54, 16  ;;  %v2587_v41 = vshll.u32 %v2090_v54, 16  ;;  %v1156_v15 = vrot.slane %v1122_v14, 7  ;;  %6606 = vmatprep.mubr.msk.bf16.mxu0 %vm11080_vm4, %v2787_v1  ;;  %v2355_v58 = vrot.slane %v2353_v18, 1 }
 0x1ca   :  { %v2360_v52 = vrot.slane %v2358_v19, 1  ;;  %v2592_v42 = vshrl.u32 %v2091_v47, 16  ;;  %v2595_v48 = vshll.u32 %v2091_v47, 16  ;;  %v2362_v4 = vshrl.u32 %v1737_v60, 16 }
 0x1cb   :  { %v2586_v34 = vrot.slane %v2584_v32, 1  ;;  %v2589_v35 = vrot.slane %v2587_v41, 2  ;;  %vm10974_vm8 = vcmp.ne.s16.totalorder %v7757_v36, 0  ;;  %v8463_v61 = vsel %vm11074_vm6, %v1154_v39, %v1156_v15  ;;  %v6782_v11 = vpop.f32.mrb[8].mxu0 }
 0x1cc   :  { %11320 = vst [vmem:[#allocation86_spill] sm:$0xff] %v8463_v61  ;;  %v8466_v63 = vsel %vm11074_vm6, %v1156_v15, %v1158_v3  ;;  %v2356_v54 = vor.u32 %v2355_v58, %v2351_v44  ;;  %v2594_v14 = vrot.slane %v2592_v42, 1  ;;  %v1025_v9 = vpop.f32.mrb[9].mxu0  ;;  %v2597_v18 = vrot.slane %v2595_v48, 2 }
 0x1cd   :  { %v2590_v1 = vor.u32 %v2589_v35, %v2586_v34  ;;  %v1738_v19 = vsel %vm10970_vm2, %v8463_v61, 0  ;;  %v2364_v47 = vor.u32 %v2362_v4, %v2360_v52  ;;  %vm10975_vm7 = vcmp.ne.s16.totalorder %v7901_v50, 0  ;;  %v6783_v60 = vpop.f32.mrb[10].mxu0 }
 0x1ce   :  { %vm10976_vm5 = vcmp.ne.s16.totalorder %v7943_v40, 0  ;;  %v2361_v39 = vsel %vm11070_vm3, %v2356_v54, %v2360_v52  ;;  %v2366_v15 = vshll.u32 %v1738_v19, 16  ;;  %v2520_v32 = vrot.slane %v8463_v61, 1  ;;  %v1028_v44 = vpop.f32.mrb[11].mxu0 }
 0x1cf   :  { %v2092_v35 = vsel %vm10969_vm15, %v8463_v61, 0  ;;  %2482 = vrot.lane.b32.xlu0 %v2361_v39, %s7123_s2  ;;  %v1125_v48 = vpack.c.bf16 %v6783_v60, %v6782_v11  ;;  %v2598_v4 = vor.u32 %v2597_v18, %v2594_v14  ;;  %v1124_v42 = vpack.c.bf16 %v1028_v44, %v1025_v9 }
 0x1d0   :  { %v2601_v41 = vshrl.u32 %v2092_v35, 16  ;;  %v2604_v58 = vshll.u32 %v2092_v35, 16  ;;  %v2368_v34 = vrot.slane %v2366_v15, 1  ;;  %v2521_v52 = vsel %vm11072_vm9, %v2518_v57, %v2520_v32 }
 0x1d1   :  { %v1739_v54 = vsel %vm10971_vm14, %v8466_v63, 0  ;;  %v1162_v21 = vrot.slane %v1125_v48, 7  ;;  %v2599_v45 = vsel %vm11069_vm13, %v2590_v1, %v2598_v4  ;;  %v1160_v61 = vrot.slane %v1124_v42, 7 }
 0x1d2   :  { %v2603_v7 = vrot.slane %v2601_v41, 1  ;;  %v2606_v10 = vrot.slane %v2604_v58, 2  ;;  %v2369_v11 = vsel %vm11070_vm3, %v2364_v47, %v2368_v34  ;;  %v2370_v39 = vshrl.u32 %v1738_v19, 16 }
 0x1d3   :  { %v2374_v14 = vshll.u32 %v1739_v54, 16  ;;  %vm10988_vm15 = vcmp.ne.s16.totalorder %v7813_v43, 0  ;;  %vm10983_vm2 = vcmp.ne.s16.totalorder %v7825_v26, 0  ;;  %2735 = vrot.lane.b32.xlu0 %v2599_v45, %s7124_s27  ;;  %2484 = vrot.lane.b32.xlu1 %v2369_v11, %s7123_s2  ;;  %v2522_v9 = vrot.slane %v8466_v63, 1  ;;  %v6786_v60 = vpop.f32.mrb[12].mxu0 }
 0x1d4   :  { %v2607_v57 = vor.u32 %v2606_v10, %v2603_v7  ;;  %v2093_v1 = vsel %vm10972_vm11, %v8466_v63, 0  ;;  %v2378_v18 = vshrl.u32 %v1739_v54, 16  ;;  %vm11032_vm14 = vcmp.ne.s16.totalorder %v7929_v22, 0  ;;  %v1041_v35 = vpop.f32.mrb[13].mxu0 }
 0x1d5   :  { %v8495_v19 = vsel %vm11074_vm6, %v1158_v3, %v1160_v61  ;;  %v8498_v47 = vsel %vm11074_vm6, %v1160_v61, %v1162_v21  ;;  %v2372_v45 = vor.u32 %v2370_v39, %v2368_v34  ;;  %v2376_v15 = vrot.slane %v2374_v14, 1  ;;  %v6787_v41 = vpop.f32.mrb[14].mxu0 }
 0x1d6   :  { %v2608_v7 = vsel %vm11069_vm13, %v2598_v4, %v2607_v57  ;;  %v2523_v10 = vsel %vm11072_vm9, %v2520_v32, %v2522_v9  ;;  %v2610_v48 = vshrl.u32 %v2093_v1, 16  ;;  %v2613_v44 = vshll.u32 %v2093_v1, 16  ;;  %v1044_v32 = vpop.f32.mrb[15].mxu0 }
 0x1d7   :  { %vm10992_vm11 = vcmp.ne.s16.totalorder %v7955_v8, 0  ;;  %v2377_v58 = vsel %vm11070_vm3, %v2372_v45, %v2376_v15  ;;  %v1740_v3 = vsel %vm10974_vm8, %v8495_v19, 0  ;;  %v2380_v61 = vor.u32 %v2378_v18, %v2376_v15  ;;  %2552 = vrot.lane.b32.xlu0 %v2521_v52, %s7116_s5  ;;  %2737 = vrot.lane.b32.xlu1 %v2608_v7, %s7124_s27 }
 0x1d8   :  { %v2524_v42 = vrot.slane %v8495_v19, 1  ;;  %v1127_v34 = vpack.c.bf16 %v6787_v41, %v6786_v60  ;;  %v2612_v4 = vrot.slane %v2610_v48, 1  ;;  %v2615_v54 = vrot.slane %v2613_v44, 2 }
 0x1d9   :  { %v2382_v11 = vshll.u32 %v1740_v3, 16  ;;  %vm10991_vm0 = vcmp.ne.s16.totalorder %v7959_v23, 0  ;;  %v1126_v39 = vpack.c.bf16 %v1044_v32, %v1041_v35  ;;  %v2094_v1 = vsel %vm10975_vm7, %v8495_v19, 0 }
 0x1da   :  { %v2525_v14 = vsel %vm11072_vm9, %v2522_v9, %v2524_v42  ;;  %v1741_v52 = vsel %vm10976_vm5, %v8498_v47, 0  ;;  %v1166_v18 = vrot.slane %v1127_v34, 7  ;;  %v2616_v60 = vor.u32 %v2615_v54, %v2612_v4 }
 0x1db   :  { %v2384_v45 = vrot.slane %v2382_v11, 1  ;;  %v2619_v15 = vshrl.u32 %v2094_v1, 16  ;;  %v1164_v7 = vrot.slane %v1126_v39, 7  ;;  %v2622_v48 = vshll.u32 %v2094_v1, 16  ;;  %2486 = vrot.lane.b32.xlu0 %v2377_v58, %s7123_s2  ;;  %2554 = vrot.lane.b32.xlu1 %v2523_v10, %s7116_s5 }
 0x1dc   :  { %v2386_v44 = vshrl.u32 %v1740_v3, 16  ;;  %v2390_v41 = vshll.u32 %v1741_v52, 16  ;;  %vm11011_vm8 = vcmp.ne.s16.totalorder %v7981_v24, 0  ;;  %v2617_v9 = vsel %vm11069_vm13, %v2607_v57, %v2616_v60  ;;  %v6790_v3 = vpop.f32.mrb[16].mxu0 }
 0x1dd   :  { %v2385_v35 = vsel %vm11070_vm3, %v2380_v61, %v2384_v45  ;;  %v2621_v32 = vrot.slane %v2619_v15, 1  ;;  %v2526_v34 = vrot.slane %v8498_v47, 1  ;;  %v8525_v4 = vsel %vm11074_vm6, %v1162_v21, %v1164_v7  ;;  %v1057_v10 = vpop.f32.mrb[17].mxu0 }
 0x1de   :  { %v8528_v54 = vsel %vm11074_vm6, %v1164_v7, %v1166_v18  ;;  %v2624_v11 = vrot.slane %v2622_v48, 2  ;;  %v2388_v39 = vor.u32 %v2386_v44, %v2384_v45  ;;  %vm11006_vm7 = vcmp.ne.s16.totalorder %v7972_v28, 0  ;;  %v6791_v1 = vpop.f32.mrb[18].mxu0 }
 0x1df   :  { %vm11005_vm5 = vcmp.ne.s16.totalorder %v7984_v20, 0  ;;  %v8535_v57 = vsel %vm10988_vm15, %v8525_v4, 0  ;;  %v8540_v21 = vsel %vm10983_vm2, %v8528_v54, 0  ;;  %v2392_v58 = vrot.slane %v2390_v41, 1  ;;  %2739 = vrot.lane.b32.xlu0 %v2617_v9, %s7124_s27  ;;  %2488 = vrot.lane.b32.xlu1 %v2385_v35, %s7123_s2  ;;  %v1060_v26 = vpop.f32.mrb[19].mxu0 }
 0x1e0   :  { %v2527_v61 = vsel %vm11072_vm9, %v2524_v42, %v2526_v34  ;;  %v10985_v45 = vrot.slane %v8535_v57, 2  ;;  %v10984_v15 = vrot.slane %v8540_v21, 2  ;;  %v2625_v7 = vor.u32 %v2624_v11, %v2621_v32 }
 0x1e1   :  { %v2095_v48 = vsel %vm11032_vm14, %v8498_v47, 0  ;;  %v1129_v44 = vpack.c.bf16 %v6791_v1, %v6790_v3  ;;  %v2393_v41 = vsel %vm11070_vm3, %v2388_v39, %v2392_v58  ;;  %v1128_v50 = vpack.c.bf16 %v1060_v26, %v1057_v10 }
 0x1e2   :  { %v2628_v43 = vshrl.u32 %v2095_v48, 16  ;;  %v2631_v42 = vshll.u32 %v2095_v48, 16  ;;  %v2799_v32 = vsel %vm11071_vm1, %v10985_v45, %v10984_v15  ;;  %v2626_v11 = vsel %vm11069_vm13, %v2616_v60, %v2625_v7 }
 0x1e3   :  { %v1742_v9 = vsel %vm10992_vm11, %v8525_v4, 0  ;;  %vm11007_vm2 = vcmp.ne.s16.totalorder %v8073_v38, 0  ;;  %v1170_v35 = vrot.slane %v1129_v44, 7  ;;  %6612 = vmatprep.mubr.msk.bf16.mxu1 %vm11080_vm4, %v2799_v32  ;;  %v2394_v26 = vshrl.u32 %v1741_v52, 16  ;;  %2556 = vrot.lane.b32.xlu0 %v2525_v14, %s7116_s5  ;;  %v6794_v52 = vpop.f32.mrb[20].mxu0 }
 0x1e4   :  { %v2630_v3 = vrot.slane %v2628_v43, 1  ;;  %v2633_v39 = vrot.slane %v2631_v42, 2  ;;  %v1168_v10 = vrot.slane %v1128_v50, 7  ;;  %v2398_v1 = vshll.u32 %v1742_v9, 16  ;;  %2741 = vrot.lane.b32.xlu1 %v2626_v11, %s7124_s27  ;;  %v1073_v23 = vpop.f32.mrb[21].mxu0 }
 0x1e5   :  { %v2528_v48 = vrot.slane %v8525_v4, 1  ;;  %v2096_v60 = vsel %vm10991_vm0, %v8525_v4, 0  ;;  %v2396_v45 = vor.u32 %v2394_v26, %v2392_v58  ;;  %vm11010_vm15 = vcmp.ne.s16.totalorder %v8164_v49, 0 }
 0x1e6   :  { %v2634_v15 = vor.u32 %v2633_v39, %v2630_v3  ;;  %v2637_v44 = vshrl.u32 %v2096_v60, 16  ;;  %v2640_v8 = vshll.u32 %v2096_v60, 16  ;;  %v8570_v43 = vsel %vm11074_vm6, %v1166_v18, %v1168_v10  ;;  %v6795_v39 = vpop.f32.mrb[22].mxu0 }
 0x1e7   :  { %v8573_v50 = vsel %vm11074_vm6, %v1168_v10, %v1170_v35  ;;  %v2400_v42 = vrot.slane %v2398_v1, 1  ;;  %v2529_v32 = vsel %vm11072_vm9, %v2526_v34, %v2528_v48  ;;  %v1743_v58 = vsel %vm11011_vm8, %v8528_v54, 0  ;;  %v11321_v1 = vld [vmem:[#allocation64_spill] sm:$0xff]  ;;  %2490 = vrot.lane.b32.xlu0 %v2393_v41, %s7123_s2 }
 0x1e8   :  { %v2635_v14 = vsel %vm11069_vm13, %v2625_v7, %v2634_v15  ;;  %v2639_v11 = vrot.slane %v2637_v44, 1  ;;  %v2642_v3 = vrot.slane %v2640_v8, 2  ;;  %v2402_v26 = vshrl.u32 %v1742_v9, 16  ;;  %2558 = vrot.lane.b32.xlu1 %v2527_v61, %s7116_s5  ;;  %v1076_v8 = vpop.f32.mrb[23].mxu0 }
 0x1e9   :  { %v2401_v18 = vsel %vm11070_vm3, %v2396_v45, %v2400_v42  ;;  %v2406_v60 = vshll.u32 %v1743_v58, 16  ;;  %v2530_v10 = vrot.slane %v8528_v54, 1  ;;  %vm11013_vm0 = vcmp.ne.s16.totalorder %v8169_v62, 0 }
 0x1ea   :  { %vm11012_vm11 = vcmp.ne.s16.totalorder %v11321_v1, 0  ;;  %v1131_v34 = vpack.c.bf16 %v6795_v39, %v6794_v52  ;;  %v2643_v7 = vor.u32 %v2642_v3, %v2639_v11  ;;  %v2097_v44 = vsel %vm11006_vm7, %v8528_v54, 0 }
 0x1eb   :  { %v1744_v45 = vsel %vm11005_vm5, %v8570_v43, 0  ;;  %v1130_v9 = vpack.c.bf16 %v1076_v8, %v1073_v23  ;;  %v2404_v24 = vor.u32 %v2402_v26, %v2400_v42  ;;  %v2408_v22 = vrot.slane %v2406_v60, 1  ;;  %2743 = vrot.lane.b32.xlu0 %v2635_v14, %s7124_s27  ;;  %v6798_v14 = vpop.f32.mrb[24].mxu0 }
 0x1ec   :  { %v2531_v40 = vsel %vm11072_vm9, %v2528_v48, %v2530_v10  ;;  %v1174_v36 = vrot.slane %v1131_v34, 7  ;;  %v2644_v41 = vsel %vm11069_vm13, %v2634_v15, %v2643_v7  ;;  %v2646_v52 = vshrl.u32 %v2097_v44, 16  ;;  %2492 = vrot.lane.b32.xlu1 %v2401_v18, %s7123_s2  ;;  %v1089_v26 = vpop.f32.mrb[25].mxu0 }
 0x1ed   :  { %v2649_v61 = vshll.u32 %v2097_v44, 16  ;;  %v1172_v39 = vrot.slane %v1130_v9, 7  ;;  %v2409_v11 = vsel %vm11070_vm3, %v2404_v24, %v2408_v22  ;;  %v2410_v3 = vshrl.u32 %v1743_v58, 16  ;;  %v6799_v9 = vpop.f32.mrb[26].mxu0 }
 0x1ee   :  { %v2414_v28 = vshll.u32 %v1744_v45, 16  ;;  %v2648_v20 = vrot.slane %v2646_v52, 1  ;;  %v2532_v42 = vrot.slane %v8570_v43, 1  ;;  %v2098_v48 = vsel %vm11007_vm2, %v8570_v43, 0 }
 0x1ef   :  { %v2651_v23 = vrot.slane %v2649_v61, 2  ;;  %vm11021_vm5 = vcmp.ne.s16.totalorder %v8378_v13, 0  ;;  %vm11028_vm7 = vcmp.ne.s16.totalorder %v8385_v0, 0  ;;  %v8604_v24 = vsel %vm11074_vm6, %v1170_v35, %v1172_v39  ;;  %2560 = vrot.lane.b32.xlu0 %v2529_v32, %s7116_s5 }
 0x1f0   :  { %v8607_v15 = vsel %vm11074_vm6, %v1172_v39, %v1174_v36  ;;  %v2412_v58 = vor.u32 %v2410_v3, %v2408_v22  ;;  %v2416_v18 = vrot.slane %v2414_v28, 1  ;;  %v8610_v34 = vsel %vm11072_vm9, %v2530_v10, %v2532_v42  ;;  %2745 = vrot.lane.b32.xlu1 %v2644_v41, %s7124_s27  ;;  %v1092_v28 = vpop.f32.mrb[27].mxu0 }
 0x1f1   :  { %v2652_v60 = vor.u32 %v2651_v23, %v2648_v20  ;;  %v2655_v8 = vshrl.u32 %v2098_v48, 16  ;;  %v2658_v44 = vshll.u32 %v2098_v48, 16  ;;  %v1745_v35 = vsel %vm11010_vm15, %v8573_v50, 0 }
 0x1f2   :  { %v2417_v52 = vsel %vm11070_vm3, %v2412_v58, %v2416_v18  ;;  %v2418_v61 = vshrl.u32 %v1744_v45, 16  ;;  %v2534_v39 = vrot.slane %v8573_v50, 1  ;;  %v1133_v22 = vpack.c.bf16 %v6799_v9, %v6798_v14 }
 0x1f3   :  { %v2653_v20 = vsel %vm11069_vm13, %v2643_v7, %v2652_v60  ;;  %v2657_v10 = vrot.slane %v2655_v8, 1  ;;  %v2660_v3 = vrot.slane %v2658_v44, 2  ;;  %vm11029_vm2 = vcmp.ne.s16.totalorder %v8389_v6, 0  ;;  %2494 = vrot.lane.b32.xlu0 %v2409_v11, %s7123_s2 }
 0x1f4   :  { %v1132_v23 = vpack.c.bf16 %v1092_v28, %v1089_v26  ;;  %v2420_v48 = vor.u32 %v2418_v61, %v2416_v18  ;;  %v2422_v58 = vshll.u32 %v1745_v35, 16  ;;  %v8622_v38 = vsel %vm11072_vm9, %v2532_v42, %v2534_v39  ;;  %2562 = vrot.lane.b32.xlu1 %v2531_v40, %s7116_s5 }
 0x1f5   :  { %v1178_v45 = vrot.slane %v1133_v22, 7  ;;  %vm11030_vm15 = vcmp.ne.s16.totalorder %v8160_v31, 0  ;;  %v2661_v32 = vor.u32 %v2660_v3, %v2657_v10  ;;  %v2099_v41 = vsel %vm11013_vm0, %v8573_v50, 0  ;;  %v6802_v10 = vpop.f32.mrb[28].mxu0 }
 0x1f6   :  { %v1746_v7 = vsel %vm11012_vm11, %v8604_v24, 0  ;;  %vm11031_vm8 = vcmp.ne.s16.totalorder %v8393_v12, 0  ;;  %v1176_v14 = vrot.slane %v1132_v23, 7  ;;  %v2424_v18 = vrot.slane %v2422_v58, 1  ;;  %v1105_v11 = vpop.f32.mrb[29].mxu0 }
 0x1f7   :  { %v2664_v26 = vshrl.u32 %v2099_v41, 16  ;;  %v2667_v8 = vshll.u32 %v2099_v41, 16  ;;  %v2662_v42 = vsel %vm11069_vm13, %v2652_v60, %v2661_v32  ;;  %v2426_v44 = vshrl.u32 %v1745_v35, 16  ;;  %v6803_v41 = vpop.f32.mrb[30].mxu0  ;;  %2747 = vrot.lane.b32.xlu0 %v2653_v20, %s7124_s27 }
 0x1f8   :  { %v2430_v9 = vshll.u32 %v1746_v7, 16  ;;  %v2536_v61 = vrot.slane %v8604_v24, 1  ;;  %v8637_v22 = vsel %vm11074_vm6, %v1174_v36, %v1176_v14  ;;  %v8640_v28 = vsel %vm11074_vm6, %v1176_v14, %v1178_v45  ;;  %2496 = vrot.lane.b32.xlu1 %v2417_v52, %s7123_s2 }
 0x1f9   :  { %v2425_v3 = vsel %vm11070_vm3, %v2420_v48, %v2424_v18  ;;  %v2666_v23 = vrot.slane %v2664_v26, 1  ;;  %vm11047_vm11 = vcmp.ne.s16.totalorder %v8397_v55, 0  ;;  %v2669_v40 = vrot.slane %v2667_v8, 2  ;;  %v1108_v26 = vpop.f32.mrb[31].mxu0 }
 0x1fa   :  { %v2428_v58 = vor.u32 %v2426_v44, %v2424_v18  ;;  %v2432_v60 = vrot.slane %v2430_v9, 1  ;;  %v8645_v35 = vsel %vm11072_vm9, %v2534_v39, %v2536_v61  ;;  %v2100_v36 = vsel %vm11021_vm5, %v8604_v24, 0 }
 0x1fb   :  { %v1747_v14 = vsel %vm11028_vm7, %v8607_v15, 0  ;;  %v2538_v48 = vrot.slane %v8607_v15, 1  ;;  %vm11048_vm0 = vcmp.ne.s16.totalorder %v8401_v37, 0  ;;  %v8658_v18 = vsel %vm2283_vm12, %v8417_v17, %v8428_v16  ;;  %2564 = vrot.lane.b32.xlu0 %v8610_v34, %s7116_s5 }
 0x1fc   :  { %11322 = vst [vmem:[#allocation87_spill] sm:$0xff] %v8658_v18  ;;  %v1135_v39 = vpack.c.bf16 %v6803_v41, %v6802_v10  ;;  %v2670_v8 = vor.u32 %v2669_v40, %v2666_v23  ;;  %v2433_v44 = vsel %vm11070_vm3, %v2428_v58, %v2432_v60  ;;  %v2673_v9 = vshrl.u32 %v2100_v36, 16  ;;  %2749 = vrot.lane.b32.xlu1 %v2662_v42, %s7124_s27  ;;  %v11323_v58 = vld [vmem:[#allocation39_spill] sm:$0xff] }
 0x1fd   :  { %v1134_v13 = vpack.c.bf16 %v1108_v26, %v1105_v11  ;;  %v2676_v0 = vshll.u32 %v2100_v36, 16  ;;  %v2434_v1 = vshrl.u32 %v1746_v7, 16  ;;  %v2438_v62 = vshll.u32 %v1747_v14, 16 }
 0x1fe   :  { %vm11034_vm5 = vcmp.ne.s16.totalorder %v8404_v29, 0  ;;  %v1182_v49 = vrot.slane %v1135_v39, 7  ;;  %v2671_v59 = vsel %vm11069_vm13, %v2661_v32, %v2670_v8  ;;  %v2675_v56 = vrot.slane %v2673_v9, 1 }
 0x1ff   :  { %v8666_v20 = vsel %vm11072_vm9, %v2536_v61, %v2538_v48  ;;  %v1180_v10 = vrot.slane %v1134_v13, 7  ;;  %v2678_v52 = vrot.slane %v2676_v0, 2  ;;  %v2436_v41 = vor.u32 %v2434_v1, %v2432_v60  ;;  %2498 = vrot.lane.b32.xlu0 %v2425_v3, %s7123_s2 }
 0x200   :  { %v2101_v23 = vsel %vm11029_vm2, %v8607_v15, 0  ;;  %vm11033_vm7 = vcmp.ne.s16.totalorder %v8408_v25, 0  ;;  %v8673_v7 = vsel %vm11074_vm6, %v1182_v49, 0  ;;  %v2440_v32 = vrot.slane %v2438_v62, 1  ;;  %2566 = vrot.lane.b32.xlu1 %v8622_v38, %s7116_s5 }
 0x201   :  { %v2682_v61 = vshrl.u32 %v2101_v23, 16  ;;  %v2685_v11 = vshll.u32 %v2101_v23, 16  ;;  %v8681_v13 = vsel %vm11030_vm15, %v8673_v7, 0  ;;  %v8684_v0 = vsel %vm11074_vm6, %v1178_v45, %v1180_v10 }
 0x202   :  { %v8687_v1 = vsel %vm11074_vm6, %v1180_v10, %v1182_v49  ;;  %v1748_v34 = vsel %vm11031_vm8, %v8637_v22, 0  ;;  %vm11045_vm2 = vcmp.ne.s16.totalorder %v8411_v33, 0  ;;  %v2679_v40 = vor.u32 %v2678_v52, %v2675_v56 }
 0x203   :  { %vm11046_vm15 = vcmp.ne.s16.totalorder %v8426_v53, 0  ;;  %v8699_v45 = vsel %vm2283_vm12, %v8428_v16, %v11323_v58  ;;  %v2441_v49 = vsel %vm11070_vm3, %v2436_v41, %v2440_v32  ;;  %v2684_v60 = vrot.slane %v2682_v61, 1  ;;  %2751 = vrot.lane.b32.xlu0 %v2671_v59, %s7124_s27  ;;  %v11333_v53 = vld [vmem:[#allocation41_spill] sm:$0xff] }
 0x204   :  { %11324 = vst [vmem:[#allocation39_spill] sm:$0xff] %v8699_v45  ;;  %v2687_v36 = vrot.slane %v2685_v11, 2  ;;  %v2442_v39 = vshrl.u32 %v1747_v14, 16  ;;  %v2680_v26 = vsel %vm11069_vm13, %v2670_v8, %v2679_v40  ;;  %v2446_v56 = vshll.u32 %v1748_v34, 16  ;;  %2500 = vrot.lane.b32.xlu1 %v2433_v44, %s7123_s2 }
 0x205   :  { %v2540_v9 = vrot.slane %v8637_v22, 1  ;;  %v2102_v16 = vsel %vm11047_vm11, %v8637_v22, 0  ;;  %vm11044_vm8 = vcmp.ne.s16.totalorder %v8415_v51, 0  ;;  %v1749_v38 = vsel %vm11048_vm0, %v8640_v28, 0 }
 0x206   :  { %v2688_v10 = vor.u32 %v2687_v36, %v2684_v60  ;;  %v2444_v52 = vor.u32 %v2442_v39, %v2440_v32  ;;  %v2691_v41 = vshrl.u32 %v2102_v16, 16  ;;  %v2694_v14 = vshll.u32 %v2102_v16, 16 }
 0x207   :  { %v2448_v23 = vrot.slane %v2446_v56, 1  ;;  %v8712_v3 = vsel %vm11072_vm9, %v2538_v48, %v2540_v9  ;;  %v2450_v8 = vshrl.u32 %v1748_v34, 16  ;;  %vm11043_vm14 = vcmp.ne.s16.totalorder %v8346_v5, 0  ;;  %2568 = vrot.lane.b32.xlu0 %v8645_v35, %s7116_s5  ;;  %v11331_v5 = vld [vmem:[#allocation60_spill] sm:$0xff] }
 0x208   :  { %v2689_v61 = vsel %vm11069_vm13, %v2679_v40, %v2688_v10  ;;  %v2693_v11 = vrot.slane %v2691_v41, 1  ;;  %v2696_v58 = vrot.slane %v2694_v14, 2  ;;  %v2454_v42 = vshll.u32 %v1749_v38, 16  ;;  %2753 = vrot.lane.b32.xlu1 %v2680_v26, %s7124_s27 }
 0x209   :  { %v2449_v32 = vsel %vm11070_vm3, %v2444_v52, %v2448_v23  ;;  %v2452_v48 = vor.u32 %v2450_v8, %v2448_v23  ;;  %v2542_v60 = vrot.slane %v8640_v28, 1  ;;  %v2103_v34 = vsel %vm11034_vm5, %v8640_v28, 0 }
 0x20a   :  { %v2697_v36 = vor.u32 %v2696_v58, %v2693_v11  ;;  %v2456_v39 = vrot.slane %v2454_v42, 1  ;;  %v2700_v56 = vshrl.u32 %v2103_v34, 16  ;;  %v2703_v40 = vshll.u32 %v2103_v34, 16 }
 0x20b   :  { %v8727_v16 = vsel %vm11072_vm9, %v2540_v9, %v2542_v60  ;;  %v1750_v59 = vsel %vm11033_vm7, %v8684_v0, 0  ;;  %v2458_v44 = vshrl.u32 %v1749_v38, 16  ;;  %v2544_v52 = vrot.slane %v8684_v0, 1  ;;  %2502 = vrot.lane.b32.xlu0 %v2441_v49, %s7123_s2 }
 0x20c   :  { %v2698_v41 = vsel %vm11069_vm13, %v2688_v10, %v2697_v36  ;;  %v8735_v14 = vsel %vm11070_vm3, %v2452_v48, %v2456_v39  ;;  %v2702_v23 = vrot.slane %v2700_v56, 1  ;;  %v2705_v8 = vrot.slane %v2703_v40, 2  ;;  %v11325_v10 = vld [vmem:[#allocation57_spill] sm:$0xff]  ;;  %2570 = vrot.lane.b32.xlu1 %v8666_v20, %s7116_s5 }
 0x20d   :  { %v2460_v42 = vor.u32 %v2458_v44, %v2456_v39  ;;  %v2462_v9 = vshll.u32 %v1750_v59, 16  ;;  %v8741_v11 = vsel %vm11072_vm9, %v2542_v60, %v2544_v52  ;;  %v2104_v38 = vsel %vm11045_vm2, %v8684_v0, 0 }
 0x20e   :  { %vm11049_vm7 = vcmp.ne.s16.totalorder %v8658_v18, 0  ;;  %v11326_v58 = vand.u32 15, %v11325_v10  ;;  %v2706_v35 = vor.u32 %v2705_v8, %v2702_v23  ;;  %v2709_v34 = vshrl.u32 %v2104_v38, 16 }
 0x20f   :  { %v2712_v26 = vshll.u32 %v2104_v38, 16  ;;  %v1751_v60 = vsel %vm11046_vm15, %v8687_v1, 0  ;;  %v2464_v39 = vrot.slane %v2462_v9, 1  ;;  %v2466_v56 = vshrl.u32 %v1750_v59, 16  ;;  %2755 = vrot.lane.b32.xlu0 %v2689_v61, %s7124_s27 }
 0x210   :  { %vm8749_vm5 = vcmp.lt.s32.totalorder %v11326_v58, 14  ;;  %v2470_v40 = vshll.u32 %v1751_v60, 16  ;;  %v2546_v44 = vrot.slane %v8687_v1, 1  ;;  %v8758_v62 = vsel %vm11069_vm13, %v2697_v36, %v2706_v35  ;;  %2504 = vrot.lane.b32.xlu1 %v2449_v32, %s7123_s2 }
 0x211   :  { %v2711_v10 = vrot.slane %v2709_v34, 1  ;;  %v2714_v58 = vrot.slane %v2712_v26, 2  ;;  %v2105_v23 = vsel %vm11044_vm8, %v8687_v1, 0  ;;  %v8767_v8 = vsel %vm11070_vm3, %v2460_v42, %v2464_v39  ;;  %vm2200_vm8 = vmpackc.low %vm8749_vm5, %vm8749_vm5 }
 0x212   :  { %v2468_v59 = vor.u32 %v2466_v56, %v2464_v39  ;;  %v2472_v9 = vrot.slane %v2470_v40, 1  ;;  %v8770_v38 = vsel %vm11072_vm9, %v2544_v52, %v2546_v44  ;;  %v2718_v34 = vshrl.u32 %v2105_v23, 16 }
 0x213   :  { %v2715_v36 = vor.u32 %v2714_v58, %v2711_v10  ;;  %v2721_v26 = vshll.u32 %v2105_v23, 16  ;;  %v1752_v51 = vsel %vm11043_vm14, %v8673_v7, 0  ;;  %v2474_v33 = vshrl.u32 %v1751_v60, 16  ;;  %2572 = vrot.lane.b32.xlu0 %v8712_v3, %s7116_s5  ;;  %v11338_v3 = vld [vmem:[#allocation68_spill] sm:$0xff] }
 0x214   :  { %v8776_v49 = vsel %vm11070_vm3, %v2468_v59, %v2472_v9  ;;  %v2478_v20 = vshll.u32 %v1752_v51, 16  ;;  %v2548_v42 = vrot.slane %v8673_v7, 1  ;;  %v2720_v56 = vrot.slane %v2718_v34, 1  ;;  %2757 = vrot.lane.b32.xlu1 %v2698_v41, %s7124_s27 }
 0x215   :  { %v8780_v39 = vsel %vm11069_vm13, %v2706_v35, %v2715_v36  ;;  %v2723_v52 = vrot.slane %v2721_v26, 2  ;;  %v11329_v40 = vshrl.u32 %v8681_v13, 16  ;;  %v2476_v58 = vor.u32 %v2474_v33, %v2472_v9  ;;  %v11332_v26 = vld [vmem:[#allocation65_spill] sm:$0xff] }
 0x216   :  { %v2480_v23 = vrot.slane %v2478_v20, 1  ;;  %v8787_v59 = vsel %vm11072_vm9, %v2546_v44, %v2548_v42  ;;  %v11330_v51 = vshll.u32 %v8681_v13, 16  ;;  %v6594_v35 = vcombine.low %v7458_v2, %v11331_v5  ;;  %v11335_v44 = vld [vmem:[#allocation66_spill] sm:$0xff]  ;;  %v11337_v20 = vld [vmem:[#allocation67_spill] sm:$0xff] }
 0x217   :  { %v2729_v10 = vrot.slane %v11329_v40, 1  ;;  %v2724_v34 = vor.u32 %v2723_v52, %v2720_v56  ;;  %v8796_v40 = vsel %vm2283_vm12, %v11333_v53, %v11332_v26  ;;  %vm11060_vm14 = vcmp.ne.s16.totalorder %v8699_v45, 0  ;;  %2506 = vrot.lane.b32.xlu0 %v8735_v14, %s7123_s2 }
 0x218   :  { %v2732_v60 = vrot.slane %v11330_v51, 2  ;;  %11334 = vst [vmem:[#allocation57_spill] sm:$0xff] %v8796_v40  ;;  %v8799_v61 = vsel %vm11070_vm3, %v2476_v58, %v2480_v23  ;;  %v8806_v13 = vsel %vm11049_vm7, %v8495_v19, 0  ;;  %vm11058_vm2 = vcmp.ne.s16.totalorder %v8796_v40, 0  ;;  %2574 = vrot.lane.b32.xlu1 %v8727_v16, %s7116_s5 }
 0x219   :  { %v2725_v32 = vsel %vm11069_vm13, %v2715_v36, %v2724_v34  ;;  %v11059_v53 = vrot.slane %v8806_v13, 2  ;;  %vm11057_vm15 = vcmp.ne.s16.totalorder %v11335_v44, 0  ;;  %v8818_v9 = vrot.slane %v6594_v35, 6 }
 0x21a   :  { %v2733_v33 = vor.u32 %v2732_v60, %v2729_v10  ;;  %v2337_v48 = vsel %vm11060_vm14, %v8498_v47, 0  ;;  %vm11056_vm5 = vcmp.ne.s16.totalorder %v11337_v20, 0  ;;  %vm11055_vm11 = vcmp.ne.s16.totalorder %v11338_v3, 0 }
 0x21b   :  { %11336 = vst [vmem:[#allocation60_spill] sm:$0xff] %v8818_v9  ;;  %v2794_v36 = vrot.slane %v2337_v48, 2  ;;  %v11339_v41 = vmov 0   ;;  %v2340_v56 = vsel %vm11058_vm2, %v8570_v43, 0  ;;  %v2341_v52 = vsel %vm11057_vm15, %v8573_v50, 0  ;;  %2759 = vrot.lane.b32.xlu0 %v8758_v62, %s7124_s27 }
 0x21c   :  { %v2734_v5 = vsel %vm11069_vm13, %v2724_v34, %v2733_v33  ;;  %v2232_v42 = vsel %vm2200_vm8, 65537, %v11339_v41  ;;  %vm11054_vm0 = vcmp.ne.s16.totalorder %v8368_v30, 0  ;;  %vm11051_vm7 = vcmp.ne.s16.totalorder %v8373_v27, 0  ;;  %2508 = vrot.lane.b32.xlu1 %v8767_v8, %s7123_s2 }
 0x21d   :  { %v8841_v10 = vsel %vm11071_vm1, %v11059_v53, %v2794_v36  ;;  %v11340_v58 = vrot.slane %v8535_v57, 2  ;;  %v2800_v51 = vrot.slane %v2340_v56, 2  ;;  %v2802_v60 = vrot.slane %v2341_v52, 2 }
 0x21e   :  { %vm11050_vm8 = vcmp.ne.s16.totalorder %v8818_v9, 0  ;;  %v2342_v14 = vsel %vm11056_vm5, %v8604_v24, 0  ;;  %v2343_v16 = vsel %vm11055_vm11, %v8607_v15, 0  ;;  %v6593_v35 = vcombine.low %v7458_v2, %v2232_v42 }
 0x21f   :  { %v8846_v23 = vsel %vm11071_vm1, %v2794_v36, %v11340_v58  ;;  %v11341_v34 = vrot.slane %v8540_v21, 2  ;;  %v8862_v26 = vsel %vm11071_vm1, %v2800_v51, %v2802_v60  ;;  %v2804_v33 = vrot.slane %v2342_v14, 2  ;;  %2576 = vrot.lane.b32.xlu0 %v8741_v11, %s7116_s5 }
 0x220   :  { %v2806_v48 = vrot.slane %v2343_v16, 2  ;;  %v2344_v36 = vsel %vm11054_vm0, %v8637_v22, 0  ;;  %v2345_v56 = vsel %vm11051_vm7, %v8640_v28, 0  ;;  %v2311_v14 = vrot.slane %v6593_v35, 6  ;;  %2761 = vrot.lane.b32.xlu1 %v8780_v39, %s7124_s27 }
 0x221   :  { %v8859_v57 = vsel %vm11071_vm1, %v11341_v34, %v2800_v51  ;;  %v8875_v21 = vsel %vm11071_vm1, %v2802_v60, %v2804_v33  ;;  %v2808_v52 = vrot.slane %v2344_v36, 2  ;;  %v2810_v58 = vrot.slane %v2345_v56, 2  ;;  %v11343_v36 = vld [vmem:[#allocation20_spill] sm:$0xff] }
 0x222   :  { %v8878_v42 = vsel %vm11071_vm1, %v2804_v33, %v2806_v48  ;;  %v2348_v51 = vsel %vm11050_vm8, %v8673_v7, 0  ;;  %v8891_v8 = vsel %vm2283_vm12, %v8365_v46, %v2311_v14  ;;  %v8895_v60 = vsel %vm2283_vm12, %v2311_v14, %v8818_v9  ;;  %v11347_v14 = vld [vmem:[#allocation18_spill] sm:$0xff]  ;;  %v11366_v9 = vld [vmem:[#allocation21_spill] sm:$0xff] }
 0x223   :  { %v8884_v16 = vsel %vm11071_vm1, %v2806_v48, %v2808_v52  ;;  %v8887_v62 = vsel %vm11071_vm1, %v2808_v52, %v2810_v58  ;;  %11342 = vst [vmem:[#allocation65_spill] sm:$0xff] %v8895_v60  ;;  %v2816_v34 = vrot.slane %v2348_v51, 2  ;;  %vm11053_vm8 = vcmp.ne.s16.totalorder %v8891_v8, 0  ;;  %2510 = vrot.lane.b32.xlu0 %v8776_v49, %s7123_s2  ;;  %v11345_v49 = vld [vmem:[#allocation17_spill] sm:$0xff] }
 0x224   :  { %vm11052_vm7 = vcmp.ne.s16.totalorder %v8895_v60, 0  ;;  %v2346_v46 = vsel %vm11053_vm8, %v8684_v0, 0  ;;  %2578 = vrot.lane.b32.xlu1 %v8770_v38, %s7116_s5  ;;  %v11344_v56 = vand.u32 15, %v11343_v36  ;;  %v11346_v52 = vand.u32 15, %v11345_v49  ;;  %v11358_v49 = vld [vmem:[#allocation86_spill] sm:$0xff] }
 0x225   :  { %v2347_v7 = vsel %vm11052_vm7, %v8687_v1, 0  ;;  %v2812_v35 = vrot.slane %v2346_v46, 2 }
 0x226   :  { %v2814_v33 = vrot.slane %v2347_v7, 2  ;;  %vm625_vm7 = vcmp.lt.s32.totalorder %v11344_v56, 14  ;;  %vm556_vm0 = vcmp.ge.s32.totalorder %v11346_v52, 2  ;;  %v6942_v56 = vld [vmem:[#allocation8 + $0x8] sm:$0xff]  }
 0x227   :  { %v8914_v11 = vsel %vm11071_vm1, %v2810_v58, %v2812_v35  ;;  %2763 = vrot.lane.b32.xlu0 %v2725_v32, %s7124_s27  ;;  %vm2176_vm8 = vmpackc.low %vm625_vm7, %vm625_vm7  ;;  %v6941_v32 = vld [vmem:[#allocation8] sm:$0xff]  }
 0x228   :  { %v8917_v39 = vsel %vm11071_vm1, %v2812_v35, %v2814_v33  ;;  %v8920_v48 = vsel %vm11071_vm1, %v2814_v33, %v2816_v34  ;;  %2512 = vrot.lane.b32.xlu1 %v8799_v61, %s7123_s2  ;;  %v2208_v38 = vsel %vm2176_vm8, 65537, %v11339_v41  ;;  %vm1271_vm11 = vmpackc.low %vm556_vm0, %vm556_vm0  ;;  %6804 = vmatprep.subr.bf16.mxu0 %v6941_v32  ;;  %v11348_v34 = vand.u32 15, %v11347_v14  ;;  %v11354_v33 = vld [vmem:[#allocation19_spill] sm:$0xff] }
 0x229   :  { %v6581_v58 = vcombine.low %v7458_v2, %v2208_v38  ;;  %v1303_v51 = vsel %vm1271_vm11, 65537, %v11339_v41  ;;  %v11351_v35 = vmov 0  ;;  %v11355_v36 = vand.u32 15, %v11354_v33 }
 0x22a   :  { %vm558_vm5 = vcmp.ge.s32.totalorder %v11348_v34, 2  ;;  %vm11081_vm0 = vcmask 523264  }
 0x22b   :  { %2580 = vrot.lane.b32.xlu0 %v8787_v59, %s7116_s5  ;;  %v2287_v61 = vrot.slane %v6581_v58, 6  ;;  %v6531_v59 = vcombine.low %v1303_v51, %v7458_v2  ;;  %vm1273_vm15 = vmpackc.low %vm558_vm5, %vm558_vm5  ;;  %vm8950_vm11 = vcmp.ge.s32.totalorder %v11355_v36, 2  ;;  %v11359_v51 = vld [vmem:[#allocation83_spill] sm:$0xff]  ;;  %vm11075_vm5 = vcmask 785408  }
 0x22c   :  { %2765 = vrot.lane.b32.xlu1 %v2734_v5, %s7124_s27  ;;  %v11349_v5 = vld [vmem:[#allocation25_spill] sm:$0xff]  ;;  %v1305_v7 = vsel %vm1273_vm15, 65537, %v11339_v41  ;;  %vm1275_vm15 = vmpackc.low %vm8950_vm11, %vm8950_vm11 }
 0x22d   :  { %v8940_v46 = vsel %vm2283_vm12, %v11349_v5, %v2287_v61  ;;  %vm8944_vm8 = vcmp.ne.s16.totalorder %v6531_v59, 0  ;;  %v6532_v38 = vcombine.low %v1305_v7, %v7458_v2  ;;  %v8967_v5 = vsel %vm2283_vm12, %v2287_v61, %v8417_v17  ;;  %v11364_v61 = vld [vmem:[#allocation85_spill] sm:$0xff] }
 0x22e   :  { %11350 = vst [vmem:[#allocation41_spill] sm:$0xff] %v8940_v46  ;;  %vm11068_vm7 = vcmp.ne.s16.totalorder %v8940_v46, 0  ;;  %v11352_v35 = vsel %vm8944_vm8, 4294967295, %v11351_v35  ;;  %v1399_v14 = vsel %vm8944_vm8, %v11359_v51, 0  ;;  %11360 = vst [vmem:[#allocation67_spill] sm:$0xff] %v8967_v5  ;;  %vm11067_vm14 = vcmp.ne.s16.totalorder %v8967_v5, 0 }
 0x22f   :  { %11353 = vst [vmem:[#allocation66_spill] sm:$0xff] %v11352_v35  ;;  %v2334_v52 = vsel %vm11068_vm7, %v11358_v49, 0  ;;  %vm8969_vm2 = vcmp.ne.s16.totalorder %v6532_v38, 0  ;;  %v11363_v35 = vld [vmem:[#allocation82_spill] sm:$0xff]  ;;  %v11365_v38 = vrot.slane %v11364_v61, 2 }
 0x230   :  { %v2788_v7 = vrot.slane %v2334_v52, 2  ;;  %v1400_v17 = vsel %vm8969_vm2, %v11363_v35, 0  ;;  %v2335_v35 = vsel %vm11067_vm14, %v8466_v63, 0 }
 0x231   :  { %v2790_v61 = vrot.slane %v2335_v35, 2 }
 0x232   :  { %v2789_v52 = vsel %vm11071_vm1, %v11365_v38, %v2788_v7 }
 0x239   :  { %v2551_v58 = vpop.permute.xlu1 %2550 }
 0x241   :  { %v2483_v34 = vpop.permute.xlu0 %2482 }
 0x242   :  { %v2820_v59 = vsel %vm11080_vm4, %v1399_v14, %v2483_v34  ;;  %v1307_v14 = vsel %vm1275_vm15, 65537, %v11339_v41 }
 0x243   :  { %v2868_v36 = vsel %vm11081_vm0, %v2820_v59, %v2551_v58  ;;  %v11367_v58 = vand.u32 15, %v11366_v9 }
 0x245   :  { %v2736_v51 = vpop.permute.xlu0 %2735  ;;  %v2485_v53 = vpop.permute.xlu1 %2484  ;;  %vm8985_vm12 = vcmp.ge.s32.totalorder %v11367_v58, 2  ;;  %v2791_v58 = vsel %vm11071_vm1, %v2788_v7, %v2790_v61 }
 0x246   :  { %v2901_v34 = vsel %vm11075_vm5, %v2868_v36, %v2736_v51  ;;  %v2823_v60 = vsel %vm11080_vm4, %v1400_v17, %v2485_v53  ;;  %v6533_v36 = vcombine.low %v1307_v14, %v7458_v2  ;;  %vm1277_vm11 = vmpackc.low %vm8985_vm12, %vm8985_vm12 }
 0x247   :  { %3116 = vmatmul.mubr.bf16.vlgmr.msra.gmra.mrb[32].mxu0 %v2901_v34  ;;  %v1309_v38 = vsel %vm1277_vm11, 65537, %v11339_v41 }
 0x248   :  { %6607 = vmatprep.mubr.msk.bf16.mxu0 %vm11080_vm4, %v2789_v52  ;;  %6805 = vmatpush3.bf16.msra.mxu0 %v6941_v32  ;;  %vm8999_vm15 = vcmp.ne.s16.totalorder %v6533_v36, 0 }
 0x249   :  { %v2553_v51 = vpop.permute.xlu0 %2552  ;;  %v2738_v34 = vpop.permute.xlu1 %2737  ;;  %6806 = vmatprep.subr.bf16.mxu0 %v6942_v56  ;;  %v1401_v52 = vsel %vm8999_vm15, %v11358_v49, 0 }
 0x24a   :  { %v2870_v9 = vsel %vm11081_vm0, %v2823_v60, %v2553_v51  ;;  %v11372_v60 = vld [vmem:[#allocation22_spill] sm:$0xff] }
 0x24b   :  { %v2904_v32 = vsel %vm11075_vm5, %v2870_v9, %v2738_v34  ;;  %v11373_v59 = vand.u32 15, %v11372_v60  ;;  %v11376_v60 = vld [vmem:[#allocation29_spill] sm:$0xff] }
 0x24c   :  { %6807 = vmatpush3.bf16.msra.mxu0 %v6942_v56  ;;  %v6534_v56 = vcombine.low %v1309_v38, %v7458_v2 }
 0x24d   :  { %v2487_v14 = vpop.permute.xlu0 %2486  ;;  %v2555_v17 = vpop.permute.xlu1 %2554  ;;  %vm564_vm12 = vcmp.ge.s32.totalorder %v11373_v59, 2  ;;  %v11377_v59 = vand.u32 15, %v11376_v60 }
 0x24e   :  { %v2826_v36 = vsel %vm11080_vm4, %v1401_v52, %v2487_v14  ;;  %vm1279_vm11 = vmpackc.low %vm564_vm12, %vm564_vm12  ;;  %vm9015_vm14 = vcmp.ne.s16.totalorder %v6534_v56, 0 }
 0x24f   :  { %3124 = vmatmul.mubr.bf16.gmra.mrb[36].mxu0 %v2904_v32  ;;  %v2872_v34 = vsel %vm11081_vm0, %v2826_v36, %v2555_v17  ;;  %v1311_v32 = vsel %vm1279_vm11, 65537, %v11339_v41  ;;  %vm568_vm7 = vcmp.ge.s32.totalorder %v11377_v59, 2  ;;  %v1402_v38 = vsel %vm9015_vm14, %v8466_v63, 0 }
 0x250   :  { %6608 = vmatprep.mubr.msk.bf16.mxu0 %vm11080_vm4, %v2791_v58  ;;  %v11378_v17 = vrot.slane %v8806_v13, 2  ;;  %v11379_v58 = vld [vmem:[#allocation28_spill] sm:$0xff]  ;;  %v6535_v60 = vcombine.low %v1311_v32, %v7458_v2  ;;  %vm1283_vm11 = vmpackc.low %vm568_vm7, %vm568_vm7  ;;  %v11381_v13 = vld [vmem:[#allocation30_spill] sm:$0xff] }
 0x251   :  { %v2740_v35 = vpop.permute.xlu0 %2739  ;;  %v2489_v51 = vpop.permute.xlu1 %2488  ;;  %v11380_v36 = vand.u32 15, %v11379_v58  ;;  %v1315_v59 = vsel %vm1283_vm11, 65537, %v11339_v41 }
 0x252   :  { %v2907_v14 = vsel %vm11075_vm5, %v2872_v34, %v2740_v35  ;;  %v2793_v52 = vsel %vm11071_vm1, %v2790_v61, %v11378_v17  ;;  %v2829_v56 = vsel %vm11080_vm4, %v1402_v38, %v2489_v51  ;;  %vm9042_vm1 = vcmp.ne.s16.totalorder %v6535_v60, 0 }
 0x253   :  { %vm566_vm12 = vcmp.ge.s32.totalorder %v11380_v36, 2  ;;  %v1403_v58 = vsel %vm9042_vm1, %v8495_v19, 0 }
 0x254   :  { %vm1281_vm13 = vmpackc.low %vm566_vm12, %vm566_vm12 }
 0x255   :  { %v2557_v49 = vpop.permute.xlu0 %2556  ;;  %v1313_v32 = vsel %vm1281_vm13, 65537, %v11339_v41 }
 0x256   :  { %v2742_v7 = vpop.permute.xlu1 %2741  ;;  %v2874_v63 = vsel %vm11081_vm0, %v2829_v56, %v2557_v49  ;;  %v6537_v49 = vcombine.low %v1315_v59, %v7458_v2  ;;  %v6536_v56 = vcombine.low %v1313_v32, %v7458_v2  ;;  %v11387_v59 = vmov 0 }
 0x257   :  { %3132 = vmatmul.mubr.bf16.gmra.mrb[40].mxu0 %v2907_v14  ;;  %v11382_v14 = vand.u32 15, %v11381_v13 }
 0x258   :  { %6609 = vmatprep.mubr.msk.bf16.mxu0 %vm11080_vm4, %v2793_v52  ;;  %v2910_v52 = vsel %vm11075_vm5, %v2874_v63, %v2742_v7  ;;  %vm9060_vm13 = vcmp.ne.s16.totalorder %v6537_v49, 0  ;;  %vm9071_vm12 = vcmp.ne.s16.totalorder %v6536_v56, 0 }
 0x259   :  { %v2491_v35 = vpop.permute.xlu0 %2490  ;;  %vm9038_vm3 = vcmp.ge.s32.totalorder %v11382_v14, 2  ;;  %v11388_v59 = vsel %vm9060_vm13, 4294967295, %v11387_v59  ;;  %v11390_v14 = vld [vmem:[#allocation31_spill] sm:$0xff]  ;;  %v1405_v32 = vsel %vm9060_vm13, %v8525_v4, 0  ;;  %v11397_v4 = vmov 0 }
 0x25a   :  { %v2559_v34 = vpop.permute.xlu1 %2558  ;;  %vm1285_vm7 = vmpackc.low %vm9038_vm3, %vm9038_vm3  ;;  %v2832_v36 = vsel %vm11080_vm4, %v1403_v58, %v2491_v35  ;;  %11389 = vst [vmem:[#allocation20_spill] sm:$0xff] %v11388_v59  ;;  %v11391_v19 = vand.u32 15, %v11390_v14  ;;  %v11394_v35 = vmov 0 }
 0x25b   :  { %v1317_v63 = vsel %vm1285_vm7, 65537, %v11339_v41  ;;  %v2876_v13 = vsel %vm11081_vm0, %v2832_v36, %v2559_v34  ;;  %v11395_v35 = vsel %vm9071_vm12, 4294967295, %v11394_v35  ;;  %v1404_v36 = vsel %vm9071_vm12, %v8498_v47, 0 }
 0x25c   :  { %vm9067_vm3 = vcmp.ge.s32.totalorder %v11391_v19, 2  ;;  %11396 = vst [vmem:[#allocation17_spill] sm:$0xff] %v11395_v35 }
 0x25d   :  { %v2744_v38 = vpop.permute.xlu0 %2743  ;;  %vm1287_vm11 = vmpackc.low %vm9067_vm3, %vm9067_vm3 }
 0x25e   :  { %v2493_v17 = vpop.permute.xlu1 %2492  ;;  %v2913_v58 = vsel %vm11075_vm5, %v2876_v13, %v2744_v38  ;;  %v1319_v14 = vsel %vm1287_vm11, 65537, %v11339_v41 }
 0x25f   :  { %3140 = vmatmul.mubr.bf16.gmra.mrb[44].mxu0 %v2910_v52 }
 0x260   :  { %6610 = vmatprep.mubr.msk.bf16.mxu0 %vm11080_vm4, %v8841_v10  ;;  %v6538_v10 = vcombine.low %v1317_v63, %v7458_v2  ;;  %v2835_v63 = vsel %vm11080_vm4, %v1404_v36, %v2493_v17  ;;  %v11400_v17 = vld [vmem:[#allocation40_spill] sm:$0xff] }
 0x261   :  { %v2561_v60 = vpop.permute.xlu0 %2560 }
 0x262   :  { %v2746_v7 = vpop.permute.xlu1 %2745  ;;  %vm9091_vm7 = vcmp.ne.s16.totalorder %v6538_v10, 0  ;;  %v2878_v47 = vsel %vm11081_vm0, %v2835_v63, %v2561_v60  ;;  %v6539_v10 = vcombine.low %v1319_v14, %v7458_v2 }
 0x263   :  { %v11398_v4 = vsel %vm9091_vm7, 4294967295, %v11397_v4  ;;  %v1406_v61 = vsel %vm9091_vm7, %v8528_v54, 0  ;;  %v11402_v54 = vmov 0 }
 0x264   :  { %11399 = vst [vmem:[#allocation18_spill] sm:$0xff] %v11398_v4  ;;  %vm9109_vm9 = vcmp.ne.s16.totalorder %v6539_v10, 0 }
 0x265   :  { %v2495_v52 = vpop.permute.xlu0 %2494  ;;  %v11403_v54 = vsel %vm9109_vm9, 4294967295, %v11402_v54  ;;  %v1407_v63 = vsel %vm9109_vm9, %v8570_v43, 0 }
 0x266   :  { %v2563_v49 = vpop.permute.xlu1 %2562  ;;  %v2838_v34 = vsel %vm11080_vm4, %v1405_v32, %v2495_v52  ;;  %v11401_v32 = vand.u32 15, %v11400_v17  ;;  %11404 = vst [vmem:[#allocation25_spill] sm:$0xff] %v11403_v54  ;;  %v11407_v17 = vmov 0 }
 0x267   :  { %v2880_v56 = vsel %vm11081_vm0, %v2838_v34, %v2563_v49  ;;  %3148 = vmatmul.mubr.bf16.gmra.mrb[48].mxu0 %v2913_v58  ;;  %v2916_v34 = vsel %vm11075_vm5, %v2878_v47, %v2746_v7  ;;  %v11405_v7 = vld [vmem:[#allocation42_spill] sm:$0xff] }
 0x268   :  { %6611 = vmatprep.mubr.msk.bf16.mxu0 %vm11080_vm4, %v8846_v23  ;;  %vm574_vm3 = vcmp.ge.s32.totalorder %v11401_v32, 2 }
 0x269   :  { %v2748_v38 = vpop.permute.xlu0 %2747  ;;  %vm1289_vm11 = vmpackc.low %vm574_vm3, %vm574_vm3 }
 0x26a   :  { %v2497_v13 = vpop.permute.xlu1 %2496  ;;  %v2919_v19 = vsel %vm11075_vm5, %v2880_v56, %v2748_v38  ;;  %v1321_v56 = vsel %vm1289_vm11, 65537, %v11339_v41  ;;  %v11406_v38 = vand.u32 15, %v11405_v7 }
 0x26b   :  { %3164 = vmatmul.mubr.bf16.vlgmr.msra.gmra.mrb[0].mxu1 %v2919_v19  ;;  %v2841_v23 = vsel %vm11080_vm4, %v1406_v61, %v2497_v13  ;;  %v6540_v14 = vcombine.low %v1321_v56, %v7458_v2 }
 0x26c   :  { %6613 = vmatprep.mubr.msk.bf16.mxu1 %vm11080_vm4, %v8859_v57  ;;  %vm576_vm3 = vcmp.ge.s32.totalorder %v11406_v38, 2  ;;  %v11415_v38 = vld [vmem:[#allocation51_spill] sm:$0xff] }
 0x26d   :  { %v2565_v52 = vpop.permute.xlu0 %2564  ;;  %vm1291_vm11 = vmpackc.low %vm576_vm3, %vm576_vm3  ;;  %vm9125_vm10 = vcmp.ne.s16.totalorder %v6540_v14, 0 }
 0x26e   :  { %v2750_v49 = vpop.permute.xlu1 %2749  ;;  %v2882_v60 = vsel %vm11081_vm0, %v2841_v23, %v2565_v52  ;;  %v11408_v17 = vsel %vm9125_vm10, 4294967295, %v11407_v17  ;;  %v1323_v23 = vsel %vm1291_vm11, 65537, %v11339_v41  ;;  %v11410_v52 = vld [vmem:[#allocation45_spill] sm:$0xff] }
 0x26f   :  { %3156 = vmatmul.mubr.bf16.gmra.mrb[52].mxu0 %v2916_v34  ;;  %v2922_v57 = vsel %vm11075_vm5, %v2882_v60, %v2750_v49  ;;  %11409 = vst [vmem:[#allocation19_spill] sm:$0xff] %v11408_v17  ;;  %v11411_v49 = vand.u32 15, %v11410_v52  ;;  %v6541_v60 = vcombine.low %v1323_v23, %v7458_v2 }
 0x271   :  { %v2499_v58 = vpop.permute.xlu0 %2498  ;;  %vm578_vm3 = vcmp.ge.s32.totalorder %v11411_v49, 2  ;;  %vm9141_vm11 = vcmp.ne.s16.totalorder %v6541_v60, 0 }
 0x272   :  { %v2567_v36 = vpop.permute.xlu1 %2566  ;;  %v2844_v13 = vsel %vm11080_vm4, %v1407_v63, %v2499_v58  ;;  %vm1293_vm6 = vmpackc.low %vm578_vm3, %vm578_vm3 }
 0x273   :  { %3172 = vmatmul.mubr.bf16.gmra.mrb[4].mxu1 %v2922_v57  ;;  %v2884_v61 = vsel %vm11081_vm0, %v2844_v13, %v2567_v36  ;;  %v11412_v57 = vmov 0  ;;  %v11416_v13 = vand.u32 15, %v11415_v38 }
 0x274   :  { %6614 = vmatprep.mubr.msk.bf16.mxu1 %vm11080_vm4, %v8862_v26  ;;  %v1408_v26 = vsel %vm9125_vm10, %v8573_v50, 0  ;;  %v11413_v57 = vsel %vm9141_vm11, 4294967295, %v11412_v57  ;;  %v1325_v50 = vsel %vm1293_vm6, 65537, %v11339_v41 }
 0x275   :  { %v2752_v19 = vpop.permute.xlu0 %2751  ;;  %11414 = vst [vmem:[#allocation86_spill] sm:$0xff] %v11413_v57  ;;  %vm580_vm3 = vcmp.ge.s32.totalorder %v11416_v13, 2 }
 0x276   :  { %v2501_v47 = vpop.permute.xlu1 %2500  ;;  %v2925_v10 = vsel %vm11075_vm5, %v2884_v61, %v2752_v19  ;;  %v6542_v19 = vcombine.low %v1325_v50, %v7458_v2  ;;  %vm1295_vm6 = vmpackc.low %vm580_vm3, %vm580_vm3 }
 0x277   :  { %v2847_v34 = vsel %vm11080_vm4, %v1408_v26, %v2501_v47 }
 0x279   :  { %v2569_v43 = vpop.permute.xlu0 %2568 }
 0x27a   :  { %v2754_v32 = vpop.permute.xlu1 %2753  ;;  %v2886_v36 = vsel %vm11081_vm0, %v2847_v34, %v2569_v43  ;;  %v11417_v43 = vmov 0 }
 0x27b   :  { %3180 = vmatmul.mubr.bf16.gmra.mrb[8].mxu1 %v2925_v10  ;;  %v2928_v7 = vsel %vm11075_vm5, %v2886_v36, %v2754_v32  ;;  %vm9157_vm5 = vcmp.ne.s16.totalorder %v6542_v19, 0  ;;  %v1327_v32 = vsel %vm1295_vm6, 65537, %v11339_v41  ;;  %v11423_v36 = vmov 0 }
 0x27c   :  { %6615 = vmatprep.mubr.msk.bf16.mxu1 %vm11080_vm4, %v8875_v21  ;;  %v1409_v21 = vsel %vm9141_vm11, %v8604_v24, 0  ;;  %v11418_v43 = vsel %vm9157_vm5, 4294967295, %v11417_v43  ;;  %vm11420_vm11 = vcmask 785408   ;;  %v1410_v10 = vsel %vm9157_vm5, %v8607_v15, 0 }
 0x27d   :  { %v2503_v58 = vpop.permute.xlu0 %2502  ;;  %11419 = vst [vmem:[#allocation83_spill] sm:$0xff] %v11418_v43  ;;  %v6543_v34 = vcombine.low %v1327_v32, %v7458_v2  ;;  %vm11426_vm5 = vcmask 785408  }
 0x27e   :  { %v2571_v56 = vpop.permute.xlu1 %2570  ;;  %v2850_v14 = vsel %vm11080_vm4, %v1409_v21, %v2503_v58 }
 0x27f   :  { %v2888_v61 = vsel %vm11081_vm0, %v2850_v14, %v2571_v56 }
 0x281   :  { %v2756_v63 = vpop.permute.xlu0 %2755 }
 0x282   :  { %v2505_v47 = vpop.permute.xlu1 %2504  ;;  %v2931_v23 = vsel %vm11420_vm11, %v2888_v61, %v2756_v63  ;;  %vm9173_vm11 = vcmp.ne.s16.totalorder %v6543_v34, 0 }
 0x283   :  { %3188 = vmatmul.mubr.bf16.gmra.mrb[12].mxu1 %v2928_v7  ;;  %v2853_v49 = vsel %vm11080_vm4, %v1410_v10, %v2505_v47  ;;  %v11424_v36 = vsel %vm9173_vm11, 4294967295, %v11423_v36  ;;  %v1411_v63 = vsel %vm9173_vm11, %v8637_v22, 0  ;;  %v11427_v7 = vld [vmem:[#allocation56_spill] sm:$0xff]  ;;  %v11432_v47 = vmov 0 }
 0x284   :  { %6616 = vmatprep.mubr.msk.bf16.mxu1 %vm11080_vm4, %v8878_v42  ;;  %v11421_v42 = vld [vmem:[#allocation55_spill] sm:$0xff]  ;;  %11425 = vst [vmem:[#allocation82_spill] sm:$0xff] %v11424_v36  ;;  %vm11435_vm11 = vcmask 785408  }
 0x285   :  { %v2573_v24 = vpop.permute.xlu0 %2572  ;;  %v11422_v52 = vand.u32 15, %v11421_v42 }
 0x286   :  { %v2758_v26 = vpop.permute.xlu1 %2757  ;;  %v2890_v58 = vsel %vm11081_vm0, %v2853_v49, %v2573_v24  ;;  %v11439_v49 = vmov 0 }
 0x287   :  { %vm582_vm3 = vcmp.ge.s32.totalorder %v11422_v52, 2  ;;  %v2934_v50 = vsel %vm11426_vm5, %v2890_v58, %v2758_v26 }
 0x288   :  { %vm1297_vm6 = vmpackc.low %vm582_vm3, %vm582_vm3  ;;  %vm11429_vm3 = vcmask 261120  }
 0x289   :  { %v2507_v60 = vpop.permute.xlu0 %2506  ;;  %v1329_v56 = vsel %vm1297_vm6, 65537, %v11339_v41  ;;  %vm11430_vm0 = vmmov %vm11429_vm3  ;;  %vm11431_vm6 = vcmask 523264  }
 0x28a   :  { %v2575_v15 = vpop.permute.xlu1 %2574  ;;  %v2856_v21 = vsel %vm11429_vm3, %v1411_v63, %v2507_v60  ;;  %v6544_v13 = vcombine.low %v1329_v56, %v7458_v2 }
 0x28b   :  { %3196 = vmatmul.mubr.bf16.gmra.mrb[16].mxu1 %v2931_v23  ;;  %v2892_v14 = vsel %vm11431_vm6, %v2856_v21, %v2575_v15  ;;  %v11436_v23 = vld [vmem:[#allocation58_spill] sm:$0xff] }
 0x28c   :  { %6617 = vmatprep.mubr.msk.bf16.mxu1 %vm11080_vm4, %v8884_v16  ;;  %v11428_v16 = vand.u32 15, %v11427_v7  ;;  %vm9189_vm5 = vcmp.ne.s16.totalorder %v6544_v13, 0  ;;  %v11437_v10 = vand.u32 15, %v11436_v23  ;;  %v11446_v7 = vmov 0 }
 0x28d   :  { %v2760_v38 = vpop.permute.xlu0 %2759  ;;  %v11433_v47 = vsel %vm9189_vm5, 4294967295, %v11432_v47  ;;  %v1412_v32 = vsel %vm9189_vm5, %v8640_v28, 0  ;;  %vm11442_vm5 = vcmask 785408  }
 0x28e   :  { %vm584_vm4 = vcmp.ge.s32.totalorder %v11428_v16, 2  ;;  %v2509_v19 = vpop.permute.xlu1 %2508  ;;  %11434 = vst [vmem:[#allocation85_spill] sm:$0xff] %v11433_v47  ;;  %v2937_v24 = vsel %vm11435_vm11, %v2892_v14, %v2760_v38 }
 0x28f   :  { %vm1299_vm10 = vmpackc.low %vm584_vm4, %vm584_vm4 }
 0x290   :  { %v1331_v22 = vsel %vm1299_vm10, 65537, %v11339_v41  ;;  %vm11438_vm4 = vmmov %vm11429_vm3 }
 0x291   :  { %v2577_v61 = vpop.permute.xlu0 %2576  ;;  %v6545_v26 = vcombine.low %v1331_v22, %v7458_v2  ;;  %v6944_v22 = vld [vmem:[#allocation8 + $0x18] sm:$0xff]  }
 0x292   :  { %v2762_v42 = vpop.permute.xlu1 %2761 }
 0x293   :  { %3204 = vmatmul.mubr.bf16.gmra.mrb[20].mxu1 %v2934_v50  ;;  %vm9205_vm11 = vcmp.ne.s16.totalorder %v6545_v26, 0 }
 0x294   :  { %6618 = vmatprep.mubr.msk.bf16.mxu1 %vm11430_vm0, %v8887_v62  ;;  %vm586_vm0 = vcmp.ge.s32.totalorder %v11437_v10, 2  ;;  %v2859_v62 = vsel %vm11438_vm4, %v1412_v32, %v2509_v19  ;;  %v11440_v49 = vsel %vm9205_vm11, 4294967295, %v11439_v49  ;;  %v1413_v58 = vsel %vm9205_vm11, %v8684_v0, 0  ;;  %vm11443_vm4 = vmmov %vm11429_vm3 }
 0x295   :  { %vm1301_vm10 = vmpackc.low %vm586_vm0, %vm586_vm0  ;;  %v2894_v52 = vsel %vm11431_vm6, %v2859_v62, %v2577_v61  ;;  %11441 = vst [vmem:[#allocation21_spill] sm:$0xff] %v11440_v49  ;;  %v2511_v28 = vpop.permute.xlu0 %2510 }
 0x296   :  { %v1333_v34 = vsel %vm1301_vm10, 65537, %v11339_v41  ;;  %v2940_v60 = vsel %vm11442_vm5, %v2894_v52, %v2762_v42  ;;  %v2579_v15 = vpop.permute.xlu1 %2578  ;;  %vm11444_vm0 = vmmov %vm11429_vm3 }
 0x297   :  { %v6546_v56 = vcombine.low %v1333_v34, %v7458_v2  ;;  %vm11449_vm10 = vmmov %vm11444_vm0 }
 0x299   :  { %v2764_v50 = vpop.permute.xlu0 %2763 }
 0x29a   :  { %v2513_v16 = vpop.permute.xlu1 %2512 }
 0x29b   :  { %3212 = vmatmul.mubr.bf16.gmra.mrb[24].mxu1 %v2937_v24 }
 0x29c   :  { %6619 = vmatprep.mubr.msk.bf16.mxu1 %vm11429_vm3, %v8914_v11  ;;  %v2862_v11 = vsel %vm11443_vm4, %v1413_v58, %v2511_v28  ;;  %vm11445_vm3 = vmmov %vm11431_vm6  ;;  %vm9219_vm6 = vcmp.ne.s16.totalorder %v6546_v56, 0 }
 0x29d   :  { %v2896_v63 = vsel %vm11445_vm3, %v2862_v11, %v2579_v15  ;;  %v11447_v7 = vsel %vm9219_vm6, 4294967295, %v11446_v7  ;;  %v1414_v0 = vsel %vm9219_vm6, %v8687_v1, 0  ;;  %v2581_v38 = vpop.permute.xlu0 %2580  ;;  %vm11450_vm4 = vmmov %vm11444_vm0  ;;  %v9233_v1 = vld [vmem:[#allocation6] ss:$0 sm:$0xff] }
 0x29e   :  { %11448 = vst [vmem:[#allocation22_spill] sm:$0xff] %v11447_v7  ;;  %v2943_v21 = vsel %vm11442_vm5, %v2896_v63, %v2764_v50  ;;  %v2865_v2 = vsel %vm11449_vm10, %v1414_v0, %v2513_v16  ;;  %v2766_v14 = vpop.permute.xlu1 %2765 }
 0x2a3   :  { %3220 = vmatmul.mubr.bf16.gmra.mrb[28].mxu1 %v2940_v60 }
 0x2a4   :  { %6620 = vmatprep.mubr.msk.bf16.mxu1 %vm11444_vm0, %v8917_v39  ;;  %v6943_v39 = vld [vmem:[#allocation8 + $0x10] sm:$0xff]   ;;  %vm11451_vm0 = vmmov %vm11445_vm3 }
 0x2a5   :  { %v2898_v13 = vsel %vm11451_vm0, %v2865_v2, %v2581_v38  ;;  %6808 = vmatprep.subr.bf16.mxu0 %v6943_v39  ;;  %vm11452_vm3 = vmmov %vm11442_vm5 }
 0x2a6   :  { %6809 = vmatpush3.bf16.msra.mxu0 %v6943_v39  ;;  %v2946_v19 = vsel %vm11452_vm3, %v2898_v13, %v2766_v14  ;;  %vm11453_vm5 = vmmov %vm11451_vm0 }
 0x2a7   :  { %6810 = vmatprep.subr.bf16.mxu0 %v6944_v22  ;;  %vm11454_vm10 = vmmov %vm11451_vm0 }
 0x2a8   :  { %vm11456_vm3 = vmmov %vm11451_vm0 }
 0x2a9   :  { %vm11472_vm6 = vmmov %vm11451_vm0 }
 0x2aa   :  { %6811 = vmatpush3.bf16.msra.mxu0 %v6944_v22  ;;  %vm11505_vm11 = vmmov %vm11451_vm0 }
 0x2ab   :  { %3228 = vmatmul.mubr.bf16.gmra.mrb[32].mxu1 %v2943_v21  ;;  %4483 = vmatprep.subr.bf16.mxu0 %v11339_v41 }
 0x2ac   :  { %6621 = vmatprep.mubr.msk.bf16.mxu1 %vm11450_vm4, %v8920_v48  ;;  %vm11455_vm4 = vmmov %vm11451_vm0 }
 0x2b3   :  { %3236 = vmatmul.mubr.bf16.gmra.mrb[36].mxu1 %v2946_v19 }
 0x31a   :  { %v3117_v61 = vpop.f32.mrb[32].mxu0 }
 0x31b   :  { %v3118_v24 = vadd.f32 %v9233_v1, %v3117_v61  ;;  %v3119_v48 = vpop.f32.mrb[33].mxu0 }
 0x31c   :  { %v3120_v32 = vpop.f32.mrb[34].mxu0 }
 0x31d   :  { %v3121_v23 = vadd.f32 %v9233_v1, %v3120_v32  ;;  %v3122_v10 = vpop.f32.mrb[35].mxu0  ;;  %v3244_v62 = vmax.f32 %v3118_v24, 0.0 }
 0x31f   :  { %v3245_v26 = vmax.f32 %v3121_v23, 0.0 }
 0x321   :  { %v3276_v42 = vpack.c.bf16 %v3245_v26, %v3244_v62 }
 0x322   :  { %v3125_v52 = vpop.f32.mrb[36].mxu0 }
 0x323   :  { %3292 = vst.msk [vmem:[#allocation2 + $0x8] sm:$0xff] %vm11453_vm5, %v3276_v42  ;;  %v3126_v28 = vadd.f32 %v9233_v1, %v3125_v52  ;;  %v3127_v34 = vpop.f32.mrb[37].mxu0  ;;  %vm11457_vm5 = vmmov %vm11451_vm0 }
 0x324   :  { %v3128_v60 = vpop.f32.mrb[38].mxu0 }
 0x325   :  { %v3129_v58 = vadd.f32 %v9233_v1, %v3128_v60  ;;  %v3130_v15 = vpop.f32.mrb[39].mxu0  ;;  %v3246_v11 = vmax.f32 %v3126_v28, 0.0 }
 0x327   :  { %v3247_v56 = vmax.f32 %v3129_v58, 0.0 }
 0x329   :  { %v3277_v50 = vpack.c.bf16 %v3247_v56, %v3246_v11 }
 0x32a   :  { %v6303_v63 = vld [vmem:[#allocation2 + $0x8] sm:$0xff]  ;;  %v3133_v16 = vpop.f32.mrb[40].mxu0 }
 0x32b   :  { %v6335_v21 = vunpack.c.l.bf16 %v6303_v63  ;;  %v6337_v0 = vunpack.c.h.bf16 %v6303_v63  ;;  %3293 = vst.msk [vmem:[#allocation2 + $0x18] sm:$0xff] %vm11454_vm10, %v3277_v50  ;;  %v3134_v2 = vadd.f32 %v9233_v1, %v3133_v16  ;;  %v3135_v38 = vpop.f32.mrb[41].mxu0  ;;  %6812 = vmatprep.mubr.msk.bf16.mxu0 %vm11455_vm4, %v6303_v63  ;;  %vm11458_vm10 = vmmov %vm11451_vm0 }
 0x32c   :  { %v3136_v39 = vpop.f32.mrb[42].mxu0  ;;  %vm11459_vm4 = vmmov %vm11451_vm0 }
 0x32d   :  { %6399 = vst.msk [vmem:[#allocation12 + $0x8] sm:$0xff] %vm11451_vm0, %v6335_v21  ;;  %v3137_v13 = vadd.f32 %v9233_v1, %v3136_v39  ;;  %v3138_v14 = vpop.f32.mrb[43].mxu0  ;;  %v3248_v19 = vmax.f32 %v3134_v2, 0.0 }
 0x32e   :  { %6401 = vst.msk [vmem:[#allocation12 + $0x18] sm:$0xff] %vm11456_vm3, %v6337_v0  ;;  %vm11460_vm3 = vmmov %vm11451_vm0 }
 0x32f   :  { %v3249_v22 = vmax.f32 %v3137_v13, 0.0 }
 0x331   :  { %v3278_v61 = vpack.c.bf16 %v3249_v22, %v3248_v19 }
 0x332   :  { %v6305_v24 = vld [vmem:[#allocation2 + $0x18] sm:$0xff]  ;;  %v3141_v48 = vpop.f32.mrb[44].mxu0 }
 0x333   :  { %v6339_v32 = vunpack.c.l.bf16 %v6305_v24  ;;  %v6341_v23 = vunpack.c.h.bf16 %v6305_v24  ;;  %3294 = vst.msk [vmem:[#allocation2 + $0x28] sm:$0xff] %vm11457_vm5, %v3278_v61  ;;  %v3142_v10 = vadd.f32 %v9233_v1, %v3141_v48  ;;  %v3143_v62 = vpop.f32.mrb[45].mxu0  ;;  %6813 = vmatmul.mubr.msk.bf16.vlgmr.msra.gmra.mrb[56].mxu0 %vm11458_vm10, %v6305_v24  ;;  %vm11461_vm5 = vmmov %vm11451_vm0 }
 0x334   :  { %v3144_v26 = vpop.f32.mrb[46].mxu0  ;;  %vm11462_vm10 = vmmov %vm11451_vm0 }
 0x335   :  { %6403 = vst.msk [vmem:[#allocation12 + $0x28] sm:$0xff] %vm11459_vm4, %v6339_v32  ;;  %v3145_v42 = vadd.f32 %v9233_v1, %v3144_v26  ;;  %v3146_v52 = vpop.f32.mrb[47].mxu0  ;;  %v3250_v28 = vmax.f32 %v3142_v10, 0.0  ;;  %vm11463_vm4 = vmmov %vm11451_vm0 }
 0x336   :  { %6405 = vst.msk [vmem:[#allocation12 + $0x38] sm:$0xff] %vm11451_vm0, %v6341_v23 }
 0x337   :  { %v3251_v34 = vmax.f32 %v3145_v42, 0.0 }
 0x339   :  { %v3279_v60 = vpack.c.bf16 %v3251_v34, %v3250_v28 }
 0x33a   :  { %v6307_v58 = vld [vmem:[#allocation2 + $0x28] sm:$0xff]  ;;  %v3149_v15 = vpop.f32.mrb[48].mxu0 }
 0x33b   :  { %v6343_v11 = vunpack.c.l.bf16 %v6307_v58  ;;  %v6345_v56 = vunpack.c.h.bf16 %v6307_v58  ;;  %3295 = vst.msk [vmem:[#allocation2 + $0x38] sm:$0xff] %vm11460_vm3, %v3279_v60  ;;  %v3150_v50 = vadd.f32 %v9233_v1, %v3149_v15  ;;  %v3151_v63 = vpop.f32.mrb[49].mxu0  ;;  %6816 = vmatprep.mubr.msk.bf16.mxu0 %vm11461_vm5, %v6307_v58  ;;  %vm11464_vm3 = vmmov %vm11451_vm0 }
 0x33c   :  { %v3152_v16 = vpop.f32.mrb[50].mxu0  ;;  %vm11465_vm5 = vmmov %vm11451_vm0 }
 0x33d   :  { %6407 = vst.msk [vmem:[#allocation12 + $0x48] sm:$0xff] %vm11462_vm10, %v6343_v11  ;;  %v3153_v21 = vadd.f32 %v9233_v1, %v3152_v16  ;;  %v3154_v0 = vpop.f32.mrb[51].mxu0  ;;  %v3252_v38 = vmax.f32 %v3150_v50, 0.0  ;;  %vm11466_vm10 = vmmov %vm11451_vm0 }
 0x33e   :  { %6409 = vst.msk [vmem:[#allocation12 + $0x58] sm:$0xff] %vm11463_vm4, %v6345_v56  ;;  %v3165_v2 = vpop.f32.mrb[0].mxu1  ;;  %vm11467_vm4 = vmmov %vm11451_vm0 }
 0x33f   :  { %v3253_v39 = vmax.f32 %v3153_v21, 0.0  ;;  %v3166_v13 = vadd.f32 %v9233_v1, %v3165_v2  ;;  %v3167_v14 = vpop.f32.mrb[1].mxu1 }
 0x340   :  { %v3168_v19 = vpop.f32.mrb[2].mxu1 }
 0x341   :  { %v3280_v22 = vpack.c.bf16 %v3253_v39, %v3252_v38  ;;  %v3169_v61 = vadd.f32 %v9233_v1, %v3168_v19  ;;  %v3170_v24 = vpop.f32.mrb[3].mxu1  ;;  %v3256_v32 = vmax.f32 %v3166_v13, 0.0 }
 0x342   :  { %v6309_v48 = vld [vmem:[#allocation2 + $0x38] sm:$0xff]  ;;  %v3157_v23 = vpop.f32.mrb[52].mxu0 }
 0x343   :  { %v6347_v10 = vunpack.c.l.bf16 %v6309_v48  ;;  %v6349_v62 = vunpack.c.h.bf16 %v6309_v48  ;;  %3296 = vst.msk [vmem:[#allocation2 + $0x48] sm:$0xff] %vm11451_vm0, %v3280_v22  ;;  %v3257_v26 = vmax.f32 %v3169_v61, 0.0  ;;  %v3158_v42 = vadd.f32 %v9233_v1, %v3157_v23  ;;  %v3159_v52 = vpop.f32.mrb[53].mxu0  ;;  %6817 = vmatmul.mubr.msk.bf16.gmra.mrb[60].mxu0 %vm11464_vm3, %v6309_v48  ;;  %vm11468_vm3 = vmmov %vm11451_vm0 }
 0x344   :  { %v3160_v28 = vpop.f32.mrb[54].mxu0 }
 0x345   :  { %6411 = vst.msk [vmem:[#allocation12 + $0x68] sm:$0xff] %vm11465_vm5, %v6347_v10  ;;  %v3282_v34 = vpack.c.bf16 %v3257_v26, %v3256_v32  ;;  %v3161_v60 = vadd.f32 %v9233_v1, %v3160_v28  ;;  %v3162_v58 = vpop.f32.mrb[55].mxu0  ;;  %v3254_v11 = vmax.f32 %v3158_v42, 0.0  ;;  %vm11469_vm5 = vmmov %vm11451_vm0 }
 0x346   :  { %6413 = vst.msk [vmem:[#allocation12 + $0x78] sm:$0xff] %vm11466_vm10, %v6349_v62  ;;  %v3173_v15 = vpop.f32.mrb[4].mxu1  ;;  %vm11470_vm10 = vmmov %vm11451_vm0 }
 0x347   :  { %3298 = vst.msk [vmem:[#allocation2 + $0x68] sm:$0xff] %vm11467_vm4, %v3282_v34  ;;  %v3255_v56 = vmax.f32 %v3161_v60, 0.0  ;;  %v3174_v50 = vadd.f32 %v9233_v1, %v3173_v15  ;;  %v3175_v63 = vpop.f32.mrb[5].mxu1  ;;  %vm11471_vm4 = vmmov %vm11451_vm0 }
 0x348   :  { %v3176_v16 = vpop.f32.mrb[6].mxu1 }
 0x349   :  { %v3281_v21 = vpack.c.bf16 %v3255_v56, %v3254_v11  ;;  %v3177_v0 = vadd.f32 %v9233_v1, %v3176_v16  ;;  %v3178_v2 = vpop.f32.mrb[7].mxu1  ;;  %v3258_v14 = vmax.f32 %v3174_v50, 0.0 }
 0x34a   :  { %v6311_v38 = vld [vmem:[#allocation2 + $0x48] sm:$0xff] }
 0x34b   :  { %v6351_v39 = vunpack.c.l.bf16 %v6311_v38  ;;  %v6353_v13 = vunpack.c.h.bf16 %v6311_v38  ;;  %3297 = vst.msk [vmem:[#allocation2 + $0x58] sm:$0xff] %vm11451_vm0, %v3281_v21  ;;  %v3259_v19 = vmax.f32 %v3177_v0, 0.0  ;;  %6820 = vmatprep.mubr.msk.bf16.mxu0 %vm11468_vm3, %v6311_v38  ;;  %vm11473_vm3 = vmmov %vm11451_vm0 }
 0x34d   :  { %6415 = vst.msk [vmem:[#allocation12 + $0x88] sm:$0xff] %vm11469_vm5, %v6351_v39  ;;  %v3283_v22 = vpack.c.bf16 %v3259_v19, %v3258_v14  ;;  %vm11474_vm5 = vmmov %vm11451_vm0 }
 0x34e   :  { %6417 = vst.msk [vmem:[#allocation12 + $0x98] sm:$0xff] %vm11470_vm10, %v6353_v13  ;;  %v6315_v61 = vld [vmem:[#allocation2 + $0x68] sm:$0xff]  ;;  %v3181_v24 = vpop.f32.mrb[8].mxu1  ;;  %vm11475_vm10 = vmmov %vm11451_vm0 }
 0x34f   :  { %v6359_v48 = vunpack.c.l.bf16 %v6315_v61  ;;  %v6361_v32 = vunpack.c.h.bf16 %v6315_v61  ;;  %3299 = vst.msk [vmem:[#allocation2 + $0x78] sm:$0xff] %vm11471_vm4, %v3283_v22  ;;  %v3182_v23 = vadd.f32 %v9233_v1, %v3181_v24  ;;  %v3183_v10 = vpop.f32.mrb[9].mxu1  ;;  %vm11476_vm4 = vmmov %vm11451_vm0 }
 0x350   :  { %v3184_v62 = vpop.f32.mrb[10].mxu1 }
 0x351   :  { %6423 = vst.msk [vmem:[#allocation12 + $0xc8] sm:$0xff] %vm11451_vm0, %v6359_v48  ;;  %v3185_v26 = vadd.f32 %v9233_v1, %v3184_v62  ;;  %v3186_v42 = vpop.f32.mrb[11].mxu1  ;;  %v3260_v60 = vmax.f32 %v3182_v23, 0.0 }
 0x352   :  { %6425 = vst.msk [vmem:[#allocation12 + $0xd8] sm:$0xff] %vm11472_vm6, %v6361_v32  ;;  %v6313_v52 = vld [vmem:[#allocation2 + $0x58] sm:$0xff]  ;;  %vm11477_vm6 = vmmov %vm11451_vm0 }
 0x353   :  { %v6355_v28 = vunpack.c.l.bf16 %v6313_v52  ;;  %v6357_v34 = vunpack.c.h.bf16 %v6313_v52  ;;  %v3261_v58 = vmax.f32 %v3185_v26, 0.0  ;;  %6821 = vmatmul.mubr.msk.bf16.gmra.mrb[64].mxu0 %vm11473_vm3, %v6313_v52  ;;  %vm11478_vm3 = vmmov %vm11451_vm0 }
 0x354   :  { %6824 = vmatprep.mubr.msk.bf16.mxu0 %vm11474_vm5, %v6315_v61  ;;  %vm11479_vm5 = vmmov %vm11451_vm0 }
 0x355   :  { %6419 = vst.msk [vmem:[#allocation12 + $0xa8] sm:$0xff] %vm11475_vm10, %v6355_v28  ;;  %v3284_v15 = vpack.c.bf16 %v3261_v58, %v3260_v60  ;;  %vm11480_vm10 = vmmov %vm11451_vm0 }
 0x356   :  { %6421 = vst.msk [vmem:[#allocation12 + $0xb8] sm:$0xff] %vm11476_vm4, %v6357_v34  ;;  %v6317_v11 = vld [vmem:[#allocation2 + $0x78] sm:$0xff]  ;;  %v3189_v56 = vpop.f32.mrb[12].mxu1  ;;  %vm11481_vm4 = vmmov %vm11451_vm0 }
 0x357   :  { %v6363_v50 = vunpack.c.l.bf16 %v6317_v11  ;;  %v6365_v63 = vunpack.c.h.bf16 %v6317_v11  ;;  %3300 = vst.msk [vmem:[#allocation2 + $0x88] sm:$0xff] %vm11477_vm6, %v3284_v15  ;;  %v3190_v16 = vadd.f32 %v9233_v1, %v3189_v56  ;;  %v3191_v21 = vpop.f32.mrb[13].mxu1  ;;  %vm11482_vm6 = vmmov %vm11451_vm0 }
 0x358   :  { %v3192_v0 = vpop.f32.mrb[14].mxu1 }
 0x359   :  { %6427 = vst.msk [vmem:[#allocation12 + $0xe8] sm:$0xff] %vm11451_vm0, %v6363_v50  ;;  %v3193_v2 = vadd.f32 %v9233_v1, %v3192_v0  ;;  %v3194_v38 = vpop.f32.mrb[15].mxu1  ;;  %v3262_v39 = vmax.f32 %v3190_v16, 0.0 }
 0x35a   :  { %6429 = vst.msk [vmem:[#allocation12 + $0xf8] sm:$0xff] %vm11478_vm3, %v6365_v63  ;;  %vm11483_vm3 = vmmov %vm11451_vm0 }
 0x35b   :  { %v3263_v13 = vmax.f32 %v3193_v2, 0.0  ;;  %6825 = vmatmul.mubr.msk.bf16.gmra.mrb[68].mxu0 %vm11479_vm5, %v6317_v11  ;;  %vm11484_vm5 = vmmov %vm11451_vm0 }
 0x35d   :  { %v3285_v14 = vpack.c.bf16 %v3263_v13, %v3262_v39 }
 0x35e   :  { %v6319_v19 = vld [vmem:[#allocation2 + $0x88] sm:$0xff]  ;;  %v3197_v22 = vpop.f32.mrb[16].mxu1 }
 0x35f   :  { %v6367_v61 = vunpack.c.l.bf16 %v6319_v19  ;;  %v6369_v24 = vunpack.c.h.bf16 %v6319_v19  ;;  %3301 = vst.msk [vmem:[#allocation2 + $0x98] sm:$0xff] %vm11480_vm10, %v3285_v14  ;;  %v3198_v48 = vadd.f32 %v9233_v1, %v3197_v22  ;;  %v3199_v32 = vpop.f32.mrb[17].mxu1  ;;  %6828 = vmatprep.mubr.msk.bf16.mxu0 %vm11481_vm4, %v6319_v19  ;;  %vm11485_vm10 = vmmov %vm11451_vm0 }
 0x360   :  { %v3200_v23 = vpop.f32.mrb[18].mxu1  ;;  %vm11486_vm4 = vmmov %vm11451_vm0 }
 0x361   :  { %6431 = vst.msk [vmem:[#allocation12 + $0x108] sm:$0xff] %vm11482_vm6, %v6367_v61  ;;  %v3201_v10 = vadd.f32 %v9233_v1, %v3200_v23  ;;  %v3202_v62 = vpop.f32.mrb[19].mxu1  ;;  %v3264_v26 = vmax.f32 %v3198_v48, 0.0  ;;  %vm11487_vm6 = vmmov %vm11451_vm0 }
 0x362   :  { %6433 = vst.msk [vmem:[#allocation12 + $0x118] sm:$0xff] %vm11451_vm0, %v6369_v24 }
 0x363   :  { %v3265_v42 = vmax.f32 %v3201_v10, 0.0 }
 0x365   :  { %v3286_v52 = vpack.c.bf16 %v3265_v42, %v3264_v26 }
 0x366   :  { %v6321_v28 = vld [vmem:[#allocation2 + $0x98] sm:$0xff]  ;;  %v3205_v34 = vpop.f32.mrb[20].mxu1 }
 0x367   :  { %v6371_v60 = vunpack.c.l.bf16 %v6321_v28  ;;  %v6373_v58 = vunpack.c.h.bf16 %v6321_v28  ;;  %3302 = vst.msk [vmem:[#allocation2 + $0xa8] sm:$0xff] %vm11483_vm3, %v3286_v52  ;;  %v3206_v15 = vadd.f32 %v9233_v1, %v3205_v34  ;;  %v3207_v11 = vpop.f32.mrb[21].mxu1  ;;  %6829 = vmatmul.mubr.msk.bf16.gmra.mrb[72].mxu0 %vm11484_vm5, %v6321_v28  ;;  %vm11488_vm3 = vmmov %vm11451_vm0 }
 0x368   :  { %v3208_v56 = vpop.f32.mrb[22].mxu1  ;;  %vm11489_vm5 = vmmov %vm11451_vm0 }
 0x369   :  { %6435 = vst.msk [vmem:[#allocation12 + $0x128] sm:$0xff] %vm11485_vm10, %v6371_v60  ;;  %v3209_v50 = vadd.f32 %v9233_v1, %v3208_v56  ;;  %v3210_v63 = vpop.f32.mrb[23].mxu1  ;;  %v3266_v16 = vmax.f32 %v3206_v15, 0.0  ;;  %vm11490_vm10 = vmmov %vm11451_vm0 }
 0x36a   :  { %6437 = vst.msk [vmem:[#allocation12 + $0x138] sm:$0xff] %vm11486_vm4, %v6373_v58  ;;  %vm11491_vm4 = vmmov %vm11451_vm0 }
 0x36b   :  { %v3267_v21 = vmax.f32 %v3209_v50, 0.0 }
 0x36d   :  { %v3287_v0 = vpack.c.bf16 %v3267_v21, %v3266_v16 }
 0x36e   :  { %v6323_v2 = vld [vmem:[#allocation2 + $0xa8] sm:$0xff]  ;;  %v3213_v38 = vpop.f32.mrb[24].mxu1 }
 0x36f   :  { %v6375_v39 = vunpack.c.l.bf16 %v6323_v2  ;;  %v6377_v13 = vunpack.c.h.bf16 %v6323_v2  ;;  %3303 = vst.msk [vmem:[#allocation2 + $0xb8] sm:$0xff] %vm11487_vm6, %v3287_v0  ;;  %v3214_v14 = vadd.f32 %v9233_v1, %v3213_v38  ;;  %v3215_v19 = vpop.f32.mrb[25].mxu1  ;;  %6832 = vmatprep.mubr.msk.bf16.mxu0 %vm11451_vm0, %v6323_v2  ;;  %vm11492_vm6 = vmmov %vm11451_vm0 }
 0x370   :  { %v3216_v22 = vpop.f32.mrb[26].mxu1 }
 0x371   :  { %6439 = vst.msk [vmem:[#allocation12 + $0x148] sm:$0xff] %vm11488_vm3, %v6375_v39  ;;  %v3217_v61 = vadd.f32 %v9233_v1, %v3216_v22  ;;  %v3218_v24 = vpop.f32.mrb[27].mxu1  ;;  %v3268_v48 = vmax.f32 %v3214_v14, 0.0  ;;  %vm11493_vm3 = vmmov %vm11451_vm0 }
 0x372   :  { %6441 = vst.msk [vmem:[#allocation12 + $0x158] sm:$0xff] %vm11489_vm5, %v6377_v13  ;;  %vm11494_vm5 = vmmov %vm11451_vm0 }
 0x373   :  { %v3269_v32 = vmax.f32 %v3217_v61, 0.0 }
 0x375   :  { %v3288_v23 = vpack.c.bf16 %v3269_v32, %v3268_v48 }
 0x376   :  { %v6325_v10 = vld [vmem:[#allocation2 + $0xb8] sm:$0xff]  ;;  %v3221_v62 = vpop.f32.mrb[28].mxu1 }
 0x377   :  { %v6379_v26 = vunpack.c.l.bf16 %v6325_v10  ;;  %v6381_v42 = vunpack.c.h.bf16 %v6325_v10  ;;  %3304 = vst.msk [vmem:[#allocation2 + $0xc8] sm:$0xff] %vm11490_vm10, %v3288_v23  ;;  %v3222_v52 = vadd.f32 %v9233_v1, %v3221_v62  ;;  %v3223_v28 = vpop.f32.mrb[29].mxu1  ;;  %6833 = vmatmul.mubr.msk.bf16.gmra.mrb[76].mxu0 %vm11491_vm4, %v6325_v10  ;;  %vm11495_vm10 = vmmov %vm11451_vm0 }
 0x378   :  { %v3224_v34 = vpop.f32.mrb[30].mxu1  ;;  %vm11496_vm4 = vmmov %vm11451_vm0 }
 0x379   :  { %6443 = vst.msk [vmem:[#allocation12 + $0x168] sm:$0xff] %vm11492_vm6, %v6379_v26  ;;  %v3225_v60 = vadd.f32 %v9233_v1, %v3224_v34  ;;  %v3226_v58 = vpop.f32.mrb[31].mxu1  ;;  %v3270_v15 = vmax.f32 %v3222_v52, 0.0  ;;  %vm11497_vm6 = vmmov %vm11451_vm0 }
 0x37a   :  { %6445 = vst.msk [vmem:[#allocation12 + $0x178] sm:$0xff] %vm11451_vm0, %v6381_v42 }
 0x37b   :  { %v3271_v11 = vmax.f32 %v3225_v60, 0.0 }
 0x37d   :  { %v3289_v56 = vpack.c.bf16 %v3271_v11, %v3270_v15 }
 0x37e   :  { %v6327_v50 = vld [vmem:[#allocation2 + $0xc8] sm:$0xff]  ;;  %v3229_v63 = vpop.f32.mrb[32].mxu1 }
 0x37f   :  { %v6383_v16 = vunpack.c.l.bf16 %v6327_v50  ;;  %v6385_v21 = vunpack.c.h.bf16 %v6327_v50  ;;  %3305 = vst.msk [vmem:[#allocation2 + $0xd8] sm:$0xff] %vm11493_vm3, %v3289_v56  ;;  %v3230_v0 = vadd.f32 %v9233_v1, %v3229_v63  ;;  %v3231_v2 = vpop.f32.mrb[33].mxu1  ;;  %6836 = vmatprep.mubr.msk.bf16.mxu0 %vm11494_vm5, %v6327_v50  ;;  %vm11498_vm3 = vmmov %vm11451_vm0  ;;  %v6946_v63 = vld [vmem:[%s10888_s6 + $0x8] sm:$0xff]  }
 0x380   :  { %v3232_v38 = vpop.f32.mrb[34].mxu1  ;;  %vm11499_vm5 = vmmov %vm11451_vm0  ;;  %v6950_v2 = vld [vmem:[%s10888_s6 + $0x28] sm:$0xff]  }
 0x381   :  { %6447 = vst.msk [vmem:[#allocation12 + $0x188] sm:$0xff] %vm11495_vm10, %v6383_v16  ;;  %v3233_v39 = vadd.f32 %v9233_v1, %v3232_v38  ;;  %v3234_v13 = vpop.f32.mrb[35].mxu1  ;;  %v3272_v14 = vmax.f32 %v3230_v0, 0.0  ;;  %vm11500_vm10 = vmmov %vm11451_vm0  ;;  %v6947_v16 = vld [vmem:[%s10888_s6 + $0x10] sm:$0xff]   ;;  %v6949_v0 = vld [vmem:[%s10888_s6 + $0x20] sm:$0xff]  }
 0x382   :  { %6449 = vst.msk [vmem:[#allocation12 + $0x198] sm:$0xff] %vm11496_vm4, %v6385_v21  ;;  %vm11501_vm4 = vmmov %vm11451_vm0  ;;  %v6948_v21 = vld [vmem:[%s10888_s6 + $0x18] sm:$0xff]   ;;  %v6951_v38 = vld [vmem:[%s10888_s6 + $0x30] sm:$0xff]  }
 0x383   :  { %v3273_v19 = vmax.f32 %v3233_v39, 0.0  ;;  %v9358_v39 = vld [vmem:[#allocation9] ss:$0 sm:$0xff]  ;;  %v6952_v13 = vld [vmem:[%s10888_s6 + $0x38] sm:$0xff]  }
 0x385   :  { %v3290_v22 = vpack.c.bf16 %v3273_v19, %v3272_v14 }
 0x386   :  { %v6329_v61 = vld [vmem:[#allocation2 + $0xd8] sm:$0xff]  ;;  %v3237_v24 = vpop.f32.mrb[36].mxu1 }
 0x387   :  { %v6387_v48 = vunpack.c.l.bf16 %v6329_v61  ;;  %v6389_v32 = vunpack.c.h.bf16 %v6329_v61  ;;  %3306 = vst.msk [vmem:[#allocation2 + $0xe8] sm:$0xff] %vm11497_vm6, %v3290_v22  ;;  %v3238_v23 = vadd.f32 %v9233_v1, %v3237_v24  ;;  %v3239_v10 = vpop.f32.mrb[37].mxu1  ;;  %6837 = vmatmul.mubr.msk.bf16.gmra.mrb[80].mxu0 %vm11451_vm0, %v6329_v61  ;;  %vm11502_vm6 = vmmov %vm11451_vm0 }
 0x388   :  { %v3240_v62 = vpop.f32.mrb[38].mxu1 }
 0x389   :  { %6451 = vst.msk [vmem:[#allocation12 + $0x1a8] sm:$0xff] %vm11498_vm3, %v6387_v48  ;;  %v3241_v26 = vadd.f32 %v9233_v1, %v3240_v62  ;;  %v3242_v42 = vpop.f32.mrb[39].mxu1  ;;  %v3274_v52 = vmax.f32 %v3238_v23, 0.0  ;;  %vm11503_vm3 = vmmov %vm11451_vm0  ;;  %v6945_v1 = vld [vmem:[%s10888_s6] sm:$0xff]  }
 0x38a   :  { %6453 = vst.msk [vmem:[#allocation12 + $0x1b8] sm:$0xff] %vm11499_vm5, %v6389_v32  ;;  %vm11504_vm5 = vmmov %vm11451_vm0  ;;  %4484 = vmatpush1.bf16.msra.mxu0 %v6945_v1  ;;  %v6953_v23 = vld [vmem:[%s10888_s6 + $0x40] sm:$0xff]  }
 0x38b   :  { %v3275_v28 = vmax.f32 %v3241_v26, 0.0  ;;  %4485 = vmatprep.subr.bf16.mxu0 %v11339_v41 }
 0x38d   :  { %v3291_v34 = vpack.c.bf16 %v3275_v28, %v3274_v52 }
 0x38e   :  { %v6331_v60 = vld [vmem:[#allocation2 + $0xe8] sm:$0xff]  ;;  %4486 = vmatpush1.bf16.msra.mxu0 %v6946_v63 }
 0x38f   :  { %v6391_v58 = vunpack.c.l.bf16 %v6331_v60  ;;  %v6393_v15 = vunpack.c.h.bf16 %v6331_v60  ;;  %3307 = vst.msk [vmem:[#allocation2 + $0xf8] sm:$0xff] %vm11500_vm10, %v3291_v34  ;;  %6840 = vmatprep.mubr.msk.bf16.mxu0 %vm11501_vm4, %v6331_v60  ;;  %4487 = vmatprep.subr.bf16.mxu0 %v11339_v41  ;;  %v11508_v63 = vld [vmem:[#allocation24_spill] sm:$0xff] }
 0x390   :  { %vm11509_vm4 = vcmp.ne.s16.totalorder %v11508_v63, 0 }
 0x391   :  { %6455 = vst.msk [vmem:[#allocation12 + $0x1c8] sm:$0xff] %vm11502_vm6, %v6391_v58  ;;  %v6954_v58 = vld [vmem:[%s10888_s6 + $0x48] sm:$0xff]  }
 0x392   :  { %6457 = vst.msk [vmem:[#allocation12 + $0x1d8] sm:$0xff] %vm11451_vm0, %v6393_v15  ;;  %4488 = vmatpush1.bf16.msra.mxu0 %v6947_v16 }
 0x393   :  { %4489 = vmatprep.subr.bf16.mxu0 %v11339_v41 }
 0x396   :  { %v6333_v11 = vld [vmem:[#allocation2 + $0xf8] sm:$0xff]  ;;  %4490 = vmatpush1.bf16.msra.mxu0 %v6948_v21 }
 0x397   :  { %v6395_v56 = vunpack.c.l.bf16 %v6333_v11  ;;  %v6397_v50 = vunpack.c.h.bf16 %v6333_v11  ;;  %6841 = vmatmul.mubr.msk.bf16.gmra.mrb[84].mxu0 %vm11503_vm3, %v6333_v11  ;;  %4491 = vmatprep.subr.bf16.mxu0 %v11339_v41  ;;  %v11510_v21 = vld [vmem:[#allocation26_spill] sm:$0xff] }
 0x398   :  { %vm11511_vm6 = vcmp.ne.s16.totalorder %v11510_v21, 0 }
 0x399   :  { %6459 = vst.msk [vmem:[#allocation12 + $0x1e8] sm:$0xff] %vm11504_vm5, %v6395_v56  ;;  %vm11516_vm5 = vcmask 1046528  }
 0x39a   :  { %6461 = vst.msk [vmem:[#allocation12 + $0x1f8] sm:$0xff] %vm11505_vm11, %v6397_v50  ;;  %4492 = vmatpush1.bf16.msra.mxu0 %v6949_v0  ;;  %vm11506_vm11 = vcmask 1040384  }
 0x39b   :  { %4493 = vmatprep.subr.bf16.mxu0 %v11339_v41  ;;  %vm11507_vm10 = vmmov %vm11506_vm11 }
 0x39e   :  { %4494 = vmatpush1.bf16.msra.mxu0 %v6950_v2 }
 0x39f   :  { %4495 = vmatprep.subr.bf16.mxu0 %v11339_v41 }
 0x3a2   :  { %4496 = vmatpush1.bf16.msra.mxu0 %v6951_v38 }
 0x3a3   :  { %4497 = vmatprep.subr.bf16.mxu0 %v11339_v41 }
 0x3a6   :  { %4498 = vmatpush1.bf16.msra.mxu0 %v6952_v13  ;;  %v11512_v13 = vld [vmem:[#allocation27_spill] sm:$0xff] }
 0x3a7   :  { %4499 = vmatprep.subr.bf16.mxu0 %v11339_v41  ;;  %vm11513_vm0 = vcmp.ne.s16.totalorder %v11512_v13, 0 }
 0x3aa   :  { %4500 = vmatpush1.bf16.msra.mxu0 %v6953_v23 }
 0x3ab   :  { %4501 = vmatprep.subr.bf16.mxu0 %v11339_v41 }
 0x3ae   :  { %4502 = vmatpush1.bf16.msra.mxu0 %v6954_v58 }
 0x406   :  { %v6814_v14 = vpop.f32.mrb[56].mxu0 }
 0x407   :  { %v3454_v19 = vadd.f32 %v6814_v14, %v9358_v39  ;;  %v3445_v22 = vpop.f32.mrb[57].mxu0 }
 0x408   :  { %v3446_v61 = vadd.f32 %v9358_v39, %v3445_v22  ;;  %v6815_v24 = vpop.f32.mrb[58].mxu0 }
 0x409   :  { %v3457_v48 = vadd.f32 %v6815_v24, %v9358_v39  ;;  %v3448_v32 = vpop.f32.mrb[59].mxu0  ;;  %v3574_v62 = vmax.f32 %v3454_v19, 0.0  ;;  %v11514_v19 = vld [vmem:[#allocation32_spill] sm:$0xff] }
 0x40a   :  { %v3449_v10 = vadd.f32 %v9358_v39, %v3448_v32  ;;  %v3572_v42 = vmax.f32 %v3446_v61, 0.0  ;;  %vm11515_vm3 = vcmp.ne.s16.totalorder %v11514_v19, 0 }
 0x40b   :  { %v3575_v26 = vmax.f32 %v3457_v48, 0.0 }
 0x40c   :  { %v3573_v52 = vmax.f32 %v3449_v10, 0.0  ;;  %v11518_v10 = vld [vmem:[#allocation23_spill] sm:$0xff] }
 0x40d   :  { %v3605_v28 = vpack.c.bf16 %v3575_v26, %v3574_v62  ;;  %v11520_v26 = vld [vmem:[#allocation33_spill] sm:$0xff] }
 0x40e   :  { %v3604_v34 = vpack.c.bf16 %v3573_v52, %v3572_v42 }
 0x40f   :  { %v3637_v60 = vrot.slane %v3605_v28, 7 }
 0x410   :  { %v3636_v15 = vrot.slane %v3604_v34, 7 }
 0x412   :  { %v9377_v11 = vsel %vm11506_vm11, %v3636_v15, %v3637_v60  ;;  %v9380_v56 = vsel %vm11507_vm10, 0, %v3636_v15  ;;  %vm11517_vm11 = vcmask 1045504   ;;  %vm11519_vm10 = vcmp.ne.s16.totalorder %v11518_v10, 0 }
 0x413   :  { %v3921_v50 = vrot.slane %v9380_v56, 1  ;;  %v3922_v1 = vrot.slane %v9377_v11, 1  ;;  %v3738_v16 = vsel %vm11509_vm4, %v9380_v56, 0  ;;  %v9390_v0 = vsel %vm11511_vm6, %v9377_v11, 0 }
 0x414   :  { %v4187_v2 = vrot.slane %v3738_v16, 2  ;;  %v11092_v38 = vrot.slane %v9390_v0, 2  ;;  %v3704_v14 = vsel %vm11513_vm0, %v9380_v56, 0  ;;  %v3705_v22 = vsel %vm11515_vm3, %v9377_v11, 0 }
 0x415   :  { %v3923_v61 = vsel %vm11516_vm5, %v3921_v50, %v3922_v1  ;;  %v3758_v24 = vshll.u32 %v3704_v14, 16  ;;  %v3763_v48 = vshll.u32 %v3705_v22, 16  ;;  %v3721_v62 = vsel %vm11519_vm10, %v9380_v56, 0 }
 0x416   :  { %v6818_v32 = vpop.f32.mrb[60].mxu0  ;;  %3954 = vrot.lane.b32.xlu1 %v3923_v61, %s7116_s5  ;;  %v4189_v23 = vsel %vm11517_vm11, %v4187_v2, %v11092_v38  ;;  %vm11521_vm4 = vcmp.ne.s16.totalorder %v11520_v26, 0  ;;  %vm11522_vm6 = vcmask 261120   ;;  %v3756_v34 = vshrl.u32 %v3704_v14, 16 }
 0x417   :  { %v3722_v42 = vsel %vm11521_vm4, %v9377_v11, 0  ;;  %v3470_v52 = vadd.f32 %v6818_v32, %v9358_v39  ;;  %v3461_v28 = vpop.f32.mrb[61].mxu0  ;;  %6654 = vmatprep.mubr.msk.bf16.mxu0 %vm11522_vm6, %v4189_v23  ;;  %v3760_v58 = vrot.slane %v3758_v24, 1  ;;  %v3987_v15 = vshrl.u32 %v3721_v62, 16 }
 0x418   :  { %v3462_v50 = vadd.f32 %v9358_v39, %v3461_v28  ;;  %v6819_v16 = vpop.f32.mrb[62].mxu0  ;;  %v3990_v2 = vshll.u32 %v3721_v62, 16  ;;  %v3995_v61 = vshrl.u32 %v3722_v42, 16  ;;  %v3998_v38 = vshll.u32 %v3722_v42, 16 }
 0x419   :  { %v3473_v10 = vadd.f32 %v6819_v16, %v9358_v39  ;;  %v3464_v19 = vpop.f32.mrb[63].mxu0  ;;  %v3761_v13 = vor.u32 %v3760_v58, %v3756_v34  ;;  %v3765_v26 = vrot.slane %v3763_v48, 1  ;;  %v3989_v21 = vrot.slane %v3987_v15, 1 }
 0x41a   :  { %v3465_v32 = vadd.f32 %v9358_v39, %v3464_v19  ;;  %v3992_v63 = vrot.slane %v3990_v2, 2  ;;  %v3997_v41 = vrot.slane %v3995_v61, 1  ;;  %v3578_v23 = vmax.f32 %v3470_v52, 0.0 }
 0x41b   :  { %v3579_v14 = vmax.f32 %v3473_v10, 0.0  ;;  %vm11523_vm0 = vsmask.f32 7424  ;;  %v4000_v7 = vrot.slane %v3998_v38, 2  ;;  %v3576_v28 = vmax.f32 %v3462_v50, 0.0 }
 0x41c   :  { %v3766_v24 = vsel %vm11523_vm0, %v3761_v13, %v3765_v26  ;;  %v3577_v49 = vmax.f32 %v3465_v32, 0.0  ;;  %v3993_v62 = vor.u32 %v3992_v63, %v3989_v21  ;;  %vm11524_vm3 = vsmask.f32 6400  ;;  %v11529_v21 = vld [vmem:[#allocation36_spill] sm:$0xff] }
 0x41d   :  { %3887 = vrot.lane.b32.xlu0 %v3766_v24, %s7123_s2  ;;  %v9417_v42 = vpack.c.bf16 %v3579_v14, %v3578_v23  ;;  %v4001_v16 = vor.u32 %v4000_v7, %v3997_v41  ;;  %v3767_v10 = vshrl.u32 %v3705_v22, 16  ;;  %vm11525_vm5 = vcmask 1040384   ;;  %v11534_v23 = vld [vmem:[#allocation37_spill] sm:$0xff] }
 0x41e   :  { %v3606_v34 = vpack.c.bf16 %v3577_v49, %v3576_v28  ;;  %vm11526_vm11 = vmmov %vm11525_vm5  ;;  %v11527_v49 = vld [vmem:[#allocation34_spill] sm:$0xff]  ;;  %vm11530_vm4 = vcmp.ne.s16.totalorder %v11529_v21, 0  ;;  %vm11533_vm0 = vcmask 1046528  }
 0x41f   :  { %v11098_v48 = vrot.slane %v9417_v42, 7  ;;  %v4002_v19 = vsel %vm11524_vm3, %v3993_v62, %v4001_v16  ;;  %v3769_v63 = vor.u32 %v3767_v10, %v3765_v26  ;;  %vm11528_vm10 = vcmp.ne.s16.totalorder %v11527_v49, 0 }
 0x420   :  { %v3639_v58 = vrot.slane %v3606_v34, 7  ;;  %vm11535_vm3 = vcmp.ne.s16.totalorder %v11534_v23, 0 }
 0x421   :  { %4138 = vrot.lane.b32.xlu0 %v4002_v19, %s7124_s27 }
 0x422   :  { %v9423_v13 = vsel %vm11525_vm5, %v3637_v60, %v3639_v58  ;;  %v9428_v38 = vsel %vm11526_vm11, %v3639_v58, %v11098_v48  ;;  %v11531_v60 = vld [vmem:[#allocation35_spill] sm:$0xff]  ;;  %vm11536_vm5 = vmmov %vm11533_vm0  ;;  %vm11537_vm11 = vsmask.f32 7424 }
 0x423   :  { %v3924_v41 = vrot.slane %v9423_v13, 1  ;;  %v3706_v7 = vsel %vm11528_vm10, %v9423_v13, 0  ;;  %v9437_v52 = vsel %vm11530_vm4, %v9428_v38, 0  ;;  %vm11532_vm6 = vcmp.ne.s16.totalorder %v11531_v60, 0  ;;  %vm11538_vm10 = vmmov %vm11537_vm11 }
 0x424   :  { %v3723_v22 = vsel %vm11532_vm6, %v9423_v13, 0  ;;  %v3771_v15 = vshll.u32 %v3706_v7, 16  ;;  %v3775_v50 = vshrl.u32 %v3706_v7, 16  ;;  %v3779_v2 = vshll.u32 %v9437_v52, 16 }
 0x425   :  { %v4004_v26 = vshrl.u32 %v3723_v22, 16  ;;  %v3925_v61 = vsel %vm11533_vm0, %v3922_v1, %v3924_v41  ;;  %v4007_v32 = vshll.u32 %v3723_v22, 16  ;;  %v3724_v14 = vsel %vm11535_vm3, %v9428_v38, 0 }
 0x426   :  { %v3926_v24 = vrot.slane %v9428_v38, 1  ;;  %3956 = vrot.lane.b32.xlu0 %v3925_v61, %s7116_s5  ;;  %v6822_v28 = vpop.f32.mrb[64].mxu0  ;;  %v3773_v62 = vrot.slane %v3771_v15, 1  ;;  %v3781_v34 = vrot.slane %v3779_v2, 1  ;;  %v4013_v58 = vshrl.u32 %v3724_v14, 16 }
 0x427   :  { %v4006_v19 = vrot.slane %v4004_v26, 1  ;;  %v3486_v10 = vadd.f32 %v6822_v28, %v9358_v39  ;;  %v3477_v7 = vpop.f32.mrb[65].mxu0  ;;  %v4009_v48 = vrot.slane %v4007_v32, 2  ;;  %v4016_v60 = vshll.u32 %v3724_v14, 16 }
 0x428   :  { %v3927_v1 = vsel %vm11536_vm5, %v3924_v41, %v3926_v24  ;;  %v3478_v22 = vadd.f32 %v9358_v39, %v3477_v7  ;;  %v6823_v23 = vpop.f32.mrb[66].mxu0  ;;  %v3774_v21 = vsel %vm11537_vm11, %v3769_v63, %v3773_v62  ;;  %v3777_v61 = vor.u32 %v3775_v50, %v3773_v62 }
 0x429   :  { %v4015_v49 = vrot.slane %v4013_v58, 1  ;;  %v3489_v15 = vadd.f32 %v6823_v23, %v9358_v39  ;;  %3889 = vrot.lane.b32.xlu1 %v3774_v21, %s7123_s2  ;;  %v3480_v2 = vpop.f32.mrb[67].mxu0  ;;  %v4010_v26 = vor.u32 %v4009_v48, %v4006_v19  ;;  %v4018_v28 = vrot.slane %v4016_v60, 2 }
 0x42a   :  { %v3582_v32 = vmax.f32 %v3486_v10, 0.0  ;;  %v3481_v14 = vadd.f32 %v9358_v39, %v3480_v2  ;;  %v3782_v47 = vsel %vm11538_vm10, %v3777_v61, %v3781_v34  ;;  %vm11539_vm4 = vsmask.f32 6400 }
 0x42b   :  { %v3583_v41 = vmax.f32 %v3489_v15, 0.0  ;;  %3891 = vrot.lane.b32.xlu0 %v3782_v47, %s7123_s2  ;;  %v4011_v7 = vsel %vm11539_vm4, %v4001_v16, %v4010_v26  ;;  %v9461_v63 = vor.u32 %v4018_v28, %v4015_v49  ;;  %vm11540_vm6 = vcmp.ne.s16.totalorder %v8940_v46, 0  ;;  %vm11541_vm0 = vmmov %vm11539_vm4 }
 0x42c   :  { %v3740_v50 = vsel %vm11540_vm6, %v9423_v13, 0  ;;  %v3580_v21 = vmax.f32 %v3478_v22, 0.0  ;;  %v3581_v23 = vmax.f32 %v3481_v14, 0.0  ;;  %vm11542_vm3 = vcmp.ne.s16.totalorder %v8967_v5, 0 }
 0x42d   :  { %v4190_v48 = vrot.slane %v3740_v50, 2  ;;  %v3609_v60 = vpack.c.bf16 %v3583_v41, %v3582_v32  ;;  %4140 = vrot.lane.b32.xlu1 %v4011_v7, %s7124_s27  ;;  %v4020_v62 = vsel %vm11541_vm0, %v4010_v26, %v9461_v63  ;;  %v9472_v47 = vsel %vm11542_vm3, %v9428_v38, 0 }
 0x42e   :  { %v3608_v16 = vpack.c.bf16 %v3581_v23, %v3580_v21  ;;  %v6826_v49 = vpop.f32.mrb[68].mxu0  ;;  %v11543_v19 = vrot.slane %v9390_v0, 2  ;;  %vm11544_vm5 = vcmask 1045504   ;;  %v11101_v10 = vrot.slane %v9472_v47, 2 }
 0x42f   :  { %v3645_v22 = vrot.slane %v3609_v60, 7  ;;  %v3502_v61 = vadd.f32 %v6826_v49, %v9358_v39  ;;  %4142 = vrot.lane.b32.xlu0 %v4020_v62, %s7124_s27  ;;  %v3493_v15 = vpop.f32.mrb[69].mxu0  ;;  %v3783_v2 = vshrl.u32 %v9437_v52, 16  ;;  %vm11545_vm11 = vmmov %vm11544_vm5  ;;  %v11546_v21 = vrot.slane %v9417_v42, 7  ;;  %v11549_v49 = vld [vmem:[#allocation38_spill] sm:$0xff] }
 0x430   :  { %v9477_v58 = vsel %vm11544_vm5, %v11543_v19, %v4190_v48  ;;  %v3643_v26 = vrot.slane %v3608_v16, 7  ;;  %v3494_v28 = vadd.f32 %v9358_v39, %v3493_v15  ;;  %v6827_v32 = vpop.f32.mrb[70].mxu0  ;;  %v9487_v0 = vsel %vm11545_vm11, %v4190_v48, %v11101_v10 }
 0x431   :  { %v3586_v14 = vmax.f32 %v3502_v61, 0.0  ;;  %v3505_v41 = vadd.f32 %v6827_v32, %v9358_v39  ;;  %3958 = vrot.lane.b32.xlu1 %v3927_v1, %s7116_s5  ;;  %v3496_v7 = vpop.f32.mrb[71].mxu0  ;;  %v3785_v50 = vor.u32 %v3783_v2, %v3781_v34  ;;  %vm11547_vm10 = vcmask 1040384   ;;  %v11551_v34 = vld [vmem:[#allocation48_spill] sm:$0xff]  ;;  %v11554_v32 = vld [vmem:[#allocation46_spill] sm:$0xff] }
 0x432   :  { %v9494_v52 = vsel %vm11547_vm10, %v11546_v21, %v3643_v26  ;;  %vm11548_vm4 = vmmov %vm11547_vm10  ;;  %v3584_v60 = vmax.f32 %v3494_v28, 0.0  ;;  %v3497_v62 = vadd.f32 %v9358_v39, %v3496_v7  ;;  %vm11550_vm6 = vcmp.ne.s16.totalorder %v11549_v49, 0  ;;  %v11556_v7 = vld [vmem:[#allocation47_spill] sm:$0xff] }
 0x433   :  { %v9497_v23 = vsel %vm11548_vm4, %v3643_v26, %v3645_v22  ;;  %v3587_v48 = vmax.f32 %v3505_v41, 0.0  ;;  %v3928_v16 = vrot.slane %v9494_v52, 1  ;;  %v3708_v1 = vsel %vm11550_vm6, %v9494_v52, 0  ;;  %vm11559_vm6 = vmmov %vm11548_vm4 }
 0x434   :  { %vm11552_vm0 = vcmp.ne.s16.totalorder %v11551_v34, 0  ;;  %v3585_v19 = vmax.f32 %v3497_v62, 0.0  ;;  %v3787_v61 = vshll.u32 %v3708_v1, 16  ;;  %v3791_v15 = vshrl.u32 %v3708_v1, 16 }
 0x435   :  { %v3709_v42 = vsel %vm11552_vm0, %v9497_v23, 0  ;;  %v9507_v26 = vpack.c.bf16 %v3587_v48, %v3586_v14  ;;  %vm11553_vm3 = vcmask 1046528   ;;  %vm11555_vm5 = vcmp.ne.s16.totalorder %v11554_v32, 0 }
 0x436   :  { %v3795_v2 = vshll.u32 %v3709_v42, 16  ;;  %v3929_v28 = vsel %vm11553_vm3, %v3926_v24, %v3928_v16  ;;  %v3725_v41 = vsel %vm11555_vm5, %v9494_v52, 0  ;;  %vm11557_vm11 = vcmp.ne.s16.totalorder %v11556_v7, 0 }
 0x437   :  { %v3726_v21 = vsel %vm11557_vm11, %v9497_v23, 0  ;;  %v3610_v10 = vpack.c.bf16 %v3585_v19, %v3584_v60  ;;  %3960 = vrot.lane.b32.xlu0 %v3929_v28, %s7116_s5  ;;  %v3789_v62 = vrot.slane %v3787_v61, 1  ;;  %v4022_v34 = vshrl.u32 %v3725_v41, 16 }
 0x438   :  { %v3797_v1 = vrot.slane %v3795_v2, 1  ;;  %v11108_v14 = vrot.slane %v9507_v26, 7  ;;  %v4025_v48 = vshll.u32 %v3725_v41, 16  ;;  %v4031_v49 = vshrl.u32 %v3726_v21, 16 }
 0x439   :  { %v4034_v5 = vshll.u32 %v3726_v21, 16  ;;  %v3647_v24 = vrot.slane %v3610_v10, 7  ;;  %vm11558_vm10 = vsmask.f32 7424  ;;  %v3793_v32 = vor.u32 %v3791_v15, %v3789_v62 }
 0x43a   :  { %v3790_v46 = vsel %vm11558_vm10, %v3785_v50, %v3789_v62  ;;  %v4024_v36 = vrot.slane %v4022_v34, 1  ;;  %v4027_v7 = vrot.slane %v4025_v48, 2  ;;  %v4033_v43 = vrot.slane %v4031_v49, 1  ;;  %v6830_v10 = vpop.f32.mrb[72].mxu0  ;;  %vm11560_vm0 = vmmov %vm11558_vm10  ;;  %v11561_v62 = vld [vmem:[#allocation49_spill] sm:$0xff] }
 0x43b   :  { %3893 = vrot.lane.b32.xlu1 %v3790_v46, %s7123_s2  ;;  %v4036_v60 = vrot.slane %v4034_v5, 2  ;;  %v3930_v19 = vrot.slane %v9497_v23, 1  ;;  %v9524_v61 = vsel %vm11548_vm4, %v3645_v22, %v3647_v24  ;;  %v9529_v2 = vsel %vm11559_vm6, %v3647_v24, %v11108_v14  ;;  %v3509_v46 = vpop.f32.mrb[73].mxu0  ;;  %vm11565_vm4 = vmmov %vm11553_vm3 }
 0x43c   :  { %v3798_v50 = vsel %vm11560_vm0, %v3793_v32, %v3797_v1  ;;  %v3799_v15 = vshrl.u32 %v3709_v42, 16  ;;  %v3518_v34 = vadd.f32 %v6830_v10, %v9358_v39  ;;  %v4028_v5 = vor.u32 %v4027_v7, %v4024_v36  ;;  %v6831_v41 = vpop.f32.mrb[74].mxu0 }
 0x43d   :  { %3895 = vrot.lane.b32.xlu0 %v3798_v50, %s7123_s2  ;;  %v4037_v49 = vor.u32 %v4036_v60, %v4033_v43  ;;  %v3931_v28 = vsel %vm11553_vm3, %v3928_v16, %v3930_v19  ;;  %v3510_v22 = vadd.f32 %v9358_v39, %v3509_v46  ;;  %v3932_v21 = vrot.slane %v9524_v61, 1  ;;  %v3512_v36 = vpop.f32.mrb[75].mxu0 }
 0x43e   :  { %vm11562_vm5 = vcmp.ne.s16.totalorder %v11561_v62, 0  ;;  %v3801_v32 = vor.u32 %v3799_v15, %v3797_v1  ;;  %v3590_v42 = vmax.f32 %v3518_v34, 0.0  ;;  %v3521_v24 = vadd.f32 %v6831_v41, %v9358_v39  ;;  %v11566_v15 = vld [vmem:[#allocation53_spill] sm:$0xff] }
 0x43f   :  { %v3710_v48 = vsel %vm11562_vm5, %v9524_v61, 0  ;;  %vm11563_vm11 = vsmask.f32 6400  ;;  %v3588_v16 = vmax.f32 %v3510_v22, 0.0  ;;  %v3513_v7 = vadd.f32 %v9358_v39, %v3512_v36 }
 0x440   :  { %v4029_v10 = vsel %vm11563_vm11, %v9461_v63, %v4028_v5  ;;  %vm11564_vm10 = vmmov %vm11563_vm11  ;;  %v3933_v60 = vsel %vm11565_vm4, %v3930_v19, %v3932_v21  ;;  %v3803_v50 = vshll.u32 %v3710_v48, 16  ;;  %v3591_v46 = vmax.f32 %v3521_v24, 0.0  ;;  %v11568_v63 = vld [vmem:[#allocation50_spill] sm:$0xff]  ;;  %v11570_v24 = vld [vmem:[#allocation52_spill] sm:$0xff] }
 0x441   :  { %v4038_v43 = vsel %vm11564_vm10, %v4028_v5, %v4037_v49  ;;  %4144 = vrot.lane.b32.xlu1 %v4029_v10, %s7124_s27  ;;  %v3807_v1 = vshrl.u32 %v3710_v48, 16  ;;  %vm11567_vm6 = vcmp.ne.s16.totalorder %v11566_v15, 0  ;;  %vm11569_vm0 = vcmp.ne.s16.totalorder %v11568_v63, 0  ;;  %vm11574_vm10 = vmmov %vm11565_vm4 }
 0x442   :  { %4146 = vrot.lane.b32.xlu0 %v4038_v43, %s7124_s27  ;;  %v3711_v34 = vsel %vm11567_vm6, %v9529_v2, 0  ;;  %v3727_v5 = vsel %vm11569_vm0, %v9524_v61, 0  ;;  %v3589_v22 = vmax.f32 %v3513_v7, 0.0  ;;  %v3805_v41 = vrot.slane %v3803_v50, 1 }
 0x443   :  { %v3811_v10 = vshll.u32 %v3711_v34, 16  ;;  %v4040_v14 = vshrl.u32 %v3727_v5, 16  ;;  %v9554_v36 = vpack.c.bf16 %v3591_v46, %v3590_v42  ;;  %v4043_v19 = vshll.u32 %v3727_v5, 16 }
 0x444   :  { %vm11571_vm3 = vcmp.ne.s16.totalorder %v11570_v24, 0  ;;  %v3934_v48 = vrot.slane %v9529_v2, 1  ;;  %v3612_v62 = vpack.c.bf16 %v3589_v22, %v3588_v16  ;;  %vm11572_vm5 = vsmask.f32 7424 }
 0x445   :  { %v3728_v43 = vsel %vm11571_vm3, %v9529_v2, 0  ;;  %3962 = vrot.lane.b32.xlu1 %v3931_v28, %s7116_s5  ;;  %v3806_v15 = vsel %vm11572_vm5, %v3801_v32, %v3805_v41  ;;  %v3809_v63 = vor.u32 %v3807_v1, %v3805_v41  ;;  %v3813_v57 = vrot.slane %v3811_v10, 1  ;;  %vm11573_vm11 = vmmov %vm11572_vm5 }
 0x446   :  { %v11115_v7 = vrot.slane %v9554_v36, 7  ;;  %3964 = vrot.lane.b32.xlu0 %v3933_v60, %s7116_s5  ;;  %v4042_v42 = vrot.slane %v4040_v14, 1  ;;  %v4045_v50 = vrot.slane %v4043_v19, 2  ;;  %v4049_v46 = vshrl.u32 %v3728_v43, 16 }
 0x447   :  { %v3651_v5 = vrot.slane %v3612_v62, 7  ;;  %v3814_v24 = vsel %vm11573_vm11, %v3809_v63, %v3813_v57  ;;  %v4052_v17 = vshll.u32 %v3728_v43, 16  ;;  %v3935_v54 = vsel %vm11574_vm10, %v3932_v21, %v3934_v48 }
 0x448   :  { %v4046_v16 = vor.u32 %v4045_v50, %v4042_v42  ;;  %v4051_v22 = vrot.slane %v4049_v46, 1  ;;  %v3815_v28 = vshrl.u32 %v3711_v34, 16  ;;  %vm11575_vm4 = vcmp.ne.s16.totalorder %v8658_v18, 0  ;;  %v11583_v42 = vld [vmem:[#allocation62_spill] sm:$0xff] }
 0x449   :  { %v9569_v32 = vsel %vm11575_vm4, %v9494_v52, 0  ;;  %v11576_v1 = vrot.slane %v9507_v26, 7  ;;  %vm11577_vm6 = vcmask 1040384   ;;  %3897 = vrot.lane.b32.xlu1 %v3806_v15, %s7123_s2  ;;  %v4054_v21 = vrot.slane %v4052_v17, 2  ;;  %v11581_v26 = vld [vmem:[#allocation54_spill] sm:$0xff] }
 0x44a   :  { %vm11579_vm0 = vmmov %vm11577_vm6  ;;  %3899 = vrot.lane.b32.xlu0 %v3814_v24, %s7123_s2  ;;  %vm11580_vm3 = vsmask.f32 6400  ;;  %vm11582_vm5 = vcmp.ne.s16.totalorder %v11581_v26, 0  ;;  %v3817_v10 = vor.u32 %v3815_v28, %v3813_v57  ;;  %vm11584_vm11 = vcmp.ne.s16.totalorder %v11583_v42, 0  ;;  %v11585_v24 = vld [vmem:[#allocation59_spill] sm:$0xff]  ;;  %v6834_v57 = vpop.f32.mrb[76].mxu0 }
 0x44b   :  { %v9574_v14 = vsel %vm11577_vm6, %v11576_v1, %v3651_v5  ;;  %v9579_v62 = vsel %vm11579_vm0, %v3651_v5, %v11115_v7  ;;  %v4047_v34 = vsel %vm11580_vm3, %v4037_v49, %v4046_v16  ;;  %v4055_v19 = vor.u32 %v4054_v21, %v4051_v22  ;;  %v11587_v5 = vld [vmem:[#allocation63_spill] sm:$0xff]  ;;  %vm11589_vm0 = vmmov %vm11580_vm3 }
 0x44c   :  { %11578 = vst [vmem:[#allocation29_spill] sm:$0xff] %v9574_v14  ;;  %v3936_v63 = vrot.slane %v9574_v14, 1  ;;  %v3712_v41 = vsel %vm11582_vm5, %v9574_v14, 0  ;;  %v3713_v15 = vsel %vm11584_vm11, %v9579_v62, 0  ;;  %vm11586_vm4 = vcmp.ne.s16.totalorder %v11585_v24, 0 }
 0x44d   :  { %v3819_v43 = vshll.u32 %v3712_v41, 16  ;;  %v3823_v17 = vshrl.u32 %v3712_v41, 16  ;;  %v3827_v46 = vshll.u32 %v3713_v15, 16  ;;  %v3729_v49 = vsel %vm11586_vm4, %v9574_v14, 0  ;;  %4148 = vrot.lane.b32.xlu1 %v4047_v34, %s7124_s27 }
 0x44e   :  { %v3937_v50 = vsel %vm11574_vm10, %v3934_v48, %v3936_v63  ;;  %vm11588_vm6 = vcmp.ne.s16.totalorder %v11587_v5, 0  ;;  %v4056_v22 = vsel %vm11589_vm0, %v4046_v16, %v4055_v19  ;;  %v4058_v21 = vshrl.u32 %v3729_v49, 16  ;;  %v3525_v48 = vpop.f32.mrb[77].mxu0  ;;  %vm11595_vm10 = vmmov %vm11589_vm0 }
 0x44f   :  { %v3730_v1 = vsel %vm11588_vm6, %v9579_v62, 0  ;;  %v3821_v28 = vrot.slane %v3819_v43, 1  ;;  %v4061_v7 = vshll.u32 %v3729_v49, 16  ;;  %v3534_v41 = vadd.f32 %v6834_v57, %v9358_v39  ;;  %4150 = vrot.lane.b32.xlu0 %v4056_v22, %s7124_s27  ;;  %v6835_v5 = vpop.f32.mrb[78].mxu0  ;;  %vm11597_vm6 = vmmov %vm11589_vm0 }
 0x450   :  { %v3829_v60 = vrot.slane %v3827_v46, 1  ;;  %v4067_v24 = vshrl.u32 %v3730_v1, 16  ;;  %v4070_v42 = vshll.u32 %v3730_v1, 16  ;;  %v3526_v26 = vadd.f32 %v9358_v39, %v3525_v48  ;;  %v3528_v43 = vpop.f32.mrb[79].mxu0 }
 0x451   :  { %vm11590_vm3 = vsmask.f32 7424  ;;  %v3825_v34 = vor.u32 %v3823_v17, %v3821_v28  ;;  %v4060_v4 = vrot.slane %v4058_v21, 1  ;;  %v3537_v16 = vadd.f32 %v6835_v5, %v9358_v39  ;;  %3966 = vrot.lane.b32.xlu1 %v3935_v54, %s7116_s5 }
 0x452   :  { %v3822_v18 = vsel %vm11590_vm3, %v3817_v10, %v3821_v28  ;;  %v4063_v59 = vrot.slane %v4061_v7, 2  ;;  %v4069_v49 = vrot.slane %v4067_v24, 1  ;;  %v3529_v57 = vadd.f32 %v9358_v39, %v3528_v43  ;;  %vm11591_vm5 = vmmov %vm11590_vm3 }
 0x453   :  { %v3830_v46 = vsel %vm11591_vm5, %v3825_v34, %v3829_v60  ;;  %v4072_v22 = vrot.slane %v4070_v42, 2  ;;  %v3594_v1 = vmax.f32 %v3534_v41, 0.0  ;;  %v3595_v35 = vmax.f32 %v3537_v16, 0.0  ;;  %3968 = vrot.lane.b32.xlu0 %v3937_v50, %s7116_s5 }
 0x454   :  { %v4064_v48 = vor.u32 %v4063_v59, %v4060_v4  ;;  %v3938_v10 = vrot.slane %v9579_v62, 1  ;;  %v3592_v17 = vmax.f32 %v3526_v26, 0.0  ;;  %v3593_v28 = vmax.f32 %v3529_v57, 0.0 }
 0x455   :  { %v9611_v5 = vor.u32 %v4072_v22, %v4069_v49  ;;  %v11592_v7 = vrot.slane %v9569_v32, 2  ;;  %v11593_v54 = vrot.slane %v9472_v47, 2  ;;  %vm11594_vm11 = vcmask 1045504   ;;  %3901 = vrot.lane.b32.xlu1 %v3822_v18, %s7123_s2  ;;  %v11601_v18 = vld [vmem:[#allocation44_spill] sm:$0xff] }
 0x456   :  { %v9620_v21 = vpack.c.bf16 %v3595_v35, %v3594_v1  ;;  %v4065_v42 = vsel %vm11595_vm10, %v4055_v19, %v4064_v48  ;;  %vm11596_vm4 = vcmask 1046528   ;;  %v3614_v59 = vpack.c.bf16 %v3593_v28, %v3592_v17  ;;  %v11599_v19 = vld [vmem:[#allocation43_spill] sm:$0xff] }
 0x457   :  { %v9618_v24 = vsel %vm11594_vm11, %v11593_v54, %v11592_v7  ;;  %v3939_v50 = vsel %vm11596_vm4, %v3936_v63, %v3938_v10  ;;  %v4074_v4 = vsel %vm11597_vm6, %v4064_v48, %v9611_v5  ;;  %vm11598_vm0 = vcmp.ne.s16.totalorder %v8699_v45, 0  ;;  %3903 = vrot.lane.b32.xlu0 %v3830_v46, %s7123_s2  ;;  %v11611_v54 = vld [vmem:[#allocation73_spill] sm:$0xff] }
 0x458   :  { %v3743_v26 = vsel %vm11598_vm0, %v9497_v23, 0  ;;  %v11123_v47 = vrot.slane %v9620_v21, 7  ;;  %v3831_v35 = vshrl.u32 %v3713_v15, 16  ;;  %vm11600_vm3 = vcmp.ne.s16.totalorder %v11599_v19, 0  ;;  %vm11608_vm0 = vmmov %vm11594_vm11 }
 0x459   :  { %v4196_v41 = vrot.slane %v3743_v26, 2  ;;  %v3744_v63 = vsel %vm11600_vm3, %v9524_v61, 0  ;;  %v3655_v34 = vrot.slane %v3614_v59, 7  ;;  %vm11602_vm5 = vcmp.ne.s16.totalorder %v11601_v18, 0  ;;  %4152 = vrot.lane.b32.xlu1 %v4065_v42, %s7124_s27  ;;  %v11613_v42 = vld [vmem:[#allocation72_spill] sm:$0xff] }
 0x45a   :  { %v4198_v16 = vrot.slane %v3744_v63, 2  ;;  %v3745_v43 = vsel %vm11602_vm5, %v9529_v2, 0  ;;  %v3833_v49 = vor.u32 %v3831_v35, %v3829_v60  ;;  %v11603_v57 = vmov %v11592_v7 }
 0x45b   :  { %v9641_v22 = vsel %vm11594_vm11, %v11603_v57, %v4196_v41  ;;  %v4200_v1 = vrot.slane %v3745_v43, 2  ;;  %vm11604_vm10 = vcmp.ne.s16.totalorder %v8796_v40, 0  ;;  %v11605_v46 = vrot.slane %v9554_v36, 7  ;;  %4154 = vrot.lane.b32.xlu0 %v4074_v4, %s7124_s27  ;;  %v11609_v36 = vld [vmem:[#allocation64_spill] sm:$0xff] }
 0x45c   :  { %v9646_v15 = vsel %vm11604_vm10, %v9574_v14, 0  ;;  %vm11606_vm4 = vcmask 1040384   ;;  %v9660_v32 = vsel %vm11608_vm0, %v4196_v41, %v4198_v16  ;;  %vm11610_vm3 = vcmp.ne.s16.totalorder %v11609_v36, 0 }
 0x45d   :  { %v9651_v48 = vsel %vm11606_vm4, %v11605_v46, %v3655_v34  ;;  %vm11607_vm6 = vmmov %vm11606_vm4  ;;  %v4202_v17 = vrot.slane %v9646_v15, 2  ;;  %vm11612_vm5 = vcmp.ne.s16.totalorder %v11611_v54, 0  ;;  %vm11614_vm11 = vcmp.ne.s16.totalorder %v11613_v42, 0  ;;  %3970 = vrot.lane.b32.xlu1 %v3939_v50, %s7116_s5  ;;  %v6838_v46 = vpop.f32.mrb[80].mxu0 }
 0x45e   :  { %v9656_v60 = vsel %vm11607_vm6, %v3655_v34, %v11123_v47  ;;  %v3940_v28 = vrot.slane %v9651_v48, 1  ;;  %v3714_v7 = vsel %vm11610_vm3, %v9651_v48, 0  ;;  %v3731_v26 = vsel %vm11614_vm11, %v9651_v48, 0  ;;  %v3541_v40 = vpop.f32.mrb[81].mxu0 }
 0x45f   :  { %v9671_v59 = vsel %vm11612_vm5, %v9656_v60, 0  ;;  %v3835_v35 = vshll.u32 %v3714_v7, 16  ;;  %v3839_v41 = vshrl.u32 %v3714_v7, 16  ;;  %v4076_v4 = vshrl.u32 %v3731_v26, 16  ;;  %v6839_v19 = vpop.f32.mrb[82].mxu0 }
 0x460   :  { %v3843_v63 = vshll.u32 %v9671_v59, 16  ;;  %vm11615_vm10 = vcmask 1046528   ;;  %v4079_v43 = vshll.u32 %v3731_v26, 16  ;;  %vm11616_vm4 = vcmp.ne.s16.totalorder %v8389_v6, 0  ;;  %v3544_v45 = vpop.f32.mrb[83].mxu0 }
 0x461   :  { %v3941_v34 = vsel %vm11615_vm10, %v3938_v10, %v3940_v28  ;;  %v3732_v57 = vsel %vm11616_vm4, %v9656_v60, 0  ;;  %v3942_v15 = vrot.slane %v9656_v60, 1  ;;  %v3837_v47 = vrot.slane %v3835_v35, 1  ;;  %vm11617_vm6 = vmmov %vm11615_vm10 }
 0x462   :  { %v3845_v42 = vrot.slane %v3843_v63, 1  ;;  %v4078_v54 = vrot.slane %v4076_v4, 1  ;;  %v4085_v36 = vshrl.u32 %v3732_v57, 16  ;;  %v3550_v7 = vadd.f32 %v6838_v46, %v9358_v39  ;;  %3972 = vrot.lane.b32.xlu0 %v3941_v34, %s7116_s5 }
 0x463   :  { %v4081_v10 = vrot.slane %v4079_v43, 2  ;;  %v4088_v26 = vshll.u32 %v3732_v57, 16  ;;  %v3943_v6 = vsel %vm11617_vm6, %v3940_v28, %v3942_v15  ;;  %v3542_v18 = vadd.f32 %v9358_v39, %v3541_v40 }
 0x464   :  { %vm11618_vm0 = vsmask.f32 7424  ;;  %v3841_v35 = vor.u32 %v3839_v41, %v3837_v47  ;;  %v4087_v63 = vrot.slane %v4085_v36, 1  ;;  %v3553_v4 = vadd.f32 %v6839_v19, %v9358_v39 }
 0x465   :  { %v3838_v50 = vsel %vm11618_vm0, %v3833_v49, %v3837_v47  ;;  %v4082_v46 = vor.u32 %v4081_v10, %v4078_v54  ;;  %v4090_v14 = vrot.slane %v4088_v26, 2  ;;  %v3598_v34 = vmax.f32 %v3550_v7, 0.0  ;;  %vm11619_vm3 = vmmov %vm11618_vm0 }
 0x466   :  { %3905 = vrot.lane.b32.xlu1 %v3838_v50, %s7123_s2  ;;  %v3545_v43 = vadd.f32 %v9358_v39, %v3544_v45  ;;  %v3846_v57 = vsel %vm11619_vm3, %v3841_v35, %v3845_v42  ;;  %v3599_v28 = vmax.f32 %v3553_v4, 0.0  ;;  %vm11620_vm5 = vsmask.f32 6400 }
 0x467   :  { %3907 = vrot.lane.b32.xlu0 %v3846_v57, %s7123_s2  ;;  %v4083_v40 = vsel %vm11620_vm5, %v9611_v5, %v4082_v46  ;;  %v9697_v47 = vor.u32 %v4090_v14, %v4087_v63  ;;  %vm11621_vm11 = vcmask 1045504   ;;  %v3596_v49 = vmax.f32 %v3542_v18, 0.0  ;;  %vm11623_vm4 = vmmov %vm11620_vm5 }
 0x468   :  { %v9700_v19 = vsel %vm11621_vm11, %v4198_v16, %v4200_v1  ;;  %v3597_v36 = vmax.f32 %v3545_v43, 0.0  ;;  %vm11622_vm10 = vmmov %vm11621_vm11  ;;  %v9705_v41 = vpack.c.bf16 %v3599_v28, %v3598_v34  ;;  %vm11624_vm6 = vcmp.ne.s16.totalorder %v11335_v44, 0 }
 0x469   :  { %v9703_v54 = vsel %vm11622_vm10, %v4200_v1, %v4202_v17  ;;  %v4092_v45 = vsel %vm11623_vm4, %v4082_v46, %v9697_v47  ;;  %v3747_v7 = vsel %vm11624_vm6, %v9579_v62, 0  ;;  %vm11625_vm0 = vcmp.ne.s16.totalorder %v11337_v20, 0  ;;  %vm11627_vm5 = vmmov %vm11622_vm10 }
 0x46a   :  { %v3616_v5 = vpack.c.bf16 %v3597_v36, %v3596_v49  ;;  %4156 = vrot.lane.b32.xlu1 %v4083_v40, %s7124_s27  ;;  %v4204_v14 = vrot.slane %v3747_v7, 2  ;;  %v3748_v16 = vsel %vm11625_vm0, %v9651_v48, 0  ;;  %v11128_v18 = vrot.slane %v9705_v41, 7  ;;  %vm11628_vm11 = vmmov %vm11627_vm5 }
 0x46b   :  { %4158 = vrot.lane.b32.xlu0 %v4092_v45, %s7124_s27  ;;  %v4206_v1 = vrot.slane %v3748_v16, 2  ;;  %vm11626_vm3 = vcmp.ne.s16.totalorder %v11338_v3, 0  ;;  %v3847_v50 = vshrl.u32 %v9671_v59, 16  ;;  %v11629_v46 = vrot.slane %v9620_v21, 7  ;;  %vm11632_vm6 = vmmov %vm11627_vm5  ;;  %v6842_v16 = vpop.f32.mrb[84].mxu0 }
 0x46c   :  { %v9721_v10 = vsel %vm11626_vm3, %v9656_v60, 0  ;;  %v3659_v26 = vrot.slane %v3616_v5, 7  ;;  %v9725_v35 = vsel %vm11627_vm5, %v4202_v17, %v4204_v14  ;;  %vm11630_vm10 = vcmask 1040384  }
 0x46d   :  { %v4208_v63 = vrot.slane %v9721_v10, 2  ;;  %v9729_v4 = vsel %vm11628_vm11, %v4204_v14, %v4206_v1  ;;  %vm11631_vm4 = vmmov %vm11630_vm10  ;;  %v3849_v59 = vor.u32 %v3847_v50, %v3845_v42  ;;  %vm11633_vm0 = vcmp.ne.s16.totalorder %v8393_v12, 0 }
 0x46e   :  { %v9734_v34 = vsel %vm11630_vm10, %v11629_v46, %v3659_v26  ;;  %v9739_v43 = vsel %vm11631_vm4, %v3659_v26, %v11128_v18  ;;  %3974 = vrot.lane.b32.xlu1 %v3943_v6, %s7116_s5  ;;  %vm11634_vm3 = vcmp.ne.s16.totalorder %v8401_v37, 0  ;;  %vm11635_vm5 = vcmp.ne.s16.totalorder %v8397_v55, 0 }
 0x46f   :  { %v9743_v17 = vsel %vm11632_vm6, %v4206_v1, %v4208_v63  ;;  %v3944_v57 = vrot.slane %v9734_v34, 1  ;;  %v3716_v21 = vsel %vm11633_vm0, %v9734_v34, 0  ;;  %v3717_v28 = vsel %vm11634_vm3, %v9739_v43, 0 }
 0x470   :  { %v3733_v40 = vsel %vm11635_vm5, %v9734_v34, 0  ;;  %v3851_v49 = vshll.u32 %v3716_v21, 16  ;;  %v3855_v6 = vshrl.u32 %v3716_v21, 16  ;;  %v3859_v42 = vshll.u32 %v3717_v28, 16  ;;  %v3557_v21 = vpop.f32.mrb[85].mxu0 }
 0x471   :  { %v4094_v36 = vshrl.u32 %v3733_v40, 16  ;;  %vm11636_vm11 = vcmask 1046528   ;;  %v4097_v7 = vshll.u32 %v3733_v40, 16  ;;  %vm11637_vm10 = vcmp.ne.s16.totalorder %v8404_v29, 0  ;;  %v6843_v29 = vpop.f32.mrb[86].mxu0 }
 0x472   :  { %v3945_v45 = vsel %vm11636_vm11, %v3942_v15, %v3944_v57  ;;  %v3734_v5 = vsel %vm11637_vm10, %v9739_v43, 0  ;;  %v3946_v14 = vrot.slane %v9739_v43, 1  ;;  %v3853_v1 = vrot.slane %v3851_v49, 1  ;;  %vm11638_vm4 = vmmov %vm11636_vm11  ;;  %v3560_v49 = vpop.f32.mrb[87].mxu0 }
 0x473   :  { %3976 = vrot.lane.b32.xlu0 %v3945_v45, %s7116_s5  ;;  %v3861_v10 = vrot.slane %v3859_v42, 1  ;;  %v4096_v26 = vrot.slane %v4094_v36, 1  ;;  %v4103_v50 = vshrl.u32 %v3734_v5, 16  ;;  %v3566_v46 = vadd.f32 %v6842_v16, %v9358_v39 }
 0x474   :  { %v4099_v18 = vrot.slane %v4097_v7, 2  ;;  %v4106_v55 = vshll.u32 %v3734_v5, 16  ;;  %v3947_v15 = vsel %vm11638_vm4, %v3944_v57, %v3946_v14  ;;  %v3558_v40 = vadd.f32 %v9358_v39, %v3557_v21 }
 0x475   :  { %vm11639_vm6 = vsmask.f32 7424  ;;  %v3857_v12 = vor.u32 %v3855_v6, %v3853_v1  ;;  %v4105_v3 = vrot.slane %v4103_v50, 1  ;;  %v3569_v45 = vadd.f32 %v6843_v29, %v9358_v39 }
 0x476   :  { %v3854_v37 = vsel %vm11639_vm6, %v3849_v59, %v3853_v1  ;;  %v4100_v42 = vor.u32 %v4099_v18, %v4096_v26  ;;  %v4108_v36 = vrot.slane %v4106_v55, 2  ;;  %v3561_v16 = vadd.f32 %v9358_v39, %v3560_v49  ;;  %vm11640_vm0 = vmmov %vm11639_vm6 }
 0x477   :  { %3909 = vrot.lane.b32.xlu1 %v3854_v37, %s7123_s2  ;;  %v3862_v7 = vsel %vm11640_vm0, %v3857_v12, %v3861_v10  ;;  %v3602_v5 = vmax.f32 %v3566_v46, 0.0  ;;  %v3603_v57 = vmax.f32 %v3569_v45, 0.0  ;;  %vm11641_vm3 = vsmask.f32 6400 }
 0x478   :  { %3911 = vrot.lane.b32.xlu0 %v3862_v7, %s7123_s2  ;;  %v4101_v59 = vsel %vm11641_vm3, %v9697_v47, %v4100_v42  ;;  %v4109_v6 = vor.u32 %v4108_v36, %v4105_v3  ;;  %v3600_v1 = vmax.f32 %v3558_v40, 0.0  ;;  %v3601_v50 = vmax.f32 %v3561_v16, 0.0  ;;  %vm11643_vm11 = vmmov %vm11641_vm3 }
 0x479   :  { %vm11642_vm5 = vcmp.ne.s16.totalorder %v8368_v30, 0  ;;  %v3619_v29 = vpack.c.bf16 %v3603_v57, %v3602_v5  ;;  %vm11644_vm10 = vcmp.ne.s16.totalorder %v8373_v27, 0  ;;  %v3863_v26 = vshrl.u32 %v3717_v28, 16  ;;  %v11655_v57 = vld [vmem:[#allocation80_spill] sm:$0xff] }
 0x47a   :  { %v3750_v37 = vsel %vm11642_vm5, %v9734_v34, 0  ;;  %v4110_v55 = vsel %vm11643_vm11, %v4100_v42, %v4109_v6  ;;  %v9782_v39 = vsel %vm11644_vm10, %v9739_v43, 0  ;;  %v3618_v18 = vpack.c.bf16 %v3601_v50, %v3600_v1 }
 0x47b   :  { %4160 = vrot.lane.b32.xlu1 %v4101_v59, %s7124_s27  ;;  %v4210_v12 = vrot.slane %v3750_v37, 2  ;;  %v11134_v3 = vrot.slane %v9782_v39, 2  ;;  %v3665_v47 = vrot.slane %v3619_v29, 7  ;;  %vm11645_vm4 = vcmask 1045504  }
 0x47c   :  { %4162 = vrot.lane.b32.xlu0 %v4110_v55, %s7124_s27  ;;  %v3663_v21 = vrot.slane %v3618_v18, 7  ;;  %vm11646_vm6 = vmmov %vm11645_vm4  ;;  %vm11647_vm0 = vcmask 1040384   ;;  %v3865_v49 = vor.u32 %v3863_v26, %v3861_v10  ;;  %vm11648_vm3 = vcmp.ne.s16.totalorder %v8160_v31, 0  ;;  %v11653_v10 = vld [vmem:[#allocation84_spill] sm:$0xff] }
 0x47d   :  { %v9787_v46 = vsel %vm11645_vm4, %v4208_v63, %v4210_v12  ;;  %v9792_v40 = vsel %vm11646_vm6, %v4210_v12, %v11134_v3  ;;  %v3686_v45 = vsel %vm11647_vm0, %v3665_v47, 0  ;;  %v11649_v36 = vrot.slane %v9705_v41, 7  ;;  %vm11650_vm5 = vmmov %vm11647_vm0  ;;  %v11658_v12 = vld [vmem:[#allocation81_spill] sm:$0xff] }
 0x47e   :  { %v3737_v42 = vsel %vm11648_vm3, %v3686_v45, 0  ;;  %vm11651_vm11 = vmmov %vm11647_vm0  ;;  %v3952_v16 = vrot.slane %v3686_v45, 1  ;;  %vm11652_vm10 = vcmp.ne.s16.totalorder %v8408_v25, 0  ;;  %vm11654_vm4 = vcmp.ne.s16.totalorder %v11653_v10, 0 }
 0x47f   :  { %3978 = vrot.lane.b32.xlu1 %v3947_v15, %s7116_s5  ;;  %v9801_v28 = vsel %vm11650_vm5, %v11649_v36, %v3663_v21  ;;  %v9804_v63 = vsel %vm11651_vm11, %v3663_v21, %v3665_v47  ;;  %vm11656_vm6 = vcmp.ne.s16.totalorder %v11655_v57, 0  ;;  %vm11657_vm0 = vcmask 1046528  }
 0x480   :  { %v3948_v7 = vrot.slane %v9801_v28, 1  ;;  %v3718_v5 = vsel %vm11652_vm10, %v9801_v28, 0  ;;  %v3719_v15 = vsel %vm11654_vm4, %v9804_v63, 0  ;;  %v3735_v41 = vsel %vm11656_vm6, %v9801_v28, 0  ;;  %vm11660_vm5 = vmmov %vm11657_vm0 }
 0x481   :  { %v3867_v59 = vshll.u32 %v3718_v5, 16  ;;  %v3871_v1 = vshrl.u32 %v3718_v5, 16  ;;  %v3875_v50 = vshll.u32 %v3719_v15, 16  ;;  %v4112_v37 = vshrl.u32 %v3735_v41, 16  ;;  %vm11661_vm11 = vmmov %vm11657_vm0 }
 0x482   :  { %v3949_v29 = vsel %vm11657_vm0, %v3946_v14, %v3948_v7  ;;  %v4115_v55 = vshll.u32 %v3735_v41, 16  ;;  %vm11659_vm3 = vcmp.ne.s16.totalorder %v11658_v12, 0  ;;  %v3950_v47 = vrot.slane %v9804_v63, 1  ;;  %v11663_v12 = vld [vmem:[#allocation69_spill] sm:$0xff] }
 0x483   :  { %v3736_v18 = vsel %vm11659_vm3, %v9804_v63, 0  ;;  %3980 = vrot.lane.b32.xlu0 %v3949_v29, %s7116_s5  ;;  %v3869_v26 = vrot.slane %v3867_v59, 1  ;;  %v3877_v21 = vrot.slane %v3875_v50, 1  ;;  %v4114_v36 = vrot.slane %v4112_v37, 1 }
 0x484   :  { %v4121_v3 = vshrl.u32 %v3736_v18, 16  ;;  %v4117_v57 = vrot.slane %v4115_v55, 2  ;;  %v4124_v10 = vshll.u32 %v3736_v18, 16  ;;  %v3951_v5 = vsel %vm11660_vm5, %v3948_v7, %v3950_v47 }
 0x485   :  { %v3953_v25 = vsel %vm11661_vm11, %v3950_v47, %v3952_v16  ;;  %vm11662_vm10 = vsmask.f32 7424  ;;  %v3873_v41 = vor.u32 %v3871_v1, %v3869_v26  ;;  %vm11664_vm4 = vcmp.ne.s16.totalorder %v11663_v12, 0 }
 0x486   :  { %v3870_v14 = vsel %vm11662_vm10, %v3865_v49, %v3869_v26  ;;  %v4123_v31 = vrot.slane %v4121_v3, 1  ;;  %v3720_v27 = vsel %vm11664_vm4, %v3686_v45, 0  ;;  %v4118_v29 = vor.u32 %v4117_v57, %v4114_v36  ;;  %vm11665_vm6 = vmmov %vm11662_vm10 }
 0x487   :  { %3913 = vrot.lane.b32.xlu1 %v3870_v14, %s7123_s2  ;;  %v4126_v59 = vrot.slane %v4124_v10, 2  ;;  %v3879_v50 = vshrl.u32 %v3719_v15, 16  ;;  %v3883_v37 = vshll.u32 %v3720_v27, 16  ;;  %v3878_v55 = vsel %vm11665_vm6, %v3873_v41, %v3877_v21  ;;  %vm11669_vm11 = vmmov %vm11665_vm6  ;;  %v11670_v15 = vld [vmem:[#allocation65_spill] sm:$0xff] }
 0x488   :  { %v4130_v18 = vshrl.u32 %v3737_v42, 16  ;;  %v4133_v30 = vshll.u32 %v3737_v42, 16  ;;  %3915 = vrot.lane.b32.xlu0 %v3878_v55, %s7123_s2  ;;  %vm11666_vm0 = vsmask.f32 6400  ;;  %vm11667_vm3 = vcmp.ne.s16.totalorder %v8891_v8, 0 }
 0x489   :  { %v4119_v16 = vsel %vm11666_vm0, %v4109_v6, %v4118_v29  ;;  %v4127_v49 = vor.u32 %v4126_v59, %v4123_v31  ;;  %v3881_v7 = vor.u32 %v3879_v50, %v3877_v21  ;;  %v3885_v3 = vrot.slane %v3883_v37, 1  ;;  %vm11668_vm5 = vmmov %vm11666_vm0  ;;  %v11672_v21 = vld [vmem:[#allocation60_spill] sm:$0xff] }
 0x48a   :  { %v4132_v1 = vrot.slane %v4130_v18, 1  ;;  %v4135_v47 = vrot.slane %v4133_v30, 2  ;;  %v3752_v57 = vsel %vm11667_vm3, %v9801_v28, 0  ;;  %vm11671_vm10 = vcmp.ne.s16.totalorder %v11670_v15, 0  ;;  %v3955_v18 = vpop.permute.xlu1 %3954 }
 0x48b   :  { %4164 = vrot.lane.b32.xlu1 %v4119_v16, %s7124_s27  ;;  %v4128_v27 = vsel %vm11668_vm5, %v4118_v29, %v4127_v49  ;;  %v3886_v10 = vsel %vm11669_vm11, %v3881_v7, %v3885_v3  ;;  %v4214_v42 = vrot.slane %v3752_v57, 2  ;;  %v3753_v6 = vsel %vm11671_vm10, %v9804_v63, 0 }
 0x48c   :  { %v4136_v31 = vor.u32 %v4135_v47, %v4132_v1  ;;  %v4216_v26 = vrot.slane %v3753_v6, 2  ;;  %vm11673_vm4 = vcmp.ne.s16.totalorder %v11672_v21, 0  ;;  %4166 = vrot.lane.b32.xlu0 %v4128_v27, %s7124_s27  ;;  %v11674_v36 = vrot.slane %v9782_v39, 2 }
 0x48d   :  { %v3754_v30 = vsel %vm11673_vm4, %v3686_v45, 0  ;;  %vm11675_vm6 = vcmask 1045504   ;;  %v3688_v45 = vsel %vm8944_vm8, %v9380_v56, 0  ;;  %vm11679_vm11 = vcmask 261120  }
 0x48e   :  { %v9846_v14 = vsel %vm11675_vm6, %v11674_v36, %v4214_v42  ;;  %v4218_v41 = vrot.slane %v3754_v30, 2  ;;  %v4137_v29 = vsel %vm11666_vm0, %v4127_v49, %v4136_v31  ;;  %vm11676_vm3 = vmmov %vm11675_vm6  ;;  %vm11680_vm10 = vcmask 523264  }
 0x48f   :  { %v9850_v59 = vsel %vm11676_vm3, %v4214_v42, %v4216_v26  ;;  %3982 = vrot.lane.b32.xlu1 %v3951_v5, %s7116_s5  ;;  %vm11677_vm5 = vmmov %vm11676_vm3  ;;  %v3888_v37 = vpop.permute.xlu0 %3887  ;;  %vm11681_vm4 = vcmask 785408   ;;  %v3689_v3 = vsel %vm8969_vm2, %v9377_v11, 0 }
 0x490   :  { %v9854_v50 = vsel %vm11677_vm5, %v4216_v26, %v4218_v41  ;;  %3984 = vrot.lane.b32.xlu0 %v3953_v25, %s7116_s5  ;;  %v4222_v55 = vsel %vm11679_vm11, %v3688_v45, %v3888_v37  ;;  %vm11682_vm6 = vmmov %vm11679_vm11 }
 0x491   :  { %v4269_v16 = vsel %vm11680_vm10, %v4222_v55, %v3955_v18  ;;  %vm11683_vm0 = vmmov %vm11682_vm6 }
 0x492   :  { %vm11684_vm3 = vmmov %vm11680_vm10 }
 0x493   :  { %3917 = vrot.lane.b32.xlu1 %v3886_v10, %s7123_s2  ;;  %v4139_v5 = vpop.permute.xlu0 %4138  ;;  %vm11685_vm5 = vmmov %vm11681_vm4 }
 0x494   :  { %v4301_v49 = vsel %vm11681_vm4, %v4269_v16, %v4139_v5  ;;  %vm11686_vm11 = vmmov %vm11683_vm0 }
 0x495   :  { %4516 = vmatmul.mubr.bf16.vlgmr.msra.gmra.mrb[88].mxu0 %v4301_v49  ;;  %vm11687_vm10 = vmmov %vm11683_vm0 }
 0x496   :  { %6655 = vmatprep.mubr.msk.bf16.mxu0 %vm11682_vm6, %v9477_v58  ;;  %v3690_v58 = vsel %vm8999_vm15, %v9423_v13, 0  ;;  %vm11688_vm4 = vmmov %vm11684_vm3 }
 0x497   :  { %4168 = vrot.lane.b32.xlu1 %v4137_v29, %s7124_s27  ;;  %vm11689_vm6 = vmmov %vm11685_vm5 }
 0x498   :  { %v3957_v25 = vpop.permute.xlu0 %3956 }
 0x49b   :  { %v3890_v7 = vpop.permute.xlu1 %3889 }
 0x49c   :  { %v4225_v56 = vsel %vm11683_vm0, %v3689_v3, %v3890_v7 }
 0x49d   :  { %v3892_v1 = vpop.permute.xlu0 %3891  ;;  %v4271_v57 = vsel %vm11684_vm3, %v4225_v56, %v3957_v25  ;;  %vm11690_vm3 = vmmov %vm11683_vm0 }
 0x49e   :  { %v4228_v42 = vsel %vm11687_vm10, %v3690_v58, %v3892_v1  ;;  %vm11693_vm10 = vmmov %vm11683_vm0 }
 0x49f   :  { %v4141_v47 = vpop.permute.xlu1 %4140 }
 0x4a0   :  { %v4304_v27 = vsel %vm11685_vm5, %v4271_v57, %v4141_v47  ;;  %vm11691_vm5 = vmmov %vm11688_vm4 }
 0x4a1   :  { %4524 = vmatmul.mubr.bf16.gmra.mrb[92].mxu0 %v4304_v27  ;;  %v4143_v11 = vpop.permute.xlu0 %4142 }
 0x4a2   :  { %6656 = vmatprep.mubr.msk.bf16.mxu0 %vm11686_vm11, %v9487_v0  ;;  %v3691_v0 = vsel %vm9015_vm14, %v9428_v38, 0  ;;  %vm11692_vm11 = vmmov %vm11689_vm6 }
 0x4a3   :  { %v3959_v10 = vpop.permute.xlu1 %3958 }
 0x4a4   :  { %v4273_v6 = vsel %vm11688_vm4, %v4228_v42, %v3959_v10  ;;  %vm11694_vm4 = vmmov %vm11683_vm0 }
 0x4a5   :  { %v4307_v26 = vsel %vm11689_vm6, %v4273_v6, %v4143_v11  ;;  %vm11695_vm6 = vmmov %vm11691_vm5 }
 0x4a9   :  { %v3961_v31 = vpop.permute.xlu0 %3960  ;;  %4532 = vmatmul.mubr.bf16.gmra.mrb[96].mxu0 %v4307_v26 }
 0x4aa   :  { %6657 = vmatprep.mubr.msk.bf16.mxu0 %vm11683_vm0, %v9618_v24  ;;  %v3692_v24 = vsel %vm9042_vm1, %v9494_v52, 0  ;;  %vm11696_vm0 = vmmov %vm11692_vm11 }
 0x4ad   :  { %v3894_v30 = vpop.permute.xlu1 %3893 }
 0x4ae   :  { %v4231_v13 = vsel %vm11690_vm3, %v3691_v0, %v3894_v30 }
 0x4af   :  { %v3896_v36 = vpop.permute.xlu0 %3895  ;;  %v4275_v29 = vsel %vm11691_vm5, %v4231_v13, %v3961_v31  ;;  %vm11698_vm5 = vmmov %vm11690_vm3  ;;  %v3695_v31 = vsel %vm9091_vm7, %v9529_v2, 0 }
 0x4b0   :  { %v4234_v38 = vsel %vm11694_vm4, %v3692_v24, %v3896_v36  ;;  %vm11701_vm4 = vmmov %vm11690_vm3  ;;  %v11712_v36 = vld [vmem:[#allocation29_spill] sm:$0xff] }
 0x4b3   :  { %v4145_v41 = vpop.permute.xlu1 %4144 }
 0x4b4   :  { %v4310_v45 = vsel %vm11692_vm11, %v4275_v29, %v4145_v41  ;;  %v4147_v37 = vpop.permute.xlu0 %4146  ;;  %vm11699_vm11 = vmmov %vm11695_vm6 }
 0x4b5   :  { %4540 = vmatmul.mubr.bf16.gmra.mrb[100].mxu0 %v4310_v45 }
 0x4b6   :  { %6658 = vmatprep.mubr.msk.bf16.mxu0 %vm11693_vm10, %v9641_v22  ;;  %v3693_v22 = vsel %vm9071_vm12, %v9497_v23, 0  ;;  %vm11700_vm10 = vmmov %vm11696_vm0 }
 0x4b7   :  { %v3963_v55 = vpop.permute.xlu1 %3962 }
 0x4b8   :  { %v4277_v18 = vsel %vm11695_vm6, %v4234_v38, %v3963_v55  ;;  %v3965_v16 = vpop.permute.xlu0 %3964  ;;  %vm11703_vm6 = vmmov %vm11690_vm3  ;;  %v11718_v38 = vld [vmem:[#allocation19_spill] sm:$0xff] }
 0x4b9   :  { %v4313_v49 = vsel %vm11696_vm0, %v4277_v18, %v4147_v37  ;;  %vm11704_vm0 = vmmov %vm11699_vm11 }
 0x4bb   :  { %v3898_v5 = vpop.permute.xlu1 %3897 }
 0x4bc   :  { %v4237_v52 = vsel %vm11698_vm5, %v3693_v22, %v3898_v5  ;;  %v3900_v3 = vpop.permute.xlu0 %3899  ;;  %vm11706_vm5 = vmmov %vm11701_vm4 }
 0x4bd   :  { %4548 = vmatmul.mubr.bf16.gmra.mrb[104].mxu0 %v4313_v49  ;;  %v4279_v1 = vsel %vm11699_vm11, %v4237_v52, %v3965_v16  ;;  %vm11708_vm11 = vmmov %vm11701_vm4 }
 0x4be   :  { %6659 = vmatprep.mubr.msk.bf16.mxu0 %vm11690_vm3, %v9660_v32  ;;  %v3694_v32 = vsel %vm9060_vm13, %v9524_v61, 0  ;;  %vm11705_vm3 = vmmov %vm11700_vm10 }
 0x4bf   :  { %v4149_v7 = vpop.permute.xlu1 %4148  ;;  %v4240_v23 = vsel %vm11703_vm6, %v3694_v32, %v3900_v3  ;;  %vm11711_vm6 = vmmov %vm11706_vm5 }
 0x4c0   :  { %v4316_v47 = vsel %vm11700_vm10, %v4279_v1, %v4149_v7  ;;  %vm11709_vm10 = vmmov %vm11704_vm0 }
 0x4c1   :  { %v4151_v27 = vpop.permute.xlu0 %4150 }
 0x4c3   :  { %v3967_v56 = vpop.permute.xlu1 %3966 }
 0x4c4   :  { %v4281_v10 = vsel %vm11704_vm0, %v4240_v23, %v3967_v56  ;;  %vm11714_vm0 = vmmov %vm11706_vm5 }
 0x4c5   :  { %4556 = vmatmul.mubr.bf16.gmra.mrb[108].mxu0 %v4316_v47  ;;  %v4319_v42 = vsel %vm11705_vm3, %v4281_v10, %v4151_v27  ;;  %v3969_v11 = vpop.permute.xlu0 %3968  ;;  %v11730_v27 = vld [vmem:[#allocation83_spill] sm:$0xff] }
 0x4c6   :  { %6660 = vmatprep.mubr.msk.bf16.mxu0 %vm11701_vm4, %v9700_v19  ;;  %vm11710_vm4 = vmmov %vm11705_vm3 }
 0x4c7   :  { %v3902_v58 = vpop.permute.xlu1 %3901  ;;  %vm11715_vm3 = vmmov %vm11709_vm10 }
 0x4c8   :  { %v4243_v61 = vsel %vm11708_vm11, %v3695_v31, %v3902_v58  ;;  %vm11717_vm11 = vmmov %vm11714_vm0 }
 0x4c9   :  { %v3904_v26 = vpop.permute.xlu0 %3903  ;;  %v4283_v0 = vsel %vm11709_vm10, %v4243_v61, %v3969_v11  ;;  %vm11719_vm10 = vnez %v11718_v38 }
 0x4cb   :  { %v4153_v6 = vpop.permute.xlu1 %4152 }
 0x4cc   :  { %v4322_v13 = vsel %vm11710_vm4, %v4283_v0, %v4153_v6 }
 0x4cd   :  { %4564 = vmatmul.mubr.bf16.gmra.mrb[112].mxu0 %v4319_v42  ;;  %v4155_v45 = vpop.permute.xlu0 %4154 }
 0x4ce   :  { %6661 = vmatprep.mubr.msk.bf16.mxu0 %vm11706_vm5, %v9703_v54  ;;  %v3696_v54 = vsel %vm9109_vm9, %v11712_v36, 0  ;;  %vm11716_vm5 = vmmov %vm11710_vm4 }
 0x4cf   :  { %v3971_v30 = vpop.permute.xlu1 %3970  ;;  %v4246_v29 = vsel %vm11714_vm0, %v3696_v54, %v3904_v26  ;;  %vm11720_vm4 = vmmov %vm11714_vm0 }
 0x4d0   :  { %v4285_v2 = vsel %vm11715_vm3, %v4246_v29, %v3971_v30  ;;  %vm11722_vm0 = vmmov %vm11716_vm5 }
 0x4d1   :  { %v4325_v24 = vsel %vm11716_vm5, %v4285_v2, %v4155_v45 }
 0x4d4   :  { %v3973_v55 = vpop.permute.xlu0 %3972 }
 0x4d5   :  { %4572 = vmatmul.mubr.bf16.gmra.mrb[116].mxu0 %v4322_v13  ;;  %v11741_v13 = vld [vmem:[#allocation85_spill] sm:$0xff] }
 0x4d6   :  { %6662 = vmatprep.mubr.msk.bf16.mxu0 %vm11711_vm6, %v9725_v35  ;;  %v3697_v35 = vsel %vm11719_vm10, %v9579_v62, 0  ;;  %vm11721_vm6 = vmmov %vm11715_vm3 }
 0x4d7   :  { %vm11723_vm3 = vmmov %vm11720_vm4 }
 0x4d8   :  { %v3906_v37 = vpop.permute.xlu1 %3905  ;;  %vm11727_vm10 = vmmov %vm11721_vm6 }
 0x4d9   :  { %v4249_v16 = vsel %vm11720_vm4, %v3697_v35, %v3906_v37  ;;  %v3908_v22 = vpop.permute.xlu0 %3907  ;;  %vm11728_vm4 = vmmov %vm11722_vm0 }
 0x4da   :  { %v4287_v5 = vsel %vm11721_vm6, %v4249_v16, %v3973_v55  ;;  %vm11729_vm6 = vmmov %vm11723_vm3  ;;  %v11753_v16 = vld [vmem:[#allocation22_spill] sm:$0xff] }
 0x4dc   :  { %v4157_v18 = vpop.permute.xlu1 %4156 }
 0x4dd   :  { %4580 = vmatmul.mubr.bf16.gmra.mrb[120].mxu0 %v4325_v24  ;;  %v4328_v49 = vsel %vm11722_vm0, %v4287_v5, %v4157_v18  ;;  %v4159_v1 = vpop.permute.xlu0 %4158  ;;  %vm11731_vm0 = vnez %v11730_v27 }
 0x4de   :  { %6663 = vmatprep.mubr.msk.bf16.mxu0 %vm11717_vm11, %v9729_v4  ;;  %v11724_v4 = vld [vmem:[#allocation86_spill] sm:$0xff]  ;;  %vm11726_vm11 = vmmov %vm11723_vm3 }
 0x4df   :  { %vm11725_vm5 = vnez %v11724_v4 }
 0x4e0   :  { %v3975_v7 = vpop.permute.xlu1 %3974  ;;  %v3698_v52 = vsel %vm11725_vm5, %v9651_v48, 0  ;;  %vm11732_vm5 = vmmov %vm11727_vm10 }
 0x4e1   :  { %v4252_v3 = vsel %vm11726_vm11, %v3698_v52, %v3908_v22  ;;  %vm11733_vm11 = vmmov %vm11728_vm4  ;;  %v9985_v52 = vld [vmem:[#allocation11] ss:$0 sm:$0xff] }
 0x4e2   :  { %v4289_v62 = vsel %vm11727_vm10, %v4252_v3, %v3975_v7  ;;  %vm11734_vm10 = vmmov %vm11723_vm3 }
 0x4e3   :  { %v4331_v47 = vsel %vm11728_vm4, %v4289_v62, %v4159_v1 }
 0x4e5   :  { %4588 = vmatmul.mubr.bf16.gmra.mrb[124].mxu0 %v4328_v49  ;;  %v3977_v32 = vpop.permute.xlu0 %3976 }
 0x4e6   :  { %6664 = vmatprep.mubr.msk.bf16.mxu0 %vm11723_vm3, %v9743_v17  ;;  %v3699_v17 = vsel %vm11731_vm0, %v9656_v60, 0  ;;  %vm11738_vm0 = vmmov %vm11732_vm5 }
 0x4e9   :  { %v3910_v56 = vpop.permute.xlu1 %3909 }
 0x4ea   :  { %v4255_v48 = vsel %vm11723_vm3, %v3699_v17, %v3910_v56  ;;  %v3912_v42 = vpop.permute.xlu0 %3911 }
 0x4eb   :  { %v4291_v23 = vsel %vm11732_vm5, %v4255_v48, %v3977_v32 }
 0x4ed   :  { %4596 = vmatmul.mubr.bf16.gmra.mrb[128].mxu0 %v4331_v47  ;;  %v4161_v58 = vpop.permute.xlu1 %4160 }
 0x4ee   :  { %6665 = vmatprep.mubr.msk.bf16.mxu0 %vm11729_vm6, %v9787_v46  ;;  %v4334_v10 = vsel %vm11733_vm11, %v4291_v23, %v4161_v58  ;;  %v11735_v46 = vld [vmem:[#allocation82_spill] sm:$0xff]  ;;  %vm11737_vm6 = vmmov %vm11723_vm3  ;;  %v4163_v26 = vpop.permute.xlu0 %4162 }
 0x4ef   :  { %vm11736_vm4 = vnez %v11735_v46  ;;  %vm11739_vm3 = vmmov %vm11733_vm11  ;;  %vm11742_vm11 = vnez %v11741_v13 }
 0x4f0   :  { %v3700_v6 = vsel %vm11736_vm4, %v9734_v34, 0  ;;  %vm11740_vm5 = vmmov %vm11737_vm6 }
 0x4f1   :  { %v3979_v11 = vpop.permute.xlu1 %3978  ;;  %v4258_v31 = vsel %vm11737_vm6, %v3700_v6, %v3912_v42  ;;  %vm11744_vm4 = vmmov %vm11738_vm0 }
 0x4f2   :  { %v4293_v60 = vsel %vm11738_vm0, %v4258_v31, %v3979_v11  ;;  %vm11745_vm6 = vmmov %vm11739_vm3 }
 0x4f3   :  { %v4337_v30 = vsel %vm11739_vm3, %v4293_v60, %v4163_v26  ;;  %vm11746_vm0 = vmmov %vm11740_vm5 }
 0x4f5   :  { %4604 = vmatmul.mubr.bf16.gmra.mrb[132].mxu0 %v4334_v10  ;;  %v3981_v0 = vpop.permute.xlu0 %3980 }
 0x4f6   :  { %6666 = vmatprep.mubr.msk.bf16.mxu0 %vm11734_vm10, %v9792_v40  ;;  %v3701_v40 = vsel %vm11742_vm11, %v9739_v43, 0  ;;  %vm11743_vm10 = vmmov %vm11740_vm5 }
 0x4f7   :  { %vm11750_vm11 = vmmov %vm11744_vm4 }
 0x4f9   :  { %v3914_v61 = vpop.permute.xlu1 %3913 }
 0x4fa   :  { %v4261_v34 = vsel %vm11743_vm10, %v3701_v40, %v3914_v61  ;;  %v3916_v45 = vpop.permute.xlu0 %3915  ;;  %vm11751_vm10 = vmmov %vm11745_vm6 }
 0x4fb   :  { %v4295_v54 = vsel %vm11744_vm4, %v4261_v34, %v3981_v0  ;;  %vm11752_vm4 = vmmov %vm11746_vm0 }
 0x4fd   :  { %4612 = vmatmul.mubr.bf16.gmra.mrb[136].mxu0 %v4337_v30  ;;  %v4165_v36 = vpop.permute.xlu1 %4164 }
 0x4fe   :  { %6667 = vmatprep.mubr.msk.bf16.mxu0 %vm11740_vm5, %v9846_v14  ;;  %v4340_v29 = vsel %vm11745_vm6, %v4295_v54, %v4165_v36  ;;  %v11747_v14 = vld [vmem:[#allocation21_spill] sm:$0xff]  ;;  %vm11749_vm5 = vmmov %vm11746_vm0  ;;  %v4167_v55 = vpop.permute.xlu0 %4166  ;;  %vm11754_vm6 = vnez %v11753_v16 }
 0x4ff   :  { %vm11748_vm3 = vnez %v11747_v14  ;;  %v11870_v16 = vld [vmem:[#allocation57_spill] sm:$0xff] }
 0x500   :  { %v3702_v37 = vsel %vm11748_vm3, %v9801_v28, 0  ;;  %vm11755_vm3 = vmmov %vm11750_vm11 }
 0x501   :  { %v3983_v2 = vpop.permute.xlu1 %3982  ;;  %v4264_v24 = vsel %vm11749_vm5, %v3702_v37, %v3916_v45  ;;  %vm11756_vm5 = vmmov %vm11751_vm10 }
 0x502   :  { %v4297_v43 = vsel %vm11750_vm11, %v4264_v24, %v3983_v2  ;;  %v3985_v28 = vpop.permute.xlu0 %3984  ;;  %vm4756_vm11 = vcmask 1048064  }
 0x503   :  { %v4343_v18 = vsel %vm11751_vm10, %v4297_v43, %v4167_v55  ;;  %vm11758_vm10 = vmmov %vm11755_vm3 }
 0x505   :  { %4620 = vmatmul.mubr.bf16.gmra.mrb[140].mxu0 %v4340_v29  ;;  %v3918_v35 = vpop.permute.xlu1 %3917 }
 0x506   :  { %6668 = vmatprep.mubr.msk.bf16.mxu0 %vm11746_vm0, %v9850_v59  ;;  %v3703_v59 = vsel %vm11754_vm6, %v9804_v63, 0 }
 0x507   :  { %v4267_v5 = vsel %vm11746_vm0, %v3703_v59, %v3918_v35  ;;  %vm11760_vm0 = vmmov %vm11755_vm3 }
 0x508   :  { %v4299_v22 = vsel %vm11755_vm3, %v4267_v5, %v3985_v28 }
 0x509   :  { %v4169_v49 = vpop.permute.xlu1 %4168 }
 0x50a   :  { %v4346_v7 = vsel %vm11756_vm5, %v4299_v22, %v4169_v49  ;;  %vm11761_vm5 = vmmov %vm11760_vm0 }
 0x50d   :  { %4628 = vmatmul.mubr.bf16.gmra.mrb[144].mxu0 %v4343_v18 }
 0x50e   :  { %6669 = vmatprep.mubr.msk.bf16.mxu0 %vm11752_vm4, %v9854_v50  ;;  %vm11759_vm4 = vmmov %vm11755_vm3 }
 0x515   :  { %4636 = vmatmul.mubr.bf16.gmra.mrb[148].mxu0 %v4346_v7 }
 0x568   :  { %v4517_v3 = vpop.f32.mrb[88].mxu0 }
 0x569   :  { %v4518_v62 = vadd.f32 %v9985_v52, %v4517_v3  ;;  %v4519_v56 = vpop.f32.mrb[89].mxu0 }
 0x56a   :  { %v4520_v50 = vpop.f32.mrb[90].mxu0 }
 0x56b   :  { %v4521_v1 = vadd.f32 %v9985_v52, %v4520_v50  ;;  %v4522_v47 = vpop.f32.mrb[91].mxu0  ;;  %v4644_v63 = vmax.f32 %v4518_v62, 0.0 }
 0x56d   :  { %v4645_v32 = vmax.f32 %v4521_v1, 0.0 }
 0x56f   :  { %v4676_v17 = vpack.c.bf16 %v4645_v32, %v4644_v63 }
 0x571   :  { %4708 = vrot.lane.b32.xlu0 %v4676_v17, %s7116_s5 }
 0x574   :  { %v4525_v58 = vpop.f32.mrb[92].mxu0 }
 0x575   :  { %v4526_v48 = vadd.f32 %v9985_v52, %v4525_v58  ;;  %v4527_v23 = vpop.f32.mrb[93].mxu0 }
 0x576   :  { %v4528_v10 = vpop.f32.mrb[94].mxu0 }
 0x577   :  { %v4529_v42 = vadd.f32 %v9985_v52, %v4528_v10  ;;  %v4530_v11 = vpop.f32.mrb[95].mxu0  ;;  %v4646_v6 = vmax.f32 %v4526_v48, 0.0 }
 0x579   :  { %v4647_v31 = vmax.f32 %v4529_v42, 0.0 }
 0x57b   :  { %v4677_v60 = vpack.c.bf16 %v4647_v31, %v4646_v6 }
 0x57c   :  { %v4533_v61 = vpop.f32.mrb[96].mxu0 }
 0x57d   :  { %v4534_v26 = vadd.f32 %v9985_v52, %v4533_v61  ;;  %4710 = vrot.lane.b32.xlu1 %v4677_v60, %s7116_s5  ;;  %v4535_v30 = vpop.f32.mrb[97].mxu0 }
 0x57e   :  { %v4536_v0 = vpop.f32.mrb[98].mxu0 }
 0x57f   :  { %v4537_v40 = vadd.f32 %v9985_v52, %v4536_v0  ;;  %v4538_v36 = vpop.f32.mrb[99].mxu0  ;;  %v4648_v34 = vmax.f32 %v4534_v26, 0.0 }
 0x581   :  { %v4649_v54 = vmax.f32 %v4537_v40, 0.0 }
 0x583   :  { %v4678_v29 = vpack.c.bf16 %v4649_v54, %v4648_v34 }
 0x585   :  { %4712 = vrot.lane.b32.xlu0 %v4678_v29, %s7116_s5 }
 0x588   :  { %v4541_v45 = vpop.f32.mrb[100].mxu0 }
 0x589   :  { %v4542_v2 = vadd.f32 %v9985_v52, %v4541_v45  ;;  %v4543_v37 = vpop.f32.mrb[101].mxu0 }
 0x58a   :  { %v4544_v24 = vpop.f32.mrb[102].mxu0 }
 0x58b   :  { %v4545_v43 = vadd.f32 %v9985_v52, %v4544_v24  ;;  %v4546_v55 = vpop.f32.mrb[103].mxu0  ;;  %v4650_v35 = vmax.f32 %v4542_v2, 0.0 }
 0x58d   :  { %v4651_v18 = vmax.f32 %v4545_v43, 0.0 }
 0x58f   :  { %v4679_v59 = vpack.c.bf16 %v4651_v18, %v4650_v35 }
 0x590   :  { %v4549_v5 = vpop.f32.mrb[104].mxu0 }
 0x591   :  { %v4550_v49 = vadd.f32 %v9985_v52, %v4549_v5  ;;  %4714 = vrot.lane.b32.xlu1 %v4679_v59, %s7116_s5  ;;  %v4551_v28 = vpop.f32.mrb[105].mxu0 }
 0x592   :  { %v4552_v22 = vpop.f32.mrb[106].mxu0 }
 0x593   :  { %v4553_v7 = vadd.f32 %v9985_v52, %v4552_v22  ;;  %v4554_v3 = vpop.f32.mrb[107].mxu0  ;;  %v4652_v62 = vmax.f32 %v4550_v49, 0.0 }
 0x595   :  { %v4653_v56 = vmax.f32 %v4553_v7, 0.0 }
 0x597   :  { %v4680_v50 = vpack.c.bf16 %v4653_v56, %v4652_v62 }
 0x598   :  { %v4557_v1 = vpop.f32.mrb[108].mxu0 }
 0x599   :  { %v4558_v47 = vadd.f32 %v9985_v52, %v4557_v1  ;;  %4716 = vrot.lane.b32.xlu0 %v4680_v50, %s7116_s5  ;;  %v4559_v63 = vpop.f32.mrb[109].mxu0 }
 0x59a   :  { %v4560_v32 = vpop.f32.mrb[110].mxu0 }
 0x59b   :  { %v4561_v17 = vadd.f32 %v9985_v52, %v4560_v32  ;;  %v4562_v58 = vpop.f32.mrb[111].mxu0  ;;  %v4654_v48 = vmax.f32 %v4558_v47, 0.0 }
 0x59d   :  { %v4655_v23 = vmax.f32 %v4561_v17, 0.0 }
 0x59f   :  { %v4681_v10 = vpack.c.bf16 %v4655_v23, %v4654_v48 }
 0x5a0   :  { %v4565_v42 = vpop.f32.mrb[112].mxu0 }
 0x5a1   :  { %v4566_v11 = vadd.f32 %v9985_v52, %v4565_v42  ;;  %4718 = vrot.lane.b32.xlu1 %v4681_v10, %s7116_s5  ;;  %v4567_v6 = vpop.f32.mrb[113].mxu0 }
 0x5a2   :  { %v4568_v31 = vpop.f32.mrb[114].mxu0 }
 0x5a3   :  { %v4569_v60 = vadd.f32 %v9985_v52, %v4568_v31  ;;  %v4570_v61 = vpop.f32.mrb[115].mxu0  ;;  %v4656_v26 = vmax.f32 %v4566_v11, 0.0  ;;  %v4774_v11 = vld [vmem:[#allocation2 + $0x8] sm:$0xff] }
 0x5a5   :  { %v4657_v30 = vmax.f32 %v4569_v60, 0.0 }
 0x5a7   :  { %v4682_v0 = vpack.c.bf16 %v4657_v30, %v4656_v26  ;;  %v4776_v26 = vld [vmem:[#allocation2 + $0x18] sm:$0xff] }
 0x5a8   :  { %v4573_v40 = vpop.f32.mrb[116].mxu0 }
 0x5a9   :  { %v4574_v36 = vadd.f32 %v9985_v52, %v4573_v40  ;;  %4720 = vrot.lane.b32.xlu0 %v4682_v0, %s7116_s5  ;;  %v4575_v34 = vpop.f32.mrb[117].mxu0 }
 0x5aa   :  { %v4576_v54 = vpop.f32.mrb[118].mxu0 }
 0x5ab   :  { %v4577_v29 = vadd.f32 %v9985_v52, %v4576_v54  ;;  %v4578_v45 = vpop.f32.mrb[119].mxu0  ;;  %v4658_v2 = vmax.f32 %v4574_v36, 0.0  ;;  %v6955_v54 = vld [vmem:[%s10890_s8] sm:$0xff]  }
 0x5ac   :  { %6844 = vmatprep.subr.bf16.mxu1 %v6955_v54 }
 0x5ad   :  { %v4659_v37 = vmax.f32 %v4577_v29, 0.0  ;;  %6845 = vmatpush3.bf16.msra.mxu1 %v6955_v54  ;;  %v6961_v54 = vld [vmem:[%s10890_s8 + $0x30] sm:$0xff]  }
 0x5af   :  { %v4683_v24 = vpack.c.bf16 %v4659_v37, %v4658_v2 }
 0x5b0   :  { %v4581_v43 = vpop.f32.mrb[120].mxu0 }
 0x5b1   :  { %v4582_v55 = vadd.f32 %v9985_v52, %v4581_v43  ;;  %4722 = vrot.lane.b32.xlu1 %v4683_v24, %s7116_s5  ;;  %v4583_v35 = vpop.f32.mrb[121].mxu0 }
 0x5b2   :  { %v4584_v18 = vpop.f32.mrb[122].mxu0 }
 0x5b3   :  { %v4585_v59 = vadd.f32 %v9985_v52, %v4584_v18  ;;  %v4586_v5 = vpop.f32.mrb[123].mxu0  ;;  %v4660_v49 = vmax.f32 %v4582_v55, 0.0 }
 0x5b4   :  { %v6956_v5 = vld [vmem:[%s10890_s8 + $0x8] sm:$0xff]  }
 0x5b5   :  { %v4661_v28 = vmax.f32 %v4585_v59, 0.0  ;;  %v4778_v59 = vld [vmem:[#allocation2 + $0x28] sm:$0xff]  ;;  %6846 = vmatprep.subr.bf16.mxu1 %v6956_v5 }
 0x5b6   :  { %6847 = vmatpush3.bf16.msra.mxu1 %v6956_v5 }
 0x5b7   :  { %v4684_v22 = vpack.c.bf16 %v4661_v28, %v4660_v49 }
 0x5b8   :  { %v4589_v7 = vpop.f32.mrb[124].mxu0 }
 0x5b9   :  { %v4590_v3 = vadd.f32 %v9985_v52, %v4589_v7  ;;  %4724 = vrot.lane.b32.xlu0 %v4684_v22, %s7116_s5  ;;  %v4591_v62 = vpop.f32.mrb[125].mxu0  ;;  %v6957_v7 = vld [vmem:[%s10890_s8 + $0x10] sm:$0xff]  }
 0x5ba   :  { %v4592_v56 = vpop.f32.mrb[126].mxu0  ;;  %v4780_v62 = vld [vmem:[#allocation2 + $0x38] sm:$0xff]  ;;  %6848 = vmatprep.subr.bf16.mxu1 %v6957_v7 }
 0x5bb   :  { %v4593_v50 = vadd.f32 %v9985_v52, %v4592_v56  ;;  %v4594_v1 = vpop.f32.mrb[127].mxu0  ;;  %v4662_v47 = vmax.f32 %v4590_v3, 0.0  ;;  %6849 = vmatpush3.bf16.msra.mxu1 %v6957_v7 }
 0x5bd   :  { %v4663_v63 = vmax.f32 %v4593_v50, 0.0 }
 0x5bf   :  { %v4685_v32 = vpack.c.bf16 %v4663_v63, %v4662_v47 }
 0x5c0   :  { %v4597_v17 = vpop.f32.mrb[128].mxu0 }
 0x5c1   :  { %v4598_v58 = vadd.f32 %v9985_v52, %v4597_v17  ;;  %4726 = vrot.lane.b32.xlu1 %v4685_v32, %s7116_s5  ;;  %v4599_v48 = vpop.f32.mrb[129].mxu0  ;;  %v6958_v32 = vld [vmem:[%s10890_s8 + $0x18] sm:$0xff]   ;;  %v6959_v17 = vld [vmem:[%s10890_s8 + $0x20] sm:$0xff]  }
 0x5c2   :  { %v4600_v23 = vpop.f32.mrb[130].mxu0  ;;  %6850 = vmatprep.subr.bf16.mxu1 %v6958_v32 }
 0x5c3   :  { %v4601_v10 = vadd.f32 %v9985_v52, %v4600_v23  ;;  %v4602_v42 = vpop.f32.mrb[131].mxu0  ;;  %v4664_v6 = vmax.f32 %v4598_v58, 0.0  ;;  %6851 = vmatpush3.bf16.msra.mxu1 %v6958_v32  ;;  %v4794_v32 = vld [vmem:[#allocation2 + $0xa8] sm:$0xff] }
 0x5c4   :  { %6852 = vmatprep.subr.bf16.mxu1 %v6959_v17 }
 0x5c5   :  { %v4665_v31 = vmax.f32 %v4601_v10, 0.0  ;;  %4862 = vrot.lane.b32.xlu1 %v4774_v11, %s7116_s5 }
 0x5c7   :  { %v10020_v60 = vpack.c.bf16 %v4665_v31, %v4664_v6  ;;  %6853 = vmatpush3.bf16.msra.mxu1 %v6959_v17  ;;  %v4796_v17 = vld [vmem:[#allocation2 + $0xb8] sm:$0xff] }
 0x5c8   :  { %v4605_v61 = vpop.f32.mrb[132].mxu0 }
 0x5c9   :  { %v4606_v30 = vadd.f32 %v9985_v52, %v4605_v61  ;;  %4866 = vrot.lane.b32.xlu1 %v4776_v26, %s7116_s5  ;;  %v4607_v0 = vpop.f32.mrb[133].mxu0  ;;  %v4782_v26 = vld [vmem:[#allocation2 + $0x48] sm:$0xff] }
 0x5ca   :  { %v4608_v40 = vpop.f32.mrb[134].mxu0 }
 0x5cb   :  { %v4609_v36 = vadd.f32 %v9985_v52, %v4608_v40  ;;  %v4610_v34 = vpop.f32.mrb[135].mxu0  ;;  %v4666_v29 = vmax.f32 %v4606_v30, 0.0  ;;  %v6960_v30 = vld [vmem:[%s10890_s8 + $0x28] sm:$0xff]  }
 0x5cc   :  { %6854 = vmatprep.subr.bf16.mxu1 %v6960_v30 }
 0x5cd   :  { %v4667_v45 = vmax.f32 %v4609_v36, 0.0  ;;  %6855 = vmatpush3.bf16.msra.mxu1 %v6960_v30 }
 0x5ce   :  { %6856 = vmatprep.subr.bf16.mxu1 %v6961_v54 }
 0x5cf   :  { %v4687_v2 = vpack.c.bf16 %v4667_v45, %v4666_v29  ;;  %v4784_v45 = vld [vmem:[#allocation2 + $0x58] sm:$0xff] }
 0x5d0   :  { %v4613_v37 = vpop.f32.mrb[136].mxu0 }
 0x5d1   :  { %v4614_v24 = vadd.f32 %v9985_v52, %v4613_v37  ;;  %4730 = vrot.lane.b32.xlu1 %v4687_v2, %s7116_s5  ;;  %v4615_v43 = vpop.f32.mrb[137].mxu0  ;;  %6857 = vmatpush3.bf16.msra.mxu1 %v6961_v54 }
 0x5d2   :  { %v4616_v55 = vpop.f32.mrb[138].mxu0 }
 0x5d3   :  { %v4617_v35 = vadd.f32 %v9985_v52, %v4616_v55  ;;  %v4618_v18 = vpop.f32.mrb[139].mxu0  ;;  %v4668_v49 = vmax.f32 %v4614_v24, 0.0 }
 0x5d5   :  { %v4669_v28 = vmax.f32 %v4617_v35, 0.0  ;;  %4870 = vrot.lane.b32.xlu1 %v4778_v59, %s7116_s5  ;;  %v6962_v35 = vld [vmem:[%s10890_s8 + $0x38] sm:$0xff]  }
 0x5d6   :  { %6858 = vmatprep.subr.bf16.mxu1 %v6962_v35 }
 0x5d7   :  { %v10035_v22 = vpack.c.bf16 %v4669_v28, %v4668_v49  ;;  %6859 = vmatpush3.bf16.msra.mxu1 %v6962_v35  ;;  %v11757_v28 = vmov 0  }
 0x5d8   :  { %v4621_v3 = vpop.f32.mrb[140].mxu0  ;;  %6077 = vmatprep.subr.bf16.mxu1 %v11757_v28 }
 0x5d9   :  { %v4622_v56 = vadd.f32 %v9985_v52, %v4621_v3  ;;  %4874 = vrot.lane.b32.xlu1 %v4780_v62, %s7116_s5  ;;  %v4623_v50 = vpop.f32.mrb[141].mxu0  ;;  %v4788_v3 = vld [vmem:[#allocation2 + $0x78] sm:$0xff] }
 0x5da   :  { %v4624_v1 = vpop.f32.mrb[142].mxu0  ;;  %v4790_v50 = vld [vmem:[#allocation2 + $0x88] sm:$0xff] }
 0x5db   :  { %v4625_v47 = vadd.f32 %v9985_v52, %v4624_v1  ;;  %v4626_v63 = vpop.f32.mrb[143].mxu0  ;;  %v4670_v58 = vmax.f32 %v4622_v56, 0.0  ;;  %v4792_v1 = vld [vmem:[#allocation2 + $0x98] sm:$0xff] }
 0x5dd   :  { %v4671_v48 = vmax.f32 %v4625_v47, 0.0 }
 0x5df   :  { %v4689_v23 = vpack.c.bf16 %v4671_v48, %v4670_v58 }
 0x5e0   :  { %v4629_v10 = vpop.f32.mrb[144].mxu0 }
 0x5e1   :  { %v4630_v42 = vadd.f32 %v9985_v52, %v4629_v10  ;;  %4734 = vrot.lane.b32.xlu1 %v4689_v23, %s7116_s5  ;;  %v4631_v11 = vpop.f32.mrb[145].mxu0  ;;  %v4800_v23 = vld [vmem:[#allocation2 + $0xd8] sm:$0xff] }
 0x5e2   :  { %v4632_v6 = vpop.f32.mrb[146].mxu0  ;;  %v4802_v11 = vld [vmem:[#allocation2 + $0xe8] sm:$0xff] }
 0x5e3   :  { %v4633_v31 = vadd.f32 %v9985_v52, %v4632_v6  ;;  %v4634_v61 = vpop.f32.mrb[147].mxu0  ;;  %v4672_v0 = vmax.f32 %v4630_v42, 0.0  ;;  %v4709_v36 = vpop.permute.xlu0 %4708  ;;  %v4804_v6 = vld [vmem:[#allocation2 + $0xf8] sm:$0xff] }
 0x5e4   :  { %4757 = vst.msk [vmem:[#allocation2] sm:$0xff] %vm4756_vm11, %v4709_v36 }
 0x5e5   :  { %v4673_v40 = vmax.f32 %v4633_v31, 0.0  ;;  %4878 = vrot.lane.b32.xlu1 %v4782_v26, %s7116_s5 }
 0x5e7   :  { %v10057_v34 = vpack.c.bf16 %v4673_v40, %v4672_v0 }
 0x5e8   :  { %v4637_v29 = vpop.f32.mrb[148].mxu0 }
 0x5e9   :  { %v4638_v2 = vadd.f32 %v9985_v52, %v4637_v29  ;;  %4882 = vrot.lane.b32.xlu1 %v4784_v45, %s7116_s5  ;;  %v4639_v37 = vpop.f32.mrb[149].mxu0 }
 0x5ea   :  { %v4640_v24 = vpop.f32.mrb[150].mxu0 }
 0x5eb   :  { %v4641_v43 = vadd.f32 %v9985_v52, %v4640_v24  ;;  %v4642_v55 = vpop.f32.mrb[151].mxu0  ;;  %v4674_v18 = vmax.f32 %v4638_v2, 0.0  ;;  %v4773_v5 = vld [vmem:[#allocation2] sm:$0xff]  ;;  %v4786_v52 = vld [vmem:[#allocation2 + $0x68] sm:$0xff] }
 0x5ec   :  { %4860 = vrot.lane.b32.xlu0 %v4773_v5, %s7116_s5 }
 0x5ed   :  { %v4675_v59 = vmax.f32 %v4641_v43, 0.0 }
 0x5ef   :  { %v4691_v49 = vpack.c.bf16 %v4675_v59, %v4674_v18  ;;  %v4711_v7 = vpop.permute.xlu1 %4710 }
 0x5f0   :  { %4758 = vst.msk [vmem:[#allocation2 + $0x10] sm:$0xff] %vm4756_vm11, %v4711_v7 }
 0x5f1   :  { %4738 = vrot.lane.b32.xlu1 %v4691_v49, %s7116_s5 }
 0x5f5   :  { %4886 = vrot.lane.b32.xlu1 %v4786_v52, %s7116_s5 }
 0x5f7   :  { %v4713_v62 = vpop.permute.xlu0 %4712  ;;  %v4775_v56 = vld [vmem:[#allocation2 + $0x10] sm:$0xff] }
 0x5f8   :  { %4759 = vst.msk [vmem:[#allocation2 + $0x20] sm:$0xff] %vm4756_vm11, %v4713_v62  ;;  %4864 = vrot.lane.b32.xlu0 %v4775_v56, %s7116_s5 }
 0x5f9   :  { %4890 = vrot.lane.b32.xlu1 %v4788_v3, %s7116_s5 }
 0x5fc   :  { %4728 = vrot.lane.b32.xlu0 %v10020_v60, %s7116_s5  ;;  %v4798_v60 = vld [vmem:[#allocation2 + $0xc8] sm:$0xff] }
 0x5fd   :  { %4894 = vrot.lane.b32.xlu1 %v4790_v50, %s7116_s5 }
 0x5ff   :  { %v4777_v47 = vld [vmem:[#allocation2 + $0x20] sm:$0xff] }
 0x600   :  { %4868 = vrot.lane.b32.xlu0 %v4777_v47, %s7116_s5 }
 0x601   :  { %4898 = vrot.lane.b32.xlu1 %v4792_v1, %s7116_s5 }
 0x603   :  { %v4715_v63 = vpop.permute.xlu1 %4714 }
 0x604   :  { %4760 = vst.msk [vmem:[#allocation2 + $0x30] sm:$0xff] %vm4756_vm11, %v4715_v63 }
 0x605   :  { %4902 = vrot.lane.b32.xlu1 %v4794_v32, %s7116_s5 }
 0x609   :  { %4906 = vrot.lane.b32.xlu1 %v4796_v17, %s7116_s5 }
 0x60b   :  { %v4717_v58 = vpop.permute.xlu0 %4716  ;;  %v4779_v48 = vld [vmem:[#allocation2 + $0x30] sm:$0xff] }
 0x60c   :  { %4761 = vst.msk [vmem:[#allocation2 + $0x40] sm:$0xff] %vm4756_vm11, %v4717_v58  ;;  %4872 = vrot.lane.b32.xlu0 %v4779_v48, %s7116_s5 }
 0x60d   :  { %4910 = vrot.lane.b32.xlu1 %v4798_v60, %s7116_s5 }
 0x610   :  { %4732 = vrot.lane.b32.xlu0 %v10035_v22, %s7116_s5 }
 0x611   :  { %4914 = vrot.lane.b32.xlu1 %v4800_v23, %s7116_s5 }
 0x613   :  { %v4719_v10 = vpop.permute.xlu1 %4718  ;;  %v4781_v42 = vld [vmem:[#allocation2 + $0x40] sm:$0xff] }
 0x614   :  { %4762 = vst.msk [vmem:[#allocation2 + $0x50] sm:$0xff] %vm4756_vm11, %v4719_v10  ;;  %4876 = vrot.lane.b32.xlu0 %v4781_v42, %s7116_s5 }
 0x615   :  { %4918 = vrot.lane.b32.xlu1 %v4802_v11, %s7116_s5 }
 0x619   :  { %4922 = vrot.lane.b32.xlu1 %v4804_v6, %s7116_s5 }
 0x61b   :  { %v4721_v31 = vpop.permute.xlu0 %4720  ;;  %v4783_v61 = vld [vmem:[#allocation2 + $0x50] sm:$0xff] }
 0x61c   :  { %4763 = vst.msk [vmem:[#allocation2 + $0x60] sm:$0xff] %vm4756_vm11, %v4721_v31  ;;  %4880 = vrot.lane.b32.xlu0 %v4783_v61, %s7116_s5 }
 0x620   :  { %4736 = vrot.lane.b32.xlu0 %v10057_v34, %s7116_s5 }
 0x623   :  { %v4723_v22 = vpop.permute.xlu1 %4722  ;;  %v4785_v26 = vld [vmem:[#allocation2 + $0x60] sm:$0xff] }
 0x624   :  { %4764 = vst.msk [vmem:[#allocation2 + $0x70] sm:$0xff] %vm4756_vm11, %v4723_v22  ;;  %4884 = vrot.lane.b32.xlu0 %v4785_v26, %s7116_s5 }
 0x62b   :  { %v4725_v30 = vpop.permute.xlu0 %4724  ;;  %v4787_v0 = vld [vmem:[#allocation2 + $0x70] sm:$0xff] }
 0x62c   :  { %4765 = vst.msk [vmem:[#allocation2 + $0x80] sm:$0xff] %vm4756_vm11, %v4725_v30  ;;  %4888 = vrot.lane.b32.xlu0 %v4787_v0, %s7116_s5 }
 0x633   :  { %v4727_v40 = vpop.permute.xlu1 %4726  ;;  %v4789_v36 = vld [vmem:[#allocation2 + $0x80] sm:$0xff] }
 0x634   :  { %4766 = vst.msk [vmem:[#allocation2 + $0x90] sm:$0xff] %vm4756_vm11, %v4727_v40  ;;  %4892 = vrot.lane.b32.xlu0 %v4789_v36, %s7116_s5 }
 0x637   :  { %v4863_v54 = vpop.permute.xlu1 %4862 }
 0x63b   :  { %v4791_v34 = vld [vmem:[#allocation2 + $0x90] sm:$0xff]  ;;  %v4867_v29 = vpop.permute.xlu1 %4866 }
 0x63c   :  { %4896 = vrot.lane.b32.xlu0 %v4791_v34, %s7116_s5 }
 0x643   :  { %v4731_v45 = vpop.permute.xlu1 %4730 }
 0x644   :  { %4768 = vst.msk [vmem:[#allocation2 + $0xb0] sm:$0xff] %vm4756_vm11, %v4731_v45 }
 0x647   :  { %v4871_v2 = vpop.permute.xlu1 %4870 }
 0x64b   :  { %v4875_v37 = vpop.permute.xlu1 %4874  ;;  %v4795_v56 = vld [vmem:[#allocation2 + $0xb0] sm:$0xff] }
 0x653   :  { %v4735_v24 = vpop.permute.xlu1 %4734 }
 0x654   :  { %4770 = vst.msk [vmem:[#allocation2 + $0xd0] sm:$0xff] %vm4756_vm11, %v4735_v24 }
 0x657   :  { %v4879_v43 = vpop.permute.xlu1 %4878 }
 0x65b   :  { %v4883_v55 = vpop.permute.xlu1 %4882  ;;  %v4799_v48 = vld [vmem:[#allocation2 + $0xd0] sm:$0xff] }
 0x65e   :  { %v4861_v35 = vpop.permute.xlu0 %4860 }
 0x65f   :  { %v4925_v18 = vsel %vm11755_vm3, %v4861_v35, %v4863_v54  ;;  %vm11762_vm3 = vmmov %vm11760_vm0 }
 0x660   :  { %6860 = vmatprep.mubr.bf16.mxu1 %v4925_v18 }
 0x663   :  { %v4739_v59 = vpop.permute.xlu1 %4738 }
 0x664   :  { %4772 = vst.msk [vmem:[#allocation2 + $0xf0] sm:$0xff] %vm4756_vm11, %v4739_v59 }
 0x667   :  { %v4887_v10 = vpop.permute.xlu1 %4886 }
 0x66a   :  { %v4865_v5 = vpop.permute.xlu0 %4864 }
 0x66b   :  { %v4926_v49 = vsel %vm11758_vm10, %v4865_v5, %v4867_v29  ;;  %vm11763_vm10 = vmmov %vm11760_vm0  ;;  %v4891_v31 = vpop.permute.xlu1 %4890  ;;  %v4803_v22 = vld [vmem:[#allocation2 + $0xf0] sm:$0xff] }
 0x66c   :  { %6861 = vmatmul.mubr.bf16.vlgmr.msra.gmra.mrb[40].mxu1 %v4926_v49 }
 0x66e   :  { %v4729_v7 = vpop.permute.xlu0 %4728 }
 0x66f   :  { %4767 = vst.msk [vmem:[#allocation2 + $0xa0] sm:$0xff] %vm4756_vm11, %v4729_v7  ;;  %v4895_v30 = vpop.permute.xlu1 %4894 }
 0x672   :  { %v4869_v52 = vpop.permute.xlu0 %4868 }
 0x673   :  { %v4927_v3 = vsel %vm11759_vm4, %v4869_v52, %v4871_v2  ;;  %vm11764_vm4 = vmmov %vm11760_vm0  ;;  %v4899_v36 = vpop.permute.xlu1 %4898 }
 0x674   :  { %6864 = vmatprep.mubr.bf16.mxu1 %v4927_v3 }
 0x676   :  { %v4793_v62 = vld [vmem:[#allocation2 + $0xa0] sm:$0xff] }
 0x677   :  { %4900 = vrot.lane.b32.xlu0 %v4793_v62, %s7116_s5  ;;  %v4903_v29 = vpop.permute.xlu1 %4902 }
 0x67b   :  { %4904 = vrot.lane.b32.xlu0 %v4795_v56, %s7116_s5 }
 0x67e   :  { %v4873_v50 = vpop.permute.xlu0 %4872 }
 0x67f   :  { %v4928_v1 = vsel %vm11760_vm0, %v4873_v50, %v4875_v37  ;;  %v4907_v37 = vpop.permute.xlu1 %4906 }
 0x680   :  { %6865 = vmatmul.mubr.bf16.gmra.mrb[44].mxu1 %v4928_v1  ;;  %v6963_v1 = vld [vmem:[%s10892_s10] sm:$0xff]  }
 0x681   :  { %6078 = vmatpush1.bf16.msra.mxu1 %v6963_v1 }
 0x682   :  { %v4733_v47 = vpop.permute.xlu0 %4732  ;;  %6079 = vmatprep.subr.bf16.mxu1 %v11757_v28 }
 0x683   :  { %4769 = vst.msk [vmem:[#allocation2 + $0xc0] sm:$0xff] %vm4756_vm11, %v4733_v47  ;;  %v6964_v47 = vld [vmem:[%s10892_s10 + $0x8] sm:$0xff]  }
 0x685   :  { %6080 = vmatpush1.bf16.msra.mxu1 %v6964_v47  ;;  %v6971_v47 = vld [vmem:[%s10892_s10 + $0x40] sm:$0xff]  }
 0x686   :  { %v4877_v63 = vpop.permute.xlu0 %4876  ;;  %6081 = vmatprep.subr.bf16.mxu1 %v11757_v28 }
 0x687   :  { %v4929_v32 = vsel %vm11761_vm5, %v4877_v63, %v4879_v43  ;;  %vm11766_vm5 = vmmov %vm11760_vm0  ;;  %v6965_v63 = vld [vmem:[%s10892_s10 + $0x10] sm:$0xff]  }
 0x688   :  { %6868 = vmatprep.mubr.bf16.mxu1 %v4929_v32  ;;  %v6966_v32 = vld [vmem:[%s10892_s10 + $0x18] sm:$0xff]  }
 0x689   :  { %6082 = vmatpush1.bf16.msra.mxu1 %v6965_v63 }
 0x68a   :  { %v4797_v17 = vld [vmem:[#allocation2 + $0xc0] sm:$0xff]  ;;  %6083 = vmatprep.subr.bf16.mxu1 %v11757_v28 }
 0x68b   :  { %4908 = vrot.lane.b32.xlu0 %v4797_v17, %s7116_s5  ;;  %v6967_v17 = vld [vmem:[%s10892_s10 + $0x20] sm:$0xff]  }
 0x68d   :  { %6084 = vmatpush1.bf16.msra.mxu1 %v6966_v32  ;;  %v11783_v32 = vld [vmem:[#allocation23_spill] sm:$0xff] }
 0x68e   :  { %v4881_v58 = vpop.permute.xlu0 %4880  ;;  %6085 = vmatprep.subr.bf16.mxu1 %v11757_v28 }
 0x68f   :  { %4912 = vrot.lane.b32.xlu0 %v4799_v48, %s7116_s5  ;;  %v4930_v60 = vsel %vm11762_vm3, %v4881_v58, %v4883_v55  ;;  %vm11767_vm3 = vmmov %vm11760_vm0  ;;  %v4911_v55 = vpop.permute.xlu1 %4910  ;;  %v6968_v58 = vld [vmem:[%s10892_s10 + $0x28] sm:$0xff]   ;;  %v6969_v48 = vld [vmem:[%s10892_s10 + $0x30] sm:$0xff]  }
 0x690   :  { %6869 = vmatmul.mubr.bf16.gmra.mrb[48].mxu1 %v4930_v60  ;;  %v6970_v60 = vld [vmem:[%s10892_s10 + $0x38] sm:$0xff]  }
 0x691   :  { %6086 = vmatpush1.bf16.msra.mxu1 %v6967_v17 }
 0x692   :  { %v4737_v23 = vpop.permute.xlu0 %4736  ;;  %6087 = vmatprep.subr.bf16.mxu1 %v11757_v28 }
 0x693   :  { %4771 = vst.msk [vmem:[#allocation2 + $0xe0] sm:$0xff] %vm4756_vm11, %v4737_v23  ;;  %vm11765_vm11 = vmmov %vm11760_vm0  ;;  %v4915_v59 = vpop.permute.xlu1 %4914  ;;  %v10168_v23 = vld [vmem:[%s10891_s9] ss:$0 sm:$0xff] }
 0x695   :  { %6088 = vmatpush1.bf16.msra.mxu1 %v6968_v58  ;;  %v11785_v58 = vld [vmem:[#allocation33_spill] sm:$0xff] }
 0x696   :  { %v4885_v42 = vpop.permute.xlu0 %4884  ;;  %6089 = vmatprep.subr.bf16.mxu1 %v11757_v28 }
 0x697   :  { %v4931_v11 = vsel %vm11763_vm10, %v4885_v42, %v4887_v10  ;;  %vm11768_vm10 = vmmov %vm11760_vm0  ;;  %v4919_v7 = vpop.permute.xlu1 %4918 }
 0x698   :  { %6872 = vmatprep.mubr.bf16.mxu1 %v4931_v11 }
 0x699   :  { %6090 = vmatpush1.bf16.msra.mxu1 %v6969_v48 }
 0x69a   :  { %v4801_v6 = vld [vmem:[#allocation2 + $0xe0] sm:$0xff]  ;;  %6091 = vmatprep.subr.bf16.mxu1 %v11757_v28 }
 0x69b   :  { %4916 = vrot.lane.b32.xlu0 %v4801_v6, %s7116_s5  ;;  %v4923_v62 = vpop.permute.xlu1 %4922 }
 0x69d   :  { %6092 = vmatpush1.bf16.msra.mxu1 %v6970_v60 }
 0x69e   :  { %v4889_v61 = vpop.permute.xlu0 %4888  ;;  %6093 = vmatprep.subr.bf16.mxu1 %v11757_v28 }
 0x69f   :  { %4920 = vrot.lane.b32.xlu0 %v4803_v22, %s7116_s5  ;;  %v4932_v26 = vsel %vm11764_vm4, %v4889_v61, %v4891_v31  ;;  %vm11769_vm4 = vmmov %vm11760_vm0 }
 0x6a0   :  { %6873 = vmatmul.mubr.bf16.gmra.mrb[52].mxu1 %v4932_v26 }
 0x6a1   :  { %6094 = vmatpush1.bf16.msra.mxu1 %v6971_v47 }
 0x6a2   :  { %6095 = vmatprep.subr.bf16.mxu1 %v11757_v28 }
 0x6a6   :  { %v4893_v0 = vpop.permute.xlu0 %4892 }
 0x6a7   :  { %v4933_v40 = vsel %vm11760_vm0, %v4893_v0, %v4895_v30 }
 0x6a8   :  { %6876 = vmatprep.mubr.bf16.mxu1 %v4933_v40 }
 0x6ae   :  { %v4897_v54 = vpop.permute.xlu0 %4896 }
 0x6af   :  { %v4934_v34 = vsel %vm11765_vm11, %v4897_v54, %v4899_v36  ;;  %vm11770_vm11 = vmmov %vm11760_vm0 }
 0x6b0   :  { %6877 = vmatmul.mubr.bf16.gmra.mrb[56].mxu1 %v4934_v34 }
 0x6e9   :  { %v4901_v45 = vpop.permute.xlu0 %4900 }
 0x6ea   :  { %v4935_v2 = vsel %vm11766_vm5, %v4901_v45, %v4903_v29  ;;  %vm11771_vm5 = vcmask 1040384  }
 0x6eb   :  { %6880 = vmatprep.mubr.bf16.mxu1 %v4935_v2 }
 0x6ed   :  { %v4905_v24 = vpop.permute.xlu0 %4904 }
 0x6ee   :  { %v4936_v43 = vsel %vm11767_vm3, %v4905_v24, %v4907_v37  ;;  %vm11772_vm3 = vmmov %vm11771_vm5 }
 0x6ef   :  { %6881 = vmatmul.mubr.bf16.gmra.mrb[60].mxu1 %v4936_v43 }
 0x6fd   :  { %v4909_v35 = vpop.permute.xlu0 %4908 }
 0x6fe   :  { %v4937_v18 = vsel %vm11768_vm10, %v4909_v35, %v4911_v55  ;;  %v11773_v55 = vld [vmem:[#allocation24_spill] sm:$0xff] }
 0x6ff   :  { %6884 = vmatprep.mubr.bf16.mxu1 %v4937_v18  ;;  %vm11774_vm10 = vcmp.ne.s16.totalorder %v11773_v55, 0  ;;  %v11775_v18 = vld [vmem:[#allocation26_spill] sm:$0xff] }
 0x701   :  { %v4913_v5 = vpop.permute.xlu0 %4912 }
 0x702   :  { %v4938_v49 = vsel %vm11769_vm4, %v4913_v5, %v4915_v59  ;;  %vm11776_vm4 = vcmp.ne.s16.totalorder %v11775_v18, 0 }
 0x703   :  { %6885 = vmatmul.mubr.bf16.gmra.mrb[64].mxu1 %v4938_v49 }
 0x70d   :  { %v4917_v52 = vpop.permute.xlu0 %4916 }
 0x70e   :  { %v4939_v3 = vsel %vm11760_vm0, %v4917_v52, %v4919_v7  ;;  %v11777_v7 = vld [vmem:[#allocation27_spill] sm:$0xff] }
 0x70f   :  { %6888 = vmatprep.mubr.bf16.mxu1 %v4939_v3  ;;  %vm11778_vm0 = vcmp.ne.s16.totalorder %v11777_v7, 0  ;;  %v11779_v3 = vld [vmem:[#allocation32_spill] sm:$0xff] }
 0x711   :  { %v4921_v56 = vpop.permute.xlu0 %4920 }
 0x712   :  { %v4940_v50 = vsel %vm11770_vm11, %v4921_v56, %v4923_v62  ;;  %vm11780_vm11 = vcmp.ne.s16.totalorder %v11779_v3, 0 }
 0x713   :  { %6889 = vmatmul.mubr.bf16.gmra.mrb[68].mxu1 %v4940_v50 }
 0x73f   :  { %v6862_v10 = vpop.f32.mrb[40].mxu1 }
 0x740   :  { %v5048_v42 = vadd.f32 %v6862_v10, %v10168_v23  ;;  %v5039_v11 = vpop.f32.mrb[41].mxu1 }
 0x741   :  { %v5040_v6 = vadd.f32 %v10168_v23, %v5039_v11  ;;  %v6863_v31 = vpop.f32.mrb[42].mxu1 }
 0x742   :  { %v5051_v61 = vadd.f32 %v6863_v31, %v10168_v23  ;;  %v5042_v22 = vpop.f32.mrb[43].mxu1  ;;  %v5168_v30 = vmax.f32 %v5048_v42, 0.0  ;;  %v6972_v31 = vld [vmem:[%s10892_s10 + $0x48] sm:$0xff]  }
 0x743   :  { %v5043_v26 = vadd.f32 %v10168_v23, %v5042_v22  ;;  %v5166_v40 = vmax.f32 %v5040_v6, 0.0  ;;  %6096 = vmatpush1.bf16.msra.mxu1 %v6972_v31 }
 0x744   :  { %v5169_v0 = vmax.f32 %v5051_v61, 0.0 }
 0x745   :  { %v5167_v36 = vmax.f32 %v5043_v26, 0.0 }
 0x746   :  { %v10174_v54 = vpack.c.bf16 %v5169_v0, %v5168_v30 }
 0x747   :  { %v5198_v34 = vpack.c.bf16 %v5167_v36, %v5166_v40 }
 0x748   :  { %v5231_v29 = vrot.slane %v10174_v54, 7 }
 0x749   :  { %v5230_v45 = vrot.slane %v5198_v34, 7 }
 0x74b   :  { %v10178_v2 = vsel %vm11771_vm5, %v5230_v45, %v5231_v29  ;;  %v10181_v37 = vsel %vm11772_vm3, 0, %v5230_v45  ;;  %vm11781_vm5 = vcmask 1046528   ;;  %vm11782_vm3 = vcmask 1045504  }
 0x74c   :  { %v5515_v24 = vrot.slane %v10181_v37, 1  ;;  %v5516_v43 = vrot.slane %v10178_v2, 1  ;;  %v5332_v35 = vsel %vm11774_vm10, %v10181_v37, 0  ;;  %v10191_v59 = vsel %vm11776_vm4, %v10178_v2, 0 }
 0x74d   :  { %v5781_v5 = vrot.slane %v5332_v35, 2  ;;  %v5782_v49 = vrot.slane %v10191_v59, 2  ;;  %v5298_v52 = vsel %vm11778_vm0, %v10181_v37, 0  ;;  %v5299_v62 = vsel %vm11780_vm11, %v10178_v2, 0 }
 0x74e   :  { %v5517_v56 = vsel %vm11781_vm5, %v5515_v24, %v5516_v43  ;;  %v5352_v50 = vshll.u32 %v5298_v52, 16  ;;  %v5357_v1 = vshll.u32 %v5299_v62, 16  ;;  %vm11784_vm10 = vcmp.ne.s16.totalorder %v11783_v32, 0 }
 0x74f   :  { %5548 = vrot.lane.b32.xlu1 %v5517_v56, %s7116_s5  ;;  %v5783_v63 = vsel %vm11782_vm3, %v5781_v5, %v5782_v49  ;;  %v5315_v17 = vsel %vm11784_vm10, %v10181_v37, 0  ;;  %vm11786_vm4 = vcmp.ne.s16.totalorder %v11785_v58, 0  ;;  %vm11787_vm0 = vcmask 261120  }
 0x750   :  { %v5316_v48 = vsel %vm11786_vm4, %v10178_v2, 0  ;;  %6690 = vmatprep.mubr.msk.bf16.mxu1 %vm11787_vm0, %v5783_v63  ;;  %v5350_v10 = vshrl.u32 %v5298_v52, 16  ;;  %v5354_v42 = vrot.slane %v5352_v50, 1  ;;  %v5581_v11 = vshrl.u32 %v5315_v17, 16 }
 0x751   :  { %v5584_v6 = vshll.u32 %v5315_v17, 16  ;;  %v5359_v26 = vrot.slane %v5357_v1, 1  ;;  %v5589_v30 = vshrl.u32 %v5316_v48, 16  ;;  %v5592_v0 = vshll.u32 %v5316_v48, 16 }
 0x752   :  { %v5355_v54 = vor.u32 %v5354_v42, %v5350_v10  ;;  %v5583_v34 = vrot.slane %v5581_v11, 1  ;;  %vm11788_vm11 = vsmask.f32 7424  ;;  %vm11789_vm5 = vsmask.f32 6400 }
 0x753   :  { %v6866_v60 = vpop.f32.mrb[44].mxu1  ;;  %v5586_v45 = vrot.slane %v5584_v6, 2  ;;  %v5591_v35 = vrot.slane %v5589_v30, 1  ;;  %v5594_v18 = vrot.slane %v5592_v0, 2  ;;  %v5361_v48 = vshrl.u32 %v5299_v62, 16  ;;  %v11792_v6 = vld [vmem:[#allocation34_spill] sm:$0xff] }
 0x754   :  { %v5064_v61 = vadd.f32 %v6866_v60, %v10168_v23  ;;  %v5055_v22 = vpop.f32.mrb[45].mxu1  ;;  %v5360_v7 = vsel %vm11788_vm11, %v5355_v54, %v5359_v26  ;;  %vm11790_vm3 = vcmask 1040384   ;;  %vm11793_vm4 = vcmp.ne.s16.totalorder %v11792_v6, 0  ;;  %v11796_v62 = vld [vmem:[#allocation35_spill] sm:$0xff] }
 0x755   :  { %v5056_v40 = vadd.f32 %v10168_v23, %v5055_v22  ;;  %v6867_v36 = vpop.f32.mrb[46].mxu1  ;;  %v5587_v52 = vor.u32 %v5586_v45, %v5583_v34  ;;  %5481 = vrot.lane.b32.xlu0 %v5360_v7, %s7123_s2  ;;  %v5595_v28 = vor.u32 %v5594_v18, %v5591_v35  ;;  %vm11791_vm10 = vmmov %vm11790_vm3  ;;  %v5363_v42 = vor.u32 %v5361_v48, %v5359_v26  ;;  %v11799_v34 = vld [vmem:[#allocation37_spill] sm:$0xff] }
 0x756   :  { %v5067_v24 = vadd.f32 %v6867_v36, %v10168_v23  ;;  %v5058_v55 = vpop.f32.mrb[47].mxu1  ;;  %v5172_v3 = vmax.f32 %v5064_v61, 0.0  ;;  %v11794_v61 = vld [vmem:[#allocation36_spill] sm:$0xff]  ;;  %vm11797_vm11 = vcmp.ne.s16.totalorder %v11796_v62, 0 }
 0x757   :  { %v5059_v5 = vadd.f32 %v10168_v23, %v5058_v55  ;;  %v5170_v50 = vmax.f32 %v5056_v40, 0.0  ;;  %v5596_v63 = vsel %vm11789_vm5, %v5587_v52, %v5595_v28  ;;  %vm11795_vm0 = vcmp.ne.s16.totalorder %v11794_v61, 0 }
 0x758   :  { %v5173_v56 = vmax.f32 %v5067_v24, 0.0  ;;  %vm11798_vm5 = vcmask 1046528  }
 0x759   :  { %v5171_v1 = vmax.f32 %v5059_v5, 0.0  ;;  %5732 = vrot.lane.b32.xlu0 %v5596_v63, %s7124_s27 }
 0x75a   :  { %v10227_v47 = vpack.c.bf16 %v5173_v56, %v5172_v3 }
 0x75b   :  { %v5200_v32 = vpack.c.bf16 %v5171_v1, %v5170_v50 }
 0x75c   :  { %v5235_v17 = vrot.slane %v10227_v47, 7  ;;  %v11818_v47 = vld [vmem:[#allocation46_spill] sm:$0xff] }
 0x75d   :  { %v5233_v58 = vrot.slane %v5200_v32, 7 }
 0x75f   :  { %v10233_v60 = vsel %vm11790_vm3, %v5231_v29, %v5233_v58  ;;  %v10238_v10 = vsel %vm11791_vm10, %v5233_v58, %v5235_v17  ;;  %vm11800_vm3 = vcmp.ne.s16.totalorder %v11799_v34, 0  ;;  %vm11801_vm10 = vmmov %vm11798_vm5 }
 0x760   :  { %v5518_v11 = vrot.slane %v10233_v60, 1  ;;  %v5300_v31 = vsel %vm11793_vm4, %v10233_v60, 0  ;;  %v5301_v22 = vsel %vm11795_vm0, %v10238_v10, 0  ;;  %v5317_v29 = vsel %vm11797_vm11, %v10233_v60, 0 }
 0x761   :  { %v5365_v30 = vshll.u32 %v5300_v31, 16  ;;  %v5369_v0 = vshrl.u32 %v5300_v31, 16  ;;  %v5373_v40 = vshll.u32 %v5301_v22, 16  ;;  %v5598_v36 = vshrl.u32 %v5317_v29, 16 }
 0x762   :  { %v5519_v26 = vsel %vm11798_vm5, %v5516_v43, %v5518_v11  ;;  %v5601_v54 = vshll.u32 %v5317_v29, 16  ;;  %v5318_v45 = vsel %vm11800_vm3, %v10238_v10, 0  ;;  %v5520_v24 = vrot.slane %v10238_v10, 1 }
 0x763   :  { %v6870_v55 = vpop.f32.mrb[48].mxu1  ;;  %5550 = vrot.lane.b32.xlu0 %v5519_v26, %s7116_s5  ;;  %v5367_v35 = vrot.slane %v5365_v30, 1  ;;  %v5375_v18 = vrot.slane %v5373_v40, 1  ;;  %v5600_v5 = vrot.slane %v5598_v36, 1  ;;  %v5607_v7 = vshrl.u32 %v5318_v45, 16 }
 0x764   :  { %v5080_v52 = vadd.f32 %v6870_v55, %v10168_v23  ;;  %v5071_v3 = vpop.f32.mrb[49].mxu1  ;;  %v5603_v56 = vrot.slane %v5601_v54, 2  ;;  %v5610_v50 = vshll.u32 %v5318_v45, 16  ;;  %v5521_v43 = vsel %vm11801_vm10, %v5518_v11, %v5520_v24 }
 0x765   :  { %v5072_v1 = vadd.f32 %v10168_v23, %v5071_v3  ;;  %v6871_v63 = vpop.f32.mrb[50].mxu1  ;;  %vm11802_vm4 = vsmask.f32 7424  ;;  %v5371_v58 = vor.u32 %v5369_v0, %v5367_v35  ;;  %v5609_v48 = vrot.slane %v5607_v7, 1  ;;  %v11805_v0 = vld [vmem:[#allocation41_spill] sm:$0xff] }
 0x766   :  { %v5368_v32 = vsel %vm11802_vm4, %v5363_v42, %v5367_v35  ;;  %v5083_v6 = vadd.f32 %v6871_v63, %v10168_v23  ;;  %v5074_v31 = vpop.f32.mrb[51].mxu1  ;;  %v5604_v61 = vor.u32 %v5603_v56, %v5600_v5  ;;  %v5612_v62 = vrot.slane %v5610_v50, 2  ;;  %vm11803_vm0 = vmmov %vm11802_vm4  ;;  %v11808_v5 = vld [vmem:[#allocation67_spill] sm:$0xff] }
 0x767   :  { %5483 = vrot.lane.b32.xlu1 %v5368_v32, %s7123_s2  ;;  %v5176_v29 = vmax.f32 %v5080_v52, 0.0  ;;  %v5075_v30 = vadd.f32 %v10168_v23, %v5074_v31  ;;  %v5376_v40 = vsel %vm11803_vm0, %v5371_v58, %v5375_v18  ;;  %vm11804_vm11 = vsmask.f32 6400 }
 0x768   :  { %v5177_v11 = vmax.f32 %v5083_v6, 0.0  ;;  %5485 = vrot.lane.b32.xlu0 %v5376_v40, %s7123_s2  ;;  %v5605_v36 = vsel %vm11804_vm11, %v5595_v28, %v5604_v61  ;;  %v5613_v42 = vor.u32 %v5612_v62, %v5609_v48  ;;  %vm11806_vm5 = vcmp.ne.s16.totalorder %v11805_v0, 0  ;;  %vm11807_vm3 = vmmov %vm11804_vm11  ;;  %v11816_v6 = vld [vmem:[#allocation48_spill] sm:$0xff]  ;;  %v11821_v40 = vld [vmem:[#allocation47_spill] sm:$0xff] }
 0x769   :  { %v5334_v26 = vsel %vm11806_vm5, %v10233_v60, 0  ;;  %v5174_v54 = vmax.f32 %v5072_v1, 0.0  ;;  %v5175_v34 = vmax.f32 %v5075_v30, 0.0  ;;  %vm11809_vm10 = vcmp.ne.s16.totalorder %v11808_v5, 0 }
 0x76a   :  { %v5784_v45 = vrot.slane %v5334_v26, 2  ;;  %v10271_v55 = vpack.c.bf16 %v5177_v11, %v5176_v29  ;;  %v5614_v35 = vsel %vm11807_vm3, %v5604_v61, %v5613_v42  ;;  %v10278_v7 = vsel %vm11809_vm10, %v10238_v10, 0 }
 0x76b   :  { %5734 = vrot.lane.b32.xlu1 %v5605_v36, %s7124_s27  ;;  %v5202_v28 = vpack.c.bf16 %v5175_v34, %v5174_v54  ;;  %vm11810_vm4 = vcmask 1045504   ;;  %v5786_v3 = vrot.slane %v10278_v7, 2  ;;  %v5377_v1 = vshrl.u32 %v5301_v22, 16  ;;  %v11814_v22 = vld [vmem:[#allocation38_spill] sm:$0xff] }
 0x76c   :  { %v10283_v52 = vsel %vm11810_vm4, %v5782_v49, %v5784_v45  ;;  %v5239_v56 = vrot.slane %v10271_v55, 7  ;;  %5736 = vrot.lane.b32.xlu0 %v5614_v35, %s7124_s27  ;;  %vm11811_vm0 = vmmov %vm11810_vm4  ;;  %vm11812_vm11 = vcmask 1040384   ;;  %vm11815_vm3 = vcmp.ne.s16.totalorder %v11814_v22, 0  ;;  %v11840_v55 = vld [vmem:[#allocation50_spill] sm:$0xff] }
 0x76d   :  { %v5237_v50 = vrot.slane %v5202_v28, 7  ;;  %v10289_v63 = vsel %vm11811_vm0, %v5784_v45, %v5786_v3  ;;  %vm11813_vm5 = vmmov %vm11812_vm11  ;;  %v5379_v32 = vor.u32 %v5377_v1, %v5375_v18  ;;  %vm11817_vm10 = vcmp.ne.s16.totalorder %v11816_v6, 0 }
 0x76e   :  { %vm11819_vm4 = vcmp.ne.s16.totalorder %v11818_v47, 0  ;;  %vm11820_vm0 = vcmask 1046528  }
 0x76f   :  { %5552 = vrot.lane.b32.xlu1 %v5521_v43, %s7116_s5  ;;  %v10295_v59 = vsel %vm11812_vm11, %v5235_v17, %v5237_v50  ;;  %v10300_v49 = vsel %vm11813_vm5, %v5237_v50, %v5239_v56  ;;  %vm11822_vm11 = vcmp.ne.s16.totalorder %v11821_v40, 0  ;;  %vm11823_vm5 = vmmov %vm11820_vm0 }
 0x770   :  { %v5522_v58 = vrot.slane %v10295_v59, 1  ;;  %v5302_v48 = vsel %vm11815_vm3, %v10295_v59, 0  ;;  %v5303_v43 = vsel %vm11817_vm10, %v10300_v49, 0  ;;  %v5319_v17 = vsel %vm11819_vm4, %v10295_v59, 0 }
 0x771   :  { %v5381_v31 = vshll.u32 %v5302_v48, 16  ;;  %v5385_v61 = vshrl.u32 %v5302_v48, 16  ;;  %v5389_v62 = vshll.u32 %v5303_v43, 16  ;;  %v5616_v29 = vshrl.u32 %v5319_v17, 16 }
 0x772   :  { %v5523_v18 = vsel %vm11820_vm0, %v5520_v24, %v5522_v58  ;;  %v5619_v30 = vshll.u32 %v5319_v17, 16  ;;  %v5320_v11 = vsel %vm11822_vm11, %v10300_v49, 0  ;;  %v5524_v36 = vrot.slane %v10300_v49, 1 }
 0x773   :  { %5554 = vrot.lane.b32.xlu0 %v5523_v18, %s7116_s5  ;;  %v6874_v0 = vpop.f32.mrb[52].mxu1  ;;  %v5383_v26 = vrot.slane %v5381_v31, 1  ;;  %v5391_v54 = vrot.slane %v5389_v62, 1  ;;  %v5618_v34 = vrot.slane %v5616_v29, 1  ;;  %v5625_v45 = vshrl.u32 %v5320_v11, 16 }
 0x774   :  { %v5096_v35 = vadd.f32 %v6874_v0, %v10168_v23  ;;  %v5087_v5 = vpop.f32.mrb[53].mxu1  ;;  %v5621_v7 = vrot.slane %v5619_v30, 2  ;;  %v5628_v28 = vshll.u32 %v5320_v11, 16  ;;  %v5525_v24 = vsel %vm11823_vm5, %v5522_v58, %v5524_v36 }
 0x775   :  { %v5088_v50 = vadd.f32 %v10168_v23, %v5087_v5  ;;  %v6875_v1 = vpop.f32.mrb[54].mxu1  ;;  %vm11824_vm3 = vsmask.f32 7424  ;;  %v5387_v48 = vor.u32 %v5385_v61, %v5383_v26  ;;  %v5627_v6 = vrot.slane %v5625_v45, 1  ;;  %v11827_v61 = vld [vmem:[#allocation87_spill] sm:$0xff] }
 0x776   :  { %v5384_v22 = vsel %vm11824_vm3, %v5379_v32, %v5383_v26  ;;  %v5099_v47 = vadd.f32 %v6875_v1, %v10168_v23  ;;  %v5090_v17 = vpop.f32.mrb[55].mxu1  ;;  %v5622_v31 = vor.u32 %v5621_v7, %v5618_v34  ;;  %v5630_v62 = vrot.slane %v5628_v28, 2  ;;  %vm11825_vm10 = vmmov %vm11824_vm3  ;;  %v11830_v5 = vld [vmem:[#allocation39_spill] sm:$0xff] }
 0x777   :  { %5487 = vrot.lane.b32.xlu1 %v5384_v22, %s7123_s2  ;;  %v5180_v29 = vmax.f32 %v5096_v35, 0.0  ;;  %v5091_v18 = vadd.f32 %v10168_v23, %v5090_v17  ;;  %v5392_v30 = vsel %vm11825_vm10, %v5387_v48, %v5391_v54  ;;  %vm11826_vm4 = vsmask.f32 6400 }
 0x778   :  { %v5181_v58 = vmax.f32 %v5099_v47, 0.0  ;;  %5489 = vrot.lane.b32.xlu0 %v5392_v30, %s7123_s2  ;;  %v5623_v40 = vsel %vm11826_vm4, %v5613_v42, %v5622_v31  ;;  %v5631_v32 = vor.u32 %v5630_v62, %v5627_v6  ;;  %vm11828_vm0 = vcmp.ne.s16.totalorder %v11827_v61, 0  ;;  %vm11829_vm11 = vmmov %vm11826_vm4 }
 0x779   :  { %v5336_v11 = vsel %vm11828_vm0, %v10295_v59, 0  ;;  %v5178_v0 = vmax.f32 %v5088_v50, 0.0  ;;  %v5179_v26 = vmax.f32 %v5091_v18, 0.0  ;;  %vm11831_vm5 = vcmp.ne.s16.totalorder %v11830_v5, 0 }
 0x77a   :  { %v5788_v45 = vrot.slane %v5336_v11, 2  ;;  %v10331_v34 = vpack.c.bf16 %v5181_v58, %v5180_v29  ;;  %v5632_v35 = vsel %vm11829_vm11, %v5622_v31, %v5631_v32  ;;  %v10338_v7 = vsel %vm11831_vm5, %v10300_v49, 0  ;;  %v11838_v29 = vld [vmem:[#allocation53_spill] sm:$0xff]  ;;  %v11843_v11 = vld [vmem:[#allocation52_spill] sm:$0xff] }
 0x77b   :  { %5738 = vrot.lane.b32.xlu1 %v5623_v40, %s7124_s27  ;;  %v5204_v42 = vpack.c.bf16 %v5179_v26, %v5178_v0  ;;  %vm11832_vm3 = vcmask 1045504   ;;  %v5790_v1 = vrot.slane %v10338_v7, 2  ;;  %v5393_v48 = vshrl.u32 %v5303_v43, 16  ;;  %v11836_v43 = vld [vmem:[#allocation49_spill] sm:$0xff] }
 0x77c   :  { %v10341_v28 = vsel %vm11832_vm3, %v5786_v3, %v5788_v45  ;;  %v11139_v50 = vrot.slane %v10331_v34, 7  ;;  %5740 = vrot.lane.b32.xlu0 %v5632_v35, %s7124_s27  ;;  %vm11833_vm10 = vmmov %vm11832_vm3  ;;  %vm11834_vm4 = vcmask 1040384   ;;  %vm11837_vm11 = vcmp.ne.s16.totalorder %v11836_v43, 0 }
 0x77d   :  { %v5241_v22 = vrot.slane %v5204_v42, 7  ;;  %v10347_v6 = vsel %vm11833_vm10, %v5788_v45, %v5790_v1  ;;  %vm11835_vm0 = vmmov %vm11834_vm4  ;;  %v5395_v17 = vor.u32 %v5393_v48, %v5391_v54  ;;  %vm11839_vm5 = vcmp.ne.s16.totalorder %v11838_v29, 0 }
 0x77e   :  { %vm11841_vm3 = vcmp.ne.s16.totalorder %v11840_v55, 0  ;;  %vm11842_vm10 = vcmask 1046528  }
 0x77f   :  { %5556 = vrot.lane.b32.xlu1 %v5525_v24, %s7116_s5  ;;  %v10353_v47 = vsel %vm11834_vm4, %v5239_v56, %v5241_v22  ;;  %v10358_v3 = vsel %vm11835_vm0, %v5241_v22, %v11139_v50  ;;  %vm11844_vm4 = vcmp.ne.s16.totalorder %v11843_v11, 0  ;;  %vm11845_vm0 = vmmov %vm11842_vm10 }
 0x780   :  { %v5526_v31 = vrot.slane %v10353_v47, 1  ;;  %v5304_v62 = vsel %vm11837_vm11, %v10353_v47, 0  ;;  %v5305_v24 = vsel %vm11839_vm5, %v10358_v3, 0  ;;  %v5321_v56 = vsel %vm11841_vm3, %v10353_v47, 0 }
 0x781   :  { %v5397_v18 = vshll.u32 %v5304_v62, 16  ;;  %v5401_v30 = vshrl.u32 %v5304_v62, 16  ;;  %v5405_v58 = vshll.u32 %v5305_v24, 16  ;;  %v5634_v40 = vshrl.u32 %v5321_v56, 16 }
 0x782   :  { %v5527_v54 = vsel %vm11842_vm10, %v5524_v36, %v5526_v31  ;;  %v5637_v61 = vshll.u32 %v5321_v56, 16  ;;  %v5322_v0 = vsel %vm11844_vm4, %v10358_v3, 0  ;;  %v5528_v26 = vrot.slane %v10358_v3, 1 }
 0x783   :  { %5558 = vrot.lane.b32.xlu0 %v5527_v54, %s7116_s5  ;;  %v6878_v45 = vpop.f32.mrb[56].mxu1  ;;  %v5399_v35 = vrot.slane %v5397_v18, 1  ;;  %v5407_v5 = vrot.slane %v5405_v58, 1  ;;  %v5636_v7 = vrot.slane %v5634_v40, 1  ;;  %v5643_v42 = vshrl.u32 %v5322_v0, 16 }
 0x784   :  { %v5112_v22 = vadd.f32 %v6878_v45, %v10168_v23  ;;  %v5103_v48 = vpop.f32.mrb[57].mxu1  ;;  %v5639_v43 = vrot.slane %v5637_v61, 2  ;;  %v5646_v62 = vshll.u32 %v5322_v0, 16  ;;  %v5529_v36 = vsel %vm11845_vm0, %v5526_v31, %v5528_v26 }
 0x785   :  { %v5104_v29 = vadd.f32 %v10168_v23, %v5103_v48  ;;  %v6879_v55 = vpop.f32.mrb[58].mxu1  ;;  %vm11846_vm11 = vsmask.f32 7424  ;;  %v5403_v11 = vor.u32 %v5401_v30, %v5399_v35  ;;  %v5645_v50 = vrot.slane %v5643_v42, 1  ;;  %v11849_v30 = vld [vmem:[#allocation43_spill] sm:$0xff] }
 0x786   :  { %v5400_v56 = vsel %vm11846_vm11, %v5395_v17, %v5399_v35  ;;  %v5115_v54 = vadd.f32 %v6879_v55, %v10168_v23  ;;  %v5106_v18 = vpop.f32.mrb[59].mxu1  ;;  %v5640_v58 = vor.u32 %v5639_v43, %v5636_v7  ;;  %v5648_v40 = vrot.slane %v5646_v62, 2  ;;  %vm11847_vm5 = vmmov %vm11846_vm11  ;;  %v11852_v43 = vld [vmem:[#allocation44_spill] sm:$0xff] }
 0x787   :  { %5491 = vrot.lane.b32.xlu1 %v5400_v56, %s7123_s2  ;;  %v5184_v45 = vmax.f32 %v5112_v22, 0.0  ;;  %v5107_v61 = vadd.f32 %v10168_v23, %v5106_v18  ;;  %v5408_v0 = vsel %vm11847_vm5, %v5403_v11, %v5407_v5  ;;  %vm11848_vm3 = vsmask.f32 6400 }
 0x788   :  { %v5185_v31 = vmax.f32 %v5115_v54, 0.0  ;;  %5493 = vrot.lane.b32.xlu0 %v5408_v0, %s7123_s2  ;;  %v5641_v48 = vsel %vm11848_vm3, %v5631_v32, %v5640_v58  ;;  %v5649_v17 = vor.u32 %v5648_v40, %v5645_v50  ;;  %vm11850_vm10 = vcmp.ne.s16.totalorder %v11849_v30, 0  ;;  %vm11851_vm4 = vmmov %vm11848_vm3 }
 0x789   :  { %v5338_v35 = vsel %vm11850_vm10, %v10353_v47, 0  ;;  %v5182_v42 = vmax.f32 %v5104_v29, 0.0  ;;  %v5183_v55 = vmax.f32 %v5107_v61, 0.0  ;;  %vm11853_vm0 = vcmp.ne.s16.totalorder %v11852_v43, 0  ;;  %v11866_v43 = vld [vmem:[#allocation63_spill] sm:$0xff] }
 0x78a   :  { %v5792_v56 = vrot.slane %v5338_v35, 2  ;;  %v10389_v7 = vpack.c.bf16 %v5185_v31, %v5184_v45  ;;  %v5650_v22 = vsel %vm11851_vm4, %v5640_v58, %v5649_v17  ;;  %v5339_v62 = vsel %vm11853_vm0, %v10358_v3, 0 }
 0x78b   :  { %5742 = vrot.lane.b32.xlu1 %v5641_v48, %s7124_s27  ;;  %v5206_v11 = vpack.c.bf16 %v5183_v55, %v5182_v42  ;;  %vm11854_vm11 = vcmask 1045504   ;;  %v5794_v50 = vrot.slane %v5339_v62, 2  ;;  %v5409_v18 = vshrl.u32 %v5305_v24, 16  ;;  %v11859_v24 = vld [vmem:[#allocation54_spill] sm:$0xff] }
 0x78c   :  { %v10397_v32 = vsel %vm11854_vm11, %v5790_v1, %v5792_v56  ;;  %v11140_v54 = vrot.slane %v10389_v7, 7  ;;  %5744 = vrot.lane.b32.xlu0 %v5650_v22, %s7124_s27  ;;  %vm11855_vm5 = vmmov %vm11854_vm11  ;;  %v11856_v58 = vrot.slane %v10331_v34, 7  ;;  %vm11857_vm3 = vcmask 1040384   ;;  %v11861_v48 = vld [vmem:[#allocation62_spill] sm:$0xff]  ;;  %v11863_v34 = vld [vmem:[#allocation59_spill] sm:$0xff] }
 0x78d   :  { %v5245_v29 = vrot.slane %v5206_v11, 7  ;;  %v10402_v40 = vsel %vm11855_vm5, %v5792_v56, %v5794_v50  ;;  %vm11858_vm10 = vmmov %vm11857_vm3  ;;  %v5411_v61 = vor.u32 %v5409_v18, %v5407_v5  ;;  %vm11860_vm4 = vcmp.ne.s16.totalorder %v11859_v24, 0 }
 0x78e   :  { %vm11862_vm0 = vcmp.ne.s16.totalorder %v11861_v48, 0  ;;  %vm11864_vm11 = vcmp.ne.s16.totalorder %v11863_v34, 0  ;;  %vm11865_vm5 = vcmask 1046528   ;;  %v11881_v39 = vrot.slane %v10389_v7, 7 }
 0x78f   :  { %5560 = vrot.lane.b32.xlu1 %v5529_v36, %s7116_s5  ;;  %v10408_v45 = vsel %vm11857_vm3, %v11856_v58, %v5245_v29  ;;  %v10413_v1 = vsel %vm11858_vm10, %v5245_v29, %v11140_v54  ;;  %vm11867_vm3 = vcmp.ne.s16.totalorder %v11866_v43, 0  ;;  %vm11868_vm10 = vmmov %vm11865_vm5 }
 0x790   :  { %v5530_v0 = vrot.slane %v10408_v45, 1  ;;  %v5306_v31 = vsel %vm11860_vm4, %v10408_v45, 0  ;;  %v5307_v36 = vsel %vm11862_vm0, %v10413_v1, 0  ;;  %v5323_v30 = vsel %vm11864_vm11, %v10408_v45, 0 }
 0x791   :  { %v5413_v35 = vshll.u32 %v5306_v31, 16  ;;  %v5417_v42 = vshrl.u32 %v5306_v31, 16  ;;  %v5421_v55 = vshll.u32 %v5307_v36, 16  ;;  %v5652_v56 = vshrl.u32 %v5323_v30, 16 }
 0x792   :  { %v5531_v5 = vsel %vm11865_vm5, %v5528_v26, %v5530_v0  ;;  %v5655_v22 = vshll.u32 %v5323_v30, 16  ;;  %v5324_v62 = vsel %vm11867_vm3, %v10413_v1, 0  ;;  %v5532_v11 = vrot.slane %v10413_v1, 1 }
 0x793   :  { %5562 = vrot.lane.b32.xlu0 %v5531_v5, %s7116_s5  ;;  %v5415_v29 = vrot.slane %v5413_v35, 1  ;;  %v5423_v18 = vrot.slane %v5421_v55, 1  ;;  %v5654_v58 = vrot.slane %v5652_v56, 1  ;;  %v5661_v24 = vshrl.u32 %v5324_v62, 16 }
 0x794   :  { %v5657_v48 = vrot.slane %v5655_v22, 2  ;;  %v5664_v34 = vshll.u32 %v5324_v62, 16  ;;  %v5533_v31 = vsel %vm11868_vm10, %v5530_v0, %v5532_v11  ;;  %v5425_v26 = vshrl.u32 %v5307_v36, 16 }
 0x795   :  { %vm11869_vm4 = vsmask.f32 7424  ;;  %v5419_v54 = vor.u32 %v5417_v42, %v5415_v29  ;;  %v5663_v43 = vrot.slane %v5661_v24, 1  ;;  %vm11871_vm0 = vcmp.ne.s16.totalorder %v11870_v16, 0 }
 0x796   :  { %v5416_v30 = vsel %vm11869_vm4, %v5411_v61, %v5415_v29  ;;  %v5340_v14 = vsel %vm11871_vm0, %v10408_v45, 0  ;;  %v5658_v35 = vor.u32 %v5657_v48, %v5654_v58  ;;  %v5666_v55 = vrot.slane %v5664_v34, 2  ;;  %vm11872_vm11 = vmmov %vm11869_vm4 }
 0x797   :  { %5495 = vrot.lane.b32.xlu1 %v5416_v30, %s7123_s2  ;;  %v10439_v56 = vor.u32 %v5425_v26, %v5423_v18  ;;  %v5796_v5 = vrot.slane %v5340_v14, 2  ;;  %v5424_v22 = vsel %vm11872_vm11, %v5419_v54, %v5423_v18  ;;  %vm11873_vm5 = vcmp.ne.s16.totalorder %v11335_v44, 0 }
 0x798   :  { %v10445_v0 = vsel %vm11873_vm5, %v10413_v1, 0  ;;  %5497 = vrot.lane.b32.xlu0 %v5424_v22, %s7123_s2  ;;  %vm11874_vm3 = vsmask.f32 6400  ;;  %v10449_v16 = vor.u32 %v5666_v55, %v5663_v43  ;;  %vm11875_vm10 = vcmask 1045504  }
 0x799   :  { %v5659_v61 = vsel %vm11874_vm3, %v5649_v17, %v5658_v35  ;;  %v10452_v36 = vsel %vm11875_vm10, %v5794_v50, %v5796_v5  ;;  %v11142_v42 = vrot.slane %v10445_v0, 2  ;;  %vm11876_vm4 = vmmov %vm11874_vm3  ;;  %v5282_v26 = vsel %vm8944_vm8, %v10181_v37, 0 }
 0x79a   :  { %v5668_v14 = vsel %vm11876_vm4, %v5658_v35, %v10449_v16  ;;  %vm11877_vm0 = vmmov %vm11875_vm10  ;;  %vm11878_vm11 = vcmask 261120   ;;  %vm11879_vm5 = vcmask 523264   ;;  %vm11880_vm3 = vcmask 785408  }
 0x79b   :  { %5746 = vrot.lane.b32.xlu1 %v5659_v61, %s7124_s27  ;;  %v10461_v44 = vsel %vm11877_vm0, %v5796_v5, %v11142_v42  ;;  %vm11882_vm8 = vcmask 1040384   ;;  %vm11884_vm4 = vmmov %vm11878_vm11  ;;  %v5290_v19 = vsel %vm9109_vm9, %v10408_v45, 0 }
 0x79c   :  { %5748 = vrot.lane.b32.xlu0 %v5668_v14, %s7124_s27  ;;  %vm11883_vm10 = vmmov %vm11882_vm8 }
 0x79f   :  { %5564 = vrot.lane.b32.xlu1 %v5533_v31, %s7116_s5 }
 0x7c1   :  { %v5549_v5 = vpop.permute.xlu1 %5548 }
 0x7c2   :  { %v6882_v17 = vpop.f32.mrb[60].mxu1 }
 0x7c3   :  { %v5128_v50 = vadd.f32 %v6882_v17, %v10168_v23  ;;  %v5119_v54 = vpop.f32.mrb[61].mxu1 }
 0x7c4   :  { %v5120_v62 = vadd.f32 %v10168_v23, %v5119_v54  ;;  %v6883_v29 = vpop.f32.mrb[62].mxu1 }
 0x7c5   :  { %v5131_v18 = vadd.f32 %v6883_v29, %v10168_v23  ;;  %v5122_v58 = vpop.f32.mrb[63].mxu1  ;;  %v5188_v48 = vmax.f32 %v5128_v50, 0.0 }
 0x7c6   :  { %v5123_v24 = vadd.f32 %v10168_v23, %v5122_v58  ;;  %v5186_v31 = vmax.f32 %v5120_v62, 0.0 }
 0x7c7   :  { %v5189_v34 = vmax.f32 %v5131_v18, 0.0  ;;  %v5482_v30 = vpop.permute.xlu0 %5481  ;;  %v11885_v18 = vld [vmem:[#allocation64_spill] sm:$0xff] }
 0x7c8   :  { %v5187_v43 = vmax.f32 %v5123_v24, 0.0  ;;  %v5816_v35 = vsel %vm11878_vm11, %v5282_v26, %v5482_v30  ;;  %vm11886_vm0 = vcmp.ne.s16.totalorder %v11885_v18, 0  ;;  %v11887_v24 = vld [vmem:[#allocation73_spill] sm:$0xff] }
 0x7c9   :  { %v10473_v55 = vpack.c.bf16 %v5189_v34, %v5188_v48  ;;  %v5863_v14 = vsel %vm11879_vm5, %v5816_v35, %v5549_v5  ;;  %vm11888_vm11 = vcmp.ne.s16.totalorder %v11887_v24, 0  ;;  %v11889_v48 = vld [vmem:[#allocation72_spill] sm:$0xff]  ;;  %v11892_v35 = vld [vmem:[#allocation74_spill] sm:$0xff] }
 0x7ca   :  { %v5208_v22 = vpack.c.bf16 %v5187_v43, %v5186_v31  ;;  %vm11890_vm5 = vcmp.ne.s16.totalorder %v11889_v48, 0 }
 0x7cb   :  { %v11141_v61 = vrot.slane %v10473_v55, 7  ;;  %v5733_v17 = vpop.permute.xlu0 %5732 }
 0x7cc   :  { %v5249_v50 = vrot.slane %v5208_v22, 7  ;;  %v5895_v54 = vsel %vm11880_vm3, %v5863_v14, %v5733_v17  ;;  %vm11891_vm3 = vcmask 1046528  }
 0x7cd   :  { %6110 = vmatmul.mubr.bf16.vlgmr.msra.gmra.mrb[72].mxu1 %v5895_v54 }
 0x7ce   :  { %v10481_v37 = vsel %vm11882_vm8, %v11881_v39, %v5249_v50  ;;  %v10486_v62 = vsel %vm11883_vm10, %v5249_v50, %v11141_v61  ;;  %6691 = vmatprep.mubr.msk.bf16.mxu1 %vm11884_vm4, %v10283_v52  ;;  %vm11893_vm8 = vcmp.ne.s16.totalorder %v11892_v35, 0  ;;  %vm11894_vm10 = vmmov %vm11891_vm3  ;;  %vm11895_vm4 = vsmask.f32 7424 }
 0x7cf   :  { %v5534_v29 = vrot.slane %v10481_v37, 1  ;;  %v5308_v58 = vsel %vm11886_vm0, %v10481_v37, 0  ;;  %v10497_v7 = vsel %vm11888_vm11, %v10486_v62, 0  ;;  %v5325_v34 = vsel %vm11890_vm5, %v10481_v37, 0  ;;  %vm11897_vm11 = vmmov %vm11895_vm4 }
 0x7d0   :  { %v5429_v26 = vshll.u32 %v5308_v58, 16  ;;  %v5437_v30 = vshll.u32 %v10497_v7, 16  ;;  %v5670_v31 = vshrl.u32 %v5325_v34, 16  ;;  %v5673_v43 = vshll.u32 %v5325_v34, 16 }
 0x7d1   :  { %v5535_v52 = vsel %vm11891_vm3, %v5532_v11, %v5534_v29  ;;  %v5326_v5 = vsel %vm11893_vm8, %v10486_v62, 0  ;;  %v11143_v22 = vrot.slane %v10486_v62, 1  ;;  %v5433_v50 = vshrl.u32 %v5308_v58, 16 }
 0x7d2   :  { %5566 = vrot.lane.b32.xlu0 %v5535_v52, %s7116_s5  ;;  %v5431_v17 = vrot.slane %v5429_v26, 1  ;;  %v5672_v54 = vrot.slane %v5670_v31, 1  ;;  %v5679_v39 = vshrl.u32 %v5326_v5, 16  ;;  %v5439_v24 = vrot.slane %v5437_v30, 1 }
 0x7d3   :  { %v5675_v48 = vrot.slane %v5673_v43, 2  ;;  %v5682_v61 = vshll.u32 %v5326_v5, 16  ;;  %v5537_v11 = vsel %vm11894_vm10, %v5534_v29, %v11143_v22  ;;  %v5283_v26 = vsel %vm8969_vm2, %v10178_v2, 0 }
 0x7d4   :  { %v5432_v42 = vsel %vm11895_vm4, %v10439_v56, %v5431_v17  ;;  %v5435_v13 = vor.u32 %v5433_v50, %v5431_v17  ;;  %v5681_v52 = vrot.slane %v5679_v39, 1  ;;  %vm11896_vm0 = vcmask 261120  }
 0x7d5   :  { %v5551_v14 = vpop.permute.xlu0 %5550  ;;  %5499 = vrot.lane.b32.xlu1 %v5432_v42, %s7123_s2  ;;  %v5676_v43 = vor.u32 %v5675_v48, %v5672_v54  ;;  %v5684_v29 = vrot.slane %v5682_v61, 2  ;;  %vm11898_vm2 = vsmask.f32 6400  ;;  %vm11899_vm5 = vcmp.ne.s16.totalorder %v11337_v20, 0 }
 0x7d6   :  { %v6886_v18 = vpop.f32.mrb[64].mxu1  ;;  %v5440_v56 = vsel %vm11897_vm11, %v5435_v13, %v5439_v24  ;;  %v5342_v61 = vsel %vm11899_vm5, %v10481_v37, 0  ;;  %vm11900_vm3 = vcmask 523264   ;;  %vm11903_vm10 = vcmask 785408   ;;  %vm11904_vm4 = vmmov %vm11898_vm2 }
 0x7d7   :  { %v5144_v34 = vadd.f32 %v6886_v18, %v10168_v23  ;;  %v5135_v35 = vpop.f32.mrb[65].mxu1  ;;  %5501 = vrot.lane.b32.xlu0 %v5440_v56, %s7123_s2  ;;  %v5677_v33 = vsel %vm11898_vm2, %v10449_v16, %v5676_v43  ;;  %v10529_v54 = vor.u32 %v5684_v29, %v5681_v52  ;;  %vm11907_vm11 = vcmask 261120  }
 0x7d8   :  { %v5136_v58 = vadd.f32 %v10168_v23, %v5135_v35  ;;  %v6887_v31 = vpop.f32.mrb[66].mxu1  ;;  %vm11909_vm5 = vmmov %vm11907_vm11 }
 0x7d9   :  { %v5484_v30 = vpop.permute.xlu1 %5483  ;;  %v5147_v18 = vadd.f32 %v6887_v31, %v10168_v23  ;;  %v5138_v22 = vpop.f32.mrb[67].mxu1  ;;  %v5192_v17 = vmax.f32 %v5144_v34, 0.0  ;;  %5750 = vrot.lane.b32.xlu1 %v5677_v33, %s7124_s27  ;;  %v11901_v34 = vld [vmem:[#allocation68_spill] sm:$0xff]  ;;  %v5686_v20 = vsel %vm11904_vm4, %v5676_v43, %v10529_v54 }
 0x7da   :  { %v5819_v5 = vsel %vm11896_vm0, %v5283_v26, %v5484_v30  ;;  %v5139_v50 = vadd.f32 %v10168_v23, %v5138_v22  ;;  %v5190_v2 = vmax.f32 %v5136_v58, 0.0  ;;  %v5486_v42 = vpop.permute.xlu0 %5485  ;;  %v5800_v22 = vrot.slane %v5342_v61, 2 }
 0x7db   :  { %v5193_v39 = vmax.f32 %v5147_v18, 0.0  ;;  %v5865_v13 = vsel %vm11900_vm3, %v5819_v5, %v5551_v14  ;;  %vm11902_vm8 = vcmp.ne.s16.totalorder %v11901_v34, 0  ;;  %5752 = vrot.lane.b32.xlu0 %v5686_v20, %s7124_s27  ;;  %v11905_v14 = vrot.slane %v10445_v0, 2 }
 0x7dc   :  { %v5191_v48 = vmax.f32 %v5139_v50, 0.0  ;;  %v10539_v16 = vsel %vm11902_vm8, %v10486_v62, 0  ;;  %vm11906_vm0 = vcmask 1045504   ;;  %v5284_v5 = vsel %vm8999_vm15, %v10233_v60, 0 }
 0x7dd   :  { %v5735_v35 = vpop.permute.xlu1 %5734  ;;  %v10541_v58 = vpack.c.bf16 %v5193_v39, %v5192_v17  ;;  %v5802_v26 = vrot.slane %v10539_v16, 2  ;;  %v10551_v31 = vsel %vm11906_vm0, %v11905_v14, %v5800_v22  ;;  %vm11908_vm2 = vmmov %vm11906_vm0  ;;  %v5822_v0 = vsel %vm11909_vm5, %v5284_v5, %v5486_v42  ;;  %5568 = vrot.lane.b32.xlu1 %v5537_v11, %s7116_s5  ;;  %v11913_v39 = vld [vmem:[#allocation75_spill] sm:$0xff] }
 0x7de   :  { %v5898_v52 = vsel %vm11903_vm10, %v5865_v13, %v5735_v35  ;;  %v5210_v30 = vpack.c.bf16 %v5191_v48, %v5190_v2  ;;  %v5441_v17 = vshrl.u32 %v10497_v7, 16  ;;  %v5737_v50 = vpop.permute.xlu0 %5736  ;;  %v11910_v60 = vrot.slane %v10473_v55, 7  ;;  %v11915_v55 = vld [vmem:[#allocation77_spill] sm:$0xff]  ;;  %v11917_v48 = vld [vmem:[#allocation76_spill] sm:$0xff] }
 0x7df   :  { %6118 = vmatmul.mubr.bf16.gmra.mrb[76].mxu1 %v5898_v52  ;;  %v11145_v29 = vrot.slane %v10541_v58, 7  ;;  %v10562_v43 = vsel %vm11908_vm2, %v5800_v22, %v5802_v26  ;;  %vm11911_vm15 = vcmask 1040384   ;;  %v5285_v2 = vsel %vm9015_vm14, %v10238_v10, 0 }
 0x7e0   :  { %6692 = vmatprep.mubr.msk.bf16.mxu1 %vm11907_vm11, %v10289_v63  ;;  %v5253_v18 = vrot.slane %v5210_v30, 7  ;;  %vm11912_vm8 = vmmov %vm11911_vm15  ;;  %v5443_v11 = vor.u32 %v5441_v17, %v5439_v24  ;;  %vm11914_vm10 = vcmp.ne.s16.totalorder %v11913_v39, 0  ;;  %vm11916_vm4 = vcmp.ne.s16.totalorder %v11915_v55, 0  ;;  %v11922_v30 = vld [vmem:[#allocation78_spill] sm:$0xff] }
 0x7e1   :  { %v5553_v56 = vpop.permute.xlu1 %5552  ;;  %vm11918_vm0 = vcmp.ne.s16.totalorder %v11917_v48, 0  ;;  %vm11919_vm11 = vcmask 785408   ;;  %v11920_v34 = vrot.slane %v10486_v62, 1  ;;  %vm11921_vm14 = vcmask 1046528  }
 0x7e2   :  { %v5867_v53 = vsel %vm11900_vm3, %v5822_v0, %v5553_v56  ;;  %v10571_v63 = vsel %vm11911_vm15, %v11910_v60, %v5253_v18  ;;  %v10576_v33 = vsel %vm11912_vm8, %v5253_v18, %v11145_v29  ;;  %vm11923_vm2 = vcmp.ne.s16.totalorder %v11922_v30, 0  ;;  %vm11924_vm3 = vmmov %vm11921_vm14 }
 0x7e3   :  { %v5538_v7 = vrot.slane %v10571_v63, 1  ;;  %v5310_v42 = vsel %vm11914_vm10, %v10571_v63, 0  ;;  %v10588_v61 = vsel %vm11916_vm4, %v10576_v33, 0  ;;  %v5327_v35 = vsel %vm11918_vm0, %v10571_v63, 0  ;;  %vm11926_vm8 = vmmov %vm11909_vm5 }
 0x7e4   :  { %v5901_v13 = vsel %vm11919_vm11, %v5867_v53, %v5737_v50  ;;  %v5445_v9 = vshll.u32 %v5310_v42, 16  ;;  %v5453_v10 = vshll.u32 %v10588_v61, 16  ;;  %v5688_v24 = vshrl.u32 %v5327_v35, 16 }
 0x7e5   :  { %v5555_v22 = vpop.permute.xlu0 %5554  ;;  %v5539_v52 = vsel %vm11921_vm14, %v11920_v34, %v5538_v7  ;;  %v5691_v20 = vshll.u32 %v5327_v35, 16  ;;  %v5328_v14 = vsel %vm11923_vm2, %v10576_v33, 0  ;;  %v11144_v5 = vrot.slane %v10576_v33, 1 }
 0x7e6   :  { %5570 = vrot.lane.b32.xlu0 %v5539_v52, %s7116_s5  ;;  %v6890_v18 = vpop.f32.mrb[68].mxu1  ;;  %v5447_v0 = vrot.slane %v5445_v9, 1  ;;  %v5449_v56 = vshrl.u32 %v5310_v42, 16  ;;  %v5690_v17 = vrot.slane %v5688_v24, 1  ;;  %v5697_v50 = vshrl.u32 %v5328_v14, 16 }
 0x7e7   :  { %6126 = vmatmul.mubr.bf16.gmra.mrb[80].mxu1 %v5901_v13  ;;  %v5160_v53 = vadd.f32 %v6890_v18, %v10168_v23  ;;  %v5151_v60 = vpop.f32.mrb[69].mxu1  ;;  %v5693_v39 = vrot.slane %v5691_v20, 2  ;;  %v5700_v55 = vshll.u32 %v5328_v14, 16  ;;  %v5541_v48 = vsel %vm11924_vm3, %v5538_v7, %v11144_v5  ;;  %vm11936_vm3 = vmmov %vm11926_vm8 }
 0x7e8   :  { %6693 = vmatprep.mubr.msk.bf16.mxu1 %vm11909_vm5, %v10341_v28  ;;  %v5152_v35 = vadd.f32 %v10168_v23, %v5151_v60  ;;  %v6891_v13 = vpop.f32.mrb[70].mxu1  ;;  %vm11925_vm15 = vsmask.f32 7424  ;;  %v5451_v9 = vor.u32 %v5449_v56, %v5447_v0  ;;  %v5455_v24 = vrot.slane %v5453_v10, 1 }
 0x7e9   :  { %v5488_v34 = vpop.permute.xlu1 %5487  ;;  %v5448_v42 = vsel %vm11925_vm15, %v5443_v11, %v5447_v0  ;;  %v5163_v30 = vadd.f32 %v6891_v13, %v10168_v23  ;;  %v5154_v28 = vpop.f32.mrb[71].mxu1  ;;  %v5694_v20 = vor.u32 %v5693_v39, %v5690_v17  ;;  %v5699_v14 = vrot.slane %v5697_v50, 1  ;;  %vm11927_vm10 = vmmov %vm11925_vm15  ;;  %v11930_v17 = vld [vmem:[#allocation70_spill] sm:$0xff] }
 0x7ea   :  { %v5825_v52 = vsel %vm11926_vm8, %v5285_v2, %v5488_v34  ;;  %5503 = vrot.lane.b32.xlu1 %v5448_v42, %s7123_s2  ;;  %v5155_v18 = vadd.f32 %v10168_v23, %v5154_v28  ;;  %v5456_v7 = vsel %vm11927_vm10, %v5451_v9, %v5455_v24  ;;  %v5196_v60 = vmax.f32 %v5160_v53, 0.0  ;;  %v5490_v29 = vpop.permute.xlu0 %5489 }
 0x7eb   :  { %v5197_v5 = vmax.f32 %v5163_v30, 0.0  ;;  %5505 = vrot.lane.b32.xlu0 %v5456_v7, %s7123_s2  ;;  %vm11928_vm4 = vsmask.f32 6400  ;;  %v5702_v2 = vrot.slane %v5700_v55, 2  ;;  %v5194_v10 = vmax.f32 %v5152_v35, 0.0  ;;  %v11933_v55 = vld [vmem:[#allocation71_spill] sm:$0xff] }
 0x7ec   :  { %v5695_v11 = vsel %vm11928_vm4, %v10529_v54, %v5694_v20  ;;  %v5195_v0 = vmax.f32 %v5155_v18, 0.0  ;;  %vm11929_vm0 = vcmask 523264   ;;  %vm11931_vm11 = vcmp.ne.s16.totalorder %v11930_v17, 0  ;;  %vm11935_vm5 = vmmov %vm11928_vm4 }
 0x7ed   :  { %v5739_v56 = vpop.permute.xlu1 %5738  ;;  %v5869_v34 = vsel %vm11929_vm0, %v5825_v52, %v5555_v22  ;;  %v5344_v23 = vsel %vm11931_vm11, %v10571_v63, 0  ;;  %v5213_v50 = vpack.c.bf16 %v5197_v5, %v5196_v60  ;;  %vm11932_vm14 = vcmask 785408   ;;  %vm11940_vm10 = vmmov %vm11929_vm0  ;;  %v11947_v60 = vld [vmem:[#allocation79_spill] sm:$0xff] }
 0x7ee   :  { %5754 = vrot.lane.b32.xlu1 %v5695_v11, %s7124_s27  ;;  %v5904_v53 = vsel %vm11932_vm14, %v5869_v34, %v5739_v56  ;;  %v10625_v39 = vor.u32 %v5702_v2, %v5699_v14  ;;  %v5804_v13 = vrot.slane %v5344_v23, 2  ;;  %v5212_v42 = vpack.c.bf16 %v5195_v0, %v5194_v10  ;;  %v11942_v14 = vld [vmem:[#allocation61_spill] sm:$0xff]  ;;  %v11949_v2 = vld [vmem:[#allocation84_spill] sm:$0xff] }
 0x7ef   :  { %v5286_v54 = vsel %vm9042_vm1, %v10295_v59, 0  ;;  %6134 = vmatmul.mubr.bf16.gmra.mrb[84].mxu1 %v5904_v53  ;;  %v5457_v22 = vshrl.u32 %v10588_v61, 16  ;;  %vm11934_vm2 = vcmp.ne.s16.totalorder %v11933_v55, 0  ;;  %v5259_v5 = vrot.slane %v5213_v50, 7  ;;  %vm11938_vm1 = vmmov %vm11936_vm3 }
 0x7f0   :  { %v10634_v35 = vsel %vm11934_vm2, %v10576_v33, 0  ;;  %v5704_v9 = vsel %vm11935_vm5, %v5694_v20, %v10625_v39  ;;  %6694 = vmatprep.mubr.msk.bf16.mxu1 %vm11936_vm3, %v10347_v6  ;;  %vm11937_vm15 = vcmask 1045504   ;;  %v5257_v61 = vrot.slane %v5212_v42, 7  ;;  %v5741_v6 = vpop.permute.xlu0 %5740  ;;  %v11955_v42 = vld [vmem:[#allocation81_spill] sm:$0xff] }
 0x7f1   :  { %v10643_v51 = vsel %vm11937_vm15, %v5802_v26, %v5804_v13  ;;  %v5806_v59 = vrot.slane %v10634_v35, 2  ;;  %v5828_v52 = vsel %vm11938_vm1, %v5286_v54, %v5490_v29  ;;  %5756 = vrot.lane.b32.xlu0 %v5704_v9, %s7124_s27  ;;  %v5557_v30 = vpop.permute.xlu1 %5556  ;;  %v5287_v28 = vsel %vm9071_vm12, %v10300_v49, 0  ;;  %vm11941_vm4 = vmmov %vm11937_vm15 }
 0x7f2   :  { %vm11939_vm8 = vcmask 1040384   ;;  %v5871_v16 = vsel %vm11940_vm10, %v5828_v52, %v5557_v30  ;;  %5572 = vrot.lane.b32.xlu1 %v5541_v48, %s7116_s5  ;;  %v5459_v26 = vor.u32 %v5457_v22, %v5455_v24  ;;  %vm11943_vm0 = vcmp.ne.s16.totalorder %v11942_v14, 0 }
 0x7f3   :  { %v10652_v20 = vsel %vm11939_vm8, %v5259_v5, 0  ;;  %v10659_v29 = vsel %vm11941_vm4, %v5804_v13, %v5806_v59  ;;  %v11944_v25 = vrot.slane %v10541_v58, 7  ;;  %vm11945_vm12 = vmmov %vm11939_vm8  ;;  %v5907_v48 = vsel %vm11932_vm14, %v5871_v16, %v5741_v6  ;;  %v11951_v58 = vld [vmem:[#allocation80_spill] sm:$0xff] }
 0x7f4   :  { %v5331_v18 = vsel %vm11943_vm0, %v10652_v20, 0  ;;  %vm11946_vm11 = vmmov %vm11939_vm8  ;;  %vm11948_vm2 = vcmp.ne.s16.totalorder %v11947_v60, 0  ;;  %vm11950_vm5 = vcmp.ne.s16.totalorder %v11949_v2, 0  ;;  %vm11952_vm3 = vcmp.ne.s16.totalorder %v11951_v58, 0 }
 0x7f5   :  { %v10667_v49 = vsel %vm11945_vm12, %v11944_v25, %v5257_v61  ;;  %v10670_v7 = vsel %vm11946_vm11, %v5257_v61, %v5259_v5  ;;  %v11953_v50 = vrot.slane %v10576_v33, 1  ;;  %vm11954_vm15 = vcmask 1046528   ;;  %v5559_v14 = vpop.permute.xlu0 %5558 }
 0x7f6   :  { %v5542_v24 = vrot.slane %v10667_v49, 1  ;;  %v5312_v11 = vsel %vm11948_vm2, %v10667_v49, 0  ;;  %v5313_v10 = vsel %vm11950_vm5, %v10670_v7, 0  ;;  %v5329_v0 = vsel %vm11952_vm3, %v10667_v49, 0  ;;  %vm11958_vm10 = vmmov %vm11954_vm15 }
 0x7f7   :  { %v5461_v56 = vshll.u32 %v5312_v11, 16  ;;  %v5465_v34 = vshrl.u32 %v5312_v11, 16  ;;  %v5469_v17 = vshll.u32 %v5313_v10, 16  ;;  %v5706_v23 = vshrl.u32 %v5329_v0, 16  ;;  %6142 = vmatmul.mubr.bf16.gmra.mrb[88].mxu1 %v5907_v48  ;;  %vm11962_vm11 = vmmov %vm11958_vm10 }
 0x7f8   :  { %v5543_v53 = vsel %vm11954_vm15, %v11953_v50, %v5542_v24  ;;  %v5709_v13 = vshll.u32 %v5329_v0, 16  ;;  %vm11956_vm1 = vcmp.ne.s16.totalorder %v11955_v42, 0  ;;  %v5544_v22 = vrot.slane %v10670_v7, 1 }
 0x7f9   :  { %v5330_v54 = vsel %vm11956_vm1, %v10670_v7, 0  ;;  %5574 = vrot.lane.b32.xlu0 %v5543_v53, %s7116_s5  ;;  %v5463_v55 = vrot.slane %v5461_v56, 1  ;;  %v5471_v5 = vrot.slane %v5469_v17, 1  ;;  %v5708_v9 = vrot.slane %v5706_v23, 1  ;;  %v5492_v25 = vpop.permute.xlu1 %5491 }
 0x7fa   :  { %v5715_v61 = vshrl.u32 %v5330_v54, 16  ;;  %vm11957_vm8 = vcmask 261120   ;;  %v5711_v52 = vrot.slane %v5709_v13, 2  ;;  %v5718_v30 = vshll.u32 %v5330_v54, 16 }
 0x7fb   :  { %6695 = vmatprep.mubr.msk.bf16.mxu1 %vm11957_vm8, %v10397_v32  ;;  %v5545_v6 = vsel %vm11958_vm10, %v5542_v24, %v5544_v22  ;;  %v5546_v16 = vrot.slane %v10652_v20, 1  ;;  %vm11959_vm4 = vsmask.f32 7424  ;;  %v5467_v11 = vor.u32 %v5465_v34, %v5463_v55  ;;  %vm11961_vm12 = vmmov %vm11957_vm8 }
 0x7fc   :  { %v5464_v60 = vsel %vm11959_vm4, %v5459_v26, %v5463_v55  ;;  %v5717_v2 = vrot.slane %v5715_v61, 1  ;;  %vm11960_vm0 = vcmp.ne.s16.totalorder %v11663_v12, 0  ;;  %v5831_v58 = vsel %vm11961_vm12, %v5287_v28, %v5492_v25  ;;  %vm11963_vm14 = vmmov %vm11959_vm4 }
 0x7fd   :  { %v5314_v48 = vsel %vm11960_vm0, %v10652_v20, 0  ;;  %5507 = vrot.lane.b32.xlu1 %v5464_v60, %s7123_s2  ;;  %v5712_v32 = vor.u32 %v5711_v52, %v5708_v9  ;;  %v5720_v0 = vrot.slane %v5718_v30, 2  ;;  %v5547_v24 = vsel %vm11962_vm11, %v5544_v22, %v5546_v16  ;;  %v5743_v28 = vpop.permute.xlu1 %5742  ;;  %v5494_v9 = vpop.permute.xlu0 %5493  ;;  %vm11969_vm8 = vmmov %vm11959_vm4 }
 0x7fe   :  { %v5472_v56 = vsel %vm11963_vm14, %v5467_v11, %v5471_v5  ;;  %v5473_v17 = vshrl.u32 %v5313_v10, 16  ;;  %v5477_v23 = vshll.u32 %v5314_v48, 16  ;;  %vm11964_vm2 = vsmask.f32 6400  ;;  %vm11971_vm4 = vmmov %vm11961_vm12 }
 0x7ff   :  { %5509 = vrot.lane.b32.xlu0 %v5472_v56, %s7123_s2  ;;  %v5713_v26 = vsel %vm11964_vm2, %v10625_v39, %v5712_v32  ;;  %vm11965_vm5 = vcmask 523264   ;;  %v5721_v34 = vor.u32 %v5720_v0, %v5717_v2  ;;  %v5724_v50 = vshrl.u32 %v5331_v18, 16  ;;  %vm11968_vm1 = vmmov %vm11964_vm2 }
 0x800   :  { %v5873_v12 = vsel %vm11965_vm5, %v5831_v58, %v5559_v14  ;;  %v5475_v53 = vor.u32 %v5473_v17, %v5471_v5  ;;  %v5479_v13 = vrot.slane %v5477_v23, 1  ;;  %v5727_v42 = vshll.u32 %v5331_v18, 16  ;;  %vm11974_vm11 = vmmov %vm11971_vm4 }
 0x801   :  { %vm11966_vm3 = vcmp.ne.s16.totalorder %v8891_v8, 0  ;;  %5758 = vrot.lane.b32.xlu1 %v5713_v26, %s7124_s27  ;;  %vm11967_vm15 = vcmask 785408   ;;  %v5722_v22 = vsel %vm11968_vm1, %v5712_v32, %v5721_v34  ;;  %v5726_v55 = vrot.slane %v5724_v50, 1  ;;  %v5561_v16 = vpop.permute.xlu1 %5560  ;;  %vm11976_vm2 = vmmov %vm11965_vm5  ;;  %v5745_v57 = vpop.permute.xlu0 %5744 }
 0x802   :  { %v5346_v54 = vsel %vm11966_vm3, %v10667_v49, 0  ;;  %v5910_v10 = vsel %vm11967_vm15, %v5873_v12, %v5743_v28  ;;  %v5480_v61 = vsel %vm11969_vm8, %v5475_v53, %v5479_v13  ;;  %v5729_v52 = vrot.slane %v5727_v42, 2  ;;  %vm11977_vm5 = vmmov %vm11968_vm1 }
 0x803   :  { %v5808_v39 = vrot.slane %v5346_v54, 2  ;;  %6150 = vmatmul.mubr.bf16.gmra.mrb[92].mxu1 %v5910_v10  ;;  %vm11970_vm10 = vcmp.ne.s16.totalorder %v11670_v15, 0  ;;  %5760 = vrot.lane.b32.xlu0 %v5722_v22, %s7124_s27  ;;  %vm11972_vm0 = vcmask 1045504   ;;  %vm11973_vm12 = vcmp.ne.s16.totalorder %v11672_v21, 0  ;;  %vm11981_vm1 = vmmov %vm11971_vm4 }
 0x804   :  { %v5347_v18 = vsel %vm11970_vm10, %v10670_v7, 0  ;;  %6696 = vmatprep.mubr.msk.bf16.mxu1 %vm11971_vm4, %v10402_v40  ;;  %v5348_v30 = vsel %vm11973_vm12, %v10652_v20, 0  ;;  %v5288_v15 = vsel %vm9060_vm13, %v10353_v47, 0  ;;  %v5730_v14 = vor.u32 %v5729_v52, %v5726_v55  ;;  %vm11975_vm14 = vmmov %vm11972_vm0 }
 0x805   :  { %v10723_v8 = vsel %vm11972_vm0, %v5806_v59, %v5808_v39  ;;  %v5810_v5 = vrot.slane %v5347_v18, 2  ;;  %v5812_v25 = vrot.slane %v5348_v30, 2  ;;  %v5834_v60 = vsel %vm11974_vm11, %v5288_v15, %v5494_v9  ;;  %5576 = vrot.lane.b32.xlu1 %v5545_v6, %s7116_s5  ;;  %vm11978_vm3 = vmmov %vm11972_vm0  ;;  %v5563_v20 = vpop.permute.xlu0 %5562  ;;  %v12006_v18 = vld [vmem:[#allocation85_spill] sm:$0xff] }
 0x806   :  { %v5875_v35 = vsel %vm11976_vm2, %v5834_v60, %v5561_v16  ;;  %v5731_v59 = vsel %vm11977_vm5, %v5721_v34, %v5730_v14  ;;  %vm11979_vm13 = vmmov %vm11967_vm15  ;;  %v5289_v6 = vsel %vm9091_vm7, %v10358_v3, 0 }
 0x807   :  { %v10734_v40 = vsel %vm11975_vm14, %v5808_v39, %v5810_v5  ;;  %v10739_v21 = vsel %vm11978_vm3, %v5810_v5, %v5812_v25  ;;  %5578 = vrot.lane.b32.xlu0 %v5547_v24, %s7116_s5  ;;  %v5913_v47 = vsel %vm11979_vm13, %v5875_v35, %v5745_v57  ;;  %vm11980_vm15 = vmmov %vm11971_vm4  ;;  %vm11989_vm14 = vnez %v11718_v38 }
 0x808   :  { %vm11982_vm8 = vmmov %vm11976_vm2 }
 0x809   :  { %5511 = vrot.lane.b32.xlu1 %v5480_v61, %s7123_s2  ;;  %v5496_v11 = vpop.permute.xlu1 %5495  ;;  %vm11983_vm10 = vmmov %vm11979_vm13  ;;  %vm11994_vm13 = vnez %v11724_v4 }
 0x80a   :  { %v5837_v2 = vsel %vm11981_vm1, %v5289_v6, %v5496_v11  ;;  %v5498_v0 = vpop.permute.xlu0 %5497  ;;  %vm11984_vm4 = vmmov %vm11981_vm1 }
 0x80b   :  { %6158 = vmatmul.mubr.bf16.gmra.mrb[96].mxu1 %v5913_v47  ;;  %v5877_v58 = vsel %vm11982_vm8, %v5837_v2, %v5563_v20  ;;  %vm11985_vm7 = vmmov %vm11981_vm1 }
 0x80c   :  { %6697 = vmatprep.mubr.msk.bf16.mxu1 %vm11980_vm15, %v10452_v36  ;;  %v5840_v36 = vsel %vm11985_vm7, %v5290_v19, %v5498_v0  ;;  %vm11986_vm0 = vmmov %vm11976_vm2 }
 0x80d   :  { %5762 = vrot.lane.b32.xlu1 %v5731_v59, %s7124_s27  ;;  %v5747_v48 = vpop.permute.xlu1 %5746  ;;  %vm11987_vm12 = vmmov %vm11983_vm10 }
 0x80e   :  { %v5916_v32 = vsel %vm11983_vm10, %v5877_v58, %v5747_v48  ;;  %v5749_v56 = vpop.permute.xlu0 %5748  ;;  %vm11988_vm11 = vmmov %vm11981_vm1  ;;  %v10820_v48 = vld [vmem:[%s10893_s11] ss:$0 sm:$0xff]  ;;  %s7125_s11 = smov [#allocation12]  }
 0x80f   :  { %vm11990_vm2 = vmmov %vm11981_vm1  ;;  %s6467_s2 = sshll.u32 %s7125_s11, 4  ;;  %s6468_s2 = int_to_ptr.vmem [resolvable:$true] %s6467_s2 }
 0x810   :  { %vm11991_vm9 = vmmov %vm11986_vm0  ;;  %s7083_s27 = scalar_lea.vmem %s6468_s2, 8192  ;;  %p7088_p13 = scmp.lt.s32.totalorder %s6468_s2, %s6468_s2 }
 0x811   :  { %v5565_v3 = vpop.permute.xlu1 %5564  ;;  %vm11992_vm5 = vmmov %vm11983_vm10  ;;  %p7084_p12 = scmp.ne.s32.totalorder %s6468_s2, %s7083_s27  ;;  %p7089_p0 = scmp.lt.s32.totalorder %s7083_s27, %s7083_s27 }
 0x812   :  { %v5879_v24 = vsel %vm11986_vm0, %v5840_v36, %v5565_v3  ;;  %vm11993_vm3 = vmmov %vm11981_vm1 }
 0x813   :  { %6166 = vmatmul.mubr.bf16.gmra.mrb[100].mxu1 %v5916_v32  ;;  %v5919_v17 = vsel %vm11987_vm12, %v5879_v24, %v5749_v56  ;;  %vm11995_vm15 = vmmov %vm11981_vm1  ;;  %p7090_p1 = por %p7089_p0, %p7088_p13 }
 0x814   :  { %6698 = vmatprep.mubr.msk.bf16.mxu1 %vm11984_vm4, %v10461_v44  ;;  %v5291_v44 = vsel %vm11989_vm14, %v10413_v1, 0  ;;  %vm11996_vm1 = vmmov %vm11986_vm0  ;;  %vm11999_vm4 = vnez %v11730_v27  ;;  %vm12003_vm14 = vnez %v11735_v46 }
 0x815   :  { %vm11997_vm8 = vmmov %vm11992_vm5  ;;  %p7091_p2 = pnand %p7090_p1, %p7084_p12 }
 0x816   :  { %vm11998_vm10 = vmmov %vm11990_vm2 }
 0x817   :  { %vm12000_vm7 = vmmov %vm11990_vm2 }
 0x818   :  { %vm12001_vm12 = vmmov %vm11992_vm5 }
 0x81b   :  { %6174 = vmatmul.mubr.bf16.gmra.mrb[104].mxu1 %v5919_v17 }
 0x81c   :  { %6699 = vmatprep.mubr.msk.bf16.mxu1 %vm11988_vm11, %v10551_v31  ;;  %v5292_v31 = vsel %vm11994_vm13, %v10481_v37, 0  ;;  %vm12002_vm11 = vmmov %vm11990_vm2  ;;  %vm12007_vm13 = vnez %v12006_v18 }
 0x844   :  { %v5567_v23 = vpop.permute.xlu0 %5566 }
 0x847   :  { %v5500_v26 = vpop.permute.xlu1 %5499 }
 0x848   :  { %v5843_v41 = vsel %vm11990_vm2, %v5291_v44, %v5500_v26 }
 0x849   :  { %v5881_v12 = vsel %vm11991_vm9, %v5843_v41, %v5567_v23  ;;  %v5502_v50 = vpop.permute.xlu0 %5501  ;;  %vm12004_vm9 = vmmov %vm11986_vm0 }
 0x84a   :  { %v5846_v38 = vsel %vm11995_vm15, %v5292_v31, %v5502_v50  ;;  %vm12008_vm15 = vmmov %vm11990_vm2 }
 0x84b   :  { %v5751_v45 = vpop.permute.xlu1 %5750 }
 0x84c   :  { %v5922_v34 = vsel %vm11992_vm5, %v5881_v12, %v5751_v45 }
 0x84d   :  { %6182 = vmatmul.mubr.bf16.gmra.mrb[108].mxu1 %v5922_v34  ;;  %v5753_v53 = vpop.permute.xlu0 %5752 }
 0x84e   :  { %6700 = vmatprep.mubr.msk.bf16.mxu1 %vm11993_vm3, %v10562_v43  ;;  %v5293_v43 = vsel %vm11999_vm4, %v10486_v62, 0  ;;  %vm12005_vm3 = vmmov %vm11990_vm2 }
 0x84f   :  { %v5569_v28 = vpop.permute.xlu1 %5568 }
 0x850   :  { %v5883_v1 = vsel %vm11996_vm1, %v5846_v38, %v5569_v28  ;;  %vm12009_vm1 = vmmov %vm11986_vm0 }
 0x851   :  { %v5925_v13 = vsel %vm11997_vm8, %v5883_v1, %v5753_v53  ;;  %vm12010_vm8 = vmmov %vm11992_vm5 }
 0x855   :  { %6190 = vmatmul.mubr.bf16.gmra.mrb[112].mxu1 %v5925_v13 }
 0x856   :  { %6701 = vmatprep.mubr.msk.bf16.mxu1 %vm11998_vm10, %v10643_v51  ;;  %v5294_v51 = vsel %vm12003_vm14, %v10571_v63, 0  ;;  %vm12011_vm10 = vmmov %vm11990_vm2 }
 0x857   :  { %vm12018_vm14 = vmmov %vm11990_vm2 }
 0x858   :  { %v5571_v42 = vpop.permute.xlu0 %5570 }
 0x85c   :  { %v5504_v54 = vpop.permute.xlu1 %5503 }
 0x85d   :  { %v5849_v4 = vsel %vm12000_vm7, %v5293_v43, %v5504_v54  ;;  %v5506_v55 = vpop.permute.xlu0 %5505  ;;  %vm12014_vm7 = vmmov %vm11990_vm2 }
 0x85e   :  { %v5885_v10 = vsel %vm11986_vm0, %v5849_v4, %v5571_v42  ;;  %v5852_v27 = vsel %vm11990_vm2, %v5294_v51, %v5506_v55 }
 0x860   :  { %v5755_v37 = vpop.permute.xlu1 %5754 }
 0x861   :  { %v5928_v22 = vsel %vm12001_vm12, %v5885_v10, %v5755_v37  ;;  %vm12015_vm12 = vmmov %vm11992_vm5 }
 0x862   :  { %6198 = vmatmul.mubr.bf16.gmra.mrb[116].mxu1 %v5928_v22 }
 0x863   :  { %6702 = vmatprep.mubr.msk.bf16.mxu1 %vm12002_vm11, %v10659_v29  ;;  %v5757_v9 = vpop.permute.xlu0 %5756  ;;  %v5295_v29 = vsel %vm12007_vm13, %v10576_v33, 0  ;;  %vm12016_vm11 = vmmov %vm11990_vm2 }
 0x864   :  { %v5573_v39 = vpop.permute.xlu1 %5572  ;;  %vm12019_vm2 = vmmov %vm11986_vm0 }
 0x865   :  { %v5887_v62 = vsel %vm12004_vm9, %v5852_v27, %v5573_v39  ;;  %vm12020_vm9 = vmmov %vm11992_vm5 }
 0x866   :  { %v5931_v61 = vsel %vm11992_vm5, %v5887_v62, %v5757_v9  ;;  %vm12022_vm5 = vmmov %vm11986_vm0 }
 0x867   :  { %vm12024_vm13 = vmmov %vm11986_vm0 }
 0x86a   :  { %6206 = vmatmul.mubr.bf16.gmra.mrb[120].mxu1 %v5931_v61 }
 0x86b   :  { %6703 = vmatprep.mubr.msk.bf16.mxu1 %vm12005_vm3, %v10723_v8  ;;  %v5575_v52 = vpop.permute.xlu0 %5574  ;;  %v12012_v8 = vld [vmem:[#allocation21_spill] sm:$0xff]  ;;  %vm12023_vm3 = vmmov %vm11986_vm0 }
 0x86c   :  { %vm12013_vm4 = vnez %v12012_v8 }
 0x86d   :  { %v5296_v14 = vsel %vm12013_vm4, %v10667_v49, 0  ;;  %vm12029_vm4 = vmmov %vm11986_vm0 }
 0x86f   :  { %v5508_v5 = vpop.permute.xlu1 %5507 }
 0x870   :  { %v5855_v46 = vsel %vm12008_vm15, %v5295_v29, %v5508_v5  ;;  %vm12025_vm15 = vmmov %vm11986_vm0 }
 0x871   :  { %v5889_v30 = vsel %vm12009_vm1, %v5855_v46, %v5575_v52  ;;  %v5510_v16 = vpop.permute.xlu0 %5509  ;;  %vm12026_vm1 = vmmov %vm11986_vm0 }
 0x872   :  { %v5858_v33 = vsel %vm12014_vm7, %v5296_v14, %v5510_v16  ;;  %vm12030_vm7 = vmmov %vm11986_vm0 }
 0x873   :  { %v5759_v63 = vpop.permute.xlu1 %5758 }
 0x874   :  { %v5934_v15 = vsel %vm12010_vm8, %v5889_v30, %v5759_v63  ;;  %vm12027_vm8 = vmmov %vm11986_vm0 }
 0x875   :  { %6214 = vmatmul.mubr.bf16.gmra.mrb[124].mxu1 %v5934_v15  ;;  %v5761_v35 = vpop.permute.xlu0 %5760 }
 0x876   :  { %6704 = vmatprep.mubr.msk.bf16.mxu1 %vm12011_vm10, %v10734_v40  ;;  %v5297_v40 = vsel %vm11754_vm6, %v10670_v7, 0  ;;  %vm12021_vm6 = vmmov %vm11986_vm0 }
 0x877   :  { %v5577_v25 = vpop.permute.xlu1 %5576  ;;  %vm12028_vm10 = vmmov %vm11986_vm0 }
 0x878   :  { %v5891_v60 = vsel %vm11986_vm0, %v5858_v33, %v5577_v25 }
 0x879   :  { %v5937_v57 = vsel %vm12015_vm12, %v5891_v60, %v5761_v35  ;;  %v5579_v6 = vpop.permute.xlu0 %5578  ;;  %vm12031_vm12 = vmmov %vm11986_vm0 }
 0x87b   :  { %v5512_v59 = vpop.permute.xlu1 %5511 }
 0x87c   :  { %v5861_v20 = vsel %vm12018_vm14, %v5297_v40, %v5512_v59  ;;  %vm12033_vm14 = vmmov %vm11986_vm0 }
 0x87d   :  { %6222 = vmatmul.mubr.bf16.gmra.mrb[128].mxu1 %v5937_v57  ;;  %v5893_v11 = vsel %vm12019_vm2, %v5861_v20, %v5579_v6  ;;  %vm12034_vm2 = vmmov %vm11986_vm0 }
 0x87e   :  { %6705 = vmatprep.mubr.msk.bf16.mxu1 %vm12016_vm11, %v10739_v21  ;;  %vm12032_vm11 = vmmov %vm11986_vm0 }
 0x87f   :  { %v5763_v49 = vpop.permute.xlu1 %5762 }
 0x880   :  { %v5940_v2 = vsel %vm12020_vm9, %v5893_v11, %v5763_v49  ;;  %vm12035_vm9 = vmmov %vm11986_vm0 }
 0x885   :  { %6230 = vmatmul.mubr.bf16.gmra.mrb[132].mxu1 %v5940_v2 }
 0x8a0   :  { %v6111_v58 = vpop.f32.mrb[72].mxu1 }
 0x8a1   :  { %v6112_v21 = vadd.f32 %v10820_v48, %v6111_v58  ;;  %v6113_v32 = vpop.f32.mrb[73].mxu1 }
 0x8a2   :  { %v6114_v0 = vpop.f32.mrb[74].mxu1 }
 0x8a3   :  { %v6115_v7 = vadd.f32 %v10820_v48, %v6114_v0  ;;  %v6116_v19 = vpop.f32.mrb[75].mxu1  ;;  %v6238_v3 = vmax.f32 %v6112_v21, 0.0 }
 0x8a5   :  { %v6239_v36 = vmax.f32 %v6115_v7, 0.0 }
 0x8a7   :  { %v6270_v24 = vpack.c.bf16 %v6239_v36, %v6238_v3 }
 0x8a9   :  { %6286 = vst.msk [vmem:[#allocation2] sm:$0xff] %vm12021_vm6, %v6270_v24 }
 0x8b0   :  { %v6302_v44 = vld [vmem:[#allocation2] sm:$0xff] }
 0x8b1   :  { %v6334_v41 = vunpack.c.l.bf16 %v6302_v44  ;;  %v6336_v45 = vunpack.c.h.bf16 %v6302_v44 }
 0x8b2   :  { %v6119_v56 = vpop.f32.mrb[76].mxu1 }
 0x8b3   :  { %v6120_v17 = vadd.f32 %v10820_v48, %v6119_v56  ;;  %v6121_v23 = vpop.f32.mrb[77].mxu1  ;;  %6398 = vst [vmem:[#allocation12] sm:$0xff] %v6334_v41  ;;  %6400 = vst [vmem:[#allocation12 + $0x10] sm:$0xff] %v6336_v45 }
 0x8b4   :  { %v6122_v26 = vpop.f32.mrb[78].mxu1 }
 0x8b5   :  { %v6123_v12 = vadd.f32 %v10820_v48, %v6122_v26  ;;  %v6124_v34 = vpop.f32.mrb[79].mxu1  ;;  %v6240_v50 = vmax.f32 %v6120_v17, 0.0 }
 0x8b7   :  { %v6241_v31 = vmax.f32 %v6123_v12, 0.0 }
 0x8b9   :  { %v6271_v28 = vpack.c.bf16 %v6241_v31, %v6240_v50 }
 0x8ba   :  { %v6127_v38 = vpop.f32.mrb[80].mxu1 }
 0x8bb   :  { %6287 = vst.msk [vmem:[#allocation2 + $0x10] sm:$0xff] %vm12022_vm5, %v6271_v28  ;;  %v6128_v1 = vadd.f32 %v10820_v48, %v6127_v38  ;;  %v6129_v53 = vpop.f32.mrb[81].mxu1 }
 0x8bc   :  { %v6130_v13 = vpop.f32.mrb[82].mxu1 }
 0x8bd   :  { %v6131_v42 = vadd.f32 %v10820_v48, %v6130_v13  ;;  %v6132_v43 = vpop.f32.mrb[83].mxu1  ;;  %v6242_v54 = vmax.f32 %v6128_v1, 0.0 }
 0x8bf   :  { %v6243_v4 = vmax.f32 %v6131_v42, 0.0 }
 0x8c1   :  { %v6272_v37 = vpack.c.bf16 %v6243_v4, %v6242_v54 }
 0x8c2   :  { %v6304_v10 = vld [vmem:[#allocation2 + $0x10] sm:$0xff]  ;;  %v6135_v22 = vpop.f32.mrb[84].mxu1 }
 0x8c3   :  { %v6338_v55 = vunpack.c.l.bf16 %v6304_v10  ;;  %v6340_v51 = vunpack.c.h.bf16 %v6304_v10  ;;  %6288 = vst.msk [vmem:[#allocation2 + $0x20] sm:$0xff] %vm12023_vm3, %v6272_v37  ;;  %v6136_v39 = vadd.f32 %v10820_v48, %v6135_v22  ;;  %v6137_v27 = vpop.f32.mrb[85].mxu1 }
 0x8c4   :  { %v6138_v62 = vpop.f32.mrb[86].mxu1 }
 0x8c5   :  { %6402 = vst [vmem:[#allocation12 + $0x20] sm:$0xff] %v6338_v55  ;;  %6404 = vst [vmem:[#allocation12 + $0x30] sm:$0xff] %v6340_v51  ;;  %v6139_v9 = vadd.f32 %v10820_v48, %v6138_v62  ;;  %v6140_v61 = vpop.f32.mrb[87].mxu1  ;;  %v6244_v52 = vmax.f32 %v6136_v39, 0.0 }
 0x8c7   :  { %v6245_v18 = vmax.f32 %v6139_v9, 0.0 }
 0x8c9   :  { %v6273_v29 = vpack.c.bf16 %v6245_v18, %v6244_v52 }
 0x8ca   :  { %v6306_v5 = vld [vmem:[#allocation2 + $0x20] sm:$0xff]  ;;  %v6143_v46 = vpop.f32.mrb[88].mxu1 }
 0x8cb   :  { %v6342_v63 = vunpack.c.l.bf16 %v6306_v5  ;;  %v6344_v30 = vunpack.c.h.bf16 %v6306_v5  ;;  %6289 = vst.msk [vmem:[#allocation2 + $0x30] sm:$0xff] %vm12024_vm13, %v6273_v29  ;;  %v6144_v15 = vadd.f32 %v10820_v48, %v6143_v46  ;;  %v6145_v16 = vpop.f32.mrb[89].mxu1 }
 0x8cc   :  { %v6146_v8 = vpop.f32.mrb[90].mxu1 }
 0x8cd   :  { %6406 = vst [vmem:[#allocation12 + $0x40] sm:$0xff] %v6342_v63  ;;  %6408 = vst [vmem:[#allocation12 + $0x50] sm:$0xff] %v6344_v30  ;;  %v6147_v14 = vadd.f32 %v10820_v48, %v6146_v8  ;;  %v6148_v25 = vpop.f32.mrb[91].mxu1  ;;  %v6246_v33 = vmax.f32 %v6144_v15, 0.0 }
 0x8cf   :  { %v6247_v60 = vmax.f32 %v6147_v14, 0.0 }
 0x8d1   :  { %v6274_v35 = vpack.c.bf16 %v6247_v60, %v6246_v33 }
 0x8d2   :  { %v6308_v59 = vld [vmem:[#allocation2 + $0x30] sm:$0xff] }
 0x8d3   :  { %v6346_v47 = vunpack.c.l.bf16 %v6308_v59  ;;  %v6348_v40 = vunpack.c.h.bf16 %v6308_v59  ;;  %6290 = vst.msk [vmem:[#allocation2 + $0x40] sm:$0xff] %vm12025_vm15, %v6274_v35 }
 0x8d5   :  { %6410 = vst [vmem:[#allocation12 + $0x60] sm:$0xff] %v6346_v47  ;;  %6412 = vst [vmem:[#allocation12 + $0x70] sm:$0xff] %v6348_v40 }
 0x8d6   :  { %v6151_v57 = vpop.f32.mrb[92].mxu1 }
 0x8d7   :  { %v6152_v20 = vadd.f32 %v10820_v48, %v6151_v57  ;;  %v6153_v49 = vpop.f32.mrb[93].mxu1 }
 0x8d8   :  { %v6154_v6 = vpop.f32.mrb[94].mxu1 }
 0x8d9   :  { %v6155_v11 = vadd.f32 %v10820_v48, %v6154_v6  ;;  %v6156_v2 = vpop.f32.mrb[95].mxu1  ;;  %v6248_v58 = vmax.f32 %v6152_v20, 0.0 }
 0x8da   :  { %v6310_v0 = vld [vmem:[#allocation2 + $0x40] sm:$0xff] }
 0x8db   :  { %v6249_v21 = vmax.f32 %v6155_v11, 0.0  ;;  %v6350_v19 = vunpack.c.l.bf16 %v6310_v0  ;;  %v6352_v3 = vunpack.c.h.bf16 %v6310_v0 }
 0x8dd   :  { %v6275_v32 = vpack.c.bf16 %v6249_v21, %v6248_v58  ;;  %6414 = vst [vmem:[#allocation12 + $0x80] sm:$0xff] %v6350_v19  ;;  %6416 = vst [vmem:[#allocation12 + $0x90] sm:$0xff] %v6352_v3 }
 0x8de   :  { %v6159_v7 = vpop.f32.mrb[96].mxu1 }
 0x8df   :  { %6291 = vst.msk [vmem:[#allocation2 + $0x50] sm:$0xff] %vm12026_vm1, %v6275_v32  ;;  %v6160_v36 = vadd.f32 %v10820_v48, %v6159_v7  ;;  %v6161_v24 = vpop.f32.mrb[97].mxu1 }
 0x8e0   :  { %v6162_v56 = vpop.f32.mrb[98].mxu1 }
 0x8e1   :  { %v6163_v17 = vadd.f32 %v10820_v48, %v6162_v56  ;;  %v6164_v23 = vpop.f32.mrb[99].mxu1  ;;  %v6250_v44 = vmax.f32 %v6160_v36, 0.0 }
 0x8e3   :  { %v6251_v26 = vmax.f32 %v6163_v17, 0.0 }
 0x8e5   :  { %v6276_v41 = vpack.c.bf16 %v6251_v26, %v6250_v44 }
 0x8e6   :  { %v6312_v45 = vld [vmem:[#allocation2 + $0x50] sm:$0xff]  ;;  %v6167_v12 = vpop.f32.mrb[100].mxu1 }
 0x8e7   :  { %v6354_v34 = vunpack.c.l.bf16 %v6312_v45  ;;  %v6356_v50 = vunpack.c.h.bf16 %v6312_v45  ;;  %6292 = vst.msk [vmem:[#allocation2 + $0x60] sm:$0xff] %vm12027_vm8, %v6276_v41  ;;  %v6168_v31 = vadd.f32 %v10820_v48, %v6167_v12  ;;  %v6169_v28 = vpop.f32.mrb[101].mxu1 }
 0x8e8   :  { %v6170_v38 = vpop.f32.mrb[102].mxu1 }
 0x8e9   :  { %6418 = vst [vmem:[#allocation12 + $0xa0] sm:$0xff] %v6354_v34  ;;  %6420 = vst [vmem:[#allocation12 + $0xb0] sm:$0xff] %v6356_v50  ;;  %v6171_v1 = vadd.f32 %v10820_v48, %v6170_v38  ;;  %v6172_v53 = vpop.f32.mrb[103].mxu1  ;;  %v6252_v13 = vmax.f32 %v6168_v31, 0.0 }
 0x8eb   :  { %v6253_v42 = vmax.f32 %v6171_v1, 0.0 }
 0x8ed   :  { %v6277_v43 = vpack.c.bf16 %v6253_v42, %v6252_v13 }
 0x8ee   :  { %v6314_v54 = vld [vmem:[#allocation2 + $0x60] sm:$0xff]  ;;  %v6175_v4 = vpop.f32.mrb[104].mxu1 }
 0x8ef   :  { %v6358_v37 = vunpack.c.l.bf16 %v6314_v54  ;;  %v6360_v10 = vunpack.c.h.bf16 %v6314_v54  ;;  %6293 = vst.msk [vmem:[#allocation2 + $0x70] sm:$0xff] %vm12028_vm10, %v6277_v43  ;;  %v6176_v22 = vadd.f32 %v10820_v48, %v6175_v4  ;;  %v6177_v55 = vpop.f32.mrb[105].mxu1 }
 0x8f0   :  { %v6178_v51 = vpop.f32.mrb[106].mxu1 }
 0x8f1   :  { %6422 = vst [vmem:[#allocation12 + $0xc0] sm:$0xff] %v6358_v37  ;;  %6424 = vst [vmem:[#allocation12 + $0xd0] sm:$0xff] %v6360_v10  ;;  %v6179_v39 = vadd.f32 %v10820_v48, %v6178_v51  ;;  %v6180_v27 = vpop.f32.mrb[107].mxu1  ;;  %v6254_v62 = vmax.f32 %v6176_v22, 0.0 }
 0x8f3   :  { %v6255_v9 = vmax.f32 %v6179_v39, 0.0 }
 0x8f5   :  { %v6278_v61 = vpack.c.bf16 %v6255_v9, %v6254_v62 }
 0x8f6   :  { %v6316_v52 = vld [vmem:[#allocation2 + $0x70] sm:$0xff] }
 0x8f7   :  { %v6362_v18 = vunpack.c.l.bf16 %v6316_v52  ;;  %v6364_v29 = vunpack.c.h.bf16 %v6316_v52  ;;  %6294 = vst.msk [vmem:[#allocation2 + $0x80] sm:$0xff] %vm12029_vm4, %v6278_v61 }
 0x8f9   :  { %6426 = vst [vmem:[#allocation12 + $0xe0] sm:$0xff] %v6362_v18  ;;  %6428 = vst [vmem:[#allocation12 + $0xf0] sm:$0xff] %v6364_v29 }
 0x8fe   :  { %v6318_v5 = vld [vmem:[#allocation2 + $0x80] sm:$0xff] }
 0x8ff   :  { %v6366_v46 = vunpack.c.l.bf16 %v6318_v5  ;;  %v6368_v63 = vunpack.c.h.bf16 %v6318_v5 }
 0x901   :  { %6430 = vst [vmem:[#allocation12 + $0x100] sm:$0xff] %v6366_v46  ;;  %6432 = vst [vmem:[#allocation12 + $0x110] sm:$0xff] %v6368_v63 }
 0x920   :  { %v6183_v30 = vpop.f32.mrb[108].mxu1 }
 0x921   :  { %v6184_v15 = vadd.f32 %v10820_v48, %v6183_v30  ;;  %v6185_v16 = vpop.f32.mrb[109].mxu1 }
 0x922   :  { %v6186_v8 = vpop.f32.mrb[110].mxu1 }
 0x923   :  { %v6187_v14 = vadd.f32 %v10820_v48, %v6186_v8  ;;  %v6188_v25 = vpop.f32.mrb[111].mxu1  ;;  %v6256_v33 = vmax.f32 %v6184_v15, 0.0 }
 0x925   :  { %v6257_v60 = vmax.f32 %v6187_v14, 0.0 }
 0x927   :  { %v6279_v35 = vpack.c.bf16 %v6257_v60, %v6256_v33 }
 0x928   :  { %v6191_v59 = vpop.f32.mrb[112].mxu1 }
 0x929   :  { %6295 = vst.msk [vmem:[#allocation2 + $0x90] sm:$0xff] %vm12030_vm7, %v6279_v35  ;;  %v6192_v57 = vadd.f32 %v10820_v48, %v6191_v59  ;;  %v6193_v47 = vpop.f32.mrb[113].mxu1 }
 0x92a   :  { %v6194_v40 = vpop.f32.mrb[114].mxu1 }
 0x92b   :  { %v6195_v20 = vadd.f32 %v10820_v48, %v6194_v40  ;;  %v6196_v49 = vpop.f32.mrb[115].mxu1  ;;  %v6258_v6 = vmax.f32 %v6192_v57, 0.0 }
 0x92d   :  { %v6259_v11 = vmax.f32 %v6195_v20, 0.0 }
 0x92f   :  { %v6280_v2 = vpack.c.bf16 %v6259_v11, %v6258_v6 }
 0x930   :  { %v6320_v58 = vld [vmem:[#allocation2 + $0x90] sm:$0xff] }
 0x931   :  { %v6370_v21 = vunpack.c.l.bf16 %v6320_v58  ;;  %v6372_v32 = vunpack.c.h.bf16 %v6320_v58  ;;  %6296 = vst.msk [vmem:[#allocation2 + $0xa0] sm:$0xff] %vm11986_vm0, %v6280_v2 }
 0x933   :  { %6434 = vst [vmem:[#allocation12 + $0x120] sm:$0xff] %v6370_v21  ;;  %6436 = vst [vmem:[#allocation12 + $0x130] sm:$0xff] %v6372_v32 }
 0x935   :  { %v6199_v0 = vpop.f32.mrb[116].mxu1 }
 0x936   :  { %v6200_v7 = vadd.f32 %v10820_v48, %v6199_v0  ;;  %v6201_v19 = vpop.f32.mrb[117].mxu1 }
 0x937   :  { %v6202_v3 = vpop.f32.mrb[118].mxu1 }
 0x938   :  { %v6203_v36 = vadd.f32 %v10820_v48, %v6202_v3  ;;  %v6204_v24 = vpop.f32.mrb[119].mxu1  ;;  %v6260_v56 = vmax.f32 %v6200_v7, 0.0  ;;  %v6322_v23 = vld [vmem:[#allocation2 + $0xa0] sm:$0xff] }
 0x939   :  { %v6374_v26 = vunpack.c.l.bf16 %v6322_v23  ;;  %v6376_v41 = vunpack.c.h.bf16 %v6322_v23 }
 0x93a   :  { %v6261_v17 = vmax.f32 %v6203_v36, 0.0 }
 0x93b   :  { %6438 = vst [vmem:[#allocation12 + $0x140] sm:$0xff] %v6374_v26  ;;  %6440 = vst [vmem:[#allocation12 + $0x150] sm:$0xff] %v6376_v41 }
 0x93c   :  { %v6281_v44 = vpack.c.bf16 %v6261_v17, %v6260_v56 }
 0x93d   :  { %v6207_v45 = vpop.f32.mrb[120].mxu1 }
 0x93e   :  { %6297 = vst.msk [vmem:[#allocation2 + $0xb0] sm:$0xff] %vm12031_vm12, %v6281_v44  ;;  %v6208_v12 = vadd.f32 %v10820_v48, %v6207_v45  ;;  %v6209_v34 = vpop.f32.mrb[121].mxu1 }
 0x93f   :  { %v6210_v50 = vpop.f32.mrb[122].mxu1 }
 0x940   :  { %v6211_v31 = vadd.f32 %v10820_v48, %v6210_v50  ;;  %v6212_v28 = vpop.f32.mrb[123].mxu1  ;;  %v6262_v38 = vmax.f32 %v6208_v12, 0.0 }
 0x942   :  { %v6263_v1 = vmax.f32 %v6211_v31, 0.0 }
 0x944   :  { %v6282_v53 = vpack.c.bf16 %v6263_v1, %v6262_v38 }
 0x945   :  { %v6324_v13 = vld [vmem:[#allocation2 + $0xb0] sm:$0xff] }
 0x946   :  { %v6378_v43 = vunpack.c.l.bf16 %v6324_v13  ;;  %v6380_v54 = vunpack.c.h.bf16 %v6324_v13  ;;  %6298 = vst.msk [vmem:[#allocation2 + $0xc0] sm:$0xff] %vm12032_vm11, %v6282_v53 }
 0x948   :  { %v6215_v42 = vpop.f32.mrb[124].mxu1  ;;  %6442 = vst [vmem:[#allocation12 + $0x160] sm:$0xff] %v6378_v43  ;;  %6444 = vst [vmem:[#allocation12 + $0x170] sm:$0xff] %v6380_v54 }
 0x949   :  { %v6216_v4 = vadd.f32 %v10820_v48, %v6215_v42  ;;  %v6217_v37 = vpop.f32.mrb[125].mxu1 }
 0x94a   :  { %v6218_v10 = vpop.f32.mrb[126].mxu1 }
 0x94b   :  { %v6219_v22 = vadd.f32 %v10820_v48, %v6218_v10  ;;  %v6220_v55 = vpop.f32.mrb[127].mxu1  ;;  %v6264_v51 = vmax.f32 %v6216_v4, 0.0 }
 0x94d   :  { %v6265_v39 = vmax.f32 %v6219_v22, 0.0  ;;  %v6326_v62 = vld [vmem:[#allocation2 + $0xc0] sm:$0xff] }
 0x94e   :  { %v6382_v61 = vunpack.c.l.bf16 %v6326_v62  ;;  %v6384_v52 = vunpack.c.h.bf16 %v6326_v62 }
 0x94f   :  { %v6283_v27 = vpack.c.bf16 %v6265_v39, %v6264_v51 }
 0x950   :  { %v6223_v9 = vpop.f32.mrb[128].mxu1  ;;  %6446 = vst [vmem:[#allocation12 + $0x180] sm:$0xff] %v6382_v61  ;;  %6448 = vst [vmem:[#allocation12 + $0x190] sm:$0xff] %v6384_v52 }
 0x951   :  { %6299 = vst.msk [vmem:[#allocation2 + $0xd0] sm:$0xff] %vm12033_vm14, %v6283_v27  ;;  %v6224_v18 = vadd.f32 %v10820_v48, %v6223_v9  ;;  %v6225_v29 = vpop.f32.mrb[129].mxu1 }
 0x952   :  { %v6226_v5 = vpop.f32.mrb[130].mxu1 }
 0x953   :  { %v6227_v46 = vadd.f32 %v10820_v48, %v6226_v5  ;;  %v6228_v63 = vpop.f32.mrb[131].mxu1  ;;  %v6266_v30 = vmax.f32 %v6224_v18, 0.0 }
 0x955   :  { %v6267_v15 = vmax.f32 %v6227_v46, 0.0 }
 0x957   :  { %v6284_v16 = vpack.c.bf16 %v6267_v15, %v6266_v30 }
 0x958   :  { %v6328_v8 = vld [vmem:[#allocation2 + $0xd0] sm:$0xff]  ;;  %v6231_v14 = vpop.f32.mrb[132].mxu1 }
 0x959   :  { %v6386_v25 = vunpack.c.l.bf16 %v6328_v8  ;;  %v6388_v33 = vunpack.c.h.bf16 %v6328_v8  ;;  %6300 = vst.msk [vmem:[#allocation2 + $0xe0] sm:$0xff] %vm12034_vm2, %v6284_v16  ;;  %v6232_v60 = vadd.f32 %v10820_v48, %v6231_v14  ;;  %v6233_v35 = vpop.f32.mrb[133].mxu1 }
 0x95a   :  { %v6234_v59 = vpop.f32.mrb[134].mxu1 }
 0x95b   :  { %6450 = vst [vmem:[#allocation12 + $0x1a0] sm:$0xff] %v6386_v25  ;;  %6452 = vst [vmem:[#allocation12 + $0x1b0] sm:$0xff] %v6388_v33  ;;  %v6235_v57 = vadd.f32 %v10820_v48, %v6234_v59  ;;  %v6236_v47 = vpop.f32.mrb[135].mxu1  ;;  %v6268_v40 = vmax.f32 %v6232_v60, 0.0 }
 0x95d   :  { %v6269_v20 = vmax.f32 %v6235_v57, 0.0 }
 0x95f   :  { %v6285_v49 = vpack.c.bf16 %v6269_v20, %v6268_v40 }
 0x960   :  { %v6330_v6 = vld [vmem:[#allocation2 + $0xe0] sm:$0xff] }
 0x961   :  { %v6390_v11 = vunpack.c.l.bf16 %v6330_v6  ;;  %v6392_v2 = vunpack.c.h.bf16 %v6330_v6  ;;  %6301 = vst.msk [vmem:[#allocation2 + $0xf0] sm:$0xff] %vm12035_vm9, %v6285_v49 }
 0x963   :  { %6454 = vst [vmem:[#allocation12 + $0x1c0] sm:$0xff] %v6390_v11  ;;  %6456 = vst [vmem:[#allocation12 + $0x1d0] sm:$0xff] %v6392_v2 }
 0x968   :  { %v6332_v58 = vld [vmem:[#allocation2 + $0xf0] sm:$0xff] }
 0x969   :  { %v6394_v21 = vunpack.c.l.bf16 %v6332_v58  ;;  %v6396_v32 = vunpack.c.h.bf16 %v6332_v58 }
 0x96b   :  { %6458 = vst [vmem:[#allocation12 + $0x1e0] sm:$0xff] %v6394_v21  ;;  %6460 = vst [vmem:[#allocation12 + $0x1f0] sm:$0xff] %v6396_v32 }
 0x96c   :  { %7094 = shalt.err (!%p7091_p2)
}
 0x96d   :  { %s7095_s16 = scalar_lea.hbm %s10894_s12, 8192 }
 0x96e   :  { %p7096_p3 = scmp.ne.s32.totalorder %s10894_s12, %s7095_s16  ;;  %p7099_p4 = scmp.lt.u32.totalorder %s7095_s16, %s10894_s12 }
 0x970   :  { %p7101_p5 = pnand %p7099_p4, %p7096_p3 }
 0x972   :  { %7104 = shalt.err (!%p7101_p5)
}
 0x973   :  { %s7126_s18 = smov 256   ;;  %s7127_s19 = smov 16  }
 0x974   :  { %6473 = dma.vmem_to_hbm [thread:$0]  %s6468_s2, 8192, %s10894_s12, [#allocation5], %s7126_s18, %s7126_s18, %s7127_s19  }
 0x975   :  { %7111 = dma.done.wait [#allocation5], 8192  }
 0x976   :  { %7112 = vsyncadd [#allocation5], 4294959104 }
 0x977   :  { %6477 = vsyncpa [#allocation4], 1 }
 0x978   :  { %6478 = vsyncpa [#allocation7], 1 }
 0x979   :  { %6479 = vsyncpa [#allocation10], 1 }
 0x97a   :  { %6480 = vsyncpa [#allocation5], 1 }

</bundles_post_ra>
